<compile_context>
chip_gen: v7x
topology: tpu7x:2x2x1
jax: 0.10.0
libtpu: 0.0.40
codegen_flags: <defaults>
</compile_context>

<pallas_src>
import math
from functools import partial

import jax
import jax.numpy as jnp
from jax.experimental import pallas as pl
from jax.experimental.pallas import tpu as pltpu  # noqa: F401  (TPU backend assumed)

# ----------------------------- model config ---------------------------------
D_MODEL = 32
N_HEADS = 4
D_K = D_MODEL // N_HEADS
D_FF = 64
N_LAYERS = 2
VOCAB = 16
EPS = 1e-6
NEG_INF = -1e9
MAX_LEN = 64


# ------------------------- fused forward kernel ------------------------------
def _fused_forward_kernel(*refs, treedef, B, Ts, Tt):
    """One kernel for the entire EncoderDecoder forward.

    refs = (src_x, tgt_x, src_mask, tgt_mask, *param_leaves, out)
    All tensors are whole-array VMEM blocks (no grid)."""
    src_x_ref, tgt_x_ref, src_mask_ref, tgt_mask_ref = refs[:4]
    out_ref = refs[-1]
    p = jax.tree_util.tree_unflatten(treedef, refs[4:-1])

    src_mask = src_mask_ref[...]  # (B, 1, Ts) int32
    tgt_mask = tgt_mask_ref[...]  # (B, Tt, Tt) int32

    # Broadcast the compact masks once; reused by every layer / head.
    enc_self_mask = jnp.broadcast_to(src_mask, (B, Ts, Ts)) > 0   # encoder self-attn
    dec_self_mask = jnp.broadcast_to(tgt_mask, (B, Tt, Tt)) > 0   # decoder self-attn
    dec_cross_mask = jnp.broadcast_to(src_mask, (B, Tt, Ts)) > 0  # decoder cross-attn

    # ---- sub-ops (all operate on VMEM-resident values) ----
    def layer_norm(x, n):
        # unbiased std (n-1) + eps added to std, matching the reference LayerNorm
        a = n["a"][...]
        b = n["b"][...]
        mean = jnp.mean(x, axis=-1, keepdims=True)
        xc = x - mean
        var = jnp.sum(xc * xc, axis=-1, keepdims=True) * (1.0 / (D_MODEL - 1))
        inv = pl.reciprocal(jnp.sqrt(var) + EPS, approx=True)
        return a * (xc * inv) + b

    def feed_forward(x, f):
        h = jnp.dot(x, f["w1"][...], preferred_element_type=jnp.float32) + f["b1"][...]
        h = jnp.maximum(h, 0.0)
        return jnp.dot(h, f["w2"][...], preferred_element_type=jnp.float32) + f["b2"][...]

    def mha(xq, xkv, a, maskb, Tq, Tk):
        # xq: (B*Tq, D), xkv: (B*Tk, D), maskb: (B, Tq, Tk) bool
        qkv_w = a["qkv_w"][...]          # (D, 3D)
        qkv_b = a["qkv_b"][...]          # (1, 3D)
        o_w = a["o_w"][...]              # (D, D)
        o_b = a["o_b"][...]              # (1, D)
        scale = 1.0 / math.sqrt(D_K)

        # fused QKV: one matmul for Q (folding 1/sqrt(dk)), one for packed KV
        q = (jnp.dot(xq, qkv_w[:, :D_MODEL], preferred_element_type=jnp.float32)
             + qkv_b[:, :D_MODEL]) * scale
        kv = (jnp.dot(xkv, qkv_w[:, D_MODEL:], preferred_element_type=jnp.float32)
              + qkv_b[:, D_MODEL:])
        k = kv[:, :D_MODEL]
        v = kv[:, D_MODEL:]

        q3 = q.reshape(B, Tq, D_MODEL)
        k3 = k.reshape(B, Tk, D_MODEL)
        v3 = v.reshape(B, Tk, D_MODEL)

        acc = jnp.zeros((B * Tq, D_MODEL), jnp.float32)
        for h in range(N_HEADS):
            sl = slice(h * D_K, (h + 1) * D_K)
            qh = q3[:, :, sl]            # (B, Tq, dk)
            kh = k3[:, :, sl]            # (B, Tk, dk)
            vh = v3[:, :, sl]            # (B, Tk, dk)
            s = jnp.einsum("bqd,bkd->bqk", qh, kh,
                           preferred_element_type=jnp.float32)
            s = jnp.where(maskb, s, NEG_INF)     # exact masked_fill semantics
            m = jnp.max(s, axis=-1, keepdims=True)
            e = jnp.exp(s - m)
            pr = e * pl.reciprocal(jnp.sum(e, axis=-1, keepdims=True), approx=True)
            oh = jnp.einsum("bqk,bkd->bqd", pr, vh,
                            preferred_element_type=jnp.float32)
            # fold the output projection per head: out += oh @ Wo[h*dk:(h+1)*dk, :]
            acc = acc + jnp.dot(oh.reshape(B * Tq, D_K), o_w[sl, :],
                                preferred_element_type=jnp.float32)
        return acc + o_b

    # -------------------------- encoder --------------------------
    x = src_x_ref[...].reshape(B * Ts, D_MODEL)
    for lp in p["enc_layers"]:
        n = layer_norm(x, lp["norm1"])
        x = x + mha(n, n, lp["self_attn"], enc_self_mask, Ts, Ts)
        n = layer_norm(x, lp["norm2"])
        x = x + feed_forward(n, lp["ff"])
    memory = layer_norm(x, p["enc_norm"])          # (B*Ts, D), stays in VMEM/vregs

    # -------------------------- decoder --------------------------
    y = tgt_x_ref[...].reshape(B * Tt, D_MODEL)
    for lp in p["dec_layers"]:
        n = layer_norm(y, lp["norm1"])
        y = y + mha(n, n, lp["self_attn"], dec_self_mask, Tt, Tt)
        n = layer_norm(y, lp["norm2"])
        y = y + mha(n, memory, lp["src_attn"], dec_cross_mask, Tt, Ts)
        n = layer_norm(y, lp["norm3"])
        y = y + feed_forward(n, lp["ff"])
    out = layer_norm(y, p["dec_norm"])

    out_ref[...] = out.reshape(B, Tt, D_MODEL)


# ------------------------------ glue (JAX) -----------------------------------
def embed(emb_weight, pe, tokens):
    # Embeddings: lut(x) * sqrt(d_model), then PositionalEncoding (dropout = id)
    x = jnp.take(emb_weight, tokens, axis=0) * math.sqrt(D_MODEL)
    return x + pe[None, : tokens.shape[1], :]


def encoder_decoder_forward(params, src, tgt, src_mask, tgt_mask):
    # == EncoderDecoder.forward: decode(encode(src, src_mask), src_mask, tgt, tgt_mask)
    src_x = embed(params["src_emb"], params["pe"], src)   # (B, Ts, D)
    tgt_x = embed(params["tgt_emb"], params["pe"], tgt)   # (B, Tt, D)

    kparams = {
        "enc_layers": params["enc_layers"],
        "enc_norm": params["enc_norm"],
        "dec_layers": params["dec_layers"],
        "dec_norm": params["dec_norm"],
    }
    flat, treedef = jax.tree_util.tree_flatten(kparams)

    B, Ts, _ = src_x.shape
    Tt = tgt_x.shape[1]

    # Single fused pallas_call: no grid, every operand is a whole-array VMEM block.
    # (Total VMEM footprint ~30 KB — fits with huge headroom on v5e/v6e/v7x.)
    # NOTE: inputs are f32; if the model is ever scaled up, cast matmul inputs to
    # bf16 (keeping preferred_element_type=f32) for full MXU throughput on v6e/v7x.
    out = pl.pallas_call(
        partial(_fused_forward_kernel, treedef=treedef, B=B, Ts=Ts, Tt=Tt),
        out_shape=jax.ShapeDtypeStruct((B, Tt, D_MODEL), jnp.float32),
    )(src_x, tgt_x, src_mask.astype(jnp.int32), tgt_mask.astype(jnp.int32), *flat)
    return out


# --------------------------- parameter init ----------------------------------
def _init_linear(key, din, dout):
    kw, kb = jax.random.split(key)
    lim = 1.0 / math.sqrt(din)
    w = jax.random.uniform(kw, (din, dout), jnp.float32, -lim, lim)
    b = jax.random.uniform(kb, (1, dout), jnp.float32, -lim, lim)
    return w, b


def _init_norm():
    return {"a": jnp.ones((1, D_MODEL), jnp.float32),
            "b": jnp.zeros((1, D_MODEL), jnp.float32)}


def _init_attn(key):
    ks = jax.random.split(key, 4)
    qw, qb = _init_linear(ks[0], D_MODEL, D_MODEL)
    kw, kb = _init_linear(ks[1], D_MODEL, D_MODEL)
    vw, vb = _init_linear(ks[2], D_MODEL, D_MODEL)
    ow, ob = _init_linear(ks[3], D_MODEL, D_MODEL)
    return {
        "qkv_w": jnp.concatenate([qw, kw, vw], axis=1),   # (D, 3D) fused QKV
        "qkv_b": jnp.concatenate([qb, kb, vb], axis=1),   # (1, 3D)
        "o_w": ow,
        "o_b": ob,
    }


def _init_ff(key):
    k1, k2 = jax.random.split(key)
    w1, b1 = _init_linear(k1, D_MODEL, D_FF)
    w2, b2 = _init_linear(k2, D_FF, D_MODEL)
    return {"w1": w1, "b1": b1, "w2": w2, "b2": b2}


def _positional_encoding(max_len, d_model):
    position = jnp.arange(max_len, dtype=jnp.float32)[:, None]
    div_term = jnp.exp(jnp.arange(0, d_model, 2, dtype=jnp.float32)
                       * (-math.log(10000.0) / d_model))
    pe = jnp.zeros((max_len, d_model), jnp.float32)
    pe = pe.at[:, 0::2].set(jnp.sin(position * div_term))
    pe = pe.at[:, 1::2].set(jnp.cos(position * div_term))
    return pe


def init_params(key):
    n_keys = 2 + N_LAYERS * 2 + N_LAYERS * 3
    keys = jax.random.split(key, n_keys)
    ki = iter(keys)

    enc_layers = []
    for _ in range(N_LAYERS):
        enc_layers.append({
            "self_attn": _init_attn(next(ki)),
            "ff": _init_ff(next(ki)),
            "norm1": _init_norm(),
            "norm2": _init_norm(),
        })
    dec_layers = []
    for _ in range(N_LAYERS):
        dec_layers.append({
            "self_attn": _init_attn(next(ki)),
            "src_attn": _init_attn(next(ki)),
            "ff": _init_ff(next(ki)),
            "norm1": _init_norm(),
            "norm2": _init_norm(),
            "norm3": _init_norm(),
        })

    return {
        "src_emb": jax.random.normal(next(ki), (VOCAB, D_MODEL), jnp.float32),
        "tgt_emb": jax.random.normal(next(ki), (VOCAB, D_MODEL), jnp.float32),
        "pe": _positional_encoding(MAX_LEN, D_MODEL),
        "enc_layers": enc_layers,
        "enc_norm": _init_norm(),
        "dec_layers": dec_layers,
        "dec_norm": _init_norm(),
    }


# --------------------------------- main ---------------------------------------
if __name__ == "__main__":
    B, S_SRC, S_TGT = 2, 8, 8

    params = init_params(jax.random.PRNGKey(0))

    ksrc, ktgt = jax.random.split(jax.random.PRNGKey(1))
    src = jax.random.randint(ksrc, (B, S_SRC), 0, VOCAB, dtype=jnp.int32)
    tgt = jax.random.randint(ktgt, (B, S_TGT), 0, VOCAB, dtype=jnp.int32)

    # src_mask: (B, 1, S_src); tgt_mask: (B, S_tgt, S_tgt) causal
    src_mask = jnp.ones((B, 1, S_SRC), jnp.int32)
    causal = jnp.tril(jnp.ones((S_TGT, S_TGT), jnp.int32))
    tgt_mask = jnp.broadcast_to(causal[None, :, :], (B, S_TGT, S_TGT))

    fwd = jax.jit(encoder_decoder_forward)
    out = fwd(params, src, tgt, src_mask, tgt_mask)
    jax.block_until_ready(out)

    assert out.shape == (B, S_TGT, D_MODEL) and out.dtype == jnp.float32
    assert bool(jnp.all(jnp.isfinite(out)))
    print("KERNEL_OK")
</pallas_src>

<mosaic_0001>
module attributes {stable_mosaic.version = 11 : i64} {
  func.func @_fused_forward_kernel(%arg0: memref<2x8x32xf32, #tpu.memory_space<vmem>>, %arg1: memref<2x8x32xf32, #tpu.memory_space<vmem>>, %arg2: memref<2x1x8xi32, #tpu.memory_space<vmem>>, %arg3: memref<2x8x8xi32, #tpu.memory_space<vmem>>, %arg4: memref<1x64xf32, #tpu.memory_space<vmem>>, %arg5: memref<1x32xf32, #tpu.memory_space<vmem>>, %arg6: memref<32x64xf32, #tpu.memory_space<vmem>>, %arg7: memref<64x32xf32, #tpu.memory_space<vmem>>, %arg8: memref<1x32xf32, #tpu.memory_space<vmem>>, %arg9: memref<1x32xf32, #tpu.memory_space<vmem>>, %arg10: memref<1x32xf32, #tpu.memory_space<vmem>>, %arg11: memref<1x32xf32, #tpu.memory_space<vmem>>, %arg12: memref<1x32xf32, #tpu.memory_space<vmem>>, %arg13: memref<1x32xf32, #tpu.memory_space<vmem>>, %arg14: memref<1x32xf32, #tpu.memory_space<vmem>>, %arg15: memref<32x32xf32, #tpu.memory_space<vmem>>, %arg16: memref<1x96xf32, #tpu.memory_space<vmem>>, %arg17: memref<32x96xf32, #tpu.memory_space<vmem>>, %arg18: memref<1x32xf32, #tpu.memory_space<vmem>>, %arg19: memref<32x32xf32, #tpu.memory_space<vmem>>, %arg20: memref<1x96xf32, #tpu.memory_space<vmem>>, %arg21: memref<32x96xf32, #tpu.memory_space<vmem>>, %arg22: memref<1x64xf32, #tpu.memory_space<vmem>>, %arg23: memref<1x32xf32, #tpu.memory_space<vmem>>, %arg24: memref<32x64xf32, #tpu.memory_space<vmem>>, %arg25: memref<64x32xf32, #tpu.memory_space<vmem>>, %arg26: memref<1x32xf32, #tpu.memory_space<vmem>>, %arg27: memref<1x32xf32, #tpu.memory_space<vmem>>, %arg28: memref<1x32xf32, #tpu.memory_space<vmem>>, %arg29: memref<1x32xf32, #tpu.memory_space<vmem>>, %arg30: memref<1x32xf32, #tpu.memory_space<vmem>>, %arg31: memref<1x32xf32, #tpu.memory_space<vmem>>, %arg32: memref<1x32xf32, #tpu.memory_space<vmem>>, %arg33: memref<32x32xf32, #tpu.memory_space<vmem>>, %arg34: memref<1x96xf32, #tpu.memory_space<vmem>>, %arg35: memref<32x96xf32, #tpu.memory_space<vmem>>, %arg36: memref<1x32xf32, #tpu.memory_space<vmem>>, %arg37: memref<32x32xf32, #tpu.memory_space<vmem>>, %arg38: memref<1x96xf32, #tpu.memory_space<vmem>>, %arg39: memref<32x96xf32, #tpu.memory_space<vmem>>, %arg40: memref<1x32xf32, #tpu.memory_space<vmem>>, %arg41: memref<1x32xf32, #tpu.memory_space<vmem>>, %arg42: memref<1x64xf32, #tpu.memory_space<vmem>>, %arg43: memref<1x32xf32, #tpu.memory_space<vmem>>, %arg44: memref<32x64xf32, #tpu.memory_space<vmem>>, %arg45: memref<64x32xf32, #tpu.memory_space<vmem>>, %arg46: memref<1x32xf32, #tpu.memory_space<vmem>>, %arg47: memref<1x32xf32, #tpu.memory_space<vmem>>, %arg48: memref<1x32xf32, #tpu.memory_space<vmem>>, %arg49: memref<1x32xf32, #tpu.memory_space<vmem>>, %arg50: memref<1x32xf32, #tpu.memory_space<vmem>>, %arg51: memref<32x32xf32, #tpu.memory_space<vmem>>, %arg52: memref<1x96xf32, #tpu.memory_space<vmem>>, %arg53: memref<32x96xf32, #tpu.memory_space<vmem>>, %arg54: memref<1x64xf32, #tpu.memory_space<vmem>>, %arg55: memref<1x32xf32, #tpu.memory_space<vmem>>, %arg56: memref<32x64xf32, #tpu.memory_space<vmem>>, %arg57: memref<64x32xf32, #tpu.memory_space<vmem>>, %arg58: memref<1x32xf32, #tpu.memory_space<vmem>>, %arg59: memref<1x32xf32, #tpu.memory_space<vmem>>, %arg60: memref<1x32xf32, #tpu.memory_space<vmem>>, %arg61: memref<1x32xf32, #tpu.memory_space<vmem>>, %arg62: memref<1x32xf32, #tpu.memory_space<vmem>>, %arg63: memref<32x32xf32, #tpu.memory_space<vmem>>, %arg64: memref<1x96xf32, #tpu.memory_space<vmem>>, %arg65: memref<32x96xf32, #tpu.memory_space<vmem>>, %arg66: memref<1x32xf32, #tpu.memory_space<vmem>>, %arg67: memref<1x32xf32, #tpu.memory_space<vmem>>, %arg68: memref<2x8x32xf32, #tpu.memory_space<vmem>>) attributes {dimension_semantics = [], scalar_prefetch = 0 : i64, scratch_operands = 0 : i64, tpu.core_type = #tpu.core_type<tc>} {
    %c0 = arith.constant 0 : index
    %c0_0 = arith.constant 0 : index
    %c0_1 = arith.constant 0 : index
    %0 = vector.load %arg2[%c0, %c0_0, %c0_1] : memref<2x1x8xi32, #tpu.memory_space<vmem>>, vector<2x1x8xi32>
    %c0_2 = arith.constant 0 : index
    %c0_3 = arith.constant 0 : index
    %c0_4 = arith.constant 0 : index
    %1 = vector.load %arg3[%c0_2, %c0_3, %c0_4] : memref<2x8x8xi32, #tpu.memory_space<vmem>>, vector<2x8x8xi32>
    %2 = vector.shape_cast %0 : vector<2x1x8xi32> to vector<2x1x8xi32>
    %3 = vector.broadcast %2 : vector<2x1x8xi32> to vector<2x8x8xi32>
    %c0_i32 = arith.constant 0 : i32
    %4 = vector.broadcast %c0_i32 : i32 to vector<2x8x8xi32>
    %5 = arith.cmpi sgt, %3, %4 : vector<2x8x8xi32>
    %c0_i32_5 = arith.constant 0 : i32
    %6 = vector.broadcast %c0_i32_5 : i32 to vector<2x8x8xi32>
    %7 = arith.cmpi sgt, %1, %6 : vector<2x8x8xi32>
    %8 = vector.shape_cast %0 : vector<2x1x8xi32> to vector<2x1x8xi32>
    %9 = vector.broadcast %8 : vector<2x1x8xi32> to vector<2x8x8xi32>
    %c0_i32_6 = arith.constant 0 : i32
    %10 = vector.broadcast %c0_i32_6 : i32 to vector<2x8x8xi32>
    %11 = arith.cmpi sgt, %9, %10 : vector<2x8x8xi32>
    %c0_7 = arith.constant 0 : index
    %c0_8 = arith.constant 0 : index
    %c0_9 = arith.constant 0 : index
    %12 = vector.load %arg0[%c0_7, %c0_8, %c0_9] : memref<2x8x32xf32, #tpu.memory_space<vmem>>, vector<2x8x32xf32>
    %13 = vector.shape_cast %12 : vector<2x8x32xf32> to vector<16x32xf32>
    %c0_10 = arith.constant 0 : index
    %c0_11 = arith.constant 0 : index
    %14 = vector.load %arg46[%c0_10, %c0_11] : memref<1x32xf32, #tpu.memory_space<vmem>>, vector<1x32xf32>
    %c0_12 = arith.constant 0 : index
    %c0_13 = arith.constant 0 : index
    %15 = vector.load %arg47[%c0_12, %c0_13] : memref<1x32xf32, #tpu.memory_space<vmem>>, vector<1x32xf32>
    %cst = arith.constant dense<0.000000e+00> : vector<16xf32>
    %16 = vector.multi_reduction <add>, %13, %cst [1] : vector<16x32xf32> to vector<16xf32>
    %17 = vector.shape_cast %16 : vector<16xf32> to vector<16x1xf32>
    %cst_14 = arith.constant 3.200000e+01 : f32
    %18 = vector.broadcast %cst_14 : f32 to vector<16x1xf32>
    %19 = arith.divf %17, %18 : vector<16x1xf32>
    %20 = vector.broadcast %19 : vector<16x1xf32> to vector<16x32xf32>
    %21 = arith.subf %13, %20 : vector<16x32xf32>
    %22 = arith.mulf %21, %21 : vector<16x32xf32>
    %cst_15 = arith.constant dense<0.000000e+00> : vector<16xf32>
    %23 = vector.multi_reduction <add>, %22, %cst_15 [1] : vector<16x32xf32> to vector<16xf32>
    %24 = vector.shape_cast %23 : vector<16xf32> to vector<16x1xf32>
    %cst_16 = arith.constant 0.0322580636 : f32
    %25 = vector.broadcast %cst_16 : f32 to vector<16x1xf32>
    %26 = arith.mulf %24, %25 : vector<16x1xf32>
    %27 = math.sqrt %26 : vector<16x1xf32>
    %cst_17 = arith.constant 9.99999997E-7 : f32
    %28 = vector.broadcast %cst_17 : f32 to vector<16x1xf32>
    %29 = arith.addf %27, %28 : vector<16x1xf32>
    %30 = tpu.reciprocal %29 {approx = true} : vector<16x1xf32> -> vector<16x1xf32>
    %31 = vector.broadcast %30 : vector<16x1xf32> to vector<16x32xf32>
    %32 = arith.mulf %21, %31 : vector<16x32xf32>
    %33 = vector.broadcast %14 : vector<1x32xf32> to vector<16x32xf32>
    %34 = arith.mulf %33, %32 : vector<16x32xf32>
    %35 = vector.broadcast %15 : vector<1x32xf32> to vector<16x32xf32>
    %36 = arith.addf %34, %35 : vector<16x32xf32>
    %c0_18 = arith.constant 0 : index
    %c0_19 = arith.constant 0 : index
    %37 = vector.load %arg53[%c0_18, %c0_19] : memref<32x96xf32, #tpu.memory_space<vmem>>, vector<32x96xf32>
    %c0_20 = arith.constant 0 : index
    %c0_21 = arith.constant 0 : index
    %38 = vector.load %arg52[%c0_20, %c0_21] : memref<1x96xf32, #tpu.memory_space<vmem>>, vector<1x96xf32>
    %c0_22 = arith.constant 0 : index
    %c0_23 = arith.constant 0 : index
    %39 = vector.load %arg51[%c0_22, %c0_23] : memref<32x32xf32, #tpu.memory_space<vmem>>, vector<32x32xf32>
    %c0_24 = arith.constant 0 : index
    %c0_25 = arith.constant 0 : index
    %40 = vector.load %arg50[%c0_24, %c0_25] : memref<1x32xf32, #tpu.memory_space<vmem>>, vector<1x32xf32>
    %41 = vector.extract_strided_slice %37 {offsets = [0, 0], sizes = [32, 32], strides = [1, 1]} : vector<32x96xf32> to vector<32x32xf32>
    %cst_26 = arith.constant dense<0.000000e+00> : vector<16x32xf32>
    %42 = tpu.matmul %36, %41, %cst_26 {dimension_numbers = #tpu.dot_dimension_numbers<[1], [0], [0], [1], [0, 0, 1, 1], [], []>} : vector<16x32xf32>, vector<32x32xf32>, vector<16x32xf32> -> vector<16x32xf32>
    %43 = vector.extract_strided_slice %38 {offsets = [0, 0], sizes = [1, 32], strides = [1, 1]} : vector<1x96xf32> to vector<1x32xf32>
    %44 = vector.broadcast %43 : vector<1x32xf32> to vector<16x32xf32>
    %45 = arith.addf %42, %44 : vector<16x32xf32>
    %cst_27 = arith.constant 0.353553385 : f32
    %46 = vector.broadcast %cst_27 : f32 to vector<16x32xf32>
    %47 = arith.mulf %45, %46 : vector<16x32xf32>
    %48 = vector.extract_strided_slice %37 {offsets = [0, 32], sizes = [32, 64], strides = [1, 1]} : vector<32x96xf32> to vector<32x64xf32>
    %cst_28 = arith.constant dense<0.000000e+00> : vector<16x64xf32>
    %49 = tpu.matmul %36, %48, %cst_28 {dimension_numbers = #tpu.dot_dimension_numbers<[1], [0], [0], [1], [0, 0, 1, 1], [], []>} : vector<16x32xf32>, vector<32x64xf32>, vector<16x64xf32> -> vector<16x64xf32>
    %50 = vector.extract_strided_slice %38 {offsets = [0, 32], sizes = [1, 64], strides = [1, 1]} : vector<1x96xf32> to vector<1x64xf32>
    %51 = vector.broadcast %50 : vector<1x64xf32> to vector<16x64xf32>
    %52 = arith.addf %49, %51 : vector<16x64xf32>
    %53 = vector.extract_strided_slice %52 {offsets = [0, 0], sizes = [16, 32], strides = [1, 1]} : vector<16x64xf32> to vector<16x32xf32>
    %54 = vector.extract_strided_slice %52 {offsets = [0, 32], sizes = [16, 32], strides = [1, 1]} : vector<16x64xf32> to vector<16x32xf32>
    %55 = vector.shape_cast %47 : vector<16x32xf32> to vector<2x8x32xf32>
    %56 = vector.shape_cast %53 : vector<16x32xf32> to vector<2x8x32xf32>
    %57 = vector.shape_cast %54 : vector<16x32xf32> to vector<2x8x32xf32>
    %cst_29 = arith.constant 0.000000e+00 : f32
    %58 = vector.broadcast %cst_29 : f32 to vector<16x32xf32>
    %59 = vector.extract_strided_slice %55 {offsets = [0, 0, 0], sizes = [2, 8, 8], strides = [1, 1, 1]} : vector<2x8x32xf32> to vector<2x8x8xf32>
    %60 = vector.extract_strided_slice %56 {offsets = [0, 0, 0], sizes = [2, 8, 8], strides = [1, 1, 1]} : vector<2x8x32xf32> to vector<2x8x8xf32>
    %61 = vector.extract_strided_slice %57 {offsets = [0, 0, 0], sizes = [2, 8, 8], strides = [1, 1, 1]} : vector<2x8x32xf32> to vector<2x8x8xf32>
    "tpu.trace_start"() <{level = 10 : i32, message = "bqd,bkd->bqk"}> : () -> ()
    %cst_30 = arith.constant dense<0.000000e+00> : vector<2x8x8xf32>
    %62 = tpu.matmul %59, %60, %cst_30 {dimension_numbers = #tpu.dot_dimension_numbers<[2], [2], [1], [1], [0, 0, 0, 1, 1, 1], [0], [0]>} : vector<2x8x8xf32>, vector<2x8x8xf32>, vector<2x8x8xf32> -> vector<2x8x8xf32>
    %cst_31 = arith.constant -1.000000e+09 : f32
    "tpu.trace_stop"() : () -> ()
    %63 = vector.broadcast %cst_31 : f32 to vector<2x8x8xf32>
    %64 = arith.select %5, %62, %63 : vector<2x8x8xi1>, vector<2x8x8xf32>
    %cst_32 = arith.constant dense<0xFF800000> : vector<2x8xf32>
    %65 = vector.multi_reduction <maximumf>, %64, %cst_32 [2] : vector<2x8x8xf32> to vector<2x8xf32>
    %66 = vector.shape_cast %65 : vector<2x8xf32> to vector<2x8x1xf32>
    %67 = vector.broadcast %66 : vector<2x8x1xf32> to vector<2x8x8xf32>
    %68 = arith.subf %64, %67 : vector<2x8x8xf32>
    %69 = math.exp %68 : vector<2x8x8xf32>
    %cst_33 = arith.constant dense<0.000000e+00> : vector<2x8xf32>
    %70 = vector.multi_reduction <add>, %69, %cst_33 [2] : vector<2x8x8xf32> to vector<2x8xf32>
    %71 = vector.shape_cast %70 : vector<2x8xf32> to vector<2x8x1xf32>
    %72 = tpu.reciprocal %71 {approx = true} : vector<2x8x1xf32> -> vector<2x8x1xf32>
    %73 = vector.broadcast %72 : vector<2x8x1xf32> to vector<2x8x8xf32>
    %74 = arith.mulf %69, %73 : vector<2x8x8xf32>
    "tpu.trace_start"() <{level = 10 : i32, message = "bqk,bkd->bqd"}> : () -> ()
    %cst_34 = arith.constant dense<0.000000e+00> : vector<2x8x8xf32>
    %75 = tpu.matmul %74, %61, %cst_34 {dimension_numbers = #tpu.dot_dimension_numbers<[2], [1], [1], [2], [0, 0, 0, 1, 1, 2], [0], [0]>} : vector<2x8x8xf32>, vector<2x8x8xf32>, vector<2x8x8xf32> -> vector<2x8x8xf32>
    "tpu.trace_stop"() : () -> ()
    %76 = vector.shape_cast %75 : vector<2x8x8xf32> to vector<16x8xf32>
    %77 = vector.extract_strided_slice %39 {offsets = [0, 0], sizes = [8, 32], strides = [1, 1]} : vector<32x32xf32> to vector<8x32xf32>
    %cst_35 = arith.constant dense<0.000000e+00> : vector<16x32xf32>
    %78 = tpu.matmul %76, %77, %cst_35 {dimension_numbers = #tpu.dot_dimension_numbers<[1], [0], [0], [1], [0, 0, 1, 1], [], []>} : vector<16x8xf32>, vector<8x32xf32>, vector<16x32xf32> -> vector<16x32xf32>
    %79 = arith.addf %58, %78 : vector<16x32xf32>
    %80 = vector.extract_strided_slice %55 {offsets = [0, 0, 8], sizes = [2, 8, 8], strides = [1, 1, 1]} : vector<2x8x32xf32> to vector<2x8x8xf32>
    %81 = vector.extract_strided_slice %56 {offsets = [0, 0, 8], sizes = [2, 8, 8], strides = [1, 1, 1]} : vector<2x8x32xf32> to vector<2x8x8xf32>
    %82 = vector.extract_strided_slice %57 {offsets = [0, 0, 8], sizes = [2, 8, 8], strides = [1, 1, 1]} : vector<2x8x32xf32> to vector<2x8x8xf32>
    "tpu.trace_start"() <{level = 10 : i32, message = "bqd,bkd->bqk"}> : () -> ()
    %cst_36 = arith.constant dense<0.000000e+00> : vector<2x8x8xf32>
    %83 = tpu.matmul %80, %81, %cst_36 {dimension_numbers = #tpu.dot_dimension_numbers<[2], [2], [1], [1], [0, 0, 0, 1, 1, 1], [0], [0]>} : vector<2x8x8xf32>, vector<2x8x8xf32>, vector<2x8x8xf32> -> vector<2x8x8xf32>
    %cst_37 = arith.constant -1.000000e+09 : f32
    "tpu.trace_stop"() : () -> ()
    %84 = vector.broadcast %cst_37 : f32 to vector<2x8x8xf32>
    %85 = arith.select %5, %83, %84 : vector<2x8x8xi1>, vector<2x8x8xf32>
    %cst_38 = arith.constant dense<0xFF800000> : vector<2x8xf32>
    %86 = vector.multi_reduction <maximumf>, %85, %cst_38 [2] : vector<2x8x8xf32> to vector<2x8xf32>
    %87 = vector.shape_cast %86 : vector<2x8xf32> to vector<2x8x1xf32>
    %88 = vector.broadcast %87 : vector<2x8x1xf32> to vector<2x8x8xf32>
    %89 = arith.subf %85, %88 : vector<2x8x8xf32>
    %90 = math.exp %89 : vector<2x8x8xf32>
    %cst_39 = arith.constant dense<0.000000e+00> : vector<2x8xf32>
    %91 = vector.multi_reduction <add>, %90, %cst_39 [2] : vector<2x8x8xf32> to vector<2x8xf32>
    %92 = vector.shape_cast %91 : vector<2x8xf32> to vector<2x8x1xf32>
    %93 = tpu.reciprocal %92 {approx = true} : vector<2x8x1xf32> -> vector<2x8x1xf32>
    %94 = vector.broadcast %93 : vector<2x8x1xf32> to vector<2x8x8xf32>
    %95 = arith.mulf %90, %94 : vector<2x8x8xf32>
    "tpu.trace_start"() <{level = 10 : i32, message = "bqk,bkd->bqd"}> : () -> ()
    %cst_40 = arith.constant dense<0.000000e+00> : vector<2x8x8xf32>
    %96 = tpu.matmul %95, %82, %cst_40 {dimension_numbers = #tpu.dot_dimension_numbers<[2], [1], [1], [2], [0, 0, 0, 1, 1, 2], [0], [0]>} : vector<2x8x8xf32>, vector<2x8x8xf32>, vector<2x8x8xf32> -> vector<2x8x8xf32>
    "tpu.trace_stop"() : () -> ()
    %97 = vector.shape_cast %96 : vector<2x8x8xf32> to vector<16x8xf32>
    %98 = vector.extract_strided_slice %39 {offsets = [8, 0], sizes = [8, 32], strides = [1, 1]} : vector<32x32xf32> to vector<8x32xf32>
    %cst_41 = arith.constant dense<0.000000e+00> : vector<16x32xf32>
    %99 = tpu.matmul %97, %98, %cst_41 {dimension_numbers = #tpu.dot_dimension_numbers<[1], [0], [0], [1], [0, 0, 1, 1], [], []>} : vector<16x8xf32>, vector<8x32xf32>, vector<16x32xf32> -> vector<16x32xf32>
    %100 = arith.addf %79, %99 : vector<16x32xf32>
    %101 = vector.extract_strided_slice %55 {offsets = [0, 0, 16], sizes = [2, 8, 8], strides = [1, 1, 1]} : vector<2x8x32xf32> to vector<2x8x8xf32>
    %102 = vector.extract_strided_slice %56 {offsets = [0, 0, 16], sizes = [2, 8, 8], strides = [1, 1, 1]} : vector<2x8x32xf32> to vector<2x8x8xf32>
    %103 = vector.extract_strided_slice %57 {offsets = [0, 0, 16], sizes = [2, 8, 8], strides = [1, 1, 1]} : vector<2x8x32xf32> to vector<2x8x8xf32>
    "tpu.trace_start"() <{level = 10 : i32, message = "bqd,bkd->bqk"}> : () -> ()
    %cst_42 = arith.constant dense<0.000000e+00> : vector<2x8x8xf32>
    %104 = tpu.matmul %101, %102, %cst_42 {dimension_numbers = #tpu.dot_dimension_numbers<[2], [2], [1], [1], [0, 0, 0, 1, 1, 1], [0], [0]>} : vector<2x8x8xf32>, vector<2x8x8xf32>, vector<2x8x8xf32> -> vector<2x8x8xf32>
    %cst_43 = arith.constant -1.000000e+09 : f32
    "tpu.trace_stop"() : () -> ()
    %105 = vector.broadcast %cst_43 : f32 to vector<2x8x8xf32>
    %106 = arith.select %5, %104, %105 : vector<2x8x8xi1>, vector<2x8x8xf32>
    %cst_44 = arith.constant dense<0xFF800000> : vector<2x8xf32>
    %107 = vector.multi_reduction <maximumf>, %106, %cst_44 [2] : vector<2x8x8xf32> to vector<2x8xf32>
    %108 = vector.shape_cast %107 : vector<2x8xf32> to vector<2x8x1xf32>
    %109 = vector.broadcast %108 : vector<2x8x1xf32> to vector<2x8x8xf32>
    %110 = arith.subf %106, %109 : vector<2x8x8xf32>
    %111 = math.exp %110 : vector<2x8x8xf32>
    %cst_45 = arith.constant dense<0.000000e+00> : vector<2x8xf32>
    %112 = vector.multi_reduction <add>, %111, %cst_45 [2] : vector<2x8x8xf32> to vector<2x8xf32>
    %113 = vector.shape_cast %112 : vector<2x8xf32> to vector<2x8x1xf32>
    %114 = tpu.reciprocal %113 {approx = true} : vector<2x8x1xf32> -> vector<2x8x1xf32>
    %115 = vector.broadcast %114 : vector<2x8x1xf32> to vector<2x8x8xf32>
    %116 = arith.mulf %111, %115 : vector<2x8x8xf32>
    "tpu.trace_start"() <{level = 10 : i32, message = "bqk,bkd->bqd"}> : () -> ()
    %cst_46 = arith.constant dense<0.000000e+00> : vector<2x8x8xf32>
    %117 = tpu.matmul %116, %103, %cst_46 {dimension_numbers = #tpu.dot_dimension_numbers<[2], [1], [1], [2], [0, 0, 0, 1, 1, 2], [0], [0]>} : vector<2x8x8xf32>, vector<2x8x8xf32>, vector<2x8x8xf32> -> vector<2x8x8xf32>
    "tpu.trace_stop"() : () -> ()
    %118 = vector.shape_cast %117 : vector<2x8x8xf32> to vector<16x8xf32>
    %119 = vector.extract_strided_slice %39 {offsets = [16, 0], sizes = [8, 32], strides = [1, 1]} : vector<32x32xf32> to vector<8x32xf32>
    %cst_47 = arith.constant dense<0.000000e+00> : vector<16x32xf32>
    %120 = tpu.matmul %118, %119, %cst_47 {dimension_numbers = #tpu.dot_dimension_numbers<[1], [0], [0], [1], [0, 0, 1, 1], [], []>} : vector<16x8xf32>, vector<8x32xf32>, vector<16x32xf32> -> vector<16x32xf32>
    %121 = arith.addf %100, %120 : vector<16x32xf32>
    %122 = vector.extract_strided_slice %55 {offsets = [0, 0, 24], sizes = [2, 8, 8], strides = [1, 1, 1]} : vector<2x8x32xf32> to vector<2x8x8xf32>
    %123 = vector.extract_strided_slice %56 {offsets = [0, 0, 24], sizes = [2, 8, 8], strides = [1, 1, 1]} : vector<2x8x32xf32> to vector<2x8x8xf32>
    %124 = vector.extract_strided_slice %57 {offsets = [0, 0, 24], sizes = [2, 8, 8], strides = [1, 1, 1]} : vector<2x8x32xf32> to vector<2x8x8xf32>
    "tpu.trace_start"() <{level = 10 : i32, message = "bqd,bkd->bqk"}> : () -> ()
    %cst_48 = arith.constant dense<0.000000e+00> : vector<2x8x8xf32>
    %125 = tpu.matmul %122, %123, %cst_48 {dimension_numbers = #tpu.dot_dimension_numbers<[2], [2], [1], [1], [0, 0, 0, 1, 1, 1], [0], [0]>} : vector<2x8x8xf32>, vector<2x8x8xf32>, vector<2x8x8xf32> -> vector<2x8x8xf32>
    %cst_49 = arith.constant -1.000000e+09 : f32
    "tpu.trace_stop"() : () -> ()
    %126 = vector.broadcast %cst_49 : f32 to vector<2x8x8xf32>
    %127 = arith.select %5, %125, %126 : vector<2x8x8xi1>, vector<2x8x8xf32>
    %cst_50 = arith.constant dense<0xFF800000> : vector<2x8xf32>
    %128 = vector.multi_reduction <maximumf>, %127, %cst_50 [2] : vector<2x8x8xf32> to vector<2x8xf32>
    %129 = vector.shape_cast %128 : vector<2x8xf32> to vector<2x8x1xf32>
    %130 = vector.broadcast %129 : vector<2x8x1xf32> to vector<2x8x8xf32>
    %131 = arith.subf %127, %130 : vector<2x8x8xf32>
    %132 = math.exp %131 : vector<2x8x8xf32>
    %cst_51 = arith.constant dense<0.000000e+00> : vector<2x8xf32>
    %133 = vector.multi_reduction <add>, %132, %cst_51 [2] : vector<2x8x8xf32> to vector<2x8xf32>
    %134 = vector.shape_cast %133 : vector<2x8xf32> to vector<2x8x1xf32>
    %135 = tpu.reciprocal %134 {approx = true} : vector<2x8x1xf32> -> vector<2x8x1xf32>
    %136 = vector.broadcast %135 : vector<2x8x1xf32> to vector<2x8x8xf32>
    %137 = arith.mulf %132, %136 : vector<2x8x8xf32>
    "tpu.trace_start"() <{level = 10 : i32, message = "bqk,bkd->bqd"}> : () -> ()
    %cst_52 = arith.constant dense<0.000000e+00> : vector<2x8x8xf32>
    %138 = tpu.matmul %137, %124, %cst_52 {dimension_numbers = #tpu.dot_dimension_numbers<[2], [1], [1], [2], [0, 0, 0, 1, 1, 2], [0], [0]>} : vector<2x8x8xf32>, vector<2x8x8xf32>, vector<2x8x8xf32> -> vector<2x8x8xf32>
    "tpu.trace_stop"() : () -> ()
    %139 = vector.shape_cast %138 : vector<2x8x8xf32> to vector<16x8xf32>
    %140 = vector.extract_strided_slice %39 {offsets = [24, 0], sizes = [8, 32], strides = [1, 1]} : vector<32x32xf32> to vector<8x32xf32>
    %cst_53 = arith.constant dense<0.000000e+00> : vector<16x32xf32>
    %141 = tpu.matmul %139, %140, %cst_53 {dimension_numbers = #tpu.dot_dimension_numbers<[1], [0], [0], [1], [0, 0, 1, 1], [], []>} : vector<16x8xf32>, vector<8x32xf32>, vector<16x32xf32> -> vector<16x32xf32>
    %142 = arith.addf %121, %141 : vector<16x32xf32>
    %143 = vector.broadcast %40 : vector<1x32xf32> to vector<16x32xf32>
    %144 = arith.addf %142, %143 : vector<16x32xf32>
    %145 = arith.addf %13, %144 : vector<16x32xf32>
    %c0_54 = arith.constant 0 : index
    %c0_55 = arith.constant 0 : index
    %146 = vector.load %arg48[%c0_54, %c0_55] : memref<1x32xf32, #tpu.memory_space<vmem>>, vector<1x32xf32>
    %c0_56 = arith.constant 0 : index
    %c0_57 = arith.constant 0 : index
    %147 = vector.load %arg49[%c0_56, %c0_57] : memref<1x32xf32, #tpu.memory_space<vmem>>, vector<1x32xf32>
    %cst_58 = arith.constant dense<0.000000e+00> : vector<16xf32>
    %148 = vector.multi_reduction <add>, %145, %cst_58 [1] : vector<16x32xf32> to vector<16xf32>
    %149 = vector.shape_cast %148 : vector<16xf32> to vector<16x1xf32>
    %cst_59 = arith.constant 3.200000e+01 : f32
    %150 = vector.broadcast %cst_59 : f32 to vector<16x1xf32>
    %151 = arith.divf %149, %150 : vector<16x1xf32>
    %152 = vector.broadcast %151 : vector<16x1xf32> to vector<16x32xf32>
    %153 = arith.subf %145, %152 : vector<16x32xf32>
    %154 = arith.mulf %153, %153 : vector<16x32xf32>
    %cst_60 = arith.constant dense<0.000000e+00> : vector<16xf32>
    %155 = vector.multi_reduction <add>, %154, %cst_60 [1] : vector<16x32xf32> to vector<16xf32>
    %156 = vector.shape_cast %155 : vector<16xf32> to vector<16x1xf32>
    %cst_61 = arith.constant 0.0322580636 : f32
    %157 = vector.broadcast %cst_61 : f32 to vector<16x1xf32>
    %158 = arith.mulf %156, %157 : vector<16x1xf32>
    %159 = math.sqrt %158 : vector<16x1xf32>
    %cst_62 = arith.constant 9.99999997E-7 : f32
    %160 = vector.broadcast %cst_62 : f32 to vector<16x1xf32>
    %161 = arith.addf %159, %160 : vector<16x1xf32>
    %162 = tpu.reciprocal %161 {approx = true} : vector<16x1xf32> -> vector<16x1xf32>
    %163 = vector.broadcast %162 : vector<16x1xf32> to vector<16x32xf32>
    %164 = arith.mulf %153, %163 : vector<16x32xf32>
    %165 = vector.broadcast %146 : vector<1x32xf32> to vector<16x32xf32>
    %166 = arith.mulf %165, %164 : vector<16x32xf32>
    %167 = vector.broadcast %147 : vector<1x32xf32> to vector<16x32xf32>
    %168 = arith.addf %166, %167 : vector<16x32xf32>
    %c0_63 = arith.constant 0 : index
    %c0_64 = arith.constant 0 : index
    %169 = vector.load %arg44[%c0_63, %c0_64] : memref<32x64xf32, #tpu.memory_space<vmem>>, vector<32x64xf32>
    %cst_65 = arith.constant dense<0.000000e+00> : vector<16x64xf32>
    %170 = tpu.matmul %168, %169, %cst_65 {dimension_numbers = #tpu.dot_dimension_numbers<[1], [0], [0], [1], [0, 0, 1, 1], [], []>} : vector<16x32xf32>, vector<32x64xf32>, vector<16x64xf32> -> vector<16x64xf32>
    %c0_66 = arith.constant 0 : index
    %c0_67 = arith.constant 0 : index
    %171 = vector.load %arg42[%c0_66, %c0_67] : memref<1x64xf32, #tpu.memory_space<vmem>>, vector<1x64xf32>
    %172 = vector.broadcast %171 : vector<1x64xf32> to vector<16x64xf32>
    %173 = arith.addf %170, %172 : vector<16x64xf32>
    %cst_68 = arith.constant 0.000000e+00 : f32
    %174 = vector.broadcast %cst_68 : f32 to vector<16x64xf32>
    %175 = arith.maximumf %173, %174 : vector<16x64xf32>
    %c0_69 = arith.constant 0 : index
    %c0_70 = arith.constant 0 : index
    %176 = vector.load %arg45[%c0_69, %c0_70] : memref<64x32xf32, #tpu.memory_space<vmem>>, vector<64x32xf32>
    %cst_71 = arith.constant dense<0.000000e+00> : vector<16x32xf32>
    %177 = tpu.matmul %175, %176, %cst_71 {dimension_numbers = #tpu.dot_dimension_numbers<[1], [0], [0], [1], [0, 0, 1, 1], [], []>} : vector<16x64xf32>, vector<64x32xf32>, vector<16x32xf32> -> vector<16x32xf32>
    %c0_72 = arith.constant 0 : index
    %c0_73 = arith.constant 0 : index
    %178 = vector.load %arg43[%c0_72, %c0_73] : memref<1x32xf32, #tpu.memory_space<vmem>>, vector<1x32xf32>
    %179 = vector.broadcast %178 : vector<1x32xf32> to vector<16x32xf32>
    %180 = arith.addf %177, %179 : vector<16x32xf32>
    %181 = arith.addf %145, %180 : vector<16x32xf32>
    %c0_74 = arith.constant 0 : index
    %c0_75 = arith.constant 0 : index
    %182 = vector.load %arg58[%c0_74, %c0_75] : memref<1x32xf32, #tpu.memory_space<vmem>>, vector<1x32xf32>
    %c0_76 = arith.constant 0 : index
    %c0_77 = arith.constant 0 : index
    %183 = vector.load %arg59[%c0_76, %c0_77] : memref<1x32xf32, #tpu.memory_space<vmem>>, vector<1x32xf32>
    %cst_78 = arith.constant dense<0.000000e+00> : vector<16xf32>
    %184 = vector.multi_reduction <add>, %181, %cst_78 [1] : vector<16x32xf32> to vector<16xf32>
    %185 = vector.shape_cast %184 : vector<16xf32> to vector<16x1xf32>
    %cst_79 = arith.constant 3.200000e+01 : f32
    %186 = vector.broadcast %cst_79 : f32 to vector<16x1xf32>
    %187 = arith.divf %185, %186 : vector<16x1xf32>
    %188 = vector.broadcast %187 : vector<16x1xf32> to vector<16x32xf32>
    %189 = arith.subf %181, %188 : vector<16x32xf32>
    %190 = arith.mulf %189, %189 : vector<16x32xf32>
    %cst_80 = arith.constant dense<0.000000e+00> : vector<16xf32>
    %191 = vector.multi_reduction <add>, %190, %cst_80 [1] : vector<16x32xf32> to vector<16xf32>
    %192 = vector.shape_cast %191 : vector<16xf32> to vector<16x1xf32>
    %cst_81 = arith.constant 0.0322580636 : f32
    %193 = vector.broadcast %cst_81 : f32 to vector<16x1xf32>
    %194 = arith.mulf %192, %193 : vector<16x1xf32>
    %195 = math.sqrt %194 : vector<16x1xf32>
    %cst_82 = arith.constant 9.99999997E-7 : f32
    %196 = vector.broadcast %cst_82 : f32 to vector<16x1xf32>
    %197 = arith.addf %195, %196 : vector<16x1xf32>
    %198 = tpu.reciprocal %197 {approx = true} : vector<16x1xf32> -> vector<16x1xf32>
    %199 = vector.broadcast %198 : vector<16x1xf32> to vector<16x32xf32>
    %200 = arith.mulf %189, %199 : vector<16x32xf32>
    %201 = vector.broadcast %182 : vector<1x32xf32> to vector<16x32xf32>
    %202 = arith.mulf %201, %200 : vector<16x32xf32>
    %203 = vector.broadcast %183 : vector<1x32xf32> to vector<16x32xf32>
    %204 = arith.addf %202, %203 : vector<16x32xf32>
    %c0_83 = arith.constant 0 : index
    %c0_84 = arith.constant 0 : index
    %205 = vector.load %arg65[%c0_83, %c0_84] : memref<32x96xf32, #tpu.memory_space<vmem>>, vector<32x96xf32>
    %c0_85 = arith.constant 0 : index
    %c0_86 = arith.constant 0 : index
    %206 = vector.load %arg64[%c0_85, %c0_86] : memref<1x96xf32, #tpu.memory_space<vmem>>, vector<1x96xf32>
    %c0_87 = arith.constant 0 : index
    %c0_88 = arith.constant 0 : index
    %207 = vector.load %arg63[%c0_87, %c0_88] : memref<32x32xf32, #tpu.memory_space<vmem>>, vector<32x32xf32>
    %c0_89 = arith.constant 0 : index
    %c0_90 = arith.constant 0 : index
    %208 = vector.load %arg62[%c0_89, %c0_90] : memref<1x32xf32, #tpu.memory_space<vmem>>, vector<1x32xf32>
    %209 = vector.extract_strided_slice %205 {offsets = [0, 0], sizes = [32, 32], strides = [1, 1]} : vector<32x96xf32> to vector<32x32xf32>
    %cst_91 = arith.constant dense<0.000000e+00> : vector<16x32xf32>
    %210 = tpu.matmul %204, %209, %cst_91 {dimension_numbers = #tpu.dot_dimension_numbers<[1], [0], [0], [1], [0, 0, 1, 1], [], []>} : vector<16x32xf32>, vector<32x32xf32>, vector<16x32xf32> -> vector<16x32xf32>
    %211 = vector.extract_strided_slice %206 {offsets = [0, 0], sizes = [1, 32], strides = [1, 1]} : vector<1x96xf32> to vector<1x32xf32>
    %212 = vector.broadcast %211 : vector<1x32xf32> to vector<16x32xf32>
    %213 = arith.addf %210, %212 : vector<16x32xf32>
    %cst_92 = arith.constant 0.353553385 : f32
    %214 = vector.broadcast %cst_92 : f32 to vector<16x32xf32>
    %215 = arith.mulf %213, %214 : vector<16x32xf32>
    %216 = vector.extract_strided_slice %205 {offsets = [0, 32], sizes = [32, 64], strides = [1, 1]} : vector<32x96xf32> to vector<32x64xf32>
    %cst_93 = arith.constant dense<0.000000e+00> : vector<16x64xf32>
    %217 = tpu.matmul %204, %216, %cst_93 {dimension_numbers = #tpu.dot_dimension_numbers<[1], [0], [0], [1], [0, 0, 1, 1], [], []>} : vector<16x32xf32>, vector<32x64xf32>, vector<16x64xf32> -> vector<16x64xf32>
    %218 = vector.extract_strided_slice %206 {offsets = [0, 32], sizes = [1, 64], strides = [1, 1]} : vector<1x96xf32> to vector<1x64xf32>
    %219 = vector.broadcast %218 : vector<1x64xf32> to vector<16x64xf32>
    %220 = arith.addf %217, %219 : vector<16x64xf32>
    %221 = vector.extract_strided_slice %220 {offsets = [0, 0], sizes = [16, 32], strides = [1, 1]} : vector<16x64xf32> to vector<16x32xf32>
    %222 = vector.extract_strided_slice %220 {offsets = [0, 32], sizes = [16, 32], strides = [1, 1]} : vector<16x64xf32> to vector<16x32xf32>
    %223 = vector.shape_cast %215 : vector<16x32xf32> to vector<2x8x32xf32>
    %224 = vector.shape_cast %221 : vector<16x32xf32> to vector<2x8x32xf32>
    %225 = vector.shape_cast %222 : vector<16x32xf32> to vector<2x8x32xf32>
    %cst_94 = arith.constant 0.000000e+00 : f32
    %226 = vector.broadcast %cst_94 : f32 to vector<16x32xf32>
    %227 = vector.extract_strided_slice %223 {offsets = [0, 0, 0], sizes = [2, 8, 8], strides = [1, 1, 1]} : vector<2x8x32xf32> to vector<2x8x8xf32>
    %228 = vector.extract_strided_slice %224 {offsets = [0, 0, 0], sizes = [2, 8, 8], strides = [1, 1, 1]} : vector<2x8x32xf32> to vector<2x8x8xf32>
    %229 = vector.extract_strided_slice %225 {offsets = [0, 0, 0], sizes = [2, 8, 8], strides = [1, 1, 1]} : vector<2x8x32xf32> to vector<2x8x8xf32>
    "tpu.trace_start"() <{level = 10 : i32, message = "bqd,bkd->bqk"}> : () -> ()
    %cst_95 = arith.constant dense<0.000000e+00> : vector<2x8x8xf32>
    %230 = tpu.matmul %227, %228, %cst_95 {dimension_numbers = #tpu.dot_dimension_numbers<[2], [2], [1], [1], [0, 0, 0, 1, 1, 1], [0], [0]>} : vector<2x8x8xf32>, vector<2x8x8xf32>, vector<2x8x8xf32> -> vector<2x8x8xf32>
    %cst_96 = arith.constant -1.000000e+09 : f32
    "tpu.trace_stop"() : () -> ()
    %231 = vector.broadcast %cst_96 : f32 to vector<2x8x8xf32>
    %232 = arith.select %5, %230, %231 : vector<2x8x8xi1>, vector<2x8x8xf32>
    %cst_97 = arith.constant dense<0xFF800000> : vector<2x8xf32>
    %233 = vector.multi_reduction <maximumf>, %232, %cst_97 [2] : vector<2x8x8xf32> to vector<2x8xf32>
    %234 = vector.shape_cast %233 : vector<2x8xf32> to vector<2x8x1xf32>
    %235 = vector.broadcast %234 : vector<2x8x1xf32> to vector<2x8x8xf32>
    %236 = arith.subf %232, %235 : vector<2x8x8xf32>
    %237 = math.exp %236 : vector<2x8x8xf32>
    %cst_98 = arith.constant dense<0.000000e+00> : vector<2x8xf32>
    %238 = vector.multi_reduction <add>, %237, %cst_98 [2] : vector<2x8x8xf32> to vector<2x8xf32>
    %239 = vector.shape_cast %238 : vector<2x8xf32> to vector<2x8x1xf32>
    %240 = tpu.reciprocal %239 {approx = true} : vector<2x8x1xf32> -> vector<2x8x1xf32>
    %241 = vector.broadcast %240 : vector<2x8x1xf32> to vector<2x8x8xf32>
    %242 = arith.mulf %237, %241 : vector<2x8x8xf32>
    "tpu.trace_start"() <{level = 10 : i32, message = "bqk,bkd->bqd"}> : () -> ()
    %cst_99 = arith.constant dense<0.000000e+00> : vector<2x8x8xf32>
    %243 = tpu.matmul %242, %229, %cst_99 {dimension_numbers = #tpu.dot_dimension_numbers<[2], [1], [1], [2], [0, 0, 0, 1, 1, 2], [0], [0]>} : vector<2x8x8xf32>, vector<2x8x8xf32>, vector<2x8x8xf32> -> vector<2x8x8xf32>
    "tpu.trace_stop"() : () -> ()
    %244 = vector.shape_cast %243 : vector<2x8x8xf32> to vector<16x8xf32>
    %245 = vector.extract_strided_slice %207 {offsets = [0, 0], sizes = [8, 32], strides = [1, 1]} : vector<32x32xf32> to vector<8x32xf32>
    %cst_100 = arith.constant dense<0.000000e+00> : vector<16x32xf32>
    %246 = tpu.matmul %244, %245, %cst_100 {dimension_numbers = #tpu.dot_dimension_numbers<[1], [0], [0], [1], [0, 0, 1, 1], [], []>} : vector<16x8xf32>, vector<8x32xf32>, vector<16x32xf32> -> vector<16x32xf32>
    %247 = arith.addf %226, %246 : vector<16x32xf32>
    %248 = vector.extract_strided_slice %223 {offsets = [0, 0, 8], sizes = [2, 8, 8], strides = [1, 1, 1]} : vector<2x8x32xf32> to vector<2x8x8xf32>
    %249 = vector.extract_strided_slice %224 {offsets = [0, 0, 8], sizes = [2, 8, 8], strides = [1, 1, 1]} : vector<2x8x32xf32> to vector<2x8x8xf32>
    %250 = vector.extract_strided_slice %225 {offsets = [0, 0, 8], sizes = [2, 8, 8], strides = [1, 1, 1]} : vector<2x8x32xf32> to vector<2x8x8xf32>
    "tpu.trace_start"() <{level = 10 : i32, message = "bqd,bkd->bqk"}> : () -> ()
    %cst_101 = arith.constant dense<0.000000e+00> : vector<2x8x8xf32>
    %251 = tpu.matmul %248, %249, %cst_101 {dimension_numbers = #tpu.dot_dimension_numbers<[2], [2], [1], [1], [0, 0, 0, 1, 1, 1], [0], [0]>} : vector<2x8x8xf32>, vector<2x8x8xf32>, vector<2x8x8xf32> -> vector<2x8x8xf32>
    %cst_102 = arith.constant -1.000000e+09 : f32
    "tpu.trace_stop"() : () -> ()
    %252 = vector.broadcast %cst_102 : f32 to vector<2x8x8xf32>
    %253 = arith.select %5, %251, %252 : vector<2x8x8xi1>, vector<2x8x8xf32>
    %cst_103 = arith.constant dense<0xFF800000> : vector<2x8xf32>
    %254 = vector.multi_reduction <maximumf>, %253, %cst_103 [2] : vector<2x8x8xf32> to vector<2x8xf32>
    %255 = vector.shape_cast %254 : vector<2x8xf32> to vector<2x8x1xf32>
    %256 = vector.broadcast %255 : vector<2x8x1xf32> to vector<2x8x8xf32>
    %257 = arith.subf %253, %256 : vector<2x8x8xf32>
    %258 = math.exp %257 : vector<2x8x8xf32>
    %cst_104 = arith.constant dense<0.000000e+00> : vector<2x8xf32>
    %259 = vector.multi_reduction <add>, %258, %cst_104 [2] : vector<2x8x8xf32> to vector<2x8xf32>
    %260 = vector.shape_cast %259 : vector<2x8xf32> to vector<2x8x1xf32>
    %261 = tpu.reciprocal %260 {approx = true} : vector<2x8x1xf32> -> vector<2x8x1xf32>
    %262 = vector.broadcast %261 : vector<2x8x1xf32> to vector<2x8x8xf32>
    %263 = arith.mulf %258, %262 : vector<2x8x8xf32>
    "tpu.trace_start"() <{level = 10 : i32, message = "bqk,bkd->bqd"}> : () -> ()
    %cst_105 = arith.constant dense<0.000000e+00> : vector<2x8x8xf32>
    %264 = tpu.matmul %263, %250, %cst_105 {dimension_numbers = #tpu.dot_dimension_numbers<[2], [1], [1], [2], [0, 0, 0, 1, 1, 2], [0], [0]>} : vector<2x8x8xf32>, vector<2x8x8xf32>, vector<2x8x8xf32> -> vector<2x8x8xf32>
    "tpu.trace_stop"() : () -> ()
    %265 = vector.shape_cast %264 : vector<2x8x8xf32> to vector<16x8xf32>
    %266 = vector.extract_strided_slice %207 {offsets = [8, 0], sizes = [8, 32], strides = [1, 1]} : vector<32x32xf32> to vector<8x32xf32>
    %cst_106 = arith.constant dense<0.000000e+00> : vector<16x32xf32>
    %267 = tpu.matmul %265, %266, %cst_106 {dimension_numbers = #tpu.dot_dimension_numbers<[1], [0], [0], [1], [0, 0, 1, 1], [], []>} : vector<16x8xf32>, vector<8x32xf32>, vector<16x32xf32> -> vector<16x32xf32>
    %268 = arith.addf %247, %267 : vector<16x32xf32>
    %269 = vector.extract_strided_slice %223 {offsets = [0, 0, 16], sizes = [2, 8, 8], strides = [1, 1, 1]} : vector<2x8x32xf32> to vector<2x8x8xf32>
    %270 = vector.extract_strided_slice %224 {offsets = [0, 0, 16], sizes = [2, 8, 8], strides = [1, 1, 1]} : vector<2x8x32xf32> to vector<2x8x8xf32>
    %271 = vector.extract_strided_slice %225 {offsets = [0, 0, 16], sizes = [2, 8, 8], strides = [1, 1, 1]} : vector<2x8x32xf32> to vector<2x8x8xf32>
    "tpu.trace_start"() <{level = 10 : i32, message = "bqd,bkd->bqk"}> : () -> ()
    %cst_107 = arith.constant dense<0.000000e+00> : vector<2x8x8xf32>
    %272 = tpu.matmul %269, %270, %cst_107 {dimension_numbers = #tpu.dot_dimension_numbers<[2], [2], [1], [1], [0, 0, 0, 1, 1, 1], [0], [0]>} : vector<2x8x8xf32>, vector<2x8x8xf32>, vector<2x8x8xf32> -> vector<2x8x8xf32>
    %cst_108 = arith.constant -1.000000e+09 : f32
    "tpu.trace_stop"() : () -> ()
    %273 = vector.broadcast %cst_108 : f32 to vector<2x8x8xf32>
    %274 = arith.select %5, %272, %273 : vector<2x8x8xi1>, vector<2x8x8xf32>
    %cst_109 = arith.constant dense<0xFF800000> : vector<2x8xf32>
    %275 = vector.multi_reduction <maximumf>, %274, %cst_109 [2] : vector<2x8x8xf32> to vector<2x8xf32>
    %276 = vector.shape_cast %275 : vector<2x8xf32> to vector<2x8x1xf32>
    %277 = vector.broadcast %276 : vector<2x8x1xf32> to vector<2x8x8xf32>
    %278 = arith.subf %274, %277 : vector<2x8x8xf32>
    %279 = math.exp %278 : vector<2x8x8xf32>
    %cst_110 = arith.constant dense<0.000000e+00> : vector<2x8xf32>
    %280 = vector.multi_reduction <add>, %279, %cst_110 [2] : vector<2x8x8xf32> to vector<2x8xf32>
    %281 = vector.shape_cast %280 : vector<2x8xf32> to vector<2x8x1xf32>
    %282 = tpu.reciprocal %281 {approx = true} : vector<2x8x1xf32> -> vector<2x8x1xf32>
    %283 = vector.broadcast %282 : vector<2x8x1xf32> to vector<2x8x8xf32>
    %284 = arith.mulf %279, %283 : vector<2x8x8xf32>
    "tpu.trace_start"() <{level = 10 : i32, message = "bqk,bkd->bqd"}> : () -> ()
    %cst_111 = arith.constant dense<0.000000e+00> : vector<2x8x8xf32>
    %285 = tpu.matmul %284, %271, %cst_111 {dimension_numbers = #tpu.dot_dimension_numbers<[2], [1], [1], [2], [0, 0, 0, 1, 1, 2], [0], [0]>} : vector<2x8x8xf32>, vector<2x8x8xf32>, vector<2x8x8xf32> -> vector<2x8x8xf32>
    "tpu.trace_stop"() : () -> ()
    %286 = vector.shape_cast %285 : vector<2x8x8xf32> to vector<16x8xf32>
    %287 = vector.extract_strided_slice %207 {offsets = [16, 0], sizes = [8, 32], strides = [1, 1]} : vector<32x32xf32> to vector<8x32xf32>
    %cst_112 = arith.constant dense<0.000000e+00> : vector<16x32xf32>
    %288 = tpu.matmul %286, %287, %cst_112 {dimension_numbers = #tpu.dot_dimension_numbers<[1], [0], [0], [1], [0, 0, 1, 1], [], []>} : vector<16x8xf32>, vector<8x32xf32>, vector<16x32xf32> -> vector<16x32xf32>
    %289 = arith.addf %268, %288 : vector<16x32xf32>
    %290 = vector.extract_strided_slice %223 {offsets = [0, 0, 24], sizes = [2, 8, 8], strides = [1, 1, 1]} : vector<2x8x32xf32> to vector<2x8x8xf32>
    %291 = vector.extract_strided_slice %224 {offsets = [0, 0, 24], sizes = [2, 8, 8], strides = [1, 1, 1]} : vector<2x8x32xf32> to vector<2x8x8xf32>
    %292 = vector.extract_strided_slice %225 {offsets = [0, 0, 24], sizes = [2, 8, 8], strides = [1, 1, 1]} : vector<2x8x32xf32> to vector<2x8x8xf32>
    "tpu.trace_start"() <{level = 10 : i32, message = "bqd,bkd->bqk"}> : () -> ()
    %cst_113 = arith.constant dense<0.000000e+00> : vector<2x8x8xf32>
    %293 = tpu.matmul %290, %291, %cst_113 {dimension_numbers = #tpu.dot_dimension_numbers<[2], [2], [1], [1], [0, 0, 0, 1, 1, 1], [0], [0]>} : vector<2x8x8xf32>, vector<2x8x8xf32>, vector<2x8x8xf32> -> vector<2x8x8xf32>
    %cst_114 = arith.constant -1.000000e+09 : f32
    "tpu.trace_stop"() : () -> ()
    %294 = vector.broadcast %cst_114 : f32 to vector<2x8x8xf32>
    %295 = arith.select %5, %293, %294 : vector<2x8x8xi1>, vector<2x8x8xf32>
    %cst_115 = arith.constant dense<0xFF800000> : vector<2x8xf32>
    %296 = vector.multi_reduction <maximumf>, %295, %cst_115 [2] : vector<2x8x8xf32> to vector<2x8xf32>
    %297 = vector.shape_cast %296 : vector<2x8xf32> to vector<2x8x1xf32>
    %298 = vector.broadcast %297 : vector<2x8x1xf32> to vector<2x8x8xf32>
    %299 = arith.subf %295, %298 : vector<2x8x8xf32>
    %300 = math.exp %299 : vector<2x8x8xf32>
    %cst_116 = arith.constant dense<0.000000e+00> : vector<2x8xf32>
    %301 = vector.multi_reduction <add>, %300, %cst_116 [2] : vector<2x8x8xf32> to vector<2x8xf32>
    %302 = vector.shape_cast %301 : vector<2x8xf32> to vector<2x8x1xf32>
    %303 = tpu.reciprocal %302 {approx = true} : vector<2x8x1xf32> -> vector<2x8x1xf32>
    %304 = vector.broadcast %303 : vector<2x8x1xf32> to vector<2x8x8xf32>
    %305 = arith.mulf %300, %304 : vector<2x8x8xf32>
    "tpu.trace_start"() <{level = 10 : i32, message = "bqk,bkd->bqd"}> : () -> ()
    %cst_117 = arith.constant dense<0.000000e+00> : vector<2x8x8xf32>
    %306 = tpu.matmul %305, %292, %cst_117 {dimension_numbers = #tpu.dot_dimension_numbers<[2], [1], [1], [2], [0, 0, 0, 1, 1, 2], [0], [0]>} : vector<2x8x8xf32>, vector<2x8x8xf32>, vector<2x8x8xf32> -> vector<2x8x8xf32>
    "tpu.trace_stop"() : () -> ()
    %307 = vector.shape_cast %306 : vector<2x8x8xf32> to vector<16x8xf32>
    %308 = vector.extract_strided_slice %207 {offsets = [24, 0], sizes = [8, 32], strides = [1, 1]} : vector<32x32xf32> to vector<8x32xf32>
    %cst_118 = arith.constant dense<0.000000e+00> : vector<16x32xf32>
    %309 = tpu.matmul %307, %308, %cst_118 {dimension_numbers = #tpu.dot_dimension_numbers<[1], [0], [0], [1], [0, 0, 1, 1], [], []>} : vector<16x8xf32>, vector<8x32xf32>, vector<16x32xf32> -> vector<16x32xf32>
    %310 = arith.addf %289, %309 : vector<16x32xf32>
    %311 = vector.broadcast %208 : vector<1x32xf32> to vector<16x32xf32>
    %312 = arith.addf %310, %311 : vector<16x32xf32>
    %313 = arith.addf %181, %312 : vector<16x32xf32>
    %c0_119 = arith.constant 0 : index
    %c0_120 = arith.constant 0 : index
    %314 = vector.load %arg60[%c0_119, %c0_120] : memref<1x32xf32, #tpu.memory_space<vmem>>, vector<1x32xf32>
    %c0_121 = arith.constant 0 : index
    %c0_122 = arith.constant 0 : index
    %315 = vector.load %arg61[%c0_121, %c0_122] : memref<1x32xf32, #tpu.memory_space<vmem>>, vector<1x32xf32>
    %cst_123 = arith.constant dense<0.000000e+00> : vector<16xf32>
    %316 = vector.multi_reduction <add>, %313, %cst_123 [1] : vector<16x32xf32> to vector<16xf32>
    %317 = vector.shape_cast %316 : vector<16xf32> to vector<16x1xf32>
    %cst_124 = arith.constant 3.200000e+01 : f32
    %318 = vector.broadcast %cst_124 : f32 to vector<16x1xf32>
    %319 = arith.divf %317, %318 : vector<16x1xf32>
    %320 = vector.broadcast %319 : vector<16x1xf32> to vector<16x32xf32>
    %321 = arith.subf %313, %320 : vector<16x32xf32>
    %322 = arith.mulf %321, %321 : vector<16x32xf32>
    %cst_125 = arith.constant dense<0.000000e+00> : vector<16xf32>
    %323 = vector.multi_reduction <add>, %322, %cst_125 [1] : vector<16x32xf32> to vector<16xf32>
    %324 = vector.shape_cast %323 : vector<16xf32> to vector<16x1xf32>
    %cst_126 = arith.constant 0.0322580636 : f32
    %325 = vector.broadcast %cst_126 : f32 to vector<16x1xf32>
    %326 = arith.mulf %324, %325 : vector<16x1xf32>
    %327 = math.sqrt %326 : vector<16x1xf32>
    %cst_127 = arith.constant 9.99999997E-7 : f32
    %328 = vector.broadcast %cst_127 : f32 to vector<16x1xf32>
    %329 = arith.addf %327, %328 : vector<16x1xf32>
    %330 = tpu.reciprocal %329 {approx = true} : vector<16x1xf32> -> vector<16x1xf32>
    %331 = vector.broadcast %330 : vector<16x1xf32> to vector<16x32xf32>
    %332 = arith.mulf %321, %331 : vector<16x32xf32>
    %333 = vector.broadcast %314 : vector<1x32xf32> to vector<16x32xf32>
    %334 = arith.mulf %333, %332 : vector<16x32xf32>
    %335 = vector.broadcast %315 : vector<1x32xf32> to vector<16x32xf32>
    %336 = arith.addf %334, %335 : vector<16x32xf32>
    %c0_128 = arith.constant 0 : index
    %c0_129 = arith.constant 0 : index
    %337 = vector.load %arg56[%c0_128, %c0_129] : memref<32x64xf32, #tpu.memory_space<vmem>>, vector<32x64xf32>
    %cst_130 = arith.constant dense<0.000000e+00> : vector<16x64xf32>
    %338 = tpu.matmul %336, %337, %cst_130 {dimension_numbers = #tpu.dot_dimension_numbers<[1], [0], [0], [1], [0, 0, 1, 1], [], []>} : vector<16x32xf32>, vector<32x64xf32>, vector<16x64xf32> -> vector<16x64xf32>
    %c0_131 = arith.constant 0 : index
    %c0_132 = arith.constant 0 : index
    %339 = vector.load %arg54[%c0_131, %c0_132] : memref<1x64xf32, #tpu.memory_space<vmem>>, vector<1x64xf32>
    %340 = vector.broadcast %339 : vector<1x64xf32> to vector<16x64xf32>
    %341 = arith.addf %338, %340 : vector<16x64xf32>
    %cst_133 = arith.constant 0.000000e+00 : f32
    %342 = vector.broadcast %cst_133 : f32 to vector<16x64xf32>
    %343 = arith.maximumf %341, %342 : vector<16x64xf32>
    %c0_134 = arith.constant 0 : index
    %c0_135 = arith.constant 0 : index
    %344 = vector.load %arg57[%c0_134, %c0_135] : memref<64x32xf32, #tpu.memory_space<vmem>>, vector<64x32xf32>
    %cst_136 = arith.constant dense<0.000000e+00> : vector<16x32xf32>
    %345 = tpu.matmul %343, %344, %cst_136 {dimension_numbers = #tpu.dot_dimension_numbers<[1], [0], [0], [1], [0, 0, 1, 1], [], []>} : vector<16x64xf32>, vector<64x32xf32>, vector<16x32xf32> -> vector<16x32xf32>
    %c0_137 = arith.constant 0 : index
    %c0_138 = arith.constant 0 : index
    %346 = vector.load %arg55[%c0_137, %c0_138] : memref<1x32xf32, #tpu.memory_space<vmem>>, vector<1x32xf32>
    %347 = vector.broadcast %346 : vector<1x32xf32> to vector<16x32xf32>
    %348 = arith.addf %345, %347 : vector<16x32xf32>
    %349 = arith.addf %313, %348 : vector<16x32xf32>
    %c0_139 = arith.constant 0 : index
    %c0_140 = arith.constant 0 : index
    %350 = vector.load %arg66[%c0_139, %c0_140] : memref<1x32xf32, #tpu.memory_space<vmem>>, vector<1x32xf32>
    %c0_141 = arith.constant 0 : index
    %c0_142 = arith.constant 0 : index
    %351 = vector.load %arg67[%c0_141, %c0_142] : memref<1x32xf32, #tpu.memory_space<vmem>>, vector<1x32xf32>
    %cst_143 = arith.constant dense<0.000000e+00> : vector<16xf32>
    %352 = vector.multi_reduction <add>, %349, %cst_143 [1] : vector<16x32xf32> to vector<16xf32>
    %353 = vector.shape_cast %352 : vector<16xf32> to vector<16x1xf32>
    %cst_144 = arith.constant 3.200000e+01 : f32
    %354 = vector.broadcast %cst_144 : f32 to vector<16x1xf32>
    %355 = arith.divf %353, %354 : vector<16x1xf32>
    %356 = vector.broadcast %355 : vector<16x1xf32> to vector<16x32xf32>
    %357 = arith.subf %349, %356 : vector<16x32xf32>
    %358 = arith.mulf %357, %357 : vector<16x32xf32>
    %cst_145 = arith.constant dense<0.000000e+00> : vector<16xf32>
    %359 = vector.multi_reduction <add>, %358, %cst_145 [1] : vector<16x32xf32> to vector<16xf32>
    %360 = vector.shape_cast %359 : vector<16xf32> to vector<16x1xf32>
    %cst_146 = arith.constant 0.0322580636 : f32
    %361 = vector.broadcast %cst_146 : f32 to vector<16x1xf32>
    %362 = arith.mulf %360, %361 : vector<16x1xf32>
    %363 = math.sqrt %362 : vector<16x1xf32>
    %cst_147 = arith.constant 9.99999997E-7 : f32
    %364 = vector.broadcast %cst_147 : f32 to vector<16x1xf32>
    %365 = arith.addf %363, %364 : vector<16x1xf32>
    %366 = tpu.reciprocal %365 {approx = true} : vector<16x1xf32> -> vector<16x1xf32>
    %367 = vector.broadcast %366 : vector<16x1xf32> to vector<16x32xf32>
    %368 = arith.mulf %357, %367 : vector<16x32xf32>
    %369 = vector.broadcast %350 : vector<1x32xf32> to vector<16x32xf32>
    %370 = arith.mulf %369, %368 : vector<16x32xf32>
    %371 = vector.broadcast %351 : vector<1x32xf32> to vector<16x32xf32>
    %372 = arith.addf %370, %371 : vector<16x32xf32>
    %c0_148 = arith.constant 0 : index
    %c0_149 = arith.constant 0 : index
    %c0_150 = arith.constant 0 : index
    %373 = vector.load %arg1[%c0_148, %c0_149, %c0_150] : memref<2x8x32xf32, #tpu.memory_space<vmem>>, vector<2x8x32xf32>
    %374 = vector.shape_cast %373 : vector<2x8x32xf32> to vector<16x32xf32>
    %c0_151 = arith.constant 0 : index
    %c0_152 = arith.constant 0 : index
    %375 = vector.load %arg8[%c0_151, %c0_152] : memref<1x32xf32, #tpu.memory_space<vmem>>, vector<1x32xf32>
    %c0_153 = arith.constant 0 : index
    %c0_154 = arith.constant 0 : index
    %376 = vector.load %arg9[%c0_153, %c0_154] : memref<1x32xf32, #tpu.memory_space<vmem>>, vector<1x32xf32>
    %cst_155 = arith.constant dense<0.000000e+00> : vector<16xf32>
    %377 = vector.multi_reduction <add>, %374, %cst_155 [1] : vector<16x32xf32> to vector<16xf32>
    %378 = vector.shape_cast %377 : vector<16xf32> to vector<16x1xf32>
    %cst_156 = arith.constant 3.200000e+01 : f32
    %379 = vector.broadcast %cst_156 : f32 to vector<16x1xf32>
    %380 = arith.divf %378, %379 : vector<16x1xf32>
    %381 = vector.broadcast %380 : vector<16x1xf32> to vector<16x32xf32>
    %382 = arith.subf %374, %381 : vector<16x32xf32>
    %383 = arith.mulf %382, %382 : vector<16x32xf32>
    %cst_157 = arith.constant dense<0.000000e+00> : vector<16xf32>
    %384 = vector.multi_reduction <add>, %383, %cst_157 [1] : vector<16x32xf32> to vector<16xf32>
    %385 = vector.shape_cast %384 : vector<16xf32> to vector<16x1xf32>
    %cst_158 = arith.constant 0.0322580636 : f32
    %386 = vector.broadcast %cst_158 : f32 to vector<16x1xf32>
    %387 = arith.mulf %385, %386 : vector<16x1xf32>
    %388 = math.sqrt %387 : vector<16x1xf32>
    %cst_159 = arith.constant 9.99999997E-7 : f32
    %389 = vector.broadcast %cst_159 : f32 to vector<16x1xf32>
    %390 = arith.addf %388, %389 : vector<16x1xf32>
    %391 = tpu.reciprocal %390 {approx = true} : vector<16x1xf32> -> vector<16x1xf32>
    %392 = vector.broadcast %391 : vector<16x1xf32> to vector<16x32xf32>
    %393 = arith.mulf %382, %392 : vector<16x32xf32>
    %394 = vector.broadcast %375 : vector<1x32xf32> to vector<16x32xf32>
    %395 = arith.mulf %394, %393 : vector<16x32xf32>
    %396 = vector.broadcast %376 : vector<1x32xf32> to vector<16x32xf32>
    %397 = arith.addf %395, %396 : vector<16x32xf32>
    %c0_160 = arith.constant 0 : index
    %c0_161 = arith.constant 0 : index
    %398 = vector.load %arg17[%c0_160, %c0_161] : memref<32x96xf32, #tpu.memory_space<vmem>>, vector<32x96xf32>
    %c0_162 = arith.constant 0 : index
    %c0_163 = arith.constant 0 : index
    %399 = vector.load %arg16[%c0_162, %c0_163] : memref<1x96xf32, #tpu.memory_space<vmem>>, vector<1x96xf32>
    %c0_164 = arith.constant 0 : index
    %c0_165 = arith.constant 0 : index
    %400 = vector.load %arg15[%c0_164, %c0_165] : memref<32x32xf32, #tpu.memory_space<vmem>>, vector<32x32xf32>
    %c0_166 = arith.constant 0 : index
    %c0_167 = arith.constant 0 : index
    %401 = vector.load %arg14[%c0_166, %c0_167] : memref<1x32xf32, #tpu.memory_space<vmem>>, vector<1x32xf32>
    %402 = vector.extract_strided_slice %398 {offsets = [0, 0], sizes = [32, 32], strides = [1, 1]} : vector<32x96xf32> to vector<32x32xf32>
    %cst_168 = arith.constant dense<0.000000e+00> : vector<16x32xf32>
    %403 = tpu.matmul %397, %402, %cst_168 {dimension_numbers = #tpu.dot_dimension_numbers<[1], [0], [0], [1], [0, 0, 1, 1], [], []>} : vector<16x32xf32>, vector<32x32xf32>, vector<16x32xf32> -> vector<16x32xf32>
    %404 = vector.extract_strided_slice %399 {offsets = [0, 0], sizes = [1, 32], strides = [1, 1]} : vector<1x96xf32> to vector<1x32xf32>
    %405 = vector.broadcast %404 : vector<1x32xf32> to vector<16x32xf32>
    %406 = arith.addf %403, %405 : vector<16x32xf32>
    %cst_169 = arith.constant 0.353553385 : f32
    %407 = vector.broadcast %cst_169 : f32 to vector<16x32xf32>
    %408 = arith.mulf %406, %407 : vector<16x32xf32>
    %409 = vector.extract_strided_slice %398 {offsets = [0, 32], sizes = [32, 64], strides = [1, 1]} : vector<32x96xf32> to vector<32x64xf32>
    %cst_170 = arith.constant dense<0.000000e+00> : vector<16x64xf32>
    %410 = tpu.matmul %397, %409, %cst_170 {dimension_numbers = #tpu.dot_dimension_numbers<[1], [0], [0], [1], [0, 0, 1, 1], [], []>} : vector<16x32xf32>, vector<32x64xf32>, vector<16x64xf32> -> vector<16x64xf32>
    %411 = vector.extract_strided_slice %399 {offsets = [0, 32], sizes = [1, 64], strides = [1, 1]} : vector<1x96xf32> to vector<1x64xf32>
    %412 = vector.broadcast %411 : vector<1x64xf32> to vector<16x64xf32>
    %413 = arith.addf %410, %412 : vector<16x64xf32>
    %414 = vector.extract_strided_slice %413 {offsets = [0, 0], sizes = [16, 32], strides = [1, 1]} : vector<16x64xf32> to vector<16x32xf32>
    %415 = vector.extract_strided_slice %413 {offsets = [0, 32], sizes = [16, 32], strides = [1, 1]} : vector<16x64xf32> to vector<16x32xf32>
    %416 = vector.shape_cast %408 : vector<16x32xf32> to vector<2x8x32xf32>
    %417 = vector.shape_cast %414 : vector<16x32xf32> to vector<2x8x32xf32>
    %418 = vector.shape_cast %415 : vector<16x32xf32> to vector<2x8x32xf32>
    %cst_171 = arith.constant 0.000000e+00 : f32
    %419 = vector.broadcast %cst_171 : f32 to vector<16x32xf32>
    %420 = vector.extract_strided_slice %416 {offsets = [0, 0, 0], sizes = [2, 8, 8], strides = [1, 1, 1]} : vector<2x8x32xf32> to vector<2x8x8xf32>
    %421 = vector.extract_strided_slice %417 {offsets = [0, 0, 0], sizes = [2, 8, 8], strides = [1, 1, 1]} : vector<2x8x32xf32> to vector<2x8x8xf32>
    %422 = vector.extract_strided_slice %418 {offsets = [0, 0, 0], sizes = [2, 8, 8], strides = [1, 1, 1]} : vector<2x8x32xf32> to vector<2x8x8xf32>
    "tpu.trace_start"() <{level = 10 : i32, message = "bqd,bkd->bqk"}> : () -> ()
    %cst_172 = arith.constant dense<0.000000e+00> : vector<2x8x8xf32>
    %423 = tpu.matmul %420, %421, %cst_172 {dimension_numbers = #tpu.dot_dimension_numbers<[2], [2], [1], [1], [0, 0, 0, 1, 1, 1], [0], [0]>} : vector<2x8x8xf32>, vector<2x8x8xf32>, vector<2x8x8xf32> -> vector<2x8x8xf32>
    %cst_173 = arith.constant -1.000000e+09 : f32
    "tpu.trace_stop"() : () -> ()
    %424 = vector.broadcast %cst_173 : f32 to vector<2x8x8xf32>
    %425 = arith.select %7, %423, %424 : vector<2x8x8xi1>, vector<2x8x8xf32>
    %cst_174 = arith.constant dense<0xFF800000> : vector<2x8xf32>
    %426 = vector.multi_reduction <maximumf>, %425, %cst_174 [2] : vector<2x8x8xf32> to vector<2x8xf32>
    %427 = vector.shape_cast %426 : vector<2x8xf32> to vector<2x8x1xf32>
    %428 = vector.broadcast %427 : vector<2x8x1xf32> to vector<2x8x8xf32>
    %429 = arith.subf %425, %428 : vector<2x8x8xf32>
    %430 = math.exp %429 : vector<2x8x8xf32>
    %cst_175 = arith.constant dense<0.000000e+00> : vector<2x8xf32>
    %431 = vector.multi_reduction <add>, %430, %cst_175 [2] : vector<2x8x8xf32> to vector<2x8xf32>
    %432 = vector.shape_cast %431 : vector<2x8xf32> to vector<2x8x1xf32>
    %433 = tpu.reciprocal %432 {approx = true} : vector<2x8x1xf32> -> vector<2x8x1xf32>
    %434 = vector.broadcast %433 : vector<2x8x1xf32> to vector<2x8x8xf32>
    %435 = arith.mulf %430, %434 : vector<2x8x8xf32>
    "tpu.trace_start"() <{level = 10 : i32, message = "bqk,bkd->bqd"}> : () -> ()
    %cst_176 = arith.constant dense<0.000000e+00> : vector<2x8x8xf32>
    %436 = tpu.matmul %435, %422, %cst_176 {dimension_numbers = #tpu.dot_dimension_numbers<[2], [1], [1], [2], [0, 0, 0, 1, 1, 2], [0], [0]>} : vector<2x8x8xf32>, vector<2x8x8xf32>, vector<2x8x8xf32> -> vector<2x8x8xf32>
    "tpu.trace_stop"() : () -> ()
    %437 = vector.shape_cast %436 : vector<2x8x8xf32> to vector<16x8xf32>
    %438 = vector.extract_strided_slice %400 {offsets = [0, 0], sizes = [8, 32], strides = [1, 1]} : vector<32x32xf32> to vector<8x32xf32>
    %cst_177 = arith.constant dense<0.000000e+00> : vector<16x32xf32>
    %439 = tpu.matmul %437, %438, %cst_177 {dimension_numbers = #tpu.dot_dimension_numbers<[1], [0], [0], [1], [0, 0, 1, 1], [], []>} : vector<16x8xf32>, vector<8x32xf32>, vector<16x32xf32> -> vector<16x32xf32>
    %440 = arith.addf %419, %439 : vector<16x32xf32>
    %441 = vector.extract_strided_slice %416 {offsets = [0, 0, 8], sizes = [2, 8, 8], strides = [1, 1, 1]} : vector<2x8x32xf32> to vector<2x8x8xf32>
    %442 = vector.extract_strided_slice %417 {offsets = [0, 0, 8], sizes = [2, 8, 8], strides = [1, 1, 1]} : vector<2x8x32xf32> to vector<2x8x8xf32>
    %443 = vector.extract_strided_slice %418 {offsets = [0, 0, 8], sizes = [2, 8, 8], strides = [1, 1, 1]} : vector<2x8x32xf32> to vector<2x8x8xf32>
    "tpu.trace_start"() <{level = 10 : i32, message = "bqd,bkd->bqk"}> : () -> ()
    %cst_178 = arith.constant dense<0.000000e+00> : vector<2x8x8xf32>
    %444 = tpu.matmul %441, %442, %cst_178 {dimension_numbers = #tpu.dot_dimension_numbers<[2], [2], [1], [1], [0, 0, 0, 1, 1, 1], [0], [0]>} : vector<2x8x8xf32>, vector<2x8x8xf32>, vector<2x8x8xf32> -> vector<2x8x8xf32>
    %cst_179 = arith.constant -1.000000e+09 : f32
    "tpu.trace_stop"() : () -> ()
    %445 = vector.broadcast %cst_179 : f32 to vector<2x8x8xf32>
    %446 = arith.select %7, %444, %445 : vector<2x8x8xi1>, vector<2x8x8xf32>
    %cst_180 = arith.constant dense<0xFF800000> : vector<2x8xf32>
    %447 = vector.multi_reduction <maximumf>, %446, %cst_180 [2] : vector<2x8x8xf32> to vector<2x8xf32>
    %448 = vector.shape_cast %447 : vector<2x8xf32> to vector<2x8x1xf32>
    %449 = vector.broadcast %448 : vector<2x8x1xf32> to vector<2x8x8xf32>
    %450 = arith.subf %446, %449 : vector<2x8x8xf32>
    %451 = math.exp %450 : vector<2x8x8xf32>
    %cst_181 = arith.constant dense<0.000000e+00> : vector<2x8xf32>
    %452 = vector.multi_reduction <add>, %451, %cst_181 [2] : vector<2x8x8xf32> to vector<2x8xf32>
    %453 = vector.shape_cast %452 : vector<2x8xf32> to vector<2x8x1xf32>
    %454 = tpu.reciprocal %453 {approx = true} : vector<2x8x1xf32> -> vector<2x8x1xf32>
    %455 = vector.broadcast %454 : vector<2x8x1xf32> to vector<2x8x8xf32>
    %456 = arith.mulf %451, %455 : vector<2x8x8xf32>
    "tpu.trace_start"() <{level = 10 : i32, message = "bqk,bkd->bqd"}> : () -> ()
    %cst_182 = arith.constant dense<0.000000e+00> : vector<2x8x8xf32>
    %457 = tpu.matmul %456, %443, %cst_182 {dimension_numbers = #tpu.dot_dimension_numbers<[2], [1], [1], [2], [0, 0, 0, 1, 1, 2], [0], [0]>} : vector<2x8x8xf32>, vector<2x8x8xf32>, vector<2x8x8xf32> -> vector<2x8x8xf32>
    "tpu.trace_stop"() : () -> ()
    %458 = vector.shape_cast %457 : vector<2x8x8xf32> to vector<16x8xf32>
    %459 = vector.extract_strided_slice %400 {offsets = [8, 0], sizes = [8, 32], strides = [1, 1]} : vector<32x32xf32> to vector<8x32xf32>
    %cst_183 = arith.constant dense<0.000000e+00> : vector<16x32xf32>
    %460 = tpu.matmul %458, %459, %cst_183 {dimension_numbers = #tpu.dot_dimension_numbers<[1], [0], [0], [1], [0, 0, 1, 1], [], []>} : vector<16x8xf32>, vector<8x32xf32>, vector<16x32xf32> -> vector<16x32xf32>
    %461 = arith.addf %440, %460 : vector<16x32xf32>
    %462 = vector.extract_strided_slice %416 {offsets = [0, 0, 16], sizes = [2, 8, 8], strides = [1, 1, 1]} : vector<2x8x32xf32> to vector<2x8x8xf32>
    %463 = vector.extract_strided_slice %417 {offsets = [0, 0, 16], sizes = [2, 8, 8], strides = [1, 1, 1]} : vector<2x8x32xf32> to vector<2x8x8xf32>
    %464 = vector.extract_strided_slice %418 {offsets = [0, 0, 16], sizes = [2, 8, 8], strides = [1, 1, 1]} : vector<2x8x32xf32> to vector<2x8x8xf32>
    "tpu.trace_start"() <{level = 10 : i32, message = "bqd,bkd->bqk"}> : () -> ()
    %cst_184 = arith.constant dense<0.000000e+00> : vector<2x8x8xf32>
    %465 = tpu.matmul %462, %463, %cst_184 {dimension_numbers = #tpu.dot_dimension_numbers<[2], [2], [1], [1], [0, 0, 0, 1, 1, 1], [0], [0]>} : vector<2x8x8xf32>, vector<2x8x8xf32>, vector<2x8x8xf32> -> vector<2x8x8xf32>
    %cst_185 = arith.constant -1.000000e+09 : f32
    "tpu.trace_stop"() : () -> ()
    %466 = vector.broadcast %cst_185 : f32 to vector<2x8x8xf32>
    %467 = arith.select %7, %465, %466 : vector<2x8x8xi1>, vector<2x8x8xf32>
    %cst_186 = arith.constant dense<0xFF800000> : vector<2x8xf32>
    %468 = vector.multi_reduction <maximumf>, %467, %cst_186 [2] : vector<2x8x8xf32> to vector<2x8xf32>
    %469 = vector.shape_cast %468 : vector<2x8xf32> to vector<2x8x1xf32>
    %470 = vector.broadcast %469 : vector<2x8x1xf32> to vector<2x8x8xf32>
    %471 = arith.subf %467, %470 : vector<2x8x8xf32>
    %472 = math.exp %471 : vector<2x8x8xf32>
    %cst_187 = arith.constant dense<0.000000e+00> : vector<2x8xf32>
    %473 = vector.multi_reduction <add>, %472, %cst_187 [2] : vector<2x8x8xf32> to vector<2x8xf32>
    %474 = vector.shape_cast %473 : vector<2x8xf32> to vector<2x8x1xf32>
    %475 = tpu.reciprocal %474 {approx = true} : vector<2x8x1xf32> -> vector<2x8x1xf32>
    %476 = vector.broadcast %475 : vector<2x8x1xf32> to vector<2x8x8xf32>
    %477 = arith.mulf %472, %476 : vector<2x8x8xf32>
    "tpu.trace_start"() <{level = 10 : i32, message = "bqk,bkd->bqd"}> : () -> ()
    %cst_188 = arith.constant dense<0.000000e+00> : vector<2x8x8xf32>
    %478 = tpu.matmul %477, %464, %cst_188 {dimension_numbers = #tpu.dot_dimension_numbers<[2], [1], [1], [2], [0, 0, 0, 1, 1, 2], [0], [0]>} : vector<2x8x8xf32>, vector<2x8x8xf32>, vector<2x8x8xf32> -> vector<2x8x8xf32>
    "tpu.trace_stop"() : () -> ()
    %479 = vector.shape_cast %478 : vector<2x8x8xf32> to vector<16x8xf32>
    %480 = vector.extract_strided_slice %400 {offsets = [16, 0], sizes = [8, 32], strides = [1, 1]} : vector<32x32xf32> to vector<8x32xf32>
    %cst_189 = arith.constant dense<0.000000e+00> : vector<16x32xf32>
    %481 = tpu.matmul %479, %480, %cst_189 {dimension_numbers = #tpu.dot_dimension_numbers<[1], [0], [0], [1], [0, 0, 1, 1], [], []>} : vector<16x8xf32>, vector<8x32xf32>, vector<16x32xf32> -> vector<16x32xf32>
    %482 = arith.addf %461, %481 : vector<16x32xf32>
    %483 = vector.extract_strided_slice %416 {offsets = [0, 0, 24], sizes = [2, 8, 8], strides = [1, 1, 1]} : vector<2x8x32xf32> to vector<2x8x8xf32>
    %484 = vector.extract_strided_slice %417 {offsets = [0, 0, 24], sizes = [2, 8, 8], strides = [1, 1, 1]} : vector<2x8x32xf32> to vector<2x8x8xf32>
    %485 = vector.extract_strided_slice %418 {offsets = [0, 0, 24], sizes = [2, 8, 8], strides = [1, 1, 1]} : vector<2x8x32xf32> to vector<2x8x8xf32>
    "tpu.trace_start"() <{level = 10 : i32, message = "bqd,bkd->bqk"}> : () -> ()
    %cst_190 = arith.constant dense<0.000000e+00> : vector<2x8x8xf32>
    %486 = tpu.matmul %483, %484, %cst_190 {dimension_numbers = #tpu.dot_dimension_numbers<[2], [2], [1], [1], [0, 0, 0, 1, 1, 1], [0], [0]>} : vector<2x8x8xf32>, vector<2x8x8xf32>, vector<2x8x8xf32> -> vector<2x8x8xf32>
    %cst_191 = arith.constant -1.000000e+09 : f32
    "tpu.trace_stop"() : () -> ()
    %487 = vector.broadcast %cst_191 : f32 to vector<2x8x8xf32>
    %488 = arith.select %7, %486, %487 : vector<2x8x8xi1>, vector<2x8x8xf32>
    %cst_192 = arith.constant dense<0xFF800000> : vector<2x8xf32>
    %489 = vector.multi_reduction <maximumf>, %488, %cst_192 [2] : vector<2x8x8xf32> to vector<2x8xf32>
    %490 = vector.shape_cast %489 : vector<2x8xf32> to vector<2x8x1xf32>
    %491 = vector.broadcast %490 : vector<2x8x1xf32> to vector<2x8x8xf32>
    %492 = arith.subf %488, %491 : vector<2x8x8xf32>
    %493 = math.exp %492 : vector<2x8x8xf32>
    %cst_193 = arith.constant dense<0.000000e+00> : vector<2x8xf32>
    %494 = vector.multi_reduction <add>, %493, %cst_193 [2] : vector<2x8x8xf32> to vector<2x8xf32>
    %495 = vector.shape_cast %494 : vector<2x8xf32> to vector<2x8x1xf32>
    %496 = tpu.reciprocal %495 {approx = true} : vector<2x8x1xf32> -> vector<2x8x1xf32>
    %497 = vector.broadcast %496 : vector<2x8x1xf32> to vector<2x8x8xf32>
    %498 = arith.mulf %493, %497 : vector<2x8x8xf32>
    "tpu.trace_start"() <{level = 10 : i32, message = "bqk,bkd->bqd"}> : () -> ()
    %cst_194 = arith.constant dense<0.000000e+00> : vector<2x8x8xf32>
    %499 = tpu.matmul %498, %485, %cst_194 {dimension_numbers = #tpu.dot_dimension_numbers<[2], [1], [1], [2], [0, 0, 0, 1, 1, 2], [0], [0]>} : vector<2x8x8xf32>, vector<2x8x8xf32>, vector<2x8x8xf32> -> vector<2x8x8xf32>
    "tpu.trace_stop"() : () -> ()
    %500 = vector.shape_cast %499 : vector<2x8x8xf32> to vector<16x8xf32>
    %501 = vector.extract_strided_slice %400 {offsets = [24, 0], sizes = [8, 32], strides = [1, 1]} : vector<32x32xf32> to vector<8x32xf32>
    %cst_195 = arith.constant dense<0.000000e+00> : vector<16x32xf32>
    %502 = tpu.matmul %500, %501, %cst_195 {dimension_numbers = #tpu.dot_dimension_numbers<[1], [0], [0], [1], [0, 0, 1, 1], [], []>} : vector<16x8xf32>, vector<8x32xf32>, vector<16x32xf32> -> vector<16x32xf32>
    %503 = arith.addf %482, %502 : vector<16x32xf32>
    %504 = vector.broadcast %401 : vector<1x32xf32> to vector<16x32xf32>
    %505 = arith.addf %503, %504 : vector<16x32xf32>
    %506 = arith.addf %374, %505 : vector<16x32xf32>
    %c0_196 = arith.constant 0 : index
    %c0_197 = arith.constant 0 : index
    %507 = vector.load %arg10[%c0_196, %c0_197] : memref<1x32xf32, #tpu.memory_space<vmem>>, vector<1x32xf32>
    %c0_198 = arith.constant 0 : index
    %c0_199 = arith.constant 0 : index
    %508 = vector.load %arg11[%c0_198, %c0_199] : memref<1x32xf32, #tpu.memory_space<vmem>>, vector<1x32xf32>
    %cst_200 = arith.constant dense<0.000000e+00> : vector<16xf32>
    %509 = vector.multi_reduction <add>, %506, %cst_200 [1] : vector<16x32xf32> to vector<16xf32>
    %510 = vector.shape_cast %509 : vector<16xf32> to vector<16x1xf32>
    %cst_201 = arith.constant 3.200000e+01 : f32
    %511 = vector.broadcast %cst_201 : f32 to vector<16x1xf32>
    %512 = arith.divf %510, %511 : vector<16x1xf32>
    %513 = vector.broadcast %512 : vector<16x1xf32> to vector<16x32xf32>
    %514 = arith.subf %506, %513 : vector<16x32xf32>
    %515 = arith.mulf %514, %514 : vector<16x32xf32>
    %cst_202 = arith.constant dense<0.000000e+00> : vector<16xf32>
    %516 = vector.multi_reduction <add>, %515, %cst_202 [1] : vector<16x32xf32> to vector<16xf32>
    %517 = vector.shape_cast %516 : vector<16xf32> to vector<16x1xf32>
    %cst_203 = arith.constant 0.0322580636 : f32
    %518 = vector.broadcast %cst_203 : f32 to vector<16x1xf32>
    %519 = arith.mulf %517, %518 : vector<16x1xf32>
    %520 = math.sqrt %519 : vector<16x1xf32>
    %cst_204 = arith.constant 9.99999997E-7 : f32
    %521 = vector.broadcast %cst_204 : f32 to vector<16x1xf32>
    %522 = arith.addf %520, %521 : vector<16x1xf32>
    %523 = tpu.reciprocal %522 {approx = true} : vector<16x1xf32> -> vector<16x1xf32>
    %524 = vector.broadcast %523 : vector<16x1xf32> to vector<16x32xf32>
    %525 = arith.mulf %514, %524 : vector<16x32xf32>
    %526 = vector.broadcast %507 : vector<1x32xf32> to vector<16x32xf32>
    %527 = arith.mulf %526, %525 : vector<16x32xf32>
    %528 = vector.broadcast %508 : vector<1x32xf32> to vector<16x32xf32>
    %529 = arith.addf %527, %528 : vector<16x32xf32>
    %c0_205 = arith.constant 0 : index
    %c0_206 = arith.constant 0 : index
    %530 = vector.load %arg21[%c0_205, %c0_206] : memref<32x96xf32, #tpu.memory_space<vmem>>, vector<32x96xf32>
    %c0_207 = arith.constant 0 : index
    %c0_208 = arith.constant 0 : index
    %531 = vector.load %arg20[%c0_207, %c0_208] : memref<1x96xf32, #tpu.memory_space<vmem>>, vector<1x96xf32>
    %c0_209 = arith.constant 0 : index
    %c0_210 = arith.constant 0 : index
    %532 = vector.load %arg19[%c0_209, %c0_210] : memref<32x32xf32, #tpu.memory_space<vmem>>, vector<32x32xf32>
    %c0_211 = arith.constant 0 : index
    %c0_212 = arith.constant 0 : index
    %533 = vector.load %arg18[%c0_211, %c0_212] : memref<1x32xf32, #tpu.memory_space<vmem>>, vector<1x32xf32>
    %534 = vector.extract_strided_slice %530 {offsets = [0, 0], sizes = [32, 32], strides = [1, 1]} : vector<32x96xf32> to vector<32x32xf32>
    %cst_213 = arith.constant dense<0.000000e+00> : vector<16x32xf32>
    %535 = tpu.matmul %529, %534, %cst_213 {dimension_numbers = #tpu.dot_dimension_numbers<[1], [0], [0], [1], [0, 0, 1, 1], [], []>} : vector<16x32xf32>, vector<32x32xf32>, vector<16x32xf32> -> vector<16x32xf32>
    %536 = vector.extract_strided_slice %531 {offsets = [0, 0], sizes = [1, 32], strides = [1, 1]} : vector<1x96xf32> to vector<1x32xf32>
    %537 = vector.broadcast %536 : vector<1x32xf32> to vector<16x32xf32>
    %538 = arith.addf %535, %537 : vector<16x32xf32>
    %cst_214 = arith.constant 0.353553385 : f32
    %539 = vector.broadcast %cst_214 : f32 to vector<16x32xf32>
    %540 = arith.mulf %538, %539 : vector<16x32xf32>
    %541 = vector.extract_strided_slice %530 {offsets = [0, 32], sizes = [32, 64], strides = [1, 1]} : vector<32x96xf32> to vector<32x64xf32>
    %cst_215 = arith.constant dense<0.000000e+00> : vector<16x64xf32>
    %542 = tpu.matmul %372, %541, %cst_215 {dimension_numbers = #tpu.dot_dimension_numbers<[1], [0], [0], [1], [0, 0, 1, 1], [], []>} : vector<16x32xf32>, vector<32x64xf32>, vector<16x64xf32> -> vector<16x64xf32>
    %543 = vector.extract_strided_slice %531 {offsets = [0, 32], sizes = [1, 64], strides = [1, 1]} : vector<1x96xf32> to vector<1x64xf32>
    %544 = vector.broadcast %543 : vector<1x64xf32> to vector<16x64xf32>
    %545 = arith.addf %542, %544 : vector<16x64xf32>
    %546 = vector.extract_strided_slice %545 {offsets = [0, 0], sizes = [16, 32], strides = [1, 1]} : vector<16x64xf32> to vector<16x32xf32>
    %547 = vector.extract_strided_slice %545 {offsets = [0, 32], sizes = [16, 32], strides = [1, 1]} : vector<16x64xf32> to vector<16x32xf32>
    %548 = vector.shape_cast %540 : vector<16x32xf32> to vector<2x8x32xf32>
    %549 = vector.shape_cast %546 : vector<16x32xf32> to vector<2x8x32xf32>
    %550 = vector.shape_cast %547 : vector<16x32xf32> to vector<2x8x32xf32>
    %cst_216 = arith.constant 0.000000e+00 : f32
    %551 = vector.broadcast %cst_216 : f32 to vector<16x32xf32>
    %552 = vector.extract_strided_slice %548 {offsets = [0, 0, 0], sizes = [2, 8, 8], strides = [1, 1, 1]} : vector<2x8x32xf32> to vector<2x8x8xf32>
    %553 = vector.extract_strided_slice %549 {offsets = [0, 0, 0], sizes = [2, 8, 8], strides = [1, 1, 1]} : vector<2x8x32xf32> to vector<2x8x8xf32>
    %554 = vector.extract_strided_slice %550 {offsets = [0, 0, 0], sizes = [2, 8, 8], strides = [1, 1, 1]} : vector<2x8x32xf32> to vector<2x8x8xf32>
    "tpu.trace_start"() <{level = 10 : i32, message = "bqd,bkd->bqk"}> : () -> ()
    %cst_217 = arith.constant dense<0.000000e+00> : vector<2x8x8xf32>
    %555 = tpu.matmul %552, %553, %cst_217 {dimension_numbers = #tpu.dot_dimension_numbers<[2], [2], [1], [1], [0, 0, 0, 1, 1, 1], [0], [0]>} : vector<2x8x8xf32>, vector<2x8x8xf32>, vector<2x8x8xf32> -> vector<2x8x8xf32>
    %cst_218 = arith.constant -1.000000e+09 : f32
    "tpu.trace_stop"() : () -> ()
    %556 = vector.broadcast %cst_218 : f32 to vector<2x8x8xf32>
    %557 = arith.select %11, %555, %556 : vector<2x8x8xi1>, vector<2x8x8xf32>
    %cst_219 = arith.constant dense<0xFF800000> : vector<2x8xf32>
    %558 = vector.multi_reduction <maximumf>, %557, %cst_219 [2] : vector<2x8x8xf32> to vector<2x8xf32>
    %559 = vector.shape_cast %558 : vector<2x8xf32> to vector<2x8x1xf32>
    %560 = vector.broadcast %559 : vector<2x8x1xf32> to vector<2x8x8xf32>
    %561 = arith.subf %557, %560 : vector<2x8x8xf32>
    %562 = math.exp %561 : vector<2x8x8xf32>
    %cst_220 = arith.constant dense<0.000000e+00> : vector<2x8xf32>
    %563 = vector.multi_reduction <add>, %562, %cst_220 [2] : vector<2x8x8xf32> to vector<2x8xf32>
    %564 = vector.shape_cast %563 : vector<2x8xf32> to vector<2x8x1xf32>
    %565 = tpu.reciprocal %564 {approx = true} : vector<2x8x1xf32> -> vector<2x8x1xf32>
    %566 = vector.broadcast %565 : vector<2x8x1xf32> to vector<2x8x8xf32>
    %567 = arith.mulf %562, %566 : vector<2x8x8xf32>
    "tpu.trace_start"() <{level = 10 : i32, message = "bqk,bkd->bqd"}> : () -> ()
    %cst_221 = arith.constant dense<0.000000e+00> : vector<2x8x8xf32>
    %568 = tpu.matmul %567, %554, %cst_221 {dimension_numbers = #tpu.dot_dimension_numbers<[2], [1], [1], [2], [0, 0, 0, 1, 1, 2], [0], [0]>} : vector<2x8x8xf32>, vector<2x8x8xf32>, vector<2x8x8xf32> -> vector<2x8x8xf32>
    "tpu.trace_stop"() : () -> ()
    %569 = vector.shape_cast %568 : vector<2x8x8xf32> to vector<16x8xf32>
    %570 = vector.extract_strided_slice %532 {offsets = [0, 0], sizes = [8, 32], strides = [1, 1]} : vector<32x32xf32> to vector<8x32xf32>
    %cst_222 = arith.constant dense<0.000000e+00> : vector<16x32xf32>
    %571 = tpu.matmul %569, %570, %cst_222 {dimension_numbers = #tpu.dot_dimension_numbers<[1], [0], [0], [1], [0, 0, 1, 1], [], []>} : vector<16x8xf32>, vector<8x32xf32>, vector<16x32xf32> -> vector<16x32xf32>
    %572 = arith.addf %551, %571 : vector<16x32xf32>
    %573 = vector.extract_strided_slice %548 {offsets = [0, 0, 8], sizes = [2, 8, 8], strides = [1, 1, 1]} : vector<2x8x32xf32> to vector<2x8x8xf32>
    %574 = vector.extract_strided_slice %549 {offsets = [0, 0, 8], sizes = [2, 8, 8], strides = [1, 1, 1]} : vector<2x8x32xf32> to vector<2x8x8xf32>
    %575 = vector.extract_strided_slice %550 {offsets = [0, 0, 8], sizes = [2, 8, 8], strides = [1, 1, 1]} : vector<2x8x32xf32> to vector<2x8x8xf32>
    "tpu.trace_start"() <{level = 10 : i32, message = "bqd,bkd->bqk"}> : () -> ()
    %cst_223 = arith.constant dense<0.000000e+00> : vector<2x8x8xf32>
    %576 = tpu.matmul %573, %574, %cst_223 {dimension_numbers = #tpu.dot_dimension_numbers<[2], [2], [1], [1], [0, 0, 0, 1, 1, 1], [0], [0]>} : vector<2x8x8xf32>, vector<2x8x8xf32>, vector<2x8x8xf32> -> vector<2x8x8xf32>
    %cst_224 = arith.constant -1.000000e+09 : f32
    "tpu.trace_stop"() : () -> ()
    %577 = vector.broadcast %cst_224 : f32 to vector<2x8x8xf32>
    %578 = arith.select %11, %576, %577 : vector<2x8x8xi1>, vector<2x8x8xf32>
    %cst_225 = arith.constant dense<0xFF800000> : vector<2x8xf32>
    %579 = vector.multi_reduction <maximumf>, %578, %cst_225 [2] : vector<2x8x8xf32> to vector<2x8xf32>
    %580 = vector.shape_cast %579 : vector<2x8xf32> to vector<2x8x1xf32>
    %581 = vector.broadcast %580 : vector<2x8x1xf32> to vector<2x8x8xf32>
    %582 = arith.subf %578, %581 : vector<2x8x8xf32>
    %583 = math.exp %582 : vector<2x8x8xf32>
    %cst_226 = arith.constant dense<0.000000e+00> : vector<2x8xf32>
    %584 = vector.multi_reduction <add>, %583, %cst_226 [2] : vector<2x8x8xf32> to vector<2x8xf32>
    %585 = vector.shape_cast %584 : vector<2x8xf32> to vector<2x8x1xf32>
    %586 = tpu.reciprocal %585 {approx = true} : vector<2x8x1xf32> -> vector<2x8x1xf32>
    %587 = vector.broadcast %586 : vector<2x8x1xf32> to vector<2x8x8xf32>
    %588 = arith.mulf %583, %587 : vector<2x8x8xf32>
    "tpu.trace_start"() <{level = 10 : i32, message = "bqk,bkd->bqd"}> : () -> ()
    %cst_227 = arith.constant dense<0.000000e+00> : vector<2x8x8xf32>
    %589 = tpu.matmul %588, %575, %cst_227 {dimension_numbers = #tpu.dot_dimension_numbers<[2], [1], [1], [2], [0, 0, 0, 1, 1, 2], [0], [0]>} : vector<2x8x8xf32>, vector<2x8x8xf32>, vector<2x8x8xf32> -> vector<2x8x8xf32>
    "tpu.trace_stop"() : () -> ()
    %590 = vector.shape_cast %589 : vector<2x8x8xf32> to vector<16x8xf32>
    %591 = vector.extract_strided_slice %532 {offsets = [8, 0], sizes = [8, 32], strides = [1, 1]} : vector<32x32xf32> to vector<8x32xf32>
    %cst_228 = arith.constant dense<0.000000e+00> : vector<16x32xf32>
    %592 = tpu.matmul %590, %591, %cst_228 {dimension_numbers = #tpu.dot_dimension_numbers<[1], [0], [0], [1], [0, 0, 1, 1], [], []>} : vector<16x8xf32>, vector<8x32xf32>, vector<16x32xf32> -> vector<16x32xf32>
    %593 = arith.addf %572, %592 : vector<16x32xf32>
    %594 = vector.extract_strided_slice %548 {offsets = [0, 0, 16], sizes = [2, 8, 8], strides = [1, 1, 1]} : vector<2x8x32xf32> to vector<2x8x8xf32>
    %595 = vector.extract_strided_slice %549 {offsets = [0, 0, 16], sizes = [2, 8, 8], strides = [1, 1, 1]} : vector<2x8x32xf32> to vector<2x8x8xf32>
    %596 = vector.extract_strided_slice %550 {offsets = [0, 0, 16], sizes = [2, 8, 8], strides = [1, 1, 1]} : vector<2x8x32xf32> to vector<2x8x8xf32>
    "tpu.trace_start"() <{level = 10 : i32, message = "bqd,bkd->bqk"}> : () -> ()
    %cst_229 = arith.constant dense<0.000000e+00> : vector<2x8x8xf32>
    %597 = tpu.matmul %594, %595, %cst_229 {dimension_numbers = #tpu.dot_dimension_numbers<[2], [2], [1], [1], [0, 0, 0, 1, 1, 1], [0], [0]>} : vector<2x8x8xf32>, vector<2x8x8xf32>, vector<2x8x8xf32> -> vector<2x8x8xf32>
    %cst_230 = arith.constant -1.000000e+09 : f32
    "tpu.trace_stop"() : () -> ()
    %598 = vector.broadcast %cst_230 : f32 to vector<2x8x8xf32>
    %599 = arith.select %11, %597, %598 : vector<2x8x8xi1>, vector<2x8x8xf32>
    %cst_231 = arith.constant dense<0xFF800000> : vector<2x8xf32>
    %600 = vector.multi_reduction <maximumf>, %599, %cst_231 [2] : vector<2x8x8xf32> to vector<2x8xf32>
    %601 = vector.shape_cast %600 : vector<2x8xf32> to vector<2x8x1xf32>
    %602 = vector.broadcast %601 : vector<2x8x1xf32> to vector<2x8x8xf32>
    %603 = arith.subf %599, %602 : vector<2x8x8xf32>
    %604 = math.exp %603 : vector<2x8x8xf32>
    %cst_232 = arith.constant dense<0.000000e+00> : vector<2x8xf32>
    %605 = vector.multi_reduction <add>, %604, %cst_232 [2] : vector<2x8x8xf32> to vector<2x8xf32>
    %606 = vector.shape_cast %605 : vector<2x8xf32> to vector<2x8x1xf32>
    %607 = tpu.reciprocal %606 {approx = true} : vector<2x8x1xf32> -> vector<2x8x1xf32>
    %608 = vector.broadcast %607 : vector<2x8x1xf32> to vector<2x8x8xf32>
    %609 = arith.mulf %604, %608 : vector<2x8x8xf32>
    "tpu.trace_start"() <{level = 10 : i32, message = "bqk,bkd->bqd"}> : () -> ()
    %cst_233 = arith.constant dense<0.000000e+00> : vector<2x8x8xf32>
    %610 = tpu.matmul %609, %596, %cst_233 {dimension_numbers = #tpu.dot_dimension_numbers<[2], [1], [1], [2], [0, 0, 0, 1, 1, 2], [0], [0]>} : vector<2x8x8xf32>, vector<2x8x8xf32>, vector<2x8x8xf32> -> vector<2x8x8xf32>
    "tpu.trace_stop"() : () -> ()
    %611 = vector.shape_cast %610 : vector<2x8x8xf32> to vector<16x8xf32>
    %612 = vector.extract_strided_slice %532 {offsets = [16, 0], sizes = [8, 32], strides = [1, 1]} : vector<32x32xf32> to vector<8x32xf32>
    %cst_234 = arith.constant dense<0.000000e+00> : vector<16x32xf32>
    %613 = tpu.matmul %611, %612, %cst_234 {dimension_numbers = #tpu.dot_dimension_numbers<[1], [0], [0], [1], [0, 0, 1, 1], [], []>} : vector<16x8xf32>, vector<8x32xf32>, vector<16x32xf32> -> vector<16x32xf32>
    %614 = arith.addf %593, %613 : vector<16x32xf32>
    %615 = vector.extract_strided_slice %548 {offsets = [0, 0, 24], sizes = [2, 8, 8], strides = [1, 1, 1]} : vector<2x8x32xf32> to vector<2x8x8xf32>
    %616 = vector.extract_strided_slice %549 {offsets = [0, 0, 24], sizes = [2, 8, 8], strides = [1, 1, 1]} : vector<2x8x32xf32> to vector<2x8x8xf32>
    %617 = vector.extract_strided_slice %550 {offsets = [0, 0, 24], sizes = [2, 8, 8], strides = [1, 1, 1]} : vector<2x8x32xf32> to vector<2x8x8xf32>
    "tpu.trace_start"() <{level = 10 : i32, message = "bqd,bkd->bqk"}> : () -> ()
    %cst_235 = arith.constant dense<0.000000e+00> : vector<2x8x8xf32>
    %618 = tpu.matmul %615, %616, %cst_235 {dimension_numbers = #tpu.dot_dimension_numbers<[2], [2], [1], [1], [0, 0, 0, 1, 1, 1], [0], [0]>} : vector<2x8x8xf32>, vector<2x8x8xf32>, vector<2x8x8xf32> -> vector<2x8x8xf32>
    %cst_236 = arith.constant -1.000000e+09 : f32
    "tpu.trace_stop"() : () -> ()
    %619 = vector.broadcast %cst_236 : f32 to vector<2x8x8xf32>
    %620 = arith.select %11, %618, %619 : vector<2x8x8xi1>, vector<2x8x8xf32>
    %cst_237 = arith.constant dense<0xFF800000> : vector<2x8xf32>
    %621 = vector.multi_reduction <maximumf>, %620, %cst_237 [2] : vector<2x8x8xf32> to vector<2x8xf32>
    %622 = vector.shape_cast %621 : vector<2x8xf32> to vector<2x8x1xf32>
    %623 = vector.broadcast %622 : vector<2x8x1xf32> to vector<2x8x8xf32>
    %624 = arith.subf %620, %623 : vector<2x8x8xf32>
    %625 = math.exp %624 : vector<2x8x8xf32>
    %cst_238 = arith.constant dense<0.000000e+00> : vector<2x8xf32>
    %626 = vector.multi_reduction <add>, %625, %cst_238 [2] : vector<2x8x8xf32> to vector<2x8xf32>
    %627 = vector.shape_cast %626 : vector<2x8xf32> to vector<2x8x1xf32>
    %628 = tpu.reciprocal %627 {approx = true} : vector<2x8x1xf32> -> vector<2x8x1xf32>
    %629 = vector.broadcast %628 : vector<2x8x1xf32> to vector<2x8x8xf32>
    %630 = arith.mulf %625, %629 : vector<2x8x8xf32>
    "tpu.trace_start"() <{level = 10 : i32, message = "bqk,bkd->bqd"}> : () -> ()
    %cst_239 = arith.constant dense<0.000000e+00> : vector<2x8x8xf32>
    %631 = tpu.matmul %630, %617, %cst_239 {dimension_numbers = #tpu.dot_dimension_numbers<[2], [1], [1], [2], [0, 0, 0, 1, 1, 2], [0], [0]>} : vector<2x8x8xf32>, vector<2x8x8xf32>, vector<2x8x8xf32> -> vector<2x8x8xf32>
    "tpu.trace_stop"() : () -> ()
    %632 = vector.shape_cast %631 : vector<2x8x8xf32> to vector<16x8xf32>
    %633 = vector.extract_strided_slice %532 {offsets = [24, 0], sizes = [8, 32], strides = [1, 1]} : vector<32x32xf32> to vector<8x32xf32>
    %cst_240 = arith.constant dense<0.000000e+00> : vector<16x32xf32>
    %634 = tpu.matmul %632, %633, %cst_240 {dimension_numbers = #tpu.dot_dimension_numbers<[1], [0], [0], [1], [0, 0, 1, 1], [], []>} : vector<16x8xf32>, vector<8x32xf32>, vector<16x32xf32> -> vector<16x32xf32>
    %635 = arith.addf %614, %634 : vector<16x32xf32>
    %636 = vector.broadcast %533 : vector<1x32xf32> to vector<16x32xf32>
    %637 = arith.addf %635, %636 : vector<16x32xf32>
    %638 = arith.addf %506, %637 : vector<16x32xf32>
    %c0_241 = arith.constant 0 : index
    %c0_242 = arith.constant 0 : index
    %639 = vector.load %arg12[%c0_241, %c0_242] : memref<1x32xf32, #tpu.memory_space<vmem>>, vector<1x32xf32>
    %c0_243 = arith.constant 0 : index
    %c0_244 = arith.constant 0 : index
    %640 = vector.load %arg13[%c0_243, %c0_244] : memref<1x32xf32, #tpu.memory_space<vmem>>, vector<1x32xf32>
    %cst_245 = arith.constant dense<0.000000e+00> : vector<16xf32>
    %641 = vector.multi_reduction <add>, %638, %cst_245 [1] : vector<16x32xf32> to vector<16xf32>
    %642 = vector.shape_cast %641 : vector<16xf32> to vector<16x1xf32>
    %cst_246 = arith.constant 3.200000e+01 : f32
    %643 = vector.broadcast %cst_246 : f32 to vector<16x1xf32>
    %644 = arith.divf %642, %643 : vector<16x1xf32>
    %645 = vector.broadcast %644 : vector<16x1xf32> to vector<16x32xf32>
    %646 = arith.subf %638, %645 : vector<16x32xf32>
    %647 = arith.mulf %646, %646 : vector<16x32xf32>
    %cst_247 = arith.constant dense<0.000000e+00> : vector<16xf32>
    %648 = vector.multi_reduction <add>, %647, %cst_247 [1] : vector<16x32xf32> to vector<16xf32>
    %649 = vector.shape_cast %648 : vector<16xf32> to vector<16x1xf32>
    %cst_248 = arith.constant 0.0322580636 : f32
    %650 = vector.broadcast %cst_248 : f32 to vector<16x1xf32>
    %651 = arith.mulf %649, %650 : vector<16x1xf32>
    %652 = math.sqrt %651 : vector<16x1xf32>
    %cst_249 = arith.constant 9.99999997E-7 : f32
    %653 = vector.broadcast %cst_249 : f32 to vector<16x1xf32>
    %654 = arith.addf %652, %653 : vector<16x1xf32>
    %655 = tpu.reciprocal %654 {approx = true} : vector<16x1xf32> -> vector<16x1xf32>
    %656 = vector.broadcast %655 : vector<16x1xf32> to vector<16x32xf32>
    %657 = arith.mulf %646, %656 : vector<16x32xf32>
    %658 = vector.broadcast %639 : vector<1x32xf32> to vector<16x32xf32>
    %659 = arith.mulf %658, %657 : vector<16x32xf32>
    %660 = vector.broadcast %640 : vector<1x32xf32> to vector<16x32xf32>
    %661 = arith.addf %659, %660 : vector<16x32xf32>
    %c0_250 = arith.constant 0 : index
    %c0_251 = arith.constant 0 : index
    %662 = vector.load %arg6[%c0_250, %c0_251] : memref<32x64xf32, #tpu.memory_space<vmem>>, vector<32x64xf32>
    %cst_252 = arith.constant dense<0.000000e+00> : vector<16x64xf32>
    %663 = tpu.matmul %661, %662, %cst_252 {dimension_numbers = #tpu.dot_dimension_numbers<[1], [0], [0], [1], [0, 0, 1, 1], [], []>} : vector<16x32xf32>, vector<32x64xf32>, vector<16x64xf32> -> vector<16x64xf32>
    %c0_253 = arith.constant 0 : index
    %c0_254 = arith.constant 0 : index
    %664 = vector.load %arg4[%c0_253, %c0_254] : memref<1x64xf32, #tpu.memory_space<vmem>>, vector<1x64xf32>
    %665 = vector.broadcast %664 : vector<1x64xf32> to vector<16x64xf32>
    %666 = arith.addf %663, %665 : vector<16x64xf32>
    %cst_255 = arith.constant 0.000000e+00 : f32
    %667 = vector.broadcast %cst_255 : f32 to vector<16x64xf32>
    %668 = arith.maximumf %666, %667 : vector<16x64xf32>
    %c0_256 = arith.constant 0 : index
    %c0_257 = arith.constant 0 : index
    %669 = vector.load %arg7[%c0_256, %c0_257] : memref<64x32xf32, #tpu.memory_space<vmem>>, vector<64x32xf32>
    %cst_258 = arith.constant dense<0.000000e+00> : vector<16x32xf32>
    %670 = tpu.matmul %668, %669, %cst_258 {dimension_numbers = #tpu.dot_dimension_numbers<[1], [0], [0], [1], [0, 0, 1, 1], [], []>} : vector<16x64xf32>, vector<64x32xf32>, vector<16x32xf32> -> vector<16x32xf32>
    %c0_259 = arith.constant 0 : index
    %c0_260 = arith.constant 0 : index
    %671 = vector.load %arg5[%c0_259, %c0_260] : memref<1x32xf32, #tpu.memory_space<vmem>>, vector<1x32xf32>
    %672 = vector.broadcast %671 : vector<1x32xf32> to vector<16x32xf32>
    %673 = arith.addf %670, %672 : vector<16x32xf32>
    %674 = arith.addf %638, %673 : vector<16x32xf32>
    %c0_261 = arith.constant 0 : index
    %c0_262 = arith.constant 0 : index
    %675 = vector.load %arg26[%c0_261, %c0_262] : memref<1x32xf32, #tpu.memory_space<vmem>>, vector<1x32xf32>
    %c0_263 = arith.constant 0 : index
    %c0_264 = arith.constant 0 : index
    %676 = vector.load %arg27[%c0_263, %c0_264] : memref<1x32xf32, #tpu.memory_space<vmem>>, vector<1x32xf32>
    %cst_265 = arith.constant dense<0.000000e+00> : vector<16xf32>
    %677 = vector.multi_reduction <add>, %674, %cst_265 [1] : vector<16x32xf32> to vector<16xf32>
    %678 = vector.shape_cast %677 : vector<16xf32> to vector<16x1xf32>
    %cst_266 = arith.constant 3.200000e+01 : f32
    %679 = vector.broadcast %cst_266 : f32 to vector<16x1xf32>
    %680 = arith.divf %678, %679 : vector<16x1xf32>
    %681 = vector.broadcast %680 : vector<16x1xf32> to vector<16x32xf32>
    %682 = arith.subf %674, %681 : vector<16x32xf32>
    %683 = arith.mulf %682, %682 : vector<16x32xf32>
    %cst_267 = arith.constant dense<0.000000e+00> : vector<16xf32>
    %684 = vector.multi_reduction <add>, %683, %cst_267 [1] : vector<16x32xf32> to vector<16xf32>
    %685 = vector.shape_cast %684 : vector<16xf32> to vector<16x1xf32>
    %cst_268 = arith.constant 0.0322580636 : f32
    %686 = vector.broadcast %cst_268 : f32 to vector<16x1xf32>
    %687 = arith.mulf %685, %686 : vector<16x1xf32>
    %688 = math.sqrt %687 : vector<16x1xf32>
    %cst_269 = arith.constant 9.99999997E-7 : f32
    %689 = vector.broadcast %cst_269 : f32 to vector<16x1xf32>
    %690 = arith.addf %688, %689 : vector<16x1xf32>
    %691 = tpu.reciprocal %690 {approx = true} : vector<16x1xf32> -> vector<16x1xf32>
    %692 = vector.broadcast %691 : vector<16x1xf32> to vector<16x32xf32>
    %693 = arith.mulf %682, %692 : vector<16x32xf32>
    %694 = vector.broadcast %675 : vector<1x32xf32> to vector<16x32xf32>
    %695 = arith.mulf %694, %693 : vector<16x32xf32>
    %696 = vector.broadcast %676 : vector<1x32xf32> to vector<16x32xf32>
    %697 = arith.addf %695, %696 : vector<16x32xf32>
    %c0_270 = arith.constant 0 : index
    %c0_271 = arith.constant 0 : index
    %698 = vector.load %arg35[%c0_270, %c0_271] : memref<32x96xf32, #tpu.memory_space<vmem>>, vector<32x96xf32>
    %c0_272 = arith.constant 0 : index
    %c0_273 = arith.constant 0 : index
    %699 = vector.load %arg34[%c0_272, %c0_273] : memref<1x96xf32, #tpu.memory_space<vmem>>, vector<1x96xf32>
    %c0_274 = arith.constant 0 : index
    %c0_275 = arith.constant 0 : index
    %700 = vector.load %arg33[%c0_274, %c0_275] : memref<32x32xf32, #tpu.memory_space<vmem>>, vector<32x32xf32>
    %c0_276 = arith.constant 0 : index
    %c0_277 = arith.constant 0 : index
    %701 = vector.load %arg32[%c0_276, %c0_277] : memref<1x32xf32, #tpu.memory_space<vmem>>, vector<1x32xf32>
    %702 = vector.extract_strided_slice %698 {offsets = [0, 0], sizes = [32, 32], strides = [1, 1]} : vector<32x96xf32> to vector<32x32xf32>
    %cst_278 = arith.constant dense<0.000000e+00> : vector<16x32xf32>
    %703 = tpu.matmul %697, %702, %cst_278 {dimension_numbers = #tpu.dot_dimension_numbers<[1], [0], [0], [1], [0, 0, 1, 1], [], []>} : vector<16x32xf32>, vector<32x32xf32>, vector<16x32xf32> -> vector<16x32xf32>
    %704 = vector.extract_strided_slice %699 {offsets = [0, 0], sizes = [1, 32], strides = [1, 1]} : vector<1x96xf32> to vector<1x32xf32>
    %705 = vector.broadcast %704 : vector<1x32xf32> to vector<16x32xf32>
    %706 = arith.addf %703, %705 : vector<16x32xf32>
    %cst_279 = arith.constant 0.353553385 : f32
    %707 = vector.broadcast %cst_279 : f32 to vector<16x32xf32>
    %708 = arith.mulf %706, %707 : vector<16x32xf32>
    %709 = vector.extract_strided_slice %698 {offsets = [0, 32], sizes = [32, 64], strides = [1, 1]} : vector<32x96xf32> to vector<32x64xf32>
    %cst_280 = arith.constant dense<0.000000e+00> : vector<16x64xf32>
    %710 = tpu.matmul %697, %709, %cst_280 {dimension_numbers = #tpu.dot_dimension_numbers<[1], [0], [0], [1], [0, 0, 1, 1], [], []>} : vector<16x32xf32>, vector<32x64xf32>, vector<16x64xf32> -> vector<16x64xf32>
    %711 = vector.extract_strided_slice %699 {offsets = [0, 32], sizes = [1, 64], strides = [1, 1]} : vector<1x96xf32> to vector<1x64xf32>
    %712 = vector.broadcast %711 : vector<1x64xf32> to vector<16x64xf32>
    %713 = arith.addf %710, %712 : vector<16x64xf32>
    %714 = vector.extract_strided_slice %713 {offsets = [0, 0], sizes = [16, 32], strides = [1, 1]} : vector<16x64xf32> to vector<16x32xf32>
    %715 = vector.extract_strided_slice %713 {offsets = [0, 32], sizes = [16, 32], strides = [1, 1]} : vector<16x64xf32> to vector<16x32xf32>
    %716 = vector.shape_cast %708 : vector<16x32xf32> to vector<2x8x32xf32>
    %717 = vector.shape_cast %714 : vector<16x32xf32> to vector<2x8x32xf32>
    %718 = vector.shape_cast %715 : vector<16x32xf32> to vector<2x8x32xf32>
    %cst_281 = arith.constant 0.000000e+00 : f32
    %719 = vector.broadcast %cst_281 : f32 to vector<16x32xf32>
    %720 = vector.extract_strided_slice %716 {offsets = [0, 0, 0], sizes = [2, 8, 8], strides = [1, 1, 1]} : vector<2x8x32xf32> to vector<2x8x8xf32>
    %721 = vector.extract_strided_slice %717 {offsets = [0, 0, 0], sizes = [2, 8, 8], strides = [1, 1, 1]} : vector<2x8x32xf32> to vector<2x8x8xf32>
    %722 = vector.extract_strided_slice %718 {offsets = [0, 0, 0], sizes = [2, 8, 8], strides = [1, 1, 1]} : vector<2x8x32xf32> to vector<2x8x8xf32>
    "tpu.trace_start"() <{level = 10 : i32, message = "bqd,bkd->bqk"}> : () -> ()
    %cst_282 = arith.constant dense<0.000000e+00> : vector<2x8x8xf32>
    %723 = tpu.matmul %720, %721, %cst_282 {dimension_numbers = #tpu.dot_dimension_numbers<[2], [2], [1], [1], [0, 0, 0, 1, 1, 1], [0], [0]>} : vector<2x8x8xf32>, vector<2x8x8xf32>, vector<2x8x8xf32> -> vector<2x8x8xf32>
    %cst_283 = arith.constant -1.000000e+09 : f32
    "tpu.trace_stop"() : () -> ()
    %724 = vector.broadcast %cst_283 : f32 to vector<2x8x8xf32>
    %725 = arith.select %7, %723, %724 : vector<2x8x8xi1>, vector<2x8x8xf32>
    %cst_284 = arith.constant dense<0xFF800000> : vector<2x8xf32>
    %726 = vector.multi_reduction <maximumf>, %725, %cst_284 [2] : vector<2x8x8xf32> to vector<2x8xf32>
    %727 = vector.shape_cast %726 : vector<2x8xf32> to vector<2x8x1xf32>
    %728 = vector.broadcast %727 : vector<2x8x1xf32> to vector<2x8x8xf32>
    %729 = arith.subf %725, %728 : vector<2x8x8xf32>
    %730 = math.exp %729 : vector<2x8x8xf32>
    %cst_285 = arith.constant dense<0.000000e+00> : vector<2x8xf32>
    %731 = vector.multi_reduction <add>, %730, %cst_285 [2] : vector<2x8x8xf32> to vector<2x8xf32>
    %732 = vector.shape_cast %731 : vector<2x8xf32> to vector<2x8x1xf32>
    %733 = tpu.reciprocal %732 {approx = true} : vector<2x8x1xf32> -> vector<2x8x1xf32>
    %734 = vector.broadcast %733 : vector<2x8x1xf32> to vector<2x8x8xf32>
    %735 = arith.mulf %730, %734 : vector<2x8x8xf32>
    "tpu.trace_start"() <{level = 10 : i32, message = "bqk,bkd->bqd"}> : () -> ()
    %cst_286 = arith.constant dense<0.000000e+00> : vector<2x8x8xf32>
    %736 = tpu.matmul %735, %722, %cst_286 {dimension_numbers = #tpu.dot_dimension_numbers<[2], [1], [1], [2], [0, 0, 0, 1, 1, 2], [0], [0]>} : vector<2x8x8xf32>, vector<2x8x8xf32>, vector<2x8x8xf32> -> vector<2x8x8xf32>
    "tpu.trace_stop"() : () -> ()
    %737 = vector.shape_cast %736 : vector<2x8x8xf32> to vector<16x8xf32>
    %738 = vector.extract_strided_slice %700 {offsets = [0, 0], sizes = [8, 32], strides = [1, 1]} : vector<32x32xf32> to vector<8x32xf32>
    %cst_287 = arith.constant dense<0.000000e+00> : vector<16x32xf32>
    %739 = tpu.matmul %737, %738, %cst_287 {dimension_numbers = #tpu.dot_dimension_numbers<[1], [0], [0], [1], [0, 0, 1, 1], [], []>} : vector<16x8xf32>, vector<8x32xf32>, vector<16x32xf32> -> vector<16x32xf32>
    %740 = arith.addf %719, %739 : vector<16x32xf32>
    %741 = vector.extract_strided_slice %716 {offsets = [0, 0, 8], sizes = [2, 8, 8], strides = [1, 1, 1]} : vector<2x8x32xf32> to vector<2x8x8xf32>
    %742 = vector.extract_strided_slice %717 {offsets = [0, 0, 8], sizes = [2, 8, 8], strides = [1, 1, 1]} : vector<2x8x32xf32> to vector<2x8x8xf32>
    %743 = vector.extract_strided_slice %718 {offsets = [0, 0, 8], sizes = [2, 8, 8], strides = [1, 1, 1]} : vector<2x8x32xf32> to vector<2x8x8xf32>
    "tpu.trace_start"() <{level = 10 : i32, message = "bqd,bkd->bqk"}> : () -> ()
    %cst_288 = arith.constant dense<0.000000e+00> : vector<2x8x8xf32>
    %744 = tpu.matmul %741, %742, %cst_288 {dimension_numbers = #tpu.dot_dimension_numbers<[2], [2], [1], [1], [0, 0, 0, 1, 1, 1], [0], [0]>} : vector<2x8x8xf32>, vector<2x8x8xf32>, vector<2x8x8xf32> -> vector<2x8x8xf32>
    %cst_289 = arith.constant -1.000000e+09 : f32
    "tpu.trace_stop"() : () -> ()
    %745 = vector.broadcast %cst_289 : f32 to vector<2x8x8xf32>
    %746 = arith.select %7, %744, %745 : vector<2x8x8xi1>, vector<2x8x8xf32>
    %cst_290 = arith.constant dense<0xFF800000> : vector<2x8xf32>
    %747 = vector.multi_reduction <maximumf>, %746, %cst_290 [2] : vector<2x8x8xf32> to vector<2x8xf32>
    %748 = vector.shape_cast %747 : vector<2x8xf32> to vector<2x8x1xf32>
    %749 = vector.broadcast %748 : vector<2x8x1xf32> to vector<2x8x8xf32>
    %750 = arith.subf %746, %749 : vector<2x8x8xf32>
    %751 = math.exp %750 : vector<2x8x8xf32>
    %cst_291 = arith.constant dense<0.000000e+00> : vector<2x8xf32>
    %752 = vector.multi_reduction <add>, %751, %cst_291 [2] : vector<2x8x8xf32> to vector<2x8xf32>
    %753 = vector.shape_cast %752 : vector<2x8xf32> to vector<2x8x1xf32>
    %754 = tpu.reciprocal %753 {approx = true} : vector<2x8x1xf32> -> vector<2x8x1xf32>
    %755 = vector.broadcast %754 : vector<2x8x1xf32> to vector<2x8x8xf32>
    %756 = arith.mulf %751, %755 : vector<2x8x8xf32>
    "tpu.trace_start"() <{level = 10 : i32, message = "bqk,bkd->bqd"}> : () -> ()
    %cst_292 = arith.constant dense<0.000000e+00> : vector<2x8x8xf32>
    %757 = tpu.matmul %756, %743, %cst_292 {dimension_numbers = #tpu.dot_dimension_numbers<[2], [1], [1], [2], [0, 0, 0, 1, 1, 2], [0], [0]>} : vector<2x8x8xf32>, vector<2x8x8xf32>, vector<2x8x8xf32> -> vector<2x8x8xf32>
    "tpu.trace_stop"() : () -> ()
    %758 = vector.shape_cast %757 : vector<2x8x8xf32> to vector<16x8xf32>
    %759 = vector.extract_strided_slice %700 {offsets = [8, 0], sizes = [8, 32], strides = [1, 1]} : vector<32x32xf32> to vector<8x32xf32>
    %cst_293 = arith.constant dense<0.000000e+00> : vector<16x32xf32>
    %760 = tpu.matmul %758, %759, %cst_293 {dimension_numbers = #tpu.dot_dimension_numbers<[1], [0], [0], [1], [0, 0, 1, 1], [], []>} : vector<16x8xf32>, vector<8x32xf32>, vector<16x32xf32> -> vector<16x32xf32>
    %761 = arith.addf %740, %760 : vector<16x32xf32>
    %762 = vector.extract_strided_slice %716 {offsets = [0, 0, 16], sizes = [2, 8, 8], strides = [1, 1, 1]} : vector<2x8x32xf32> to vector<2x8x8xf32>
    %763 = vector.extract_strided_slice %717 {offsets = [0, 0, 16], sizes = [2, 8, 8], strides = [1, 1, 1]} : vector<2x8x32xf32> to vector<2x8x8xf32>
    %764 = vector.extract_strided_slice %718 {offsets = [0, 0, 16], sizes = [2, 8, 8], strides = [1, 1, 1]} : vector<2x8x32xf32> to vector<2x8x8xf32>
    "tpu.trace_start"() <{level = 10 : i32, message = "bqd,bkd->bqk"}> : () -> ()
    %cst_294 = arith.constant dense<0.000000e+00> : vector<2x8x8xf32>
    %765 = tpu.matmul %762, %763, %cst_294 {dimension_numbers = #tpu.dot_dimension_numbers<[2], [2], [1], [1], [0, 0, 0, 1, 1, 1], [0], [0]>} : vector<2x8x8xf32>, vector<2x8x8xf32>, vector<2x8x8xf32> -> vector<2x8x8xf32>
    %cst_295 = arith.constant -1.000000e+09 : f32
    "tpu.trace_stop"() : () -> ()
    %766 = vector.broadcast %cst_295 : f32 to vector<2x8x8xf32>
    %767 = arith.select %7, %765, %766 : vector<2x8x8xi1>, vector<2x8x8xf32>
    %cst_296 = arith.constant dense<0xFF800000> : vector<2x8xf32>
    %768 = vector.multi_reduction <maximumf>, %767, %cst_296 [2] : vector<2x8x8xf32> to vector<2x8xf32>
    %769 = vector.shape_cast %768 : vector<2x8xf32> to vector<2x8x1xf32>
    %770 = vector.broadcast %769 : vector<2x8x1xf32> to vector<2x8x8xf32>
    %771 = arith.subf %767, %770 : vector<2x8x8xf32>
    %772 = math.exp %771 : vector<2x8x8xf32>
    %cst_297 = arith.constant dense<0.000000e+00> : vector<2x8xf32>
    %773 = vector.multi_reduction <add>, %772, %cst_297 [2] : vector<2x8x8xf32> to vector<2x8xf32>
    %774 = vector.shape_cast %773 : vector<2x8xf32> to vector<2x8x1xf32>
    %775 = tpu.reciprocal %774 {approx = true} : vector<2x8x1xf32> -> vector<2x8x1xf32>
    %776 = vector.broadcast %775 : vector<2x8x1xf32> to vector<2x8x8xf32>
    %777 = arith.mulf %772, %776 : vector<2x8x8xf32>
    "tpu.trace_start"() <{level = 10 : i32, message = "bqk,bkd->bqd"}> : () -> ()
    %cst_298 = arith.constant dense<0.000000e+00> : vector<2x8x8xf32>
    %778 = tpu.matmul %777, %764, %cst_298 {dimension_numbers = #tpu.dot_dimension_numbers<[2], [1], [1], [2], [0, 0, 0, 1, 1, 2], [0], [0]>} : vector<2x8x8xf32>, vector<2x8x8xf32>, vector<2x8x8xf32> -> vector<2x8x8xf32>
    "tpu.trace_stop"() : () -> ()
    %779 = vector.shape_cast %778 : vector<2x8x8xf32> to vector<16x8xf32>
    %780 = vector.extract_strided_slice %700 {offsets = [16, 0], sizes = [8, 32], strides = [1, 1]} : vector<32x32xf32> to vector<8x32xf32>
    %cst_299 = arith.constant dense<0.000000e+00> : vector<16x32xf32>
    %781 = tpu.matmul %779, %780, %cst_299 {dimension_numbers = #tpu.dot_dimension_numbers<[1], [0], [0], [1], [0, 0, 1, 1], [], []>} : vector<16x8xf32>, vector<8x32xf32>, vector<16x32xf32> -> vector<16x32xf32>
    %782 = arith.addf %761, %781 : vector<16x32xf32>
    %783 = vector.extract_strided_slice %716 {offsets = [0, 0, 24], sizes = [2, 8, 8], strides = [1, 1, 1]} : vector<2x8x32xf32> to vector<2x8x8xf32>
    %784 = vector.extract_strided_slice %717 {offsets = [0, 0, 24], sizes = [2, 8, 8], strides = [1, 1, 1]} : vector<2x8x32xf32> to vector<2x8x8xf32>
    %785 = vector.extract_strided_slice %718 {offsets = [0, 0, 24], sizes = [2, 8, 8], strides = [1, 1, 1]} : vector<2x8x32xf32> to vector<2x8x8xf32>
    "tpu.trace_start"() <{level = 10 : i32, message = "bqd,bkd->bqk"}> : () -> ()
    %cst_300 = arith.constant dense<0.000000e+00> : vector<2x8x8xf32>
    %786 = tpu.matmul %783, %784, %cst_300 {dimension_numbers = #tpu.dot_dimension_numbers<[2], [2], [1], [1], [0, 0, 0, 1, 1, 1], [0], [0]>} : vector<2x8x8xf32>, vector<2x8x8xf32>, vector<2x8x8xf32> -> vector<2x8x8xf32>
    %cst_301 = arith.constant -1.000000e+09 : f32
    "tpu.trace_stop"() : () -> ()
    %787 = vector.broadcast %cst_301 : f32 to vector<2x8x8xf32>
    %788 = arith.select %7, %786, %787 : vector<2x8x8xi1>, vector<2x8x8xf32>
    %cst_302 = arith.constant dense<0xFF800000> : vector<2x8xf32>
    %789 = vector.multi_reduction <maximumf>, %788, %cst_302 [2] : vector<2x8x8xf32> to vector<2x8xf32>
    %790 = vector.shape_cast %789 : vector<2x8xf32> to vector<2x8x1xf32>
    %791 = vector.broadcast %790 : vector<2x8x1xf32> to vector<2x8x8xf32>
    %792 = arith.subf %788, %791 : vector<2x8x8xf32>
    %793 = math.exp %792 : vector<2x8x8xf32>
    %cst_303 = arith.constant dense<0.000000e+00> : vector<2x8xf32>
    %794 = vector.multi_reduction <add>, %793, %cst_303 [2] : vector<2x8x8xf32> to vector<2x8xf32>
    %795 = vector.shape_cast %794 : vector<2x8xf32> to vector<2x8x1xf32>
    %796 = tpu.reciprocal %795 {approx = true} : vector<2x8x1xf32> -> vector<2x8x1xf32>
    %797 = vector.broadcast %796 : vector<2x8x1xf32> to vector<2x8x8xf32>
    %798 = arith.mulf %793, %797 : vector<2x8x8xf32>
    "tpu.trace_start"() <{level = 10 : i32, message = "bqk,bkd->bqd"}> : () -> ()
    %cst_304 = arith.constant dense<0.000000e+00> : vector<2x8x8xf32>
    %799 = tpu.matmul %798, %785, %cst_304 {dimension_numbers = #tpu.dot_dimension_numbers<[2], [1], [1], [2], [0, 0, 0, 1, 1, 2], [0], [0]>} : vector<2x8x8xf32>, vector<2x8x8xf32>, vector<2x8x8xf32> -> vector<2x8x8xf32>
    "tpu.trace_stop"() : () -> ()
    %800 = vector.shape_cast %799 : vector<2x8x8xf32> to vector<16x8xf32>
    %801 = vector.extract_strided_slice %700 {offsets = [24, 0], sizes = [8, 32], strides = [1, 1]} : vector<32x32xf32> to vector<8x32xf32>
    %cst_305 = arith.constant dense<0.000000e+00> : vector<16x32xf32>
    %802 = tpu.matmul %800, %801, %cst_305 {dimension_numbers = #tpu.dot_dimension_numbers<[1], [0], [0], [1], [0, 0, 1, 1], [], []>} : vector<16x8xf32>, vector<8x32xf32>, vector<16x32xf32> -> vector<16x32xf32>
    %803 = arith.addf %782, %802 : vector<16x32xf32>
    %804 = vector.broadcast %701 : vector<1x32xf32> to vector<16x32xf32>
    %805 = arith.addf %803, %804 : vector<16x32xf32>
    %806 = arith.addf %674, %805 : vector<16x32xf32>
    %c0_306 = arith.constant 0 : index
    %c0_307 = arith.constant 0 : index
    %807 = vector.load %arg28[%c0_306, %c0_307] : memref<1x32xf32, #tpu.memory_space<vmem>>, vector<1x32xf32>
    %c0_308 = arith.constant 0 : index
    %c0_309 = arith.constant 0 : index
    %808 = vector.load %arg29[%c0_308, %c0_309] : memref<1x32xf32, #tpu.memory_space<vmem>>, vector<1x32xf32>
    %cst_310 = arith.constant dense<0.000000e+00> : vector<16xf32>
    %809 = vector.multi_reduction <add>, %806, %cst_310 [1] : vector<16x32xf32> to vector<16xf32>
    %810 = vector.shape_cast %809 : vector<16xf32> to vector<16x1xf32>
    %cst_311 = arith.constant 3.200000e+01 : f32
    %811 = vector.broadcast %cst_311 : f32 to vector<16x1xf32>
    %812 = arith.divf %810, %811 : vector<16x1xf32>
    %813 = vector.broadcast %812 : vector<16x1xf32> to vector<16x32xf32>
    %814 = arith.subf %806, %813 : vector<16x32xf32>
    %815 = arith.mulf %814, %814 : vector<16x32xf32>
    %cst_312 = arith.constant dense<0.000000e+00> : vector<16xf32>
    %816 = vector.multi_reduction <add>, %815, %cst_312 [1] : vector<16x32xf32> to vector<16xf32>
    %817 = vector.shape_cast %816 : vector<16xf32> to vector<16x1xf32>
    %cst_313 = arith.constant 0.0322580636 : f32
    %818 = vector.broadcast %cst_313 : f32 to vector<16x1xf32>
    %819 = arith.mulf %817, %818 : vector<16x1xf32>
    %820 = math.sqrt %819 : vector<16x1xf32>
    %cst_314 = arith.constant 9.99999997E-7 : f32
    %821 = vector.broadcast %cst_314 : f32 to vector<16x1xf32>
    %822 = arith.addf %820, %821 : vector<16x1xf32>
    %823 = tpu.reciprocal %822 {approx = true} : vector<16x1xf32> -> vector<16x1xf32>
    %824 = vector.broadcast %823 : vector<16x1xf32> to vector<16x32xf32>
    %825 = arith.mulf %814, %824 : vector<16x32xf32>
    %826 = vector.broadcast %807 : vector<1x32xf32> to vector<16x32xf32>
    %827 = arith.mulf %826, %825 : vector<16x32xf32>
    %828 = vector.broadcast %808 : vector<1x32xf32> to vector<16x32xf32>
    %829 = arith.addf %827, %828 : vector<16x32xf32>
    %c0_315 = arith.constant 0 : index
    %c0_316 = arith.constant 0 : index
    %830 = vector.load %arg39[%c0_315, %c0_316] : memref<32x96xf32, #tpu.memory_space<vmem>>, vector<32x96xf32>
    %c0_317 = arith.constant 0 : index
    %c0_318 = arith.constant 0 : index
    %831 = vector.load %arg38[%c0_317, %c0_318] : memref<1x96xf32, #tpu.memory_space<vmem>>, vector<1x96xf32>
    %c0_319 = arith.constant 0 : index
    %c0_320 = arith.constant 0 : index
    %832 = vector.load %arg37[%c0_319, %c0_320] : memref<32x32xf32, #tpu.memory_space<vmem>>, vector<32x32xf32>
    %c0_321 = arith.constant 0 : index
    %c0_322 = arith.constant 0 : index
    %833 = vector.load %arg36[%c0_321, %c0_322] : memref<1x32xf32, #tpu.memory_space<vmem>>, vector<1x32xf32>
    %834 = vector.extract_strided_slice %830 {offsets = [0, 0], sizes = [32, 32], strides = [1, 1]} : vector<32x96xf32> to vector<32x32xf32>
    %cst_323 = arith.constant dense<0.000000e+00> : vector<16x32xf32>
    %835 = tpu.matmul %829, %834, %cst_323 {dimension_numbers = #tpu.dot_dimension_numbers<[1], [0], [0], [1], [0, 0, 1, 1], [], []>} : vector<16x32xf32>, vector<32x32xf32>, vector<16x32xf32> -> vector<16x32xf32>
    %836 = vector.extract_strided_slice %831 {offsets = [0, 0], sizes = [1, 32], strides = [1, 1]} : vector<1x96xf32> to vector<1x32xf32>
    %837 = vector.broadcast %836 : vector<1x32xf32> to vector<16x32xf32>
    %838 = arith.addf %835, %837 : vector<16x32xf32>
    %cst_324 = arith.constant 0.353553385 : f32
    %839 = vector.broadcast %cst_324 : f32 to vector<16x32xf32>
    %840 = arith.mulf %838, %839 : vector<16x32xf32>
    %841 = vector.extract_strided_slice %830 {offsets = [0, 32], sizes = [32, 64], strides = [1, 1]} : vector<32x96xf32> to vector<32x64xf32>
    %cst_325 = arith.constant dense<0.000000e+00> : vector<16x64xf32>
    %842 = tpu.matmul %372, %841, %cst_325 {dimension_numbers = #tpu.dot_dimension_numbers<[1], [0], [0], [1], [0, 0, 1, 1], [], []>} : vector<16x32xf32>, vector<32x64xf32>, vector<16x64xf32> -> vector<16x64xf32>
    %843 = vector.extract_strided_slice %831 {offsets = [0, 32], sizes = [1, 64], strides = [1, 1]} : vector<1x96xf32> to vector<1x64xf32>
    %844 = vector.broadcast %843 : vector<1x64xf32> to vector<16x64xf32>
    %845 = arith.addf %842, %844 : vector<16x64xf32>
    %846 = vector.extract_strided_slice %845 {offsets = [0, 0], sizes = [16, 32], strides = [1, 1]} : vector<16x64xf32> to vector<16x32xf32>
    %847 = vector.extract_strided_slice %845 {offsets = [0, 32], sizes = [16, 32], strides = [1, 1]} : vector<16x64xf32> to vector<16x32xf32>
    %848 = vector.shape_cast %840 : vector<16x32xf32> to vector<2x8x32xf32>
    %849 = vector.shape_cast %846 : vector<16x32xf32> to vector<2x8x32xf32>
    %850 = vector.shape_cast %847 : vector<16x32xf32> to vector<2x8x32xf32>
    %cst_326 = arith.constant 0.000000e+00 : f32
    %851 = vector.broadcast %cst_326 : f32 to vector<16x32xf32>
    %852 = vector.extract_strided_slice %848 {offsets = [0, 0, 0], sizes = [2, 8, 8], strides = [1, 1, 1]} : vector<2x8x32xf32> to vector<2x8x8xf32>
    %853 = vector.extract_strided_slice %849 {offsets = [0, 0, 0], sizes = [2, 8, 8], strides = [1, 1, 1]} : vector<2x8x32xf32> to vector<2x8x8xf32>
    %854 = vector.extract_strided_slice %850 {offsets = [0, 0, 0], sizes = [2, 8, 8], strides = [1, 1, 1]} : vector<2x8x32xf32> to vector<2x8x8xf32>
    "tpu.trace_start"() <{level = 10 : i32, message = "bqd,bkd->bqk"}> : () -> ()
    %cst_327 = arith.constant dense<0.000000e+00> : vector<2x8x8xf32>
    %855 = tpu.matmul %852, %853, %cst_327 {dimension_numbers = #tpu.dot_dimension_numbers<[2], [2], [1], [1], [0, 0, 0, 1, 1, 1], [0], [0]>} : vector<2x8x8xf32>, vector<2x8x8xf32>, vector<2x8x8xf32> -> vector<2x8x8xf32>
    %cst_328 = arith.constant -1.000000e+09 : f32
    "tpu.trace_stop"() : () -> ()
    %856 = vector.broadcast %cst_328 : f32 to vector<2x8x8xf32>
    %857 = arith.select %11, %855, %856 : vector<2x8x8xi1>, vector<2x8x8xf32>
    %cst_329 = arith.constant dense<0xFF800000> : vector<2x8xf32>
    %858 = vector.multi_reduction <maximumf>, %857, %cst_329 [2] : vector<2x8x8xf32> to vector<2x8xf32>
    %859 = vector.shape_cast %858 : vector<2x8xf32> to vector<2x8x1xf32>
    %860 = vector.broadcast %859 : vector<2x8x1xf32> to vector<2x8x8xf32>
    %861 = arith.subf %857, %860 : vector<2x8x8xf32>
    %862 = math.exp %861 : vector<2x8x8xf32>
    %cst_330 = arith.constant dense<0.000000e+00> : vector<2x8xf32>
    %863 = vector.multi_reduction <add>, %862, %cst_330 [2] : vector<2x8x8xf32> to vector<2x8xf32>
    %864 = vector.shape_cast %863 : vector<2x8xf32> to vector<2x8x1xf32>
    %865 = tpu.reciprocal %864 {approx = true} : vector<2x8x1xf32> -> vector<2x8x1xf32>
    %866 = vector.broadcast %865 : vector<2x8x1xf32> to vector<2x8x8xf32>
    %867 = arith.mulf %862, %866 : vector<2x8x8xf32>
    "tpu.trace_start"() <{level = 10 : i32, message = "bqk,bkd->bqd"}> : () -> ()
    %cst_331 = arith.constant dense<0.000000e+00> : vector<2x8x8xf32>
    %868 = tpu.matmul %867, %854, %cst_331 {dimension_numbers = #tpu.dot_dimension_numbers<[2], [1], [1], [2], [0, 0, 0, 1, 1, 2], [0], [0]>} : vector<2x8x8xf32>, vector<2x8x8xf32>, vector<2x8x8xf32> -> vector<2x8x8xf32>
    "tpu.trace_stop"() : () -> ()
    %869 = vector.shape_cast %868 : vector<2x8x8xf32> to vector<16x8xf32>
    %870 = vector.extract_strided_slice %832 {offsets = [0, 0], sizes = [8, 32], strides = [1, 1]} : vector<32x32xf32> to vector<8x32xf32>
    %cst_332 = arith.constant dense<0.000000e+00> : vector<16x32xf32>
    %871 = tpu.matmul %869, %870, %cst_332 {dimension_numbers = #tpu.dot_dimension_numbers<[1], [0], [0], [1], [0, 0, 1, 1], [], []>} : vector<16x8xf32>, vector<8x32xf32>, vector<16x32xf32> -> vector<16x32xf32>
    %872 = arith.addf %851, %871 : vector<16x32xf32>
    %873 = vector.extract_strided_slice %848 {offsets = [0, 0, 8], sizes = [2, 8, 8], strides = [1, 1, 1]} : vector<2x8x32xf32> to vector<2x8x8xf32>
    %874 = vector.extract_strided_slice %849 {offsets = [0, 0, 8], sizes = [2, 8, 8], strides = [1, 1, 1]} : vector<2x8x32xf32> to vector<2x8x8xf32>
    %875 = vector.extract_strided_slice %850 {offsets = [0, 0, 8], sizes = [2, 8, 8], strides = [1, 1, 1]} : vector<2x8x32xf32> to vector<2x8x8xf32>
    "tpu.trace_start"() <{level = 10 : i32, message = "bqd,bkd->bqk"}> : () -> ()
    %cst_333 = arith.constant dense<0.000000e+00> : vector<2x8x8xf32>
    %876 = tpu.matmul %873, %874, %cst_333 {dimension_numbers = #tpu.dot_dimension_numbers<[2], [2], [1], [1], [0, 0, 0, 1, 1, 1], [0], [0]>} : vector<2x8x8xf32>, vector<2x8x8xf32>, vector<2x8x8xf32> -> vector<2x8x8xf32>
    %cst_334 = arith.constant -1.000000e+09 : f32
    "tpu.trace_stop"() : () -> ()
    %877 = vector.broadcast %cst_334 : f32 to vector<2x8x8xf32>
    %878 = arith.select %11, %876, %877 : vector<2x8x8xi1>, vector<2x8x8xf32>
    %cst_335 = arith.constant dense<0xFF800000> : vector<2x8xf32>
    %879 = vector.multi_reduction <maximumf>, %878, %cst_335 [2] : vector<2x8x8xf32> to vector<2x8xf32>
    %880 = vector.shape_cast %879 : vector<2x8xf32> to vector<2x8x1xf32>
    %881 = vector.broadcast %880 : vector<2x8x1xf32> to vector<2x8x8xf32>
    %882 = arith.subf %878, %881 : vector<2x8x8xf32>
    %883 = math.exp %882 : vector<2x8x8xf32>
    %cst_336 = arith.constant dense<0.000000e+00> : vector<2x8xf32>
    %884 = vector.multi_reduction <add>, %883, %cst_336 [2] : vector<2x8x8xf32> to vector<2x8xf32>
    %885 = vector.shape_cast %884 : vector<2x8xf32> to vector<2x8x1xf32>
    %886 = tpu.reciprocal %885 {approx = true} : vector<2x8x1xf32> -> vector<2x8x1xf32>
    %887 = vector.broadcast %886 : vector<2x8x1xf32> to vector<2x8x8xf32>
    %888 = arith.mulf %883, %887 : vector<2x8x8xf32>
    "tpu.trace_start"() <{level = 10 : i32, message = "bqk,bkd->bqd"}> : () -> ()
    %cst_337 = arith.constant dense<0.000000e+00> : vector<2x8x8xf32>
    %889 = tpu.matmul %888, %875, %cst_337 {dimension_numbers = #tpu.dot_dimension_numbers<[2], [1], [1], [2], [0, 0, 0, 1, 1, 2], [0], [0]>} : vector<2x8x8xf32>, vector<2x8x8xf32>, vector<2x8x8xf32> -> vector<2x8x8xf32>
    "tpu.trace_stop"() : () -> ()
    %890 = vector.shape_cast %889 : vector<2x8x8xf32> to vector<16x8xf32>
    %891 = vector.extract_strided_slice %832 {offsets = [8, 0], sizes = [8, 32], strides = [1, 1]} : vector<32x32xf32> to vector<8x32xf32>
    %cst_338 = arith.constant dense<0.000000e+00> : vector<16x32xf32>
    %892 = tpu.matmul %890, %891, %cst_338 {dimension_numbers = #tpu.dot_dimension_numbers<[1], [0], [0], [1], [0, 0, 1, 1], [], []>} : vector<16x8xf32>, vector<8x32xf32>, vector<16x32xf32> -> vector<16x32xf32>
    %893 = arith.addf %872, %892 : vector<16x32xf32>
    %894 = vector.extract_strided_slice %848 {offsets = [0, 0, 16], sizes = [2, 8, 8], strides = [1, 1, 1]} : vector<2x8x32xf32> to vector<2x8x8xf32>
    %895 = vector.extract_strided_slice %849 {offsets = [0, 0, 16], sizes = [2, 8, 8], strides = [1, 1, 1]} : vector<2x8x32xf32> to vector<2x8x8xf32>
    %896 = vector.extract_strided_slice %850 {offsets = [0, 0, 16], sizes = [2, 8, 8], strides = [1, 1, 1]} : vector<2x8x32xf32> to vector<2x8x8xf32>
    "tpu.trace_start"() <{level = 10 : i32, message = "bqd,bkd->bqk"}> : () -> ()
    %cst_339 = arith.constant dense<0.000000e+00> : vector<2x8x8xf32>
    %897 = tpu.matmul %894, %895, %cst_339 {dimension_numbers = #tpu.dot_dimension_numbers<[2], [2], [1], [1], [0, 0, 0, 1, 1, 1], [0], [0]>} : vector<2x8x8xf32>, vector<2x8x8xf32>, vector<2x8x8xf32> -> vector<2x8x8xf32>
    %cst_340 = arith.constant -1.000000e+09 : f32
    "tpu.trace_stop"() : () -> ()
    %898 = vector.broadcast %cst_340 : f32 to vector<2x8x8xf32>
    %899 = arith.select %11, %897, %898 : vector<2x8x8xi1>, vector<2x8x8xf32>
    %cst_341 = arith.constant dense<0xFF800000> : vector<2x8xf32>
    %900 = vector.multi_reduction <maximumf>, %899, %cst_341 [2] : vector<2x8x8xf32> to vector<2x8xf32>
    %901 = vector.shape_cast %900 : vector<2x8xf32> to vector<2x8x1xf32>
    %902 = vector.broadcast %901 : vector<2x8x1xf32> to vector<2x8x8xf32>
    %903 = arith.subf %899, %902 : vector<2x8x8xf32>
    %904 = math.exp %903 : vector<2x8x8xf32>
    %cst_342 = arith.constant dense<0.000000e+00> : vector<2x8xf32>
    %905 = vector.multi_reduction <add>, %904, %cst_342 [2] : vector<2x8x8xf32> to vector<2x8xf32>
    %906 = vector.shape_cast %905 : vector<2x8xf32> to vector<2x8x1xf32>
    %907 = tpu.reciprocal %906 {approx = true} : vector<2x8x1xf32> -> vector<2x8x1xf32>
    %908 = vector.broadcast %907 : vector<2x8x1xf32> to vector<2x8x8xf32>
    %909 = arith.mulf %904, %908 : vector<2x8x8xf32>
    "tpu.trace_start"() <{level = 10 : i32, message = "bqk,bkd->bqd"}> : () -> ()
    %cst_343 = arith.constant dense<0.000000e+00> : vector<2x8x8xf32>
    %910 = tpu.matmul %909, %896, %cst_343 {dimension_numbers = #tpu.dot_dimension_numbers<[2], [1], [1], [2], [0, 0, 0, 1, 1, 2], [0], [0]>} : vector<2x8x8xf32>, vector<2x8x8xf32>, vector<2x8x8xf32> -> vector<2x8x8xf32>
    "tpu.trace_stop"() : () -> ()
    %911 = vector.shape_cast %910 : vector<2x8x8xf32> to vector<16x8xf32>
    %912 = vector.extract_strided_slice %832 {offsets = [16, 0], sizes = [8, 32], strides = [1, 1]} : vector<32x32xf32> to vector<8x32xf32>
    %cst_344 = arith.constant dense<0.000000e+00> : vector<16x32xf32>
    %913 = tpu.matmul %911, %912, %cst_344 {dimension_numbers = #tpu.dot_dimension_numbers<[1], [0], [0], [1], [0, 0, 1, 1], [], []>} : vector<16x8xf32>, vector<8x32xf32>, vector<16x32xf32> -> vector<16x32xf32>
    %914 = arith.addf %893, %913 : vector<16x32xf32>
    %915 = vector.extract_strided_slice %848 {offsets = [0, 0, 24], sizes = [2, 8, 8], strides = [1, 1, 1]} : vector<2x8x32xf32> to vector<2x8x8xf32>
    %916 = vector.extract_strided_slice %849 {offsets = [0, 0, 24], sizes = [2, 8, 8], strides = [1, 1, 1]} : vector<2x8x32xf32> to vector<2x8x8xf32>
    %917 = vector.extract_strided_slice %850 {offsets = [0, 0, 24], sizes = [2, 8, 8], strides = [1, 1, 1]} : vector<2x8x32xf32> to vector<2x8x8xf32>
    "tpu.trace_start"() <{level = 10 : i32, message = "bqd,bkd->bqk"}> : () -> ()
    %cst_345 = arith.constant dense<0.000000e+00> : vector<2x8x8xf32>
    %918 = tpu.matmul %915, %916, %cst_345 {dimension_numbers = #tpu.dot_dimension_numbers<[2], [2], [1], [1], [0, 0, 0, 1, 1, 1], [0], [0]>} : vector<2x8x8xf32>, vector<2x8x8xf32>, vector<2x8x8xf32> -> vector<2x8x8xf32>
    %cst_346 = arith.constant -1.000000e+09 : f32
    "tpu.trace_stop"() : () -> ()
    %919 = vector.broadcast %cst_346 : f32 to vector<2x8x8xf32>
    %920 = arith.select %11, %918, %919 : vector<2x8x8xi1>, vector<2x8x8xf32>
    %cst_347 = arith.constant dense<0xFF800000> : vector<2x8xf32>
    %921 = vector.multi_reduction <maximumf>, %920, %cst_347 [2] : vector<2x8x8xf32> to vector<2x8xf32>
    %922 = vector.shape_cast %921 : vector<2x8xf32> to vector<2x8x1xf32>
    %923 = vector.broadcast %922 : vector<2x8x1xf32> to vector<2x8x8xf32>
    %924 = arith.subf %920, %923 : vector<2x8x8xf32>
    %925 = math.exp %924 : vector<2x8x8xf32>
    %cst_348 = arith.constant dense<0.000000e+00> : vector<2x8xf32>
    %926 = vector.multi_reduction <add>, %925, %cst_348 [2] : vector<2x8x8xf32> to vector<2x8xf32>
    %927 = vector.shape_cast %926 : vector<2x8xf32> to vector<2x8x1xf32>
    %928 = tpu.reciprocal %927 {approx = true} : vector<2x8x1xf32> -> vector<2x8x1xf32>
    %929 = vector.broadcast %928 : vector<2x8x1xf32> to vector<2x8x8xf32>
    %930 = arith.mulf %925, %929 : vector<2x8x8xf32>
    "tpu.trace_start"() <{level = 10 : i32, message = "bqk,bkd->bqd"}> : () -> ()
    %cst_349 = arith.constant dense<0.000000e+00> : vector<2x8x8xf32>
    %931 = tpu.matmul %930, %917, %cst_349 {dimension_numbers = #tpu.dot_dimension_numbers<[2], [1], [1], [2], [0, 0, 0, 1, 1, 2], [0], [0]>} : vector<2x8x8xf32>, vector<2x8x8xf32>, vector<2x8x8xf32> -> vector<2x8x8xf32>
    "tpu.trace_stop"() : () -> ()
    %932 = vector.shape_cast %931 : vector<2x8x8xf32> to vector<16x8xf32>
    %933 = vector.extract_strided_slice %832 {offsets = [24, 0], sizes = [8, 32], strides = [1, 1]} : vector<32x32xf32> to vector<8x32xf32>
    %cst_350 = arith.constant dense<0.000000e+00> : vector<16x32xf32>
    %934 = tpu.matmul %932, %933, %cst_350 {dimension_numbers = #tpu.dot_dimension_numbers<[1], [0], [0], [1], [0, 0, 1, 1], [], []>} : vector<16x8xf32>, vector<8x32xf32>, vector<16x32xf32> -> vector<16x32xf32>
    %935 = arith.addf %914, %934 : vector<16x32xf32>
    %936 = vector.broadcast %833 : vector<1x32xf32> to vector<16x32xf32>
    %937 = arith.addf %935, %936 : vector<16x32xf32>
    %938 = arith.addf %806, %937 : vector<16x32xf32>
    %c0_351 = arith.constant 0 : index
    %c0_352 = arith.constant 0 : index
    %939 = vector.load %arg30[%c0_351, %c0_352] : memref<1x32xf32, #tpu.memory_space<vmem>>, vector<1x32xf32>
    %c0_353 = arith.constant 0 : index
    %c0_354 = arith.constant 0 : index
    %940 = vector.load %arg31[%c0_353, %c0_354] : memref<1x32xf32, #tpu.memory_space<vmem>>, vector<1x32xf32>
    %cst_355 = arith.constant dense<0.000000e+00> : vector<16xf32>
    %941 = vector.multi_reduction <add>, %938, %cst_355 [1] : vector<16x32xf32> to vector<16xf32>
    %942 = vector.shape_cast %941 : vector<16xf32> to vector<16x1xf32>
    %cst_356 = arith.constant 3.200000e+01 : f32
    %943 = vector.broadcast %cst_356 : f32 to vector<16x1xf32>
    %944 = arith.divf %942, %943 : vector<16x1xf32>
    %945 = vector.broadcast %944 : vector<16x1xf32> to vector<16x32xf32>
    %946 = arith.subf %938, %945 : vector<16x32xf32>
    %947 = arith.mulf %946, %946 : vector<16x32xf32>
    %cst_357 = arith.constant dense<0.000000e+00> : vector<16xf32>
    %948 = vector.multi_reduction <add>, %947, %cst_357 [1] : vector<16x32xf32> to vector<16xf32>
    %949 = vector.shape_cast %948 : vector<16xf32> to vector<16x1xf32>
    %cst_358 = arith.constant 0.0322580636 : f32
    %950 = vector.broadcast %cst_358 : f32 to vector<16x1xf32>
    %951 = arith.mulf %949, %950 : vector<16x1xf32>
    %952 = math.sqrt %951 : vector<16x1xf32>
    %cst_359 = arith.constant 9.99999997E-7 : f32
    %953 = vector.broadcast %cst_359 : f32 to vector<16x1xf32>
    %954 = arith.addf %952, %953 : vector<16x1xf32>
    %955 = tpu.reciprocal %954 {approx = true} : vector<16x1xf32> -> vector<16x1xf32>
    %956 = vector.broadcast %955 : vector<16x1xf32> to vector<16x32xf32>
    %957 = arith.mulf %946, %956 : vector<16x32xf32>
    %958 = vector.broadcast %939 : vector<1x32xf32> to vector<16x32xf32>
    %959 = arith.mulf %958, %957 : vector<16x32xf32>
    %960 = vector.broadcast %940 : vector<1x32xf32> to vector<16x32xf32>
    %961 = arith.addf %959, %960 : vector<16x32xf32>
    %c0_360 = arith.constant 0 : index
    %c0_361 = arith.constant 0 : index
    %962 = vector.load %arg24[%c0_360, %c0_361] : memref<32x64xf32, #tpu.memory_space<vmem>>, vector<32x64xf32>
    %cst_362 = arith.constant dense<0.000000e+00> : vector<16x64xf32>
    %963 = tpu.matmul %961, %962, %cst_362 {dimension_numbers = #tpu.dot_dimension_numbers<[1], [0], [0], [1], [0, 0, 1, 1], [], []>} : vector<16x32xf32>, vector<32x64xf32>, vector<16x64xf32> -> vector<16x64xf32>
    %c0_363 = arith.constant 0 : index
    %c0_364 = arith.constant 0 : index
    %964 = vector.load %arg22[%c0_363, %c0_364] : memref<1x64xf32, #tpu.memory_space<vmem>>, vector<1x64xf32>
    %965 = vector.broadcast %964 : vector<1x64xf32> to vector<16x64xf32>
    %966 = arith.addf %963, %965 : vector<16x64xf32>
    %cst_365 = arith.constant 0.000000e+00 : f32
    %967 = vector.broadcast %cst_365 : f32 to vector<16x64xf32>
    %968 = arith.maximumf %966, %967 : vector<16x64xf32>
    %c0_366 = arith.constant 0 : index
    %c0_367 = arith.constant 0 : index
    %969 = vector.load %arg25[%c0_366, %c0_367] : memref<64x32xf32, #tpu.memory_space<vmem>>, vector<64x32xf32>
    %cst_368 = arith.constant dense<0.000000e+00> : vector<16x32xf32>
    %970 = tpu.matmul %968, %969, %cst_368 {dimension_numbers = #tpu.dot_dimension_numbers<[1], [0], [0], [1], [0, 0, 1, 1], [], []>} : vector<16x64xf32>, vector<64x32xf32>, vector<16x32xf32> -> vector<16x32xf32>
    %c0_369 = arith.constant 0 : index
    %c0_370 = arith.constant 0 : index
    %971 = vector.load %arg23[%c0_369, %c0_370] : memref<1x32xf32, #tpu.memory_space<vmem>>, vector<1x32xf32>
    %972 = vector.broadcast %971 : vector<1x32xf32> to vector<16x32xf32>
    %973 = arith.addf %970, %972 : vector<16x32xf32>
    %974 = arith.addf %938, %973 : vector<16x32xf32>
    %c0_371 = arith.constant 0 : index
    %c0_372 = arith.constant 0 : index
    %975 = vector.load %arg40[%c0_371, %c0_372] : memref<1x32xf32, #tpu.memory_space<vmem>>, vector<1x32xf32>
    %c0_373 = arith.constant 0 : index
    %c0_374 = arith.constant 0 : index
    %976 = vector.load %arg41[%c0_373, %c0_374] : memref<1x32xf32, #tpu.memory_space<vmem>>, vector<1x32xf32>
    %cst_375 = arith.constant dense<0.000000e+00> : vector<16xf32>
    %977 = vector.multi_reduction <add>, %974, %cst_375 [1] : vector<16x32xf32> to vector<16xf32>
    %978 = vector.shape_cast %977 : vector<16xf32> to vector<16x1xf32>
    %cst_376 = arith.constant 3.200000e+01 : f32
    %979 = vector.broadcast %cst_376 : f32 to vector<16x1xf32>
    %980 = arith.divf %978, %979 : vector<16x1xf32>
    %981 = vector.broadcast %980 : vector<16x1xf32> to vector<16x32xf32>
    %982 = arith.subf %974, %981 : vector<16x32xf32>
    %983 = arith.mulf %982, %982 : vector<16x32xf32>
    %cst_377 = arith.constant dense<0.000000e+00> : vector<16xf32>
    %984 = vector.multi_reduction <add>, %983, %cst_377 [1] : vector<16x32xf32> to vector<16xf32>
    %985 = vector.shape_cast %984 : vector<16xf32> to vector<16x1xf32>
    %cst_378 = arith.constant 0.0322580636 : f32
    %986 = vector.broadcast %cst_378 : f32 to vector<16x1xf32>
    %987 = arith.mulf %985, %986 : vector<16x1xf32>
    %988 = math.sqrt %987 : vector<16x1xf32>
    %cst_379 = arith.constant 9.99999997E-7 : f32
    %989 = vector.broadcast %cst_379 : f32 to vector<16x1xf32>
    %990 = arith.addf %988, %989 : vector<16x1xf32>
    %991 = tpu.reciprocal %990 {approx = true} : vector<16x1xf32> -> vector<16x1xf32>
    %992 = vector.broadcast %991 : vector<16x1xf32> to vector<16x32xf32>
    %993 = arith.mulf %982, %992 : vector<16x32xf32>
    %994 = vector.broadcast %975 : vector<1x32xf32> to vector<16x32xf32>
    %995 = arith.mulf %994, %993 : vector<16x32xf32>
    %996 = vector.broadcast %976 : vector<1x32xf32> to vector<16x32xf32>
    %997 = arith.addf %995, %996 : vector<16x32xf32>
    %998 = vector.shape_cast %997 : vector<16x32xf32> to vector<2x8x32xf32>
    %c0_380 = arith.constant 0 : index
    %c0_381 = arith.constant 0 : index
    %c0_382 = arith.constant 0 : index
    %999 = vector.load %arg68[%c0_380, %c0_381, %c0_382] : memref<2x8x32xf32, #tpu.memory_space<vmem>>, vector<2x8x32xf32>
    tpu.vector_store %arg68[%c0_380, %c0_381, %c0_382], %998 {strides = array<i32>} : memref<2x8x32xf32, #tpu.memory_space<vmem>>, vector<2x8x32xf32>,
    return
  }
}

</mosaic_0001>

<bundles_post_ra>
// kernel: encoder_decoder_forward.1
= control target key start
LH: loop header
LB: loop body
LE: loop exit
PB: predicated region body
PF: predicated region fallthrough
CT: control target
= control target key end

     0   :  { %s16245_s6 = smov 1   ;;  %s16246_s10 = smov 2   ;;  %s18278_s0 = inlined_call_operand.smem [shape: u32[69], index: -1, kind: input, shape index: {}] }
   0x1   :  { %s16362_s5 = sld [smem:[%s18278_s0]]   ;;  %s16247_s14 = smov 3  }
   0x2   :  { %s16367_s9 = sld [smem:[%s18278_s0 + %s16245_s6]]   ;;  %s16248_s18 = smov 4  }
   0x3   :  { %s16372_s13 = sld [smem:[%s18278_s0 + %s16246_s10]]   ;;  %s16249_s22 = smov 5  }
   0x4   :  { %s16377_s17 = sld [smem:[%s18278_s0 + %s16247_s14]]   ;;  %s16250_s26 = smov 6  }
   0x5   :  { %s16382_s21 = sld [smem:[%s18278_s0 + %s16248_s18]]   ;;  %s16251_s30 = smov 7  }
   0x6   :  { %s16387_s25 = sld [smem:[%s18278_s0 + %s16249_s22]]   ;;  %s16252_s4 = smov 8  }
   0x7   :  { %18315 = sst [smem:[#allocation64_spill]] %s16362_s5  ;;  %s16253_s10 = smov 9  }
   0x8   :  { %18316 = sst [smem:[#allocation65_spill]] %s16367_s9  ;;  %s16254_s15 = smov 10  }
   0x9   :  { %18317 = sst [smem:[#allocation66_spill]] %s16372_s13  ;;  %s16255_s20 = smov 11  }
   0xa   :  { %18318 = sst [smem:[#allocation67_spill]] %s16377_s17  ;;  %s16257_s1 = smov 13  }
   0xb   :  { %18319 = sst [smem:[#allocation68_spill]] %s16382_s21  ;;  %s16258_s7 = smov 14  }
   0xc   :  { %18320 = sst [smem:[#allocation69_spill]] %s16387_s25  ;;  %s16260_s22 = smov 16  }
   0xd   :  { %s16392_s29 = sld [smem:[%s18278_s0 + %s16250_s26]]   ;;  %s16256_s26 = smov 12  }
   0xe   :  { %s16397_s3 = sld [smem:[%s18278_s0 + %s16251_s30]]   ;;  %s16261_s28 = smov 17  }
   0xf   :  { %s16402_s8 = sld [smem:[%s18278_s0 + %s16252_s4]]  }
  0x10   :  { %s16407_s14 = sld [smem:[%s18278_s0 + %s16253_s10]]  }
  0x11   :  { %s16412_s19 = sld [smem:[%s18278_s0 + %s16254_s15]]   ;;  %s16259_s15 = smov 15  }
  0x12   :  { %s16417_s24 = sld [smem:[%s18278_s0 + %s16255_s20]]  }
  0x13   :  { %18321 = sst [smem:[#allocation70_spill]] %s16392_s29 }
  0x14   :  { %18322 = sst [smem:[#allocation71_spill]] %s16397_s3 }
  0x15   :  { %18323 = sst [smem:[#allocation72_spill]] %s16402_s8 }
  0x16   :  { %18324 = sst [smem:[#allocation73_spill]] %s16407_s14 }
  0x17   :  { %18325 = sst [smem:[#allocation74_spill]] %s16412_s19 }
  0x18   :  { %18326 = sst [smem:[#allocation75_spill]] %s16417_s24 }
  0x19   :  { %s16422_s30 = sld [smem:[%s18278_s0 + %s16256_s26]]  }
  0x1a   :  { %s16427_s6 = sld [smem:[%s18278_s0 + %s16257_s1]]  }
  0x1b   :  { %s16432_s12 = sld [smem:[%s18278_s0 + %s16258_s7]]   ;;  %s16262_s7 = smov 18  }
  0x1c   :  { %s16437_s20 = sld [smem:[%s18278_s0 + %s16259_s15]]   ;;  %s16263_s15 = smov 19  }
  0x1d   :  { %s16442_s27 = sld [smem:[%s18278_s0 + %s16260_s22]]   ;;  %s16264_s22 = smov 20  }
  0x1e   :  { %s16447_s4 = sld [smem:[%s18278_s0 + %s16261_s28]]   ;;  %s16265_s28 = smov 21  }
  0x1f   :  { %18327 = sst [smem:[#allocation76_spill]] %s16422_s30 }
  0x20   :  { %18328 = sst [smem:[#allocation77_spill]] %s16427_s6 }
  0x21   :  { %18329 = sst [smem:[#allocation78_spill]] %s16432_s12 }
  0x22   :  { %18330 = sst [smem:[#allocation79_spill]] %s16437_s20 }
  0x23   :  { %18331 = sst [smem:[#allocation80_spill]] %s16442_s27 }
  0x24   :  { %18332 = sst [smem:[#allocation81_spill]] %s16447_s4 }
  0x25   :  { %s16452_s25 = sld [smem:[%s18278_s0 + %s16262_s7]]   ;;  %s16266_s7 = smov 22  }
  0x26   :  { %s16457_s21 = sld [smem:[%s18278_s0 + %s16263_s15]]   ;;  %s16267_s15 = smov 23  }
  0x27   :  { %s16462_s6 = sld [smem:[%s18278_s0 + %s16264_s22]]   ;;  %s16268_s22 = smov 24  }
  0x28   :  { %s16467_s30 = sld [smem:[%s18278_s0 + %s16265_s28]]   ;;  %s16269_s28 = smov 25  }
  0x29   :  { %s16472_s3 = sld [smem:[%s18278_s0 + %s16266_s7]]   ;;  %s16270_s7 = smov 26  }
  0x2a   :  { %s16477_s29 = sld [smem:[%s18278_s0 + %s16267_s15]]   ;;  %s16271_s15 = smov 27  }
  0x2b   :  { %18333 = sst [smem:[#allocation82_spill]] %s16452_s25 }
  0x2c   :  { %18334 = sst [smem:[#allocation83_spill]] %s16457_s21 }
  0x2d   :  { %18335 = sst [smem:[#allocation84_spill]] %s16462_s6 }
  0x2e   :  { %18336 = sst [smem:[#allocation85_spill]] %s16467_s30 }
  0x2f   :  { %18337 = sst [smem:[#allocation86_spill]] %s16472_s3 }
  0x30   :  { %18338 = sst [smem:[#allocation87_spill]] %s16477_s29 }
  0x31   :  { %s16482_s25 = sld [smem:[%s18278_s0 + %s16268_s22]]   ;;  %s16272_s22 = smov 28  }
  0x32   :  { %s16487_s21 = sld [smem:[%s18278_s0 + %s16269_s28]]   ;;  %s16273_s28 = smov 29  }
  0x33   :  { %s16492_s3 = sld [smem:[%s18278_s0 + %s16270_s7]]   ;;  %s16274_s7 = smov 30  }
  0x34   :  { %s16497_s29 = sld [smem:[%s18278_s0 + %s16271_s15]]   ;;  %s16275_s15 = smov 31  }
  0x35   :  { %s16517_s24 = sld [smem:[%s18278_s0 + %s16275_s15]]   ;;  %s16279_s15 = smov 35  }
  0x36   :  { %s16537_s12 = sld [smem:[%s18278_s0 + %s16279_s15]]   ;;  %s16283_s15 = smov 39  }
  0x37   :  { %18339 = sst [smem:[#allocation88_spill]] %s16482_s25 }
  0x38   :  { %18340 = sst [smem:[#allocation89_spill]] %s16487_s21 }
  0x39   :  { %18341 = sst [smem:[#allocation90_spill]] %s16492_s3 }
  0x3a   :  { %s16502_s25 = sld [smem:[%s18278_s0 + %s16272_s22]]   ;;  %s16276_s22 = smov 32  }
  0x3b   :  { %s16507_s21 = sld [smem:[%s18278_s0 + %s16273_s28]]   ;;  %s16277_s28 = smov 33  }
  0x3c   :  { %s16512_s3 = sld [smem:[%s18278_s0 + %s16274_s7]]   ;;  %s16278_s7 = smov 34  }
  0x3d   :  { %18343 = sst [smem:[#allocation92_spill]] %s16517_s24 }
  0x3e   :  { %s16522_s19 = sld [smem:[%s18278_s0 + %s16276_s22]]   ;;  %s16280_s22 = smov 36  }
  0x3f   :  { %s16527_s6 = sld [smem:[%s18278_s0 + %s16277_s28]]   ;;  %s16281_s28 = smov 37  }
  0x40   :  { %s16532_s30 = sld [smem:[%s18278_s0 + %s16278_s7]]   ;;  %s16282_s7 = smov 38  }
  0x41   :  { %18342 = sst [smem:[#allocation91_spill]] %s16507_s21 }
  0x42   :  { %18346 = sst [smem:[#allocation95_spill]] %s16537_s12 }
  0x43   :  { %s16542_s20 = sld [smem:[%s18278_s0 + %s16280_s22]]   ;;  %s16284_s22 = smov 40  }
  0x44   :  { %s16552_s17 = sld [smem:[%s18278_s0 + %s16282_s7]]   ;;  %s16286_s7 = smov 42  }
  0x45   :  { %18344 = sst [smem:[#allocation93_spill]] %s16527_s6 }
  0x46   :  { %18345 = sst [smem:[#allocation94_spill]] %s16532_s30 }
  0x47   :  { %s16547_s6 = sld [smem:[%s18278_s0 + %s16281_s28]]   ;;  %s16285_s28 = smov 41  }
  0x48   :  { %s16557_s12 = sld [smem:[%s18278_s0 + %s16283_s15]]   ;;  %s16287_s15 = smov 43  }
  0x49   :  { %s16562_s14 = sld [smem:[%s18278_s0 + %s16284_s22]]   ;;  %s16288_s22 = smov 44  }
  0x4a   :  { %18348 = sst [smem:[#allocation97_spill]] %s16552_s17 }
  0x4b   :  { %s16572_s8 = sld [smem:[%s18278_s0 + %s16286_s7]]   ;;  %s16290_s7 = smov 46  }
  0x4c   :  { %s16582_s27 = sld [smem:[%s18278_s0 + %s16288_s22]]   ;;  %s16292_s22 = smov 48  }
  0x4d   :  { %18347 = sst [smem:[#allocation96_spill]] %s16547_s6 }
  0x4e   :  { %18349 = sst [smem:[#allocation98_spill]] %s16557_s12 }
  0x4f   :  { %s16567_s6 = sld [smem:[%s18278_s0 + %s16285_s28]]   ;;  %s16289_s28 = smov 45  }
  0x50   :  { %s16577_s12 = sld [smem:[%s18278_s0 + %s16287_s15]]   ;;  %s16291_s15 = smov 47  }
  0x51   :  { %s16587_s4 = sld [smem:[%s18278_s0 + %s16289_s28]]   ;;  %s16293_s28 = smov 49  }
  0x52   :  { %18352 = sst [smem:[#allocation101_spill]] %s16582_s27 }
  0x53   :  { %s16592_s9 = sld [smem:[%s18278_s0 + %s16290_s7]]   ;;  %s16294_s7 = smov 50  }
  0x54   :  { %s16597_s13 = sld [smem:[%s18278_s0 + %s16291_s15]]   ;;  %s16295_s15 = smov 51  }
  0x55   :  { %18350 = sst [smem:[#allocation99_spill]] %s16567_s6 }
  0x56   :  { %18351 = sst [smem:[#allocation100_spill]] %s16577_s12 }
  0x57   :  { %18353 = sst [smem:[#allocation102_spill]] %s16587_s4 }
  0x58   :  { %s16602_s27 = sld [smem:[%s18278_s0 + %s16292_s22]]   ;;  %s16296_s22 = smov 52  }
  0x59   :  { %s16607_s4 = sld [smem:[%s18278_s0 + %s16293_s28]]   ;;  %s16297_s28 = smov 53  }
  0x5a   :  { %18354 = sst [smem:[#allocation103_spill]] %s16597_s13 }
  0x5b   :  { %s16612_s5 = sld [smem:[%s18278_s0 + %s16294_s7]]   ;;  %s16298_s7 = smov 54  }
  0x5c   :  { %s16617_s13 = sld [smem:[%s18278_s0 + %s16295_s15]]   ;;  %s16299_s15 = smov 55  }
  0x5d   :  { %s16622_s12 = sld [smem:[%s18278_s0 + %s16296_s22]]   ;;  %s16300_s22 = smov 56  }
  0x5e   :  { %s16632_s6 = sld [smem:[%s18278_s0 + %s16298_s7]]   ;;  %s16302_s7 = smov 58  }
  0x5f   :  { %18355 = sst [smem:[#allocation104_spill]] %s16607_s4 }
  0x60   :  { %s16627_s4 = sld [smem:[%s18278_s0 + %s16297_s28]]   ;;  %s16301_s28 = smov 57  }
  0x61   :  { %s16652_s17 = sld [smem:[%s18278_s0 + %s16302_s7]]   ;;  %s16306_s7 = smov 62  }
  0x62   :  { %18356 = sst [smem:[#allocation105_spill]] %s16617_s13 }
  0x63   :  { %18357 = sst [smem:[#allocation106_spill]] %s16622_s12 }
  0x64   :  { %s16637_s13 = sld [smem:[%s18278_s0 + %s16299_s15]]   ;;  %s16303_s15 = smov 59  }
  0x65   :  { %s16642_s12 = sld [smem:[%s18278_s0 + %s16300_s22]]   ;;  %s16304_s22 = smov 60  }
  0x66   :  { %18358 = sst [smem:[#allocation107_spill]] %s16627_s4 }
  0x67   :  { %s16647_s4 = sld [smem:[%s18278_s0 + %s16301_s28]]   ;;  %s16305_s28 = smov 61  }
  0x68   :  { %s16672_s30 = sld [smem:[%s18278_s0 + %s16306_s7]]   ;;  %s16310_s7 = smov 66  }
  0x69   :  { %s16692_s21 = sld [smem:[%s18278_s0 + %s16310_s7]]  }
  0x6a   :  { %18359 = sst [smem:[#allocation108_spill]] %s16637_s13 }
  0x6b   :  { %18360 = sst [smem:[#allocation109_spill]] %s16642_s12 }
  0x6c   :  { %s16657_s13 = sld [smem:[%s18278_s0 + %s16303_s15]]   ;;  %s16307_s15 = smov 63  }
  0x6d   :  { %18361 = sst [smem:[#allocation110_spill]] %s16647_s4 }
  0x6e   :  { %s16662_s12 = sld [smem:[%s18278_s0 + %s16304_s22]]   ;;  %s16308_s22 = smov 64  }
  0x6f   :  { %s16667_s4 = sld [smem:[%s18278_s0 + %s16305_s28]]   ;;  %s16309_s28 = smov 65  }
  0x70   :  { %s16682_s24 = sld [smem:[%s18278_s0 + %s16308_s22]]   ;;  %s16312_s22 = smov 68  }
  0x72   :  { %18362 = sst [smem:[#allocation111_spill]] %s16657_s13 }
  0x73   :  { %s16677_s13 = sld [smem:[%s18278_s0 + %s16307_s15]]   ;;  %s16311_s15 = smov 67  }
  0x75   :  { %18363 = sst [smem:[#allocation112_spill]] %s16667_s4 }
  0x76   :  { %18365 = sst [smem:[#allocation114_spill]] %s16682_s24 }
  0x77   :  { %s16687_s4 = sld [smem:[%s18278_s0 + %s16309_s28]]  }
  0x78   :  { %s16702_s24 = sld [smem:[%s18278_s0 + %s16312_s22]]  }
  0x79   :  { %18364 = sst [smem:[#allocation113_spill]] %s16677_s13 }
  0x7a   :  { %s16697_s13 = sld [smem:[%s18278_s0 + %s16311_s15]]  }
  0x7b   :  { %142 = vsyncpa [#allocation3], 0 }
  0x7c   :  { %143 = vsyncpa [#allocation6], 0 }
  0x7d   :  { %144 = vsyncpa [#allocation9], 0 }
  0x7e   :  { %145 = vsyncpa [#allocation12], 0 }
  0x7f   :  { %146 = vsyncpa [#allocation15], 0 }
  0x80   :  { %147 = vsyncpa [#allocation18], 0 }
  0x81   :  { %148 = vsyncpa [#allocation21], 0 }
  0x82   :  { %149 = vsyncpa [#allocation24], 0 }
  0x83   :  { %150 = vsyncpa [#allocation27], 0 }
  0x84   :  { %151 = vsyncpa [#allocation30], 0 }
  0x85   :  { %152 = vsyncpa [#allocation33], 0 }
  0x86   :  { %153 = vsyncpa [#allocation36], 0 }
  0x87   :  { %154 = vsyncpa [#allocation39], 0 }
  0x88   :  { %155 = vsyncpa [#allocation42], 0 }
  0x89   :  { %156 = vsyncpa [#allocation45], 0 }
  0x8a   :  { %157 = vsyncpa [#allocation4], 0  ;;  %s16313_s0 = smov [#allocation5]   ;;  %s16314_s1 = smov [#allocation8]  }
  0x8b   :  { %s228_s28 = sshll.u32 %s16313_s0, 4  ;;  %s248_s2 = sshll.u32 %s16314_s1, 4  ;;  %s229_s28 = int_to_ptr.vmem [resolvable:$true] %s228_s28  ;;  %s249_s2 = int_to_ptr.vmem [resolvable:$true] %s248_s2 }
  0x8c   :  { %s15553_s7 = scalar_lea.hbm %s16502_s25, 16 }
  0x8d   :  { %p15554_p0 = scmp.ne.s32.totalorder %s16502_s25, %s15553_s7  ;;  %p15557_p1 = scmp.lt.u32.totalorder %s15553_s7, %s16502_s25 }
  0x8f   :  { %p15559_p2 = pnand %p15557_p1, %p15554_p0 }
  0x91   :  { %15562 = shalt.err (!%p15559_p2)
}
  0x92   :  { %s15563_s10 = scalar_lea.vmem %s229_s28, 16  ;;  %s15567_s11 = scalar_lea.vmem %s229_s28, 32 }
  0x93   :  { %p15564_p3 = scmp.ne.s32.totalorder %s229_s28, %s15563_s10  ;;  %p15568_p4 = scmp.lt.s32.totalorder %s229_s28, %s229_s28 }
  0x94   :  { %p15569_p5 = scmp.lt.s32.totalorder %s15567_s11, %s15563_s10 }
  0x96   :  { %p15570_p6 = por %p15569_p5, %p15568_p4 }
  0x98   :  { %p15571_p7 = pnand %p15570_p6, %p15564_p3 }
  0x9a   :  { %15574 = shalt.err (!%p15571_p7)
}
  0x9b   :  { %231 = dma.hbm_to_vmem [thread:$0]  %s16502_s25, 16, %s229_s28, [#allocation6]  }
  0x9c   :  { %s15575_s15 = scalar_lea.hbm %s16512_s3, 16 }
  0x9d   :  { %p15576_p8 = scmp.ne.s32.totalorder %s16512_s3, %s15575_s15  ;;  %p15579_p9 = scmp.lt.u32.totalorder %s15575_s15, %s16512_s3 }
  0x9f   :  { %p15581_p10 = pnand %p15579_p9, %p15576_p8 }
  0xa1   :  { %15584 = shalt.err (!%p15581_p10)
}
  0xa2   :  { %s15585_s16 = scalar_lea.vmem %s249_s2, 16  ;;  %s15589_s18 = scalar_lea.vmem %s249_s2, 32 }
  0xa3   :  { %p15586_p11 = scmp.ne.s32.totalorder %s249_s2, %s15585_s16  ;;  %p15590_p12 = scmp.lt.s32.totalorder %s249_s2, %s249_s2 }
  0xa4   :  { %p15591_p13 = scmp.lt.s32.totalorder %s15589_s18, %s15585_s16 }
  0xa6   :  { %p15592_p0 = por %p15591_p13, %p15590_p12 }
  0xa8   :  { %p15593_p1 = pnand %p15592_p0, %p15586_p11 }
  0xaa   :  { %15596 = shalt.err (!%p15593_p1)
}
  0xab   :  { %251 = dma.hbm_to_vmem [thread:$0]  %s16512_s3, 16, %s249_s2, [#allocation9]  }
  0xac   :  { %s16315_s22 = smov [#allocation11]   ;;  %s16316_s23 = smov [#allocation14]  }
  0xad   :  { %s268_s25 = sshll.u32 %s16315_s22, 4  ;;  %s292_s26 = sshll.u32 %s16316_s23, 4  ;;  %s269_s25 = int_to_ptr.vmem [resolvable:$true] %s268_s25  ;;  %s293_s26 = int_to_ptr.vmem [resolvable:$true] %s292_s26 }
  0xae   :  { %s15597_s0 = scalar_lea.hbm %s16522_s19, 16 }
  0xaf   :  { %p15598_p2 = scmp.ne.s32.totalorder %s16522_s19, %s15597_s0  ;;  %p15601_p3 = scmp.lt.u32.totalorder %s15597_s0, %s16522_s19 }
  0xb1   :  { %p15603_p4 = pnand %p15601_p3, %p15598_p2 }
  0xb3   :  { %15606 = shalt.err (!%p15603_p4)
}
  0xb4   :  { %s15607_s28 = scalar_lea.vmem %s269_s25, 16  ;;  %s15611_s1 = scalar_lea.vmem %s269_s25, 32 }
  0xb5   :  { %p15608_p5 = scmp.ne.s32.totalorder %s269_s25, %s15607_s28  ;;  %p15612_p6 = scmp.lt.s32.totalorder %s269_s25, %s269_s25 }
  0xb6   :  { %p15613_p7 = scmp.lt.s32.totalorder %s15611_s1, %s15607_s28 }
  0xb8   :  { %p15614_p8 = por %p15613_p7, %p15612_p6 }
  0xba   :  { %p15615_p9 = pnand %p15614_p8, %p15608_p5 }
  0xbc   :  { %15618 = shalt.err (!%p15615_p9)
}
  0xbd   :  { %271 = dma.hbm_to_vmem [thread:$0]  %s16522_s19, 16, %s269_s25, [#allocation12]  }
  0xbe   :  { %s15619_s3 = scalar_lea.hbm %s16542_s20, 16 }
  0xbf   :  { %p15620_p10 = scmp.ne.s32.totalorder %s16542_s20, %s15619_s3  ;;  %p15623_p11 = scmp.lt.u32.totalorder %s15619_s3, %s16542_s20 }
  0xc1   :  { %p15625_p12 = pnand %p15623_p11, %p15620_p10 }
  0xc3   :  { %15628 = shalt.err (!%p15625_p12)
}
  0xc4   :  { %s15629_s2 = scalar_lea.vmem %s293_s26, 16  ;;  %s15633_s7 = scalar_lea.vmem %s293_s26, 32 }
  0xc5   :  { %p15630_p13 = scmp.ne.s32.totalorder %s293_s26, %s15629_s2  ;;  %p15634_p0 = scmp.lt.s32.totalorder %s293_s26, %s293_s26 }
  0xc6   :  { %p15635_p1 = scmp.lt.s32.totalorder %s15633_s7, %s15629_s2 }
  0xc8   :  { %p15636_p2 = por %p15635_p1, %p15634_p0 }
  0xca   :  { %p15637_p3 = pnand %p15636_p2, %p15630_p13 }
  0xcc   :  { %15640 = shalt.err (!%p15637_p3)
}
  0xcd   :  { %295 = dma.hbm_to_vmem [thread:$0]  %s16542_s20, 16, %s293_s26, [#allocation15]  }
  0xce   :  { %s16317_s10 = smov [#allocation17]   ;;  %s16318_s11 = smov [#allocation20]  }
  0xcf   :  { %s316_s19 = sshll.u32 %s16317_s10, 4  ;;  %s336_s15 = sshll.u32 %s16318_s11, 4  ;;  %s317_s19 = int_to_ptr.vmem [resolvable:$true] %s316_s19  ;;  %s337_s15 = int_to_ptr.vmem [resolvable:$true] %s336_s15 }
  0xd0   :  { %s15641_s16 = scalar_lea.hbm %s16562_s14, 16 }
  0xd1   :  { %p15642_p4 = scmp.ne.s32.totalorder %s16562_s14, %s15641_s16  ;;  %p15645_p5 = scmp.lt.u32.totalorder %s15641_s16, %s16562_s14 }
  0xd3   :  { %p15647_p6 = pnand %p15645_p5, %p15642_p4 }
  0xd5   :  { %15650 = shalt.err (!%p15647_p6)
}
  0xd6   :  { %s15651_s18 = scalar_lea.vmem %s317_s19, 16  ;;  %s15655_s22 = scalar_lea.vmem %s317_s19, 32 }
  0xd7   :  { %p15652_p7 = scmp.ne.s32.totalorder %s317_s19, %s15651_s18  ;;  %p15656_p8 = scmp.lt.s32.totalorder %s317_s19, %s317_s19 }
  0xd8   :  { %p15657_p9 = scmp.lt.s32.totalorder %s15655_s22, %s15651_s18 }
  0xda   :  { %p15658_p10 = por %p15657_p9, %p15656_p8 }
  0xdc   :  { %p15659_p11 = pnand %p15658_p10, %p15652_p7 }
  0xde   :  { %15662 = shalt.err (!%p15659_p11)
}
  0xdf   :  { %319 = dma.hbm_to_vmem [thread:$0]  %s16562_s14, 16, %s317_s19, [#allocation18]  }
  0xe0   :  { %s15663_s20 = scalar_lea.hbm %s16572_s8, 16 }
  0xe1   :  { %p15664_p12 = scmp.ne.s32.totalorder %s16572_s8, %s15663_s20  ;;  %p15667_p13 = scmp.lt.u32.totalorder %s15663_s20, %s16572_s8 }
  0xe3   :  { %p15669_p0 = pnand %p15667_p13, %p15664_p12 }
  0xe5   :  { %15672 = shalt.err (!%p15669_p0)
}
  0xe6   :  { %s15673_s25 = scalar_lea.vmem %s337_s15, 16  ;;  %s15677_s23 = scalar_lea.vmem %s337_s15, 32 }
  0xe7   :  { %p15674_p1 = scmp.ne.s32.totalorder %s337_s15, %s15673_s25  ;;  %p15678_p2 = scmp.lt.s32.totalorder %s337_s15, %s337_s15 }
  0xe8   :  { %p15679_p3 = scmp.lt.s32.totalorder %s15677_s23, %s15673_s25 }
  0xea   :  { %p15680_p4 = por %p15679_p3, %p15678_p2 }
  0xec   :  { %p15681_p5 = pnand %p15680_p4, %p15674_p1 }
  0xee   :  { %15684 = shalt.err (!%p15681_p5)
}
  0xef   :  { %339 = dma.hbm_to_vmem [thread:$0]  %s16572_s8, 16, %s337_s15, [#allocation21]  }
  0xf0   :  { %s16319_s26 = smov [#allocation23]   ;;  %s16320_s0 = smov [#allocation26]  }
  0xf1   :  { %s360_s14 = sshll.u32 %s16319_s26, 4  ;;  %s380_s28 = sshll.u32 %s16320_s0, 4  ;;  %s361_s14 = int_to_ptr.vmem [resolvable:$true] %s360_s14  ;;  %s381_s28 = int_to_ptr.vmem [resolvable:$true] %s380_s28 }
  0xf2   :  { %s15685_s1 = scalar_lea.hbm %s16592_s9, 16 }
  0xf3   :  { %p15686_p6 = scmp.ne.s32.totalorder %s16592_s9, %s15685_s1  ;;  %p15689_p7 = scmp.lt.u32.totalorder %s15685_s1, %s16592_s9 }
  0xf5   :  { %p15691_p8 = pnand %p15689_p7, %p15686_p6 }
  0xf7   :  { %15694 = shalt.err (!%p15691_p8)
}
  0xf8   :  { %s15695_s3 = scalar_lea.vmem %s361_s14, 16  ;;  %s15699_s2 = scalar_lea.vmem %s361_s14, 32 }
  0xf9   :  { %p15696_p9 = scmp.ne.s32.totalorder %s361_s14, %s15695_s3  ;;  %p15700_p10 = scmp.lt.s32.totalorder %s361_s14, %s361_s14 }
  0xfa   :  { %p15701_p11 = scmp.lt.s32.totalorder %s15699_s2, %s15695_s3 }
  0xfc   :  { %p15702_p12 = por %p15701_p11, %p15700_p10 }
  0xfe   :  { %p15703_p13 = pnand %p15702_p12, %p15696_p9 }
 0x100   :  { %15706 = shalt.err (!%p15703_p13)
}
 0x101   :  { %363 = dma.hbm_to_vmem [thread:$0]  %s16592_s9, 16, %s361_s14, [#allocation24]  }
 0x102   :  { %s15707_s8 = scalar_lea.hbm %s16602_s27, 16 }
 0x103   :  { %p15708_p0 = scmp.ne.s32.totalorder %s16602_s27, %s15707_s8  ;;  %p15711_p1 = scmp.lt.u32.totalorder %s15707_s8, %s16602_s27 }
 0x105   :  { %p15713_p2 = pnand %p15711_p1, %p15708_p0 }
 0x107   :  { %15716 = shalt.err (!%p15713_p2)
}
 0x108   :  { %s15717_s7 = scalar_lea.vmem %s381_s28, 16  ;;  %s15721_s10 = scalar_lea.vmem %s381_s28, 32 }
 0x109   :  { %p15718_p3 = scmp.ne.s32.totalorder %s381_s28, %s15717_s7  ;;  %p15722_p4 = scmp.lt.s32.totalorder %s381_s28, %s381_s28 }
 0x10a   :  { %p15723_p5 = scmp.lt.s32.totalorder %s15721_s10, %s15717_s7 }
 0x10c   :  { %p15724_p6 = por %p15723_p5, %p15722_p4 }
 0x10e   :  { %p15725_p7 = pnand %p15724_p6, %p15718_p3 }
 0x110   :  { %15728 = shalt.err (!%p15725_p7)
}
 0x111   :  { %383 = dma.hbm_to_vmem [thread:$0]  %s16602_s27, 16, %s381_s28, [#allocation27]  }
 0x112   :  { %s16321_s19 = smov [#allocation29]   ;;  %s16322_s11 = smov [#allocation32]  }
 0x113   :  { %s400_s9 = sshll.u32 %s16321_s19, 4  ;;  %s424_s15 = sshll.u32 %s16322_s11, 4  ;;  %s401_s9 = int_to_ptr.vmem [resolvable:$true] %s400_s9  ;;  %s425_s15 = int_to_ptr.vmem [resolvable:$true] %s424_s15 }
 0x114   :  { %s15729_s16 = scalar_lea.hbm %s16612_s5, 16 }
 0x115   :  { %p15730_p8 = scmp.ne.s32.totalorder %s16612_s5, %s15729_s16  ;;  %p15733_p9 = scmp.lt.u32.totalorder %s15729_s16, %s16612_s5 }
 0x117   :  { %p15735_p10 = pnand %p15733_p9, %p15730_p8 }
 0x119   :  { %15738 = shalt.err (!%p15735_p10)
}
 0x11a   :  { %s15739_s18 = scalar_lea.vmem %s401_s9, 16  ;;  %s15743_s22 = scalar_lea.vmem %s401_s9, 32 }
 0x11b   :  { %p15740_p11 = scmp.ne.s32.totalorder %s401_s9, %s15739_s18  ;;  %p15744_p12 = scmp.lt.s32.totalorder %s401_s9, %s401_s9 }
 0x11c   :  { %p15745_p13 = scmp.lt.s32.totalorder %s15743_s22, %s15739_s18 }
 0x11e   :  { %p15746_p0 = por %p15745_p13, %p15744_p12 }
 0x120   :  { %p15747_p1 = pnand %p15746_p0, %p15740_p11 }
 0x122   :  { %15750 = shalt.err (!%p15747_p1)
}
 0x123   :  { %403 = dma.hbm_to_vmem [thread:$0]  %s16612_s5, 16, %s401_s9, [#allocation30]  }
 0x124   :  { %s15751_s27 = scalar_lea.hbm %s16632_s6, 16 }
 0x125   :  { %p15752_p2 = scmp.ne.s32.totalorder %s16632_s6, %s15751_s27  ;;  %p15755_p3 = scmp.lt.u32.totalorder %s15751_s27, %s16632_s6 }
 0x127   :  { %p15757_p4 = pnand %p15755_p3, %p15752_p2 }
 0x129   :  { %15760 = shalt.err (!%p15757_p4)
}
 0x12a   :  { %s15761_s20 = scalar_lea.vmem %s425_s15, 16  ;;  %s15765_s25 = scalar_lea.vmem %s425_s15, 32 }
 0x12b   :  { %p15762_p5 = scmp.ne.s32.totalorder %s425_s15, %s15761_s20  ;;  %p15766_p6 = scmp.lt.s32.totalorder %s425_s15, %s425_s15 }
 0x12c   :  { %p15767_p7 = scmp.lt.s32.totalorder %s15765_s25, %s15761_s20 }
 0x12e   :  { %p15768_p8 = por %p15767_p7, %p15766_p6 }
 0x130   :  { %p15769_p9 = pnand %p15768_p8, %p15762_p5 }
 0x132   :  { %15772 = shalt.err (!%p15769_p9)
}
 0x133   :  { %427 = dma.hbm_to_vmem [thread:$0]  %s16632_s6, 16, %s425_s15, [#allocation33]  }
 0x134   :  { %s16323_s23 = smov [#allocation35]   ;;  %s16324_s26 = smov [#allocation38]  }
 0x135   :  { %s448_s5 = sshll.u32 %s16323_s23, 4  ;;  %s468_s14 = sshll.u32 %s16324_s26, 4  ;;  %s449_s5 = int_to_ptr.vmem [resolvable:$true] %s448_s5  ;;  %s469_s14 = int_to_ptr.vmem [resolvable:$true] %s468_s14 }
 0x136   :  { %s15773_s0 = scalar_lea.hbm %s16652_s17, 16 }
 0x137   :  { %p15774_p10 = scmp.ne.s32.totalorder %s16652_s17, %s15773_s0  ;;  %p15777_p11 = scmp.lt.u32.totalorder %s15773_s0, %s16652_s17 }
 0x139   :  { %p15779_p12 = pnand %p15777_p11, %p15774_p10 }
 0x13b   :  { %15782 = shalt.err (!%p15779_p12)
}
 0x13c   :  { %s15783_s28 = scalar_lea.vmem %s449_s5, 16  ;;  %s15787_s1 = scalar_lea.vmem %s449_s5, 32 }
 0x13d   :  { %p15784_p13 = scmp.ne.s32.totalorder %s449_s5, %s15783_s28  ;;  %p15788_p0 = scmp.lt.s32.totalorder %s449_s5, %s449_s5 }
 0x13e   :  { %p15789_p1 = scmp.lt.s32.totalorder %s15787_s1, %s15783_s28 }
 0x140   :  { %p15790_p2 = por %p15789_p1, %p15788_p0 }
 0x142   :  { %p15791_p3 = pnand %p15790_p2, %p15784_p13 }
 0x144   :  { %15794 = shalt.err (!%p15791_p3)
}
 0x145   :  { %451 = dma.hbm_to_vmem [thread:$0]  %s16652_s17, 16, %s449_s5, [#allocation36]  }
 0x146   :  { %s15795_s6 = scalar_lea.hbm %s16662_s12, 16 }
 0x147   :  { %p15796_p4 = scmp.ne.s32.totalorder %s16662_s12, %s15795_s6  ;;  %p15799_p5 = scmp.lt.u32.totalorder %s15795_s6, %s16662_s12 }
 0x149   :  { %p15801_p6 = pnand %p15799_p5, %p15796_p4 }
 0x14b   :  { %15804 = shalt.err (!%p15801_p6)
}
 0x14c   :  { %s15805_s3 = scalar_lea.vmem %s469_s14, 16  ;;  %s15809_s2 = scalar_lea.vmem %s469_s14, 32 }
 0x14d   :  { %p15806_p7 = scmp.ne.s32.totalorder %s469_s14, %s15805_s3  ;;  %p15810_p8 = scmp.lt.s32.totalorder %s469_s14, %s469_s14 }
 0x14e   :  { %p15811_p9 = scmp.lt.s32.totalorder %s15809_s2, %s15805_s3 }
 0x150   :  { %p15812_p10 = por %p15811_p9, %p15810_p8 }
 0x152   :  { %p15813_p11 = pnand %p15812_p10, %p15806_p7 }
 0x154   :  { %15816 = shalt.err (!%p15813_p11)
}
 0x155   :  { %471 = dma.hbm_to_vmem [thread:$0]  %s16662_s12, 16, %s469_s14, [#allocation39]  }
 0x156   :  { %s16325_s8 = smov [#allocation41]   ;;  %s16326_s7 = smov [#allocation44]  }
 0x157   :  { %s488_s17 = sshll.u32 %s16325_s8, 4  ;;  %s512_s10 = sshll.u32 %s16326_s7, 4  ;;  %s489_s17 = int_to_ptr.vmem [resolvable:$true] %s488_s17  ;;  %s513_s10 = int_to_ptr.vmem [resolvable:$true] %s512_s10 }
 0x158   :  { %s15817_s19 = scalar_lea.hbm %s16672_s30, 16 }
 0x159   :  { %p15818_p12 = scmp.ne.s32.totalorder %s16672_s30, %s15817_s19  ;;  %p15821_p13 = scmp.lt.u32.totalorder %s15817_s19, %s16672_s30 }
 0x15b   :  { %p15823_p0 = pnand %p15821_p13, %p15818_p12 }
 0x15d   :  { %15826 = shalt.err (!%p15823_p0)
}
 0x15e   :  { %s15827_s9 = scalar_lea.vmem %s489_s17, 16  ;;  %s15831_s11 = scalar_lea.vmem %s489_s17, 32 }
 0x15f   :  { %p15828_p1 = scmp.ne.s32.totalorder %s489_s17, %s15827_s9  ;;  %p15832_p2 = scmp.lt.s32.totalorder %s489_s17, %s489_s17 }
 0x160   :  { %p15833_p3 = scmp.lt.s32.totalorder %s15831_s11, %s15827_s9 }
 0x162   :  { %p15834_p4 = por %p15833_p3, %p15832_p2 }
 0x164   :  { %p15835_p5 = pnand %p15834_p4, %p15828_p1 }
 0x166   :  { %15838 = shalt.err (!%p15835_p5)
}
 0x167   :  { %491 = dma.hbm_to_vmem [thread:$0]  %s16672_s30, 16, %s489_s17, [#allocation42]  }
 0x168   :  { %s15839_s12 = scalar_lea.hbm %s16692_s21, 16 }
 0x169   :  { %p15840_p6 = scmp.ne.s32.totalorder %s16692_s21, %s15839_s12  ;;  %p15843_p7 = scmp.lt.u32.totalorder %s15839_s12, %s16692_s21 }
 0x16b   :  { %p15845_p8 = pnand %p15843_p7, %p15840_p6 }
 0x16d   :  { %15848 = shalt.err (!%p15845_p8)
}
 0x16e   :  { %s15849_s15 = scalar_lea.vmem %s513_s10, 16  ;;  %s15853_s16 = scalar_lea.vmem %s513_s10, 32 }
 0x16f   :  { %p15850_p9 = scmp.ne.s32.totalorder %s513_s10, %s15849_s15  ;;  %p15854_p10 = scmp.lt.s32.totalorder %s513_s10, %s513_s10 }
 0x170   :  { %p15855_p11 = scmp.lt.s32.totalorder %s15853_s16, %s15849_s15 }
 0x172   :  { %p15856_p12 = por %p15855_p11, %p15854_p10 }
 0x174   :  { %p15857_p13 = pnand %p15856_p12, %p15850_p9 }
 0x176   :  { %15860 = shalt.err (!%p15857_p13)
}
 0x177   :  { %515 = dma.hbm_to_vmem [thread:$0]  %s16692_s21, 16, %s513_s10, [#allocation45]  }
 0x178   :  { %s16327_s18 = smov [#allocation2]   ;;  %s16328_s22 = smov [#allocation7]  }
 0x179   :  { %s218_s30 = sshll.u32 %s16327_s18, 4  ;;  %s238_s27 = sshll.u32 %s16328_s22, 4  ;;  %s219_s30 = int_to_ptr.vmem [resolvable:$true] %s218_s30  ;;  %s239_s27 = int_to_ptr.vmem [resolvable:$true] %s238_s27 }
 0x17a   :  { %s15861_s20 = scalar_lea.hbm %s16497_s29, 16 }
 0x17b   :  { %p15862_p0 = scmp.ne.s32.totalorder %s16497_s29, %s15861_s20  ;;  %p15865_p1 = scmp.lt.u32.totalorder %s15861_s20, %s16497_s29 }
 0x17d   :  { %p15867_p2 = pnand %p15865_p1, %p15862_p0 }
 0x17f   :  { %15870 = shalt.err (!%p15867_p2)
}
 0x180   :  { %s15871_s25 = scalar_lea.vmem %s219_s30, 16  ;;  %s15875_s23 = scalar_lea.vmem %s219_s30, 32 }
 0x181   :  { %p15872_p3 = scmp.ne.s32.totalorder %s219_s30, %s15871_s25  ;;  %p15876_p4 = scmp.lt.s32.totalorder %s219_s30, %s219_s30 }
 0x182   :  { %p15877_p5 = scmp.lt.s32.totalorder %s15875_s23, %s15871_s25 }
 0x184   :  { %p15878_p6 = por %p15877_p5, %p15876_p4 }
 0x186   :  { %p15879_p7 = pnand %p15878_p6, %p15872_p3 }
 0x188   :  { %15882 = shalt.err (!%p15879_p7)
}
 0x189   :  { %s18366_s21 = sld [smem:[#allocation91_spill]] }
 0x18a   :  { %221 = dma.hbm_to_vmem [thread:$0]  %s16497_s29, 16, %s219_s30, [#allocation3]  }
 0x18f   :  { %s15883_s5 = scalar_lea.hbm %s18366_s21, 16 }
 0x190   :  { %p15884_p8 = scmp.ne.s32.totalorder %s18366_s21, %s15883_s5  ;;  %p15887_p9 = scmp.lt.u32.totalorder %s15883_s5, %s18366_s21 }
 0x192   :  { %p15889_p10 = pnand %p15887_p9, %p15884_p8 }
 0x194   :  { %15892 = shalt.err (!%p15889_p10)
}
 0x195   :  { %s15893_s26 = scalar_lea.vmem %s239_s27, 16  ;;  %s15897_s14 = scalar_lea.vmem %s239_s27, 32 }
 0x196   :  { %p15894_p11 = scmp.ne.s32.totalorder %s239_s27, %s15893_s26  ;;  %p15898_p12 = scmp.lt.s32.totalorder %s239_s27, %s239_s27 }
 0x197   :  { %p15899_p13 = scmp.lt.s32.totalorder %s15897_s14, %s15893_s26 }
 0x199   :  { %p15900_p0 = por %p15899_p13, %p15898_p12 }
 0x19b   :  { %p15901_p1 = pnand %p15900_p0, %p15894_p11 }
 0x19d   :  { %15904 = shalt.err (!%p15901_p1)
}
 0x19e   :  { %s18367_s0 = sld [smem:[#allocation92_spill]]  ;;  %s16329_s28 = smov [#allocation10]  }
 0x19f   :  { %241 = dma.hbm_to_vmem [thread:$0]  %s18366_s21, 16, %s239_s27, [#allocation6]  }
 0x1a0   :  { %s258_s29 = sshll.u32 %s16329_s28, 4  ;;  %s16330_s1 = smov [#allocation13]   ;;  %s259_s29 = int_to_ptr.vmem [resolvable:$true] %s258_s29 }
 0x1a1   :  { %s280_s6 = sshll.u32 %s16330_s1, 4  ;;  %s281_s6 = int_to_ptr.vmem [resolvable:$true] %s280_s6 }
 0x1a4   :  { %s15905_s3 = scalar_lea.hbm %s18367_s0, 16 }
 0x1a5   :  { %p15906_p2 = scmp.ne.s32.totalorder %s18367_s0, %s15905_s3  ;;  %p15909_p3 = scmp.lt.u32.totalorder %s15905_s3, %s18367_s0 }
 0x1a7   :  { %p15911_p4 = pnand %p15909_p3, %p15906_p2 }
 0x1a9   :  { %15914 = shalt.err (!%p15911_p4)
}
 0x1aa   :  { %s15915_s2 = scalar_lea.vmem %s259_s29, 16  ;;  %s15919_s8 = scalar_lea.vmem %s259_s29, 32 }
 0x1ab   :  { %p15916_p5 = scmp.ne.s32.totalorder %s259_s29, %s15915_s2  ;;  %p15920_p6 = scmp.lt.s32.totalorder %s259_s29, %s259_s29 }
 0x1ac   :  { %p15921_p7 = scmp.lt.s32.totalorder %s15919_s8, %s15915_s2 }
 0x1ae   :  { %p15922_p8 = por %p15921_p7, %p15920_p6 }
 0x1b0   :  { %p15923_p9 = pnand %p15922_p8, %p15916_p5 }
 0x1b2   :  { %15926 = shalt.err (!%p15923_p9)
}
 0x1b3   :  { %s18368_s17 = sld [smem:[#allocation94_spill]] }
 0x1b4   :  { %261 = dma.hbm_to_vmem [thread:$0]  %s18367_s0, 16, %s259_s29, [#allocation9]  }
 0x1b9   :  { %s15927_s7 = scalar_lea.hbm %s18368_s17, 16 }
 0x1ba   :  { %p15928_p10 = scmp.ne.s32.totalorder %s18368_s17, %s15927_s7  ;;  %p15931_p11 = scmp.lt.u32.totalorder %s15927_s7, %s18368_s17 }
 0x1bc   :  { %p15933_p12 = pnand %p15931_p11, %p15928_p10 }
 0x1be   :  { %15936 = shalt.err (!%p15933_p12)
}
 0x1bf   :  { %s15937_s10 = scalar_lea.vmem %s281_s6, 16  ;;  %s15941_s19 = scalar_lea.vmem %s281_s6, 32 }
 0x1c0   :  { %p15938_p13 = scmp.ne.s32.totalorder %s281_s6, %s15937_s10  ;;  %p15942_p0 = scmp.lt.s32.totalorder %s281_s6, %s281_s6 }
 0x1c1   :  { %p15943_p1 = scmp.lt.s32.totalorder %s15941_s19, %s15937_s10 }
 0x1c3   :  { %p15944_p2 = por %p15943_p1, %p15942_p0 }
 0x1c5   :  { %p15945_p3 = pnand %p15944_p2, %p15938_p13 }
 0x1c7   :  { %15948 = shalt.err (!%p15945_p3)
}
 0x1c8   :  { %s18369_s9 = sld [smem:[#allocation97_spill]]  ;;  %s16331_s11 = smov [#allocation16]  }
 0x1c9   :  { %283 = dma.hbm_to_vmem [thread:$0]  %s18368_s17, 16, %s281_s6, [#allocation12]  }
 0x1ca   :  { %s304_s12 = sshll.u32 %s16331_s11, 4  ;;  %s16332_s15 = smov [#allocation19]   ;;  %s305_s12 = int_to_ptr.vmem [resolvable:$true] %s304_s12 }
 0x1cb   :  { %s326_s16 = sshll.u32 %s16332_s15, 4  ;;  %s327_s16 = int_to_ptr.vmem [resolvable:$true] %s326_s16 }
 0x1ce   :  { %s15949_s18 = scalar_lea.hbm %s18369_s9, 16 }
 0x1cf   :  { %p15950_p4 = scmp.ne.s32.totalorder %s18369_s9, %s15949_s18  ;;  %p15953_p5 = scmp.lt.u32.totalorder %s15949_s18, %s18369_s9 }
 0x1d1   :  { %p15955_p6 = pnand %p15953_p5, %p15950_p4 }
 0x1d3   :  { %15958 = shalt.err (!%p15955_p6)
}
 0x1d4   :  { %s15959_s30 = scalar_lea.vmem %s305_s12, 16  ;;  %s15963_s22 = scalar_lea.vmem %s305_s12, 32 }
 0x1d5   :  { %p15960_p7 = scmp.ne.s32.totalorder %s305_s12, %s15959_s30  ;;  %p15964_p8 = scmp.lt.s32.totalorder %s305_s12, %s305_s12 }
 0x1d6   :  { %p15965_p9 = scmp.lt.s32.totalorder %s15963_s22, %s15959_s30 }
 0x1d8   :  { %p15966_p10 = por %p15965_p9, %p15964_p8 }
 0x1da   :  { %p15967_p11 = pnand %p15966_p10, %p15960_p7 }
 0x1dc   :  { %15970 = shalt.err (!%p15967_p11)
}
 0x1dd   :  { %s18370_s27 = sld [smem:[#allocation99_spill]] }
 0x1de   :  { %307 = dma.hbm_to_vmem [thread:$0]  %s18369_s9, 16, %s305_s12, [#allocation15]  }
 0x1e3   :  { %s15971_s20 = scalar_lea.hbm %s18370_s27, 16 }
 0x1e4   :  { %p15972_p12 = scmp.ne.s32.totalorder %s18370_s27, %s15971_s20  ;;  %p15975_p13 = scmp.lt.u32.totalorder %s15971_s20, %s18370_s27 }
 0x1e6   :  { %p15977_p0 = pnand %p15975_p13, %p15972_p12 }
 0x1e8   :  { %15980 = shalt.err (!%p15977_p0)
}
 0x1e9   :  { %s15981_s25 = scalar_lea.vmem %s327_s16, 16  ;;  %s15985_s23 = scalar_lea.vmem %s327_s16, 32 }
 0x1ea   :  { %p15982_p1 = scmp.ne.s32.totalorder %s327_s16, %s15981_s25  ;;  %p15986_p2 = scmp.lt.s32.totalorder %s327_s16, %s327_s16 }
 0x1eb   :  { %p15987_p3 = scmp.lt.s32.totalorder %s15985_s23, %s15981_s25 }
 0x1ed   :  { %p15988_p4 = por %p15987_p3, %p15986_p2 }
 0x1ef   :  { %p15989_p5 = pnand %p15988_p4, %p15982_p1 }
 0x1f1   :  { %15992 = shalt.err (!%p15989_p5)
}
 0x1f2   :  { %s18371_s21 = sld [smem:[#allocation100_spill]]  ;;  %s16333_s5 = smov [#allocation22]  }
 0x1f3   :  { %329 = dma.hbm_to_vmem [thread:$0]  %s18370_s27, 16, %s327_s16, [#allocation18]  }
 0x1f4   :  { %s346_s26 = sshll.u32 %s16333_s5, 4  ;;  %s16334_s14 = smov [#allocation25]   ;;  %s347_s26 = int_to_ptr.vmem [resolvable:$true] %s346_s26 }
 0x1f5   :  { %s370_s0 = sshll.u32 %s16334_s14, 4  ;;  %s371_s0 = int_to_ptr.vmem [resolvable:$true] %s370_s0 }
 0x1f8   :  { %s15993_s28 = scalar_lea.hbm %s18371_s21, 16 }
 0x1f9   :  { %p15994_p6 = scmp.ne.s32.totalorder %s18371_s21, %s15993_s28  ;;  %p15997_p7 = scmp.lt.u32.totalorder %s15993_s28, %s18371_s21 }
 0x1fb   :  { %p15999_p8 = pnand %p15997_p7, %p15994_p6 }
 0x1fd   :  { %16002 = shalt.err (!%p15999_p8)
}
 0x1fe   :  { %s16003_s29 = scalar_lea.vmem %s347_s26, 16  ;;  %s16007_s1 = scalar_lea.vmem %s347_s26, 32 }
 0x1ff   :  { %p16004_p9 = scmp.ne.s32.totalorder %s347_s26, %s16003_s29  ;;  %p16008_p10 = scmp.lt.s32.totalorder %s347_s26, %s347_s26 }
 0x200   :  { %p16009_p11 = scmp.lt.s32.totalorder %s16007_s1, %s16003_s29 }
 0x202   :  { %p16010_p12 = por %p16009_p11, %p16008_p10 }
 0x204   :  { %p16011_p13 = pnand %p16010_p12, %p16004_p9 }
 0x206   :  { %16014 = shalt.err (!%p16011_p13)
}
 0x207   :  { %s18372_s6 = sld [smem:[#allocation103_spill]] }
 0x208   :  { %349 = dma.hbm_to_vmem [thread:$0]  %s18371_s21, 16, %s347_s26, [#allocation21]  }
 0x20d   :  { %s16015_s3 = scalar_lea.hbm %s18372_s6, 16 }
 0x20e   :  { %p16016_p0 = scmp.ne.s32.totalorder %s18372_s6, %s16015_s3  ;;  %p16019_p1 = scmp.lt.u32.totalorder %s16015_s3, %s18372_s6 }
 0x210   :  { %p16021_p2 = pnand %p16019_p1, %p16016_p0 }
 0x212   :  { %16024 = shalt.err (!%p16021_p2)
}
 0x213   :  { %s16025_s2 = scalar_lea.vmem %s371_s0, 16  ;;  %s16029_s8 = scalar_lea.vmem %s371_s0, 32 }
 0x214   :  { %p16026_p3 = scmp.ne.s32.totalorder %s371_s0, %s16025_s2  ;;  %p16030_p4 = scmp.lt.s32.totalorder %s371_s0, %s371_s0 }
 0x215   :  { %p16031_p5 = scmp.lt.s32.totalorder %s16029_s8, %s16025_s2 }
 0x217   :  { %p16032_p6 = por %p16031_p5, %p16030_p4 }
 0x219   :  { %p16033_p7 = pnand %p16032_p6, %p16026_p3 }
 0x21b   :  { %16036 = shalt.err (!%p16033_p7)
}
 0x21c   :  { %s18373_s17 = sld [smem:[#allocation104_spill]]  ;;  %s16335_s7 = smov [#allocation28]  }
 0x21d   :  { %373 = dma.hbm_to_vmem [thread:$0]  %s18372_s6, 16, %s371_s0, [#allocation24]  }
 0x21e   :  { %s390_s10 = sshll.u32 %s16335_s7, 4  ;;  %s16336_s19 = smov [#allocation31]   ;;  %s391_s10 = int_to_ptr.vmem [resolvable:$true] %s390_s10 }
 0x21f   :  { %s412_s9 = sshll.u32 %s16336_s19, 4  ;;  %s413_s9 = int_to_ptr.vmem [resolvable:$true] %s412_s9 }
 0x222   :  { %s16037_s11 = scalar_lea.hbm %s18373_s17, 16 }
 0x223   :  { %p16038_p8 = scmp.ne.s32.totalorder %s18373_s17, %s16037_s11  ;;  %p16041_p9 = scmp.lt.u32.totalorder %s16037_s11, %s18373_s17 }
 0x225   :  { %p16043_p10 = pnand %p16041_p9, %p16038_p8 }
 0x227   :  { %16046 = shalt.err (!%p16043_p10)
}
 0x228   :  { %s16047_s12 = scalar_lea.vmem %s391_s10, 16  ;;  %s16051_s15 = scalar_lea.vmem %s391_s10, 32 }
 0x229   :  { %p16048_p11 = scmp.ne.s32.totalorder %s391_s10, %s16047_s12  ;;  %p16052_p12 = scmp.lt.s32.totalorder %s391_s10, %s391_s10 }
 0x22a   :  { %p16053_p13 = scmp.lt.s32.totalorder %s16051_s15, %s16047_s12 }
 0x22c   :  { %p16054_p0 = por %p16053_p13, %p16052_p12 }
 0x22e   :  { %p16055_p1 = pnand %p16054_p0, %p16048_p11 }
 0x230   :  { %16058 = shalt.err (!%p16055_p1)
}
 0x231   :  { %s18374_s16 = sld [smem:[#allocation106_spill]] }
 0x232   :  { %393 = dma.hbm_to_vmem [thread:$0]  %s18373_s17, 16, %s391_s10, [#allocation27]  }
 0x237   :  { %s16059_s18 = scalar_lea.hbm %s18374_s16, 16 }
 0x238   :  { %p16060_p2 = scmp.ne.s32.totalorder %s18374_s16, %s16059_s18  ;;  %p16063_p3 = scmp.lt.u32.totalorder %s16059_s18, %s18374_s16 }
 0x23a   :  { %p16065_p4 = pnand %p16063_p3, %p16060_p2 }
 0x23c   :  { %16068 = shalt.err (!%p16065_p4)
}
 0x23d   :  { %s16069_s30 = scalar_lea.vmem %s413_s9, 16  ;;  %s16073_s22 = scalar_lea.vmem %s413_s9, 32 }
 0x23e   :  { %p16070_p5 = scmp.ne.s32.totalorder %s413_s9, %s16069_s30  ;;  %p16074_p6 = scmp.lt.s32.totalorder %s413_s9, %s413_s9 }
 0x23f   :  { %p16075_p7 = scmp.lt.s32.totalorder %s16073_s22, %s16069_s30 }
 0x241   :  { %p16076_p8 = por %p16075_p7, %p16074_p6 }
 0x243   :  { %p16077_p9 = pnand %p16076_p8, %p16070_p5 }
 0x245   :  { %16080 = shalt.err (!%p16077_p9)
}
 0x246   :  { %s18375_s27 = sld [smem:[#allocation108_spill]]  ;;  %s16337_s20 = smov [#allocation34]  }
 0x247   :  { %415 = dma.hbm_to_vmem [thread:$0]  %s18374_s16, 16, %s413_s9, [#allocation30]  }
 0x248   :  { %s434_s25 = sshll.u32 %s16337_s20, 4  ;;  %s16338_s23 = smov [#allocation37]   ;;  %s435_s25 = int_to_ptr.vmem [resolvable:$true] %s434_s25 }
 0x249   :  { %s458_s21 = sshll.u32 %s16338_s23, 4  ;;  %s459_s21 = int_to_ptr.vmem [resolvable:$true] %s458_s21 }
 0x24c   :  { %s16081_s5 = scalar_lea.hbm %s18375_s27, 16 }
 0x24d   :  { %p16082_p10 = scmp.ne.s32.totalorder %s18375_s27, %s16081_s5  ;;  %p16085_p11 = scmp.lt.u32.totalorder %s16081_s5, %s18375_s27 }
 0x24f   :  { %p16087_p12 = pnand %p16085_p11, %p16082_p10 }
 0x251   :  { %16090 = shalt.err (!%p16087_p12)
}
 0x252   :  { %s16091_s26 = scalar_lea.vmem %s435_s25, 16  ;;  %s16095_s14 = scalar_lea.vmem %s435_s25, 32 }
 0x253   :  { %p16092_p13 = scmp.ne.s32.totalorder %s435_s25, %s16091_s26  ;;  %p16096_p0 = scmp.lt.s32.totalorder %s435_s25, %s435_s25 }
 0x254   :  { %p16097_p1 = scmp.lt.s32.totalorder %s16095_s14, %s16091_s26 }
 0x256   :  { %p16098_p2 = por %p16097_p1, %p16096_p0 }
 0x258   :  { %p16099_p3 = pnand %p16098_p2, %p16092_p13 }
 0x25a   :  { %16102 = shalt.err (!%p16099_p3)
}
 0x25b   :  { %s18376_s0 = sld [smem:[#allocation111_spill]] }
 0x25c   :  { %437 = dma.hbm_to_vmem [thread:$0]  %s18375_s27, 16, %s435_s25, [#allocation33]  }
 0x261   :  { %s16103_s28 = scalar_lea.hbm %s18376_s0, 16 }
 0x262   :  { %p16104_p4 = scmp.ne.s32.totalorder %s18376_s0, %s16103_s28  ;;  %p16107_p5 = scmp.lt.u32.totalorder %s16103_s28, %s18376_s0 }
 0x264   :  { %p16109_p6 = pnand %p16107_p5, %p16104_p4 }
 0x266   :  { %16112 = shalt.err (!%p16109_p6)
}
 0x267   :  { %s16113_s29 = scalar_lea.vmem %s459_s21, 16  ;;  %s16117_s1 = scalar_lea.vmem %s459_s21, 32 }
 0x268   :  { %p16114_p7 = scmp.ne.s32.totalorder %s459_s21, %s16113_s29  ;;  %p16118_p8 = scmp.lt.s32.totalorder %s459_s21, %s459_s21 }
 0x269   :  { %p16119_p9 = scmp.lt.s32.totalorder %s16117_s1, %s16113_s29 }
 0x26b   :  { %p16120_p10 = por %p16119_p9, %p16118_p8 }
 0x26d   :  { %p16121_p11 = pnand %p16120_p10, %p16114_p7 }
 0x26f   :  { %16124 = shalt.err (!%p16121_p11)
}
 0x270   :  { %s18377_s6 = sld [smem:[#allocation112_spill]]  ;;  %s16339_s3 = smov [#allocation40]  }
 0x271   :  { %461 = dma.hbm_to_vmem [thread:$0]  %s18376_s0, 16, %s459_s21, [#allocation36]  }
 0x272   :  { %s478_s2 = sshll.u32 %s16339_s3, 4  ;;  %s16340_s8 = smov [#allocation43]   ;;  %s479_s2 = int_to_ptr.vmem [resolvable:$true] %s478_s2 }
 0x273   :  { %s500_s17 = sshll.u32 %s16340_s8, 4  ;;  %s501_s17 = int_to_ptr.vmem [resolvable:$true] %s500_s17 }
 0x276   :  { %s16125_s7 = scalar_lea.hbm %s18377_s6, 16 }
 0x277   :  { %p16126_p12 = scmp.ne.s32.totalorder %s18377_s6, %s16125_s7  ;;  %p16129_p13 = scmp.lt.u32.totalorder %s16125_s7, %s18377_s6 }
 0x279   :  { %p16131_p0 = pnand %p16129_p13, %p16126_p12 }
 0x27b   :  { %16134 = shalt.err (!%p16131_p0)
}
 0x27c   :  { %s16135_s10 = scalar_lea.vmem %s479_s2, 16  ;;  %s16139_s19 = scalar_lea.vmem %s479_s2, 32 }
 0x27d   :  { %p16136_p1 = scmp.ne.s32.totalorder %s479_s2, %s16135_s10  ;;  %p16140_p2 = scmp.lt.s32.totalorder %s479_s2, %s479_s2 }
 0x27e   :  { %p16141_p3 = scmp.lt.s32.totalorder %s16139_s19, %s16135_s10 }
 0x280   :  { %p16142_p4 = por %p16141_p3, %p16140_p2 }
 0x282   :  { %p16143_p5 = pnand %p16142_p4, %p16136_p1 }
 0x284   :  { %16146 = shalt.err (!%p16143_p5)
}
 0x285   :  { %s18378_s9 = sld [smem:[#allocation114_spill]] }
 0x286   :  { %481 = dma.hbm_to_vmem [thread:$0]  %s18377_s6, 16, %s479_s2, [#allocation39]  }
 0x28b   :  { %s16147_s11 = scalar_lea.hbm %s18378_s9, 16 }
 0x28c   :  { %p16148_p6 = scmp.ne.s32.totalorder %s18378_s9, %s16147_s11  ;;  %p16151_p7 = scmp.lt.u32.totalorder %s16147_s11, %s18378_s9 }
 0x28e   :  { %p16153_p8 = pnand %p16151_p7, %p16148_p6 }
 0x290   :  { %16156 = shalt.err (!%p16153_p8)
}
 0x291   :  { %s16157_s12 = scalar_lea.vmem %s501_s17, 16  ;;  %s16161_s15 = scalar_lea.vmem %s501_s17, 32 }
 0x292   :  { %p16158_p9 = scmp.ne.s32.totalorder %s501_s17, %s16157_s12  ;;  %p16162_p10 = scmp.lt.s32.totalorder %s501_s17, %s501_s17 }
 0x293   :  { %p16163_p11 = scmp.lt.s32.totalorder %s16161_s15, %s16157_s12 }
 0x295   :  { %p16164_p12 = por %p16163_p11, %p16162_p10 }
 0x297   :  { %p16165_p13 = pnand %p16164_p12, %p16158_p9 }
 0x299   :  { %16168 = shalt.err (!%p16165_p13)
}
 0x29a   :  { %503 = dma.hbm_to_vmem [thread:$0]  %s18378_s9, 16, %s501_s17, [#allocation42]  }
 0x29b   :  { %s16341_s16 = smov [#allocation46]   ;;  %s16169_s30 = scalar_lea.hbm %s16697_s13, 16 }
 0x29c   :  { %s522_s18 = sshll.u32 %s16341_s16, 4  ;;  %p16170_p0 = scmp.ne.s32.totalorder %s16697_s13, %s16169_s30  ;;  %s523_s18 = int_to_ptr.vmem [resolvable:$true] %s522_s18 }
 0x29d   :  { %p16173_p1 = scmp.lt.u32.totalorder %s16169_s30, %s16697_s13 }
 0x29f   :  { %p16175_p2 = pnand %p16173_p1, %p16170_p0 }
 0x2a1   :  { %16178 = shalt.err (!%p16175_p2)
}
 0x2a2   :  { %s16179_s22 = scalar_lea.vmem %s523_s18, 16  ;;  %s16183_s27 = scalar_lea.vmem %s523_s18, 32 }
 0x2a3   :  { %p16180_p3 = scmp.ne.s32.totalorder %s523_s18, %s16179_s22  ;;  %p16184_p4 = scmp.lt.s32.totalorder %s523_s18, %s523_s18 }
 0x2a4   :  { %p16185_p5 = scmp.lt.s32.totalorder %s16183_s27, %s16179_s22 }
 0x2a6   :  { %p16186_p6 = por %p16185_p5, %p16184_p4 }
 0x2a8   :  { %p16187_p7 = pnand %p16186_p6, %p16180_p3 }
 0x2aa   :  { %16190 = shalt.err (!%p16187_p7)
}
 0x2ab   :  { %525 = dma.hbm_to_vmem [thread:$0]  %s16697_s13, 16, %s523_s18, [#allocation45]  }
 0x2ac   :  { %16213 = dma.done.wait [#allocation3], 16  }
 0x2ad   :  { %16214 = vsyncadd [#allocation3], 4294967280 }
 0x2ae   :  { %16215 = dma.done.wait [#allocation6], 32  }
 0x2af   :  { %16216 = vsyncadd [#allocation6], 4294967264 }
 0x2b0   :  { %16217 = dma.done.wait [#allocation9], 32  }
 0x2b1   :  { %16218 = vsyncadd [#allocation9], 4294967264 }
 0x2b2   :  { %16219 = dma.done.wait [#allocation12], 32  }
 0x2b3   :  { %16220 = vsyncadd [#allocation12], 4294967264 }
 0x2b4   :  { %16221 = dma.done.wait [#allocation15], 32  }
 0x2b5   :  { %16222 = vsyncadd [#allocation15], 4294967264 }
 0x2b6   :  { %16223 = dma.done.wait [#allocation18], 32  }
 0x2b7   :  { %16224 = vsyncadd [#allocation18], 4294967264 }
 0x2b8   :  { %16225 = dma.done.wait [#allocation21], 32  }
 0x2b9   :  { %16226 = vsyncadd [#allocation21], 4294967264 }
 0x2ba   :  { %16227 = dma.done.wait [#allocation24], 32  }
 0x2bb   :  { %16228 = vsyncadd [#allocation24], 4294967264 }
 0x2bc   :  { %16229 = dma.done.wait [#allocation27], 32  }
 0x2bd   :  { %16230 = vsyncadd [#allocation27], 4294967264 }
 0x2be   :  { %16231 = dma.done.wait [#allocation30], 32  }
 0x2bf   :  { %16232 = vsyncadd [#allocation30], 4294967264 }
 0x2c0   :  { %16233 = dma.done.wait [#allocation33], 32  }
 0x2c1   :  { %16234 = vsyncadd [#allocation33], 4294967264 }
 0x2c2   :  { %16235 = dma.done.wait [#allocation36], 32  }
 0x2c3   :  { %16236 = vsyncadd [#allocation36], 4294967264 }
 0x2c4   :  { %16237 = dma.done.wait [#allocation39], 32  }
 0x2c5   :  { %16238 = vsyncadd [#allocation39], 4294967264 }
 0x2c6   :  { %16239 = dma.done.wait [#allocation42], 32  }
 0x2c7   :  { %16240 = vsyncadd [#allocation42], 4294967264 }
 0x2c8   :  { %16241 = dma.done.wait [#allocation45], 32  }
 0x2c9   :  { %16242 = vsyncadd [#allocation45], 4294967264  ;;  %s18379_s13 = sld [smem:[#allocation64_spill]]  ;;  %s18380_s20 = sld [smem:[#allocation107_spill]]  ;;  %vm633_vm0 = vcmask 261120   ;;  %v16343_v57 = vmov 0.0  }
 0x2ca   :  { %s16342_s25 = smov 96   ;;  %v13342_v26 = vld [vmem:[#allocation31] ss:$0 sm:$0xff]  ;;  %v13340_v44 = vld [vmem:[#allocation23] ss:$0 sm:$0xff]  ;;  %14038 = vmatprep.subr.mxu0 %v16343_v57  ;;  %vm16344_vm5 = vmmov 0  }
 0x2cb   :  { %v13341_v46 = vld [vmem:[#allocation25] ss:$0 sm:$0xff]  ;;  %14040 = vmatprep.mubr.msk.f32.mxu0 %vm16344_vm5, %v16343_v57  ;;  %s18381_s23 = sld [smem:[#allocation66_spill]]  ;;  %vm884_vm6 = vcmask 64512   ;;  %s16345_s21 = smov 120   ;;  %vm2714_vm13 = vcmask 523264  }
 0x2cc   :  { %s16346_s5 = smov 112   ;;  %s16347_s26 = smov 88  }
 0x2cd   :  { %s16348_s14 = smov 80   ;;  %s16349_s0 = smov 104  }
 0x2ce   :  { %s18382_s28 = sld [smem:[#allocation105_spill]]  ;;  %s16350_s29 = smov 72  }
 0x2cf   :  { %v16821_v0 = vld [vmem:[%s18379_s13] sm:$0xff]  ;;  %v16824_v1 = vld [vmem:[%s18379_s13 + $0x8] sm:$0xff]  ;;  %v693_v17 = vld [vmem:[%s18380_s20 + $0x10] sm:$0xff]  ;;  %s18383_s1 = sld [smem:[#allocation101_spill]]  ;;  %s18384_s6 = sld [smem:[#allocation102_spill]] }
 0x2d0   :  { %v634_v2 = vsel %vm633_vm0, %v16821_v0, 0.0  ;;  %v637_v3 = vsel %vm633_vm0, %v16824_v1, 0.0  ;;  %v691_v4 = vld [vmem:[%s18380_s20] sm:$0xff]  ;;  %v692_v5 = vld [vmem:[%s18380_s20 + $0x8] sm:$0xff]  ;;  %v694_v18 = vld [vmem:[%s18380_s20 + $0x18] sm:$0xff]  ;;  %s18386_s3 = sld [smem:[#allocation65_spill]] }
 0x2d1   :  { %635 = vadd.xlane.f32.xlu0 %v634_v2  ;;  %v15205_v6 = vpack.i.bf16 %v692_v5, %v691_v4  ;;  %v15210_v19 = vpack.i.bf16 %v694_v18, %v693_v17  ;;  %v14868_v20 = vpack.c.bf16 %v692_v5, %v691_v4  ;;  %v14872_v21 = vpack.c.bf16 %v694_v18, %v693_v17  ;;  %s18387_s2 = sld [smem:[#allocation81_spill]]  ;;  %s18388_s8 = sld [smem:[#allocation109_spill]] }
 0x2d2   :  { %s18389_s17 = sld [smem:[#allocation80_spill]]  ;;  %s18390_s7 = sld [smem:[#allocation110_spill]] }
 0x2d3   :  { %14869 = vmatprep.subr.bf16.mxu1 %v14868_v20  ;;  %s18391_s10 = sld [smem:[#allocation72_spill]]  ;;  %s18392_s19 = sld [smem:[#allocation73_spill]] }
 0x2d4   :  { %14871 = vmatpush3.bf16.msra.mxu1 %v14868_v20  ;;  %s18393_s9 = sld [smem:[#allocation67_spill]]  ;;  %s18394_s11 = sld [smem:[#allocation79_spill]] }
 0x2d5   :  { %638 = vadd.xlane.f32.xlu0 %v637_v3  ;;  %14873 = vmatprep.subr.bf16.mxu1 %v14872_v21  ;;  %s18395_s12 = sld [smem:[#allocation78_spill]]  ;;  %s18396_s15 = sld [smem:[#allocation85_spill]] }
 0x2d6   :  { %s18397_s16 = sld [smem:[#allocation84_spill]]  ;;  %s18398_s18 = sld [smem:[#allocation74_spill]] }
 0x2d7   :  { %s18399_s30 = sld [smem:[#allocation75_spill]]  ;;  %s18401_s27 = sld [smem:[#allocation82_spill]] }
 0x2d8   :  { %14875 = vmatpush3.bf16.msra.mxu1 %v14872_v21  ;;  %s18400_s22 = sld [smem:[#allocation83_spill]]  ;;  %s18402_s13 = sld [smem:[#allocation70_spill]] }
 0x2d9   :  { %s18403_s20 = sld [smem:[#allocation71_spill]] }
 0x2eb   :  { %15206 = vrot.lane.b32.xlu0 %v15205_v6, %s16342_s25 }
 0x35e   :  { %v636_v7 = vpop.xlane.xlu0 %635 }
 0x35f   :  { %v641_v8 = vmul.f32 0.03125, %v636_v7  ;;  %v16874_v7 = vld [vmem:[%s18381_s23 + $0x1] ss:$0 sm:$0xff] }
 0x360   :  { %vm626_vm7 = vcmp.gt.s32.totalorder %v16874_v7, 0 }
 0x361   :  { %v643_v9 = vsub.f32 %v16821_v0, %v641_v8 }
 0x362   :  { %v639_v10 = vpop.xlane.xlu0 %638 }
 0x363   :  { %v642_v11 = vmul.f32 0.03125, %v639_v10  ;;  %v645_v12 = vmul.f32 %v643_v9, %v643_v9 }
 0x365   :  { %v644_v13 = vsub.f32 %v16824_v1, %v642_v11  ;;  %v647_v14 = vsel %vm633_vm0, %v645_v12, 0.0 }
 0x366   :  { %648 = vadd.xlane.f32.xlu1 %v647_v14  ;;  %v15207_v22 = vpop.permute.xlu0 %15206 }
 0x367   :  { %v646_v15 = vmul.f32 %v644_v13, %v644_v13  ;;  %v15209_v23 = vunpack.i.h.bf16 %v15207_v22  ;;  %v15208_v24 = vunpack.i.l.bf16 %v15207_v22 }
 0x369   :  { %v650_v16 = vsel %vm633_vm0, %v646_v15, 0.0  ;;  %v14876_v25 = vpack.c.bf16 %v15209_v23, %v15208_v24 }
 0x36a   :  { %651 = vadd.xlane.f32.xlu1 %v650_v16 }
 0x36b   :  { %14877 = vmatprep.subr.bf16.mxu1 %v14876_v25 }
 0x37b   :  { %15211 = vrot.lane.b32.xlu1 %v15210_v19, %s16342_s25  ;;  %v16888_v19 = vld [vmem:[%s18381_s23] ss:$0 sm:$0xff]  ;;  %s18404_s23 = sld [smem:[#allocation76_spill]] }
 0x37c   :  { %vm625_vm8 = vcmp.gt.s32.totalorder %v16888_v19, 0 }
 0x37f   :  { %806 = vrot.lane.b32.xlu1 %v13342_v26, %s16342_s25 }
 0x3f3   :  { %v649_v27 = vpop.xlane.xlu1 %648 }
 0x3f4   :  { %v653_v28 = vmul.f32 0.032258064, %v649_v27 }
 0x3f6   :  { %15265 = vrsqrt.f32 %v653_v28  ;;  %vm657_vm1 = vcmp.eq.f32.partialorder %v653_v28, inf  ;;  %v660_v33 = vand.u32 2147483648, %v653_v28  ;;  %vm659_vm2 = vcmp.eq.f32.partialorder %v653_v28, 0.0 }
 0x3f7   :  { %v652_v29 = vpop.xlane.xlu1 %651 }
 0x3f8   :  { %v654_v30 = vmul.f32 0.032258064, %v652_v29 }
 0x3fa   :  { %15267 = vrsqrt.f32 %v654_v30  ;;  %vm664_vm3 = vcmp.eq.f32.partialorder %v654_v30, inf  ;;  %v667_v39 = vand.u32 2147483648, %v654_v30  ;;  %vm666_vm4 = vcmp.eq.f32.partialorder %v654_v30, 0.0 }
 0x3fb   :  { %v15212_v47 = vpop.permute.xlu1 %15211 }
 0x3fc   :  { %v15214_v52 = vunpack.i.h.bf16 %v15212_v47  ;;  %v15213_v53 = vunpack.i.l.bf16 %v15212_v47 }
 0x3fe   :  { %v14880_v56 = vpack.c.bf16 %v15214_v52, %v15213_v53 }
 0x3ff   :  { %v807_v60 = vpop.permute.xlu1 %806 }
 0x400   :  { %v15266_v31 = vpop.eup %15265 }
 0x401   :  { %v656_v32 = vmul.f32 %v15266_v31, %v653_v28 }
 0x403   :  { %v658_v34 = vsel %vm657_vm1, %v653_v28, %v656_v32 }
 0x404   :  { %v15268_v35 = vpop.eup %15267  ;;  %v661_v36 = vsel %vm659_vm2, %v660_v33, %v658_v34 }
 0x405   :  { %v663_v37 = vmul.f32 %v15268_v35, %v654_v30  ;;  %v669_v38 = vadd.f32 1e-06, %v661_v36 }
 0x407   :  { %v665_v40 = vsel %vm664_vm3, %v654_v30, %v663_v37  ;;  %15269 = vrcp.f32 %v669_v38 }
 0x408   :  { %v668_v41 = vsel %vm666_vm4, %v667_v39, %v665_v40 }
 0x409   :  { %v670_v42 = vadd.f32 1e-06, %v668_v41 }
 0x40b   :  { %15271 = vrcp.f32 %v670_v42 }
 0x411   :  { %v15270_v43 = vpop.eup %15269 }
 0x412   :  { %v673_v45 = vmul.f32 %v15270_v43, %v643_v9 }
 0x414   :  { %v681_v48 = vmul.f32 %v13340_v44, %v673_v45 }
 0x415   :  { %v15272_v49 = vpop.eup %15271 }
 0x416   :  { %v674_v50 = vmul.f32 %v15272_v49, %v644_v13  ;;  %v689_v51 = vadd.f32 %v13341_v46, %v681_v48 }
 0x418   :  { %v682_v54 = vmul.f32 %v13340_v44, %v674_v50  ;;  %14024 = vmatprep.mubr.msk.f32.mxu1 %vm633_vm0, %v689_v51 }
 0x41a   :  { %v690_v55 = vadd.f32 %v13341_v46, %v682_v54 }
 0x41c   :  { %14025 = vmatmul.mubr.msk.f32.vlgmr.msra.gmra.mrb[0].mxu1 %vm633_vm0, %v690_v55 }
 0x41d   :  { %14879 = vmatpush3.bf16.msra.mxu1 %v14876_v25  ;;  %14035 = vmatprep.mubr.msk.f32.mxu1 %vm633_vm0, %v689_v51 }
 0x41e   :  { %14881 = vmatprep.subr.bf16.mxu1 %v14880_v56 }
 0x421   :  { %14883 = vmatpush3.bf16.msra.mxu1 %v14880_v56 }
 0x422   :  { %14043 = vmatprep.subr.mxu1 %v16343_v57 }
 0x424   :  { %14036 = vmatmul.mubr.msk.f32.vlgmr.msra.gmra.mrb[2].mxu1 %vm633_vm0, %v690_v55 }
 0x425   :  { %14045 = vmatprep.mubr.msk.f32.mxu1 %vm16344_vm5, %v16343_v57 }
 0x4ef   :  { %v14026_v58 = vpop.f32.mrb[0].mxu1 }
 0x4f0   :  { %v779_v59 = vpop.f32.mrb[1].mxu1  ;;  %v785_v61 = vadd.f32 %v14026_v58, %v13342_v26 }
 0x4f1   :  { %v780_v63 = vadd.f32 %v13342_v26, %v779_v59 }
 0x4f2   :  { %v16857_v5 = vmul.f32 0.35355338, %v785_v61 }
 0x4f3   :  { %v16862_v6 = vmul.f32 0.35355338, %v780_v63 }
 0x4f7   :  { %v14037_v62 = vpop.f32.mrb[2].mxu1 }
 0x4f8   :  { %v16851_v2 = vadd.f32 %v14037_v62, %v807_v60  ;;  %v875_v3 = vpop.f32.mrb[3].mxu1 }
 0x4f9   :  { %v16853_v4 = vadd.f32 %v875_v3, %v807_v60 }
 0x4fa   :  { %14044 = vmatpush3.xpose.msk.msra.mxu1 %vm884_vm6, %v16851_v2 }
 0x4fb   :  { %14039 = vmatpush3.xpose.msk.msra.mxu0 %vm884_vm6, %v16853_v4  ;;  %14053 = vmatprep.subr.mxu1 %v16343_v57 }
 0x4fc   :  { %14048 = vmatprep.subr.mxu0 %v16343_v57 }
 0x4fd   :  { %14046 = vmatmul.mubr.msk.f32.vlgmr.msra.gmra.mrb[4].mxu1 %vm884_vm6, %v16857_v5 }
 0x4fe   :  { %14041 = vmatmul.mubr.msk.f32.vlgmr.msra.gmra.mrb[0].mxu0 %vm884_vm6, %v16862_v6  ;;  %14055 = vmatprep.mubr.msk.f32.mxu1 %vm16344_vm5, %v16343_v57 }
 0x4ff   :  { %14050 = vmatprep.mubr.msk.f32.mxu0 %vm16344_vm5, %v16343_v57 }
 0x5d0   :  { %v1033_v8 = vpop.f32.mrb[4].mxu1 }
 0x5d1   :  { %v1038_v9 = vsel %vm626_vm7, %v1033_v8, -1e+09  ;;  %v957_v10 = vpop.f32.mrb[0].mxu0  ;;  %v14047_v11 = vpop.f32.mrb[5].mxu1 }
 0x5d2   :  { %v14042_v12 = vpop.f32.mrb[1].mxu0  ;;  %v1042_v13 = vsel %vm884_vm6, %v1038_v9, -inf  ;;  %v1037_v20 = vsel %vm625_vm8, %v957_v10, -1e+09 }
 0x5d3   :  { %1043 = vmax.xlane.f32.xlu1 %v1042_v13  ;;  %v1039_v21 = vsel %vm884_vm6, %v1037_v20, -inf }
 0x5e4   :  { %1293 = vrot.lane.b32.xlu1 %v16851_v2, %s16345_s21 }
 0x5e8   :  { %1291 = vrot.lane.b32.xlu1 %v16857_v5, %s16345_s21 }
 0x660   :  { %v1044_v14 = vpop.xlane.xlu1 %1043 }
 0x661   :  { %v1046_v15 = vsub.f32 %v1038_v9, %v1044_v14 }
 0x663   :  { %v1049_v16 = vmul.f32 1.442695, %v1046_v15 }
 0x664   :  { %v1294_v25 = vpop.permute.xlu1 %1293 }
 0x665   :  { %15273 = vpow2.f32 %v1049_v16 }
 0x668   :  { %v1292_v27 = vpop.permute.xlu1 %1291 }
 0x66f   :  { %v15274_v17 = vpop.eup %15273 }
 0x670   :  { %v1054_v18 = vsel %vm884_vm6, %v15274_v17, 0.0 }
 0x671   :  { %1055 = vadd.xlane.f32.xlu0 %v1054_v18 }
 0x687   :  { %1137 = vrot.lane.b32.xlu0 %v16851_v2, %s16342_s25 }
 0x6a6   :  { %1040 = vmax.xlane.f32.xlu0 %v1039_v21 }
 0x6bc   :  { %1061 = vrot.lane.b32.xlu0 %v16853_v4, %s16342_s25 }
 0x6c0   :  { %1213 = vrot.lane.b32.xlu0 %v16862_v6, %s16345_s21 }
 0x6fe   :  { %v1056_v22 = vpop.xlane.xlu0 %1055 }
 0x6ff   :  { %15275 = vrcp.f32 %v1056_v22 }
 0x702   :  { %v1138_v23 = vpop.permute.xlu0 %1137 }
 0x703   :  { %14054 = vmatpush3.msra.mxu1 %v1138_v23 }
 0x704   :  { %14063 = vmatprep.subr.mxu1 %v16343_v57 }
 0x709   :  { %v15276_v24 = vpop.eup %15275 }
 0x70a   :  { %v1060_v26 = vmul.f32 %v15276_v24, %v15274_v17 }
 0x70c   :  { %14056 = vmatmul.mubr.msk.f32.vlgmr.msra.gmra.mrb[6].mxu1 %vm884_vm6, %v1060_v26  ;;  %v697_v26 = vld [vmem:[%s18382_s28 + $0x8] sm:$0xff] }
 0x70d   :  { %14064 = vmatpush3.xpose.msk.msra.mxu1 %vm884_vm6, %v1294_v25  ;;  %14065 = vmatprep.mubr.msk.f32.mxu1 %vm16344_vm5, %v16343_v57 }
 0x70e   :  { %14073 = vmatprep.subr.mxu1 %v16343_v57 }
 0x710   :  { %14066 = vmatmul.mubr.msk.f32.vlgmr.msra.gmra.mrb[8].mxu1 %vm884_vm6, %v1292_v27  ;;  %v696_v27 = vld [vmem:[%s18382_s28] sm:$0xff] }
 0x711   :  { %14075 = vmatprep.mubr.msk.f32.mxu1 %vm16344_vm5, %v16343_v57 }
 0x733   :  { %v1041_v28 = vpop.xlane.xlu0 %1040 }
 0x734   :  { %v1045_v29 = vsub.f32 %v1037_v20, %v1041_v28 }
 0x736   :  { %v1047_v30 = vmul.f32 1.442695, %v1045_v29 }
 0x737   :  { %v1062_v31 = vpop.permute.xlu0 %1061 }
 0x738   :  { %15277 = vpow2.f32 %v1047_v30  ;;  %14049 = vmatpush3.msra.mxu0 %v1062_v31 }
 0x739   :  { %14058 = vmatprep.subr.mxu0 %v16343_v57 }
 0x73b   :  { %v1214_v40 = vpop.permute.xlu0 %1213 }
 0x742   :  { %v15278_v32 = vpop.eup %15277 }
 0x743   :  { %v1051_v33 = vsel %vm884_vm6, %v15278_v32, 0.0 }
 0x744   :  { %1052 = vadd.xlane.f32.xlu1 %v1051_v33 }
 0x755   :  { %1215 = vrot.lane.b32.xlu1 %v16853_v4, %s16345_s21 }
 0x7d1   :  { %v1053_v34 = vpop.xlane.xlu1 %1052 }
 0x7d2   :  { %15279 = vrcp.f32 %v1053_v34 }
 0x7d5   :  { %v1216_v37 = vpop.permute.xlu1 %1215 }
 0x7dc   :  { %v15280_v35 = vpop.eup %15279 }
 0x7dd   :  { %v1059_v36 = vmul.f32 %v15280_v35, %v15278_v32 }
 0x7df   :  { %14051 = vmatmul.mubr.msk.f32.vlgmr.msra.gmra.mrb[2].mxu0 %vm884_vm6, %v1059_v36  ;;  %v16912_v38 = vpop.f32.mrb[6].mxu1 }
 0x7e0   :  { %14059 = vmatpush3.xpose.msk.msra.mxu0 %vm884_vm6, %v1216_v37  ;;  %v14057_v39 = vpop.f32.mrb[7].mxu1  ;;  %14060 = vmatprep.mubr.msk.f32.mxu0 %vm16344_vm5, %v16343_v57 }
 0x7e1   :  { %14068 = vmatprep.subr.mxu0 %v16343_v57 }
 0x7e3   :  { %14061 = vmatmul.mubr.msk.f32.vlgmr.msra.gmra.mrb[4].mxu0 %vm884_vm6, %v1214_v40  ;;  %v1365_v41 = vpop.f32.mrb[8].mxu1 }
 0x7e4   :  { %v1370_v42 = vsel %vm626_vm7, %v1365_v41, -1e+09  ;;  %v14067_v43 = vpop.f32.mrb[9].mxu1  ;;  %14070 = vmatprep.mubr.msk.f32.mxu0 %vm16344_vm5, %v16343_v57  ;;  %v698_v41 = vld [vmem:[%s18382_s28 + $0x10] sm:$0xff] }
 0x7e5   :  { %v1374_v44 = vsel %vm884_vm6, %v1370_v42, -inf }
 0x7e6   :  { %1375 = vmax.xlane.f32.xlu1 %v1374_v44 }
 0x7f7   :  { %1709 = vrot.lane.b32.xlu1 %v16853_v4, %s16346_s5 }
 0x7fb   :  { %1707 = vrot.lane.b32.xlu1 %v16862_v6, %s16346_s5 }
 0x7ff   :  { %1785 = vrot.lane.b32.xlu1 %v16857_v5, %s16346_s5 }
 0x873   :  { %v1376_v45 = vpop.xlane.xlu1 %1375 }
 0x874   :  { %v1378_v46 = vsub.f32 %v1370_v42, %v1376_v45 }
 0x876   :  { %v1381_v47 = vmul.f32 1.442695, %v1378_v46 }
 0x877   :  { %v1710_v59 = vpop.permute.xlu1 %1709 }
 0x878   :  { %15281 = vpow2.f32 %v1381_v47 }
 0x87b   :  { %v1708_v62 = vpop.permute.xlu1 %1707 }
 0x87f   :  { %v1786_v3 = vpop.permute.xlu1 %1785 }
 0x882   :  { %v15282_v48 = vpop.eup %15281 }
 0x883   :  { %v1386_v49 = vsel %vm884_vm6, %v15282_v48, 0.0 }
 0x884   :  { %1387 = vadd.xlane.f32.xlu0 %v1386_v49 }
 0x89a   :  { %1469 = vrot.lane.b32.xlu0 %v16851_v2, %s16347_s26 }
 0x89e   :  { %1787 = vrot.lane.b32.xlu0 %v16851_v2, %s16346_s5 }
 0x8b2   :  { %v16935_v50 = vpop.f32.mrb[2].mxu0 }
 0x8b3   :  { %v14052_v51 = vpop.f32.mrb[3].mxu0 }
 0x8b6   :  { %v1287_v52 = vpop.f32.mrb[4].mxu0 }
 0x8b7   :  { %v14062_v53 = vpop.f32.mrb[5].mxu0  ;;  %v1369_v54 = vsel %vm625_vm8, %v1287_v52, -1e+09 }
 0x8b8   :  { %v1371_v55 = vsel %vm884_vm6, %v1369_v54, -inf }
 0x8bd   :  { %1372 = vmax.xlane.f32.xlu0 %v1371_v55 }
 0x8d3   :  { %1393 = vrot.lane.b32.xlu0 %v16853_v4, %s16347_s26 }
 0x8d7   :  { %1887 = vrot.lane.b32.xlu0 %v16853_v4, %s16348_s14 }
 0x8db   :  { %2124 = vrot.lane.b32.xlu0 %v16853_v4, %s16349_s0 }
 0x8df   :  { %2202 = vrot.lane.b32.xlu0 %v16851_v2, %s16349_s0 }
 0x8e3   :  { %2122 = vrot.lane.b32.xlu0 %v16862_v6, %s16349_s0 }
 0x8e7   :  { %2200 = vrot.lane.b32.xlu0 %v16857_v5, %s16349_s0 }
 0x911   :  { %v1388_v56 = vpop.xlane.xlu0 %1387 }
 0x912   :  { %15283 = vrcp.f32 %v1388_v56 }
 0x915   :  { %v1470_v58 = vpop.permute.xlu0 %1469 }
 0x916   :  { %14074 = vmatpush3.msra.mxu1 %v1470_v58 }
 0x917   :  { %14088 = vmatprep.subr.mxu1 %v16343_v57 }
 0x919   :  { %v1788_v63 = vpop.permute.xlu0 %1787 }
 0x91c   :  { %v15284_v60 = vpop.eup %15283 }
 0x91d   :  { %v1392_v61 = vmul.f32 %v15284_v60, %v15282_v48 }
 0x91f   :  { %14076 = vmatmul.mubr.msk.f32.vlgmr.msra.gmra.mrb[10].mxu1 %vm884_vm6, %v1392_v61 }
 0x920   :  { %14089 = vmatpush3.xpose.msk.msra.mxu1 %vm884_vm6, %v1710_v59  ;;  %14090 = vmatprep.mubr.msk.f32.mxu1 %vm16344_vm5, %v16343_v57 }
 0x921   :  { %14093 = vmatprep.subr.mxu1 %v16343_v57 }
 0x923   :  { %14091 = vmatmul.mubr.msk.f32.vlgmr.msra.gmra.mrb[12].mxu1 %vm884_vm6, %v1708_v62 }
 0x924   :  { %14094 = vmatpush3.xpose.msk.msra.mxu1 %vm884_vm6, %v1788_v63  ;;  %14095 = vmatprep.mubr.msk.f32.mxu1 %vm16344_vm5, %v16343_v57 }
 0x925   :  { %14103 = vmatprep.subr.mxu1 %v16343_v57 }
 0x927   :  { %14096 = vmatmul.mubr.msk.f32.vlgmr.msra.gmra.mrb[14].mxu1 %vm884_vm6, %v1786_v3 }
 0x928   :  { %14105 = vmatprep.mubr.msk.f32.mxu1 %vm16344_vm5, %v16343_v57 }
 0x94a   :  { %v1373_v5 = vpop.xlane.xlu0 %1372 }
 0x94b   :  { %v1377_v6 = vsub.f32 %v1369_v54, %v1373_v5 }
 0x94d   :  { %v1379_v8 = vmul.f32 1.442695, %v1377_v6 }
 0x94e   :  { %v1394_v9 = vpop.permute.xlu0 %1393 }
 0x94f   :  { %15285 = vpow2.f32 %v1379_v8  ;;  %14069 = vmatpush3.msra.mxu0 %v1394_v9 }
 0x950   :  { %14078 = vmatprep.subr.mxu0 %v697_v26 }
 0x952   :  { %v1888_v42 = vpop.permute.xlu0 %1887 }
 0x956   :  { %v2125_v46 = vpop.permute.xlu0 %2124 }
 0x959   :  { %v15286_v10 = vpop.eup %15285 }
 0x95a   :  { %v1383_v11 = vsel %vm884_vm6, %v15286_v10, 0.0 }
 0x95b   :  { %1384 = vadd.xlane.f32.xlu1 %v1383_v11 }
 0x9e8   :  { %v1385_v12 = vpop.xlane.xlu1 %1384 }
 0x9e9   :  { %15287 = vrcp.f32 %v1385_v12 }
 0x9f2   :  { %v1541_v13 = vpop.f32.mrb[10].mxu1 }
 0x9f3   :  { %v15288_v14 = vpop.eup %15287  ;;  %v14077_v15 = vpop.f32.mrb[11].mxu1 }
 0x9f4   :  { %v1391_v16 = vmul.f32 %v15288_v14, %v15286_v10 }
 0x9f6   :  { %14071 = vmatmul.mubr.msk.f32.vlgmr.msra.gmra.mrb[6].mxu0 %vm884_vm6, %v1391_v16  ;;  %v1781_v17 = vpop.f32.mrb[12].mxu1 }
 0x9f7   :  { %v1863_v18 = vsel %vm625_vm8, %v1781_v17, -1e+09  ;;  %v14092_v20 = vpop.f32.mrb[13].mxu1  ;;  %14079 = vmatpush3.msra.mxu0 %v697_v26 }
 0x9f8   :  { %v1865_v21 = vsel %vm884_vm6, %v1863_v18, -inf  ;;  %14083 = vmatprep.subr.mxu0 %v696_v27 }
 0x9f9   :  { %1866 = vmax.xlane.f32.xlu1 %v1865_v21 }
 0x9fa   :  { %v1859_v22 = vpop.f32.mrb[14].mxu1 }
 0x9fb   :  { %v1864_v23 = vsel %vm626_vm7, %v1859_v22, -1e+09  ;;  %v14097_v24 = vpop.f32.mrb[15].mxu1  ;;  %v699_v22 = vld [vmem:[%s18382_s28 + $0x18] sm:$0xff]  ;;  %s18405_s28 = sld [smem:[#allocation77_spill]] }
 0x9fc   :  { %v1868_v25 = vsel %vm884_vm6, %v1864_v23, -inf }
 0x9fd   :  { %1869 = vmax.xlane.f32.xlu1 %v1868_v25 }
 0xa86   :  { %v1867_v28 = vpop.xlane.xlu1 %1866 }
 0xa87   :  { %v1871_v29 = vsub.f32 %v1863_v18, %v1867_v28 }
 0xa89   :  { %v1873_v30 = vmul.f32 1.442695, %v1871_v29 }
 0xa8a   :  { %v1870_v31 = vpop.xlane.xlu1 %1869 }
 0xa8b   :  { %15289 = vpow2.f32 %v1873_v30  ;;  %v1872_v32 = vsub.f32 %v1864_v23, %v1870_v31 }
 0xa8d   :  { %v1875_v33 = vmul.f32 1.442695, %v1872_v32 }
 0xa8f   :  { %15291 = vpow2.f32 %v1875_v33 }
 0xa95   :  { %v15290_v34 = vpop.eup %15289 }
 0xa96   :  { %v1877_v35 = vsel %vm884_vm6, %v15290_v34, 0.0 }
 0xa97   :  { %1878 = vadd.xlane.f32.xlu1 %v1877_v35 }
 0xa99   :  { %v15292_v36 = vpop.eup %15291 }
 0xa9a   :  { %v1880_v37 = vsel %vm884_vm6, %v15292_v36, 0.0 }
 0xa9b   :  { %1881 = vadd.xlane.f32.xlu1 %v1880_v37 }
 0xaac   :  { %1963 = vrot.lane.b32.xlu1 %v16851_v2, %s16348_s14 }
 0xac9   :  { %v1465_v39 = vpop.f32.mrb[6].mxu0 }
 0xaca   :  { %v14072_v40 = vpop.f32.mrb[7].mxu0  ;;  %14080 = vmatprep.mubr.msk.f32.mxu0 %vm884_vm6, %v1465_v39 }
 0xacb   :  { %14081 = vmatmul.mubr.msk.f32.vlgmr.msra.gmra.mrb[8].mxu0 %vm884_vm6, %v1541_v13 }
 0xacc   :  { %14085 = vmatprep.mubr.msk.f32.mxu0 %vm884_vm6, %v16935_v50  ;;  %14084 = vmatpush3.msra.mxu0 %v696_v27 }
 0xacd   :  { %14098 = vmatprep.subr.mxu0 %v16343_v57 }
 0xad3   :  { %14086 = vmatmul.mubr.msk.f32.vlgmr.msra.gmra.mrb[8].mxu0 %vm884_vm6, %v16912_v38  ;;  %v2203_v38 = vpop.permute.xlu0 %2202 }
 0xad4   :  { %14099 = vmatpush3.msra.mxu0 %v1888_v42  ;;  %14100 = vmatprep.mubr.msk.f32.mxu0 %vm16344_vm5, %v16343_v57 }
 0xad5   :  { %14108 = vmatprep.subr.mxu0 %v698_v41 }
 0xad7   :  { %v2123_v51 = vpop.permute.xlu0 %2122 }
 0xadb   :  { %v2201_v56 = vpop.permute.xlu0 %2200 }
 0xb24   :  { %v1879_v43 = vpop.xlane.xlu1 %1878 }
 0xb25   :  { %15293 = vrcp.f32 %v1879_v43 }
 0xb28   :  { %v1882_v44 = vpop.xlane.xlu1 %1881 }
 0xb29   :  { %15295 = vrcp.f32 %v1882_v44 }
 0xb2c   :  { %v1964_v45 = vpop.permute.xlu1 %1963 }
 0xb2d   :  { %14104 = vmatpush3.msra.mxu1 %v1964_v45 }
 0xb2e   :  { %14113 = vmatprep.subr.mxu1 %v16343_v57 }
 0xb2f   :  { %v15294_v47 = vpop.eup %15293 }
 0xb30   :  { %v1885_v48 = vmul.f32 %v15294_v47, %v15290_v34  ;;  %v2605_v47 = vld [vmem:[%s18383_s1] sm:$0xff] }
 0xb32   :  { %14101 = vmatmul.mubr.msk.f32.vlgmr.msra.gmra.mrb[10].mxu0 %vm884_vm6, %v1885_v48  ;;  %v2606_v48 = vld [vmem:[%s18383_s1 + $0x8] sm:$0xff] }
 0xb33   :  { %v15296_v49 = vpop.eup %15295  ;;  %14109 = vmatpush3.msra.mxu0 %v698_v41 }
 0xb34   :  { %v1886_v50 = vmul.f32 %v15296_v49, %v15292_v36  ;;  %14118 = vmatprep.subr.mxu0 %v16343_v57  ;;  %v2607_v49 = vld [vmem:[%s18383_s1 + $0x10] sm:$0xff] }
 0xb36   :  { %14106 = vmatmul.mubr.msk.f32.vlgmr.msra.gmra.mrb[16].mxu1 %vm884_vm6, %v1886_v50  ;;  %v2608_v50 = vld [vmem:[%s18383_s1 + $0x18] sm:$0xff]  ;;  %s18406_s1 = sld [smem:[#allocation68_spill]] }
 0xb37   :  { %14114 = vmatpush3.xpose.msk.msra.mxu1 %vm884_vm6, %v2125_v46  ;;  %14115 = vmatprep.mubr.msk.f32.mxu1 %vm16344_vm5, %v16343_v57 }
 0xb38   :  { %14123 = vmatprep.subr.mxu1 %v16343_v57 }
 0xb3a   :  { %14116 = vmatmul.mubr.msk.f32.vlgmr.msra.gmra.mrb[18].mxu1 %vm884_vm6, %v2123_v51  ;;  %v14888_v51 = vpack.c.bf16 %v2608_v50, %v2607_v49 }
 0xb3b   :  { %14125 = vmatprep.mubr.msk.f32.mxu1 %vm16344_vm5, %v16343_v57 }
 0xc05   :  { %v1959_v52 = vpop.f32.mrb[10].mxu0 }
 0xc06   :  { %v14102_v53 = vpop.f32.mrb[11].mxu0  ;;  %14110 = vmatprep.mubr.msk.f32.mxu0 %vm884_vm6, %v1959_v52  ;;  %v2699_v52 = vld [vmem:[%s18384_s6] sm:$0xff] }
 0xc07   :  { %v2700_v53 = vld [vmem:[%s18384_s6 + $0x8] sm:$0xff] }
 0xc09   :  { %v2035_v54 = vpop.f32.mrb[16].mxu1 }
 0xc0a   :  { %v14107_v55 = vpop.f32.mrb[17].mxu1  ;;  %14111 = vmatmul.mubr.msk.f32.vlgmr.msra.gmra.mrb[8].mxu0 %vm884_vm6, %v2035_v54  ;;  %v2701_v54 = vld [vmem:[%s18384_s6 + $0x10] sm:$0xff] }
 0xc0b   :  { %14119 = vmatpush3.xpose.msk.msra.mxu0 %vm884_vm6, %v2203_v38  ;;  %14120 = vmatprep.mubr.msk.f32.mxu0 %vm16344_vm5, %v16343_v57  ;;  %v14884_v38 = vpack.c.bf16 %v2606_v48, %v2605_v47  ;;  %v14892_v55 = vpack.c.bf16 %v2700_v53, %v2699_v52 }
 0xc0c   :  { %14128 = vmatprep.subr.mxu0 %v16343_v57 }
 0xc0d   :  { %v2196_v58 = vpop.f32.mrb[18].mxu1 }
 0xc0e   :  { %v2278_v59 = vsel %vm625_vm8, %v2196_v58, -1e+09  ;;  %v14117_v60 = vpop.f32.mrb[19].mxu1  ;;  %14121 = vmatmul.mubr.msk.f32.vlgmr.msra.gmra.mrb[12].mxu0 %vm884_vm6, %v2201_v56  ;;  %v2702_v56 = vld [vmem:[%s18384_s6 + $0x18] sm:$0xff] }
 0xc0f   :  { %v2280_v61 = vsel %vm884_vm6, %v2278_v59, -inf  ;;  %14130 = vmatprep.mubr.msk.f32.mxu0 %vm16344_vm5, %v16343_v57  ;;  %v14896_v58 = vpack.c.bf16 %v2702_v56, %v2701_v54  ;;  %v2704_v60 = vld [vmem:[%s18384_s6 + $0x28] sm:$0xff] }
 0xc10   :  { %2281 = vmax.xlane.f32.xlu1 %v2280_v61  ;;  %v2857_v56 = vld [vmem:[%s16687_s4 + $0x8] sm:$0xff] }
 0xc21   :  { %2302 = vrot.lane.b32.xlu1 %v16853_v4, %s16350_s29 }
 0xc9d   :  { %v2282_v62 = vpop.xlane.xlu1 %2281 }
 0xc9e   :  { %v2286_v3 = vsub.f32 %v2278_v59, %v2282_v62  ;;  %v2703_v59 = vld [vmem:[%s18384_s6 + $0x20] sm:$0xff] }
 0xc9f   :  { %v14900_v61 = vpack.c.bf16 %v2704_v60, %v2703_v59  ;;  %v2858_v59 = vld [vmem:[%s16687_s4 + $0x10] sm:$0xff]  ;;  %v2859_v60 = vld [vmem:[%s16687_s4 + $0x18] sm:$0xff] }
 0xca0   :  { %v2288_v5 = vmul.f32 1.442695, %v2286_v3 }
 0xca1   :  { %v2303_v63 = vpop.permute.xlu1 %2302 }
 0xca2   :  { %14124 = vmatpush3.msra.mxu1 %v2303_v63  ;;  %15297 = vpow2.f32 %v2288_v5 }
 0xca3   :  { %14885 = vmatprep.subr.bf16.mxu1 %v14884_v38 }
 0xcac   :  { %v15298_v11 = vpop.eup %15297 }
 0xcad   :  { %v2292_v12 = vsel %vm884_vm6, %v15298_v11, 0.0 }
 0xce1   :  { %v2274_v6 = vpop.f32.mrb[12].mxu0 }
 0xce2   :  { %v2279_v8 = vsel %vm626_vm7, %v2274_v6, -1e+09  ;;  %v14122_v9 = vpop.f32.mrb[13].mxu0 }
 0xce3   :  { %v2283_v10 = vsel %vm884_vm6, %v2279_v8, -inf }
 0xce4   :  { %2284 = vmax.xlane.f32.xlu0 %v2283_v10 }
 0xce8   :  { %2293 = vadd.xlane.f32.xlu0 %v2292_v12 }
 0xd71   :  { %v2285_v4 = vpop.xlane.xlu0 %2284 }
 0xd72   :  { %v2287_v13 = vsub.f32 %v2279_v8, %v2285_v4 }
 0xd74   :  { %v2290_v14 = vmul.f32 1.442695, %v2287_v13 }
 0xd75   :  { %v2294_v15 = vpop.xlane.xlu0 %2293 }
 0xd76   :  { %15299 = vpow2.f32 %v2290_v14 }
 0xd77   :  { %15301 = vrcp.f32 %v2294_v15 }
 0xd80   :  { %v15300_v16 = vpop.eup %15299 }
 0xd81   :  { %v15302_v17 = vpop.eup %15301  ;;  %v2295_v18 = vsel %vm884_vm6, %v15300_v16, 0.0 }
 0xd82   :  { %2296 = vadd.xlane.f32.xlu0 %v2295_v18  ;;  %v2300_v20 = vmul.f32 %v15302_v17, %v15298_v11 }
 0xd84   :  { %14126 = vmatmul.mubr.msk.f32.vlgmr.msra.gmra.mrb[20].mxu1 %vm884_vm6, %v2300_v20  ;;  %v13380_v20 = vld [vmem:[#allocation26] ss:$0 sm:$0xff] }
 0xd85   :  { %14887 = vmatpush3.bf16.msra.mxu1 %v14884_v38 }
 0xd86   :  { %14889 = vmatprep.subr.bf16.mxu1 %v14888_v51 }
 0xd89   :  { %14891 = vmatpush3.bf16.msra.mxu1 %v14888_v51 }
 0xd98   :  { %2378 = vrot.lane.b32.xlu0 %v16851_v2, %s16350_s29  ;;  %v13379_v2 = vld [vmem:[#allocation29] ss:$0 sm:$0xff] }
 0xe0f   :  { %v2297_v21 = vpop.xlane.xlu0 %2296 }
 0xe10   :  { %15303 = vrcp.f32 %v2297_v21 }
 0xe13   :  { %v2379_v23 = vpop.permute.xlu0 %2378 }
 0xe14   :  { %14129 = vmatpush3.msra.mxu0 %v2379_v23 }
 0xe15   :  { %14133 = vmatprep.subr.mxu0 %v699_v22 }
 0xe1a   :  { %v15304_v24 = vpop.eup %15303 }
 0xe1b   :  { %v2301_v25 = vmul.f32 %v15304_v24, %v15300_v16  ;;  %v13381_v24 = vld [vmem:[#allocation28] ss:$0 sm:$0xff] }
 0xe1d   :  { %14131 = vmatmul.mubr.msk.f32.vlgmr.msra.gmra.mrb[14].mxu0 %vm884_vm6, %v2301_v25 }
 0xe1e   :  { %14134 = vmatpush3.msra.mxu0 %v699_v22 }
 0xe1f   :  { %14893 = vmatprep.subr.bf16.mxu0 %v14892_v55 }
 0xe57   :  { %v2374_v26 = vpop.f32.mrb[20].mxu1 }
 0xe58   :  { %v14127_v27 = vpop.f32.mrb[21].mxu1  ;;  %14135 = vmatprep.mubr.msk.f32.mxu0 %vm884_vm6, %v2374_v26 }
 0xef0   :  { %v2450_v28 = vpop.f32.mrb[14].mxu0 }
 0xef1   :  { %v14132_v29 = vpop.f32.mrb[15].mxu0  ;;  %14136 = vmatmul.mubr.msk.f32.vlgmr.msra.gmra.mrb[8].mxu0 %vm884_vm6, %v2450_v28 }
 0xef2   :  { %14895 = vmatpush3.bf16.msra.mxu0 %v14892_v55  ;;  %v2705_v29 = vld [vmem:[%s18384_s6 + $0x30] sm:$0xff]  ;;  %v2856_v55 = vld [vmem:[%s16687_s4] sm:$0xff]  ;;  %s18385_s4 = sld [smem:[#allocation113_spill]] }
 0xef3   :  { %14897 = vmatprep.subr.bf16.mxu0 %v14896_v58 }
 0xef6   :  { %14899 = vmatpush3.bf16.msra.mxu0 %v14896_v58  ;;  %v15215_v58 = vpack.i.bf16 %v2857_v56, %v2856_v55 }
 0xef7   :  { %14901 = vmatprep.subr.bf16.mxu0 %v14900_v61 }
 0xefa   :  { %14903 = vmatpush3.bf16.msra.mxu0 %v14900_v61  ;;  %v15220_v61 = vpack.i.bf16 %v2859_v60, %v2858_v59 }
 0xfc4   :  { %v14137_v30 = vpop.f32.mrb[8].mxu0 }
 0xfc5   :  { %v2544_v31 = vadd.f32 %v14137_v30, %v13379_v2  ;;  %v2526_v32 = vpop.f32.mrb[9].mxu0 }
 0xfc6   :  { %v2543_v33 = vadd.f32 %v13379_v2, %v2526_v32  ;;  %v2706_v2 = vld [vmem:[%s18384_s6 + $0x38] sm:$0xff]  ;;  %s18407_s6 = sld [smem:[#allocation69_spill]] }
 0xfc7   :  { %v17028_v34 = vadd.f32 %v2544_v31, %v16824_v1  ;;  %v14904_v30 = vpack.c.bf16 %v2706_v2, %v2705_v29  ;;  %v13382_v31 = vld [vmem:[#allocation20] ss:$0 sm:$0xff] }
 0xfc8   :  { %v17031_v35 = vadd.f32 %v2543_v33, %v16821_v0 }
 0xfc9   :  { %v2552_v36 = vsel %vm633_vm0, %v17028_v34, 0.0  ;;  %14905 = vmatprep.subr.bf16.mxu0 %v14904_v30 }
 0xfca   :  { %2553 = vadd.xlane.f32.xlu0 %v2552_v36  ;;  %v2549_v37 = vsel %vm633_vm0, %v17031_v35, 0.0  ;;  %14907 = vmatpush3.bf16.msra.mxu0 %v14904_v30 }
 0xfcb   :  { %2550 = vadd.xlane.f32.xlu1 %v2549_v37  ;;  %14190 = vmatprep.subr.mxu0 %v16343_v57 }
0x1057   :  { %v2554_v39 = vpop.xlane.xlu0 %2553 }
0x1058   :  { %v2556_v40 = vmul.f32 0.03125, %v2554_v39  ;;  %v2551_v41 = vpop.xlane.xlu1 %2550 }
0x1059   :  { %v2555_v1 = vmul.f32 0.03125, %v2551_v41  ;;  %v13385_v41 = vld [vmem:[#allocation22] ss:$0 sm:$0xff] }
0x105a   :  { %v2558_v42 = vsub.f32 %v17028_v34, %v2556_v40 }
0x105b   :  { %v2557_v0 = vsub.f32 %v17031_v35, %v2555_v1 }
0x105c   :  { %v2560_v43 = vmul.f32 %v2558_v42, %v2558_v42 }
0x105d   :  { %v2559_v44 = vmul.f32 %v2557_v0, %v2557_v0 }
0x105e   :  { %v2564_v45 = vsel %vm633_vm0, %v2560_v43, 0.0 }
0x105f   :  { %2565 = vadd.xlane.f32.xlu0 %v2564_v45  ;;  %v2561_v46 = vsel %vm633_vm0, %v2559_v44, 0.0 }
0x1060   :  { %2562 = vadd.xlane.f32.xlu1 %v2561_v46 }
0x10ec   :  { %v2566_v62 = vpop.xlane.xlu0 %2565 }
0x10ed   :  { %v2568_v63 = vmul.f32 0.032258064, %v2566_v62  ;;  %v2563_v3 = vpop.xlane.xlu1 %2562  ;;  %v14908_v62 = vpack.c.bf16 %v2857_v56, %v2856_v55 }
0x10ee   :  { %v2567_v5 = vmul.f32 0.032258064, %v2563_v3  ;;  %v13390_v3 = vld [vmem:[#allocation43] ss:$0 sm:$0xff] }
0x10ef   :  { %15305 = vrsqrt.f32 %v2568_v63  ;;  %vm2578_vm9 = vcmp.eq.f32.partialorder %v2568_v63, inf  ;;  %v2581_v10 = vand.u32 2147483648, %v2568_v63  ;;  %vm2580_vm10 = vcmp.eq.f32.partialorder %v2568_v63, 0.0  ;;  %14909 = vmatprep.subr.bf16.mxu1 %v14908_v62 }
0x10f0   :  { %15307 = vrsqrt.f32 %v2567_v5  ;;  %vm2571_vm11 = vcmp.eq.f32.partialorder %v2567_v5, inf  ;;  %v2574_v4 = vand.u32 2147483648, %v2567_v5  ;;  %vm2573_vm12 = vcmp.eq.f32.partialorder %v2567_v5, 0.0 }
0x10f9   :  { %v15306_v6 = vpop.eup %15305 }
0x10fa   :  { %v15308_v8 = vpop.eup %15307  ;;  %v2577_v9 = vmul.f32 %v15306_v6, %v2568_v63 }
0x10fb   :  { %v2570_v11 = vmul.f32 %v15308_v8, %v2567_v5 }
0x10fc   :  { %v2579_v12 = vsel %vm2578_vm9, %v2568_v63, %v2577_v9  ;;  %v14912_v63 = vpack.c.bf16 %v2859_v60, %v2858_v59 }
0x10fd   :  { %v2582_v13 = vsel %vm2580_vm10, %v2581_v10, %v2579_v12  ;;  %v2572_v14 = vsel %vm2571_vm11, %v2567_v5, %v2570_v11 }
0x10fe   :  { %v2584_v15 = vadd.f32 1e-06, %v2582_v13  ;;  %v2575_v16 = vsel %vm2573_vm12, %v2574_v4, %v2572_v14 }
0x10ff   :  { %v2583_v17 = vadd.f32 1e-06, %v2575_v16 }
0x1100   :  { %15309 = vrcp.f32 %v2584_v15 }
0x1101   :  { %15311 = vrcp.f32 %v2583_v17 }
0x110a   :  { %v15310_v18 = vpop.eup %15309 }
0x110b   :  { %v15312_v21 = vpop.eup %15311  ;;  %v2588_v22 = vmul.f32 %v15310_v18, %v2558_v42 }
0x110c   :  { %v2587_v23 = vmul.f32 %v15312_v21, %v2557_v0 }
0x110d   :  { %v2596_v25 = vmul.f32 %v13380_v20, %v2588_v22 }
0x110e   :  { %v2595_v26 = vmul.f32 %v13380_v20, %v2587_v23 }
0x110f   :  { %v2604_v28 = vadd.f32 %v13381_v24, %v2596_v25 }
0x1110   :  { %v2603_v27 = vadd.f32 %v13381_v24, %v2595_v26 }
0x1112   :  { %14146 = vmatprep.mubr.msk.f32.mxu1 %vm633_vm0, %v2603_v27 }
0x1113   :  { %14147 = vmatmul.mubr.msk.f32.vlgmr.msra.gmra.mrb[22].mxu1 %vm633_vm0, %v2604_v28  ;;  %v13388_v28 = vld [vmem:[#allocation35] ss:$0 sm:$0xff] }
0x1114   :  { %14911 = vmatpush3.bf16.msra.mxu1 %v14908_v62 }
0x1115   :  { %14913 = vmatprep.subr.bf16.mxu1 %v14912_v63 }
0x1118   :  { %14915 = vmatpush3.bf16.msra.mxu1 %v14912_v63 }
0x11e6   :  { %v14148_v32 = vpop.f32.mrb[22].mxu1 }
0x11e7   :  { %v2694_v33 = vadd.f32 %v14148_v32, %v13382_v31  ;;  %v2688_v36 = vpop.f32.mrb[23].mxu1 }
0x11e8   :  { %v2689_v37 = vadd.f32 %v13382_v31, %v2688_v36 }
0x11e9   :  { %v2698_v40 = vmax.f32 %v2694_v33, 0.0  ;;  %v13389_v33 = vld [vmem:[#allocation37] ss:$0 sm:$0xff] }
0x11ea   :  { %v2697_v39 = vmax.f32 %v2689_v37, 0.0 }
0x11ec   :  { %14165 = vmatprep.mubr.msk.f32.mxu0 %vm2714_vm13, %v2697_v39 }
0x11ed   :  { %14166 = vmatmul.mubr.msk.f32.vlgmr.msra.gmra.mrb[16].mxu0 %vm2714_vm13, %v2698_v40 }
0x11ee   :  { %14192 = vmatprep.mubr.msk.f32.mxu0 %vm16344_vm5, %v16343_v57 }
0x12c0   :  { %v14167_v1 = vpop.f32.mrb[16].mxu0 }
0x12c1   :  { %v2793_v42 = vadd.f32 %v14167_v1, %v13385_v41  ;;  %v2787_v0 = vpop.f32.mrb[17].mxu0 }
0x12c2   :  { %v2788_v43 = vadd.f32 %v13385_v41, %v2787_v0 }
0x12c3   :  { %v17061_v44 = vadd.f32 %v2793_v42, %v17028_v34 }
0x12c4   :  { %v17064_v45 = vadd.f32 %v2788_v43, %v17031_v35 }
0x12c5   :  { %v2803_v46 = vsel %vm633_vm0, %v17061_v44, 0.0 }
0x12c6   :  { %2804 = vadd.xlane.f32.xlu0 %v2803_v46  ;;  %v2800_v47 = vsel %vm633_vm0, %v17064_v45, 0.0 }
0x12c7   :  { %2801 = vadd.xlane.f32.xlu1 %v2800_v47 }
0x1353   :  { %v2805_v48 = vpop.xlane.xlu0 %2804 }
0x1354   :  { %v2807_v49 = vmul.f32 0.03125, %v2805_v48  ;;  %v2802_v38 = vpop.xlane.xlu1 %2801 }
0x1355   :  { %v2806_v34 = vmul.f32 0.03125, %v2802_v38 }
0x1356   :  { %v2809_v50 = vsub.f32 %v17061_v44, %v2807_v49 }
0x1357   :  { %v2808_v35 = vsub.f32 %v17064_v45, %v2806_v34 }
0x1358   :  { %v2811_v51 = vmul.f32 %v2809_v50, %v2809_v50 }
0x1359   :  { %v2810_v52 = vmul.f32 %v2808_v35, %v2808_v35 }
0x135a   :  { %v2815_v53 = vsel %vm633_vm0, %v2811_v51, 0.0 }
0x135b   :  { %2816 = vadd.xlane.f32.xlu0 %v2815_v53  ;;  %v2812_v54 = vsel %vm633_vm0, %v2810_v52, 0.0 }
0x135c   :  { %2813 = vadd.xlane.f32.xlu1 %v2812_v54 }
0x136d   :  { %15216 = vrot.lane.b32.xlu1 %v15215_v58, %s16342_s25 }
0x1371   :  { %15221 = vrot.lane.b32.xlu0 %v15220_v61, %s16342_s25  ;;  %2971 = vrot.lane.b32.xlu1 %v13390_v3, %s16342_s25 }
0x13e8   :  { %v2817_v5 = vpop.xlane.xlu0 %2816 }
0x13e9   :  { %v2819_v6 = vmul.f32 0.032258064, %v2817_v5  ;;  %v2814_v8 = vpop.xlane.xlu1 %2813 }
0x13ea   :  { %v2818_v9 = vmul.f32 0.032258064, %v2814_v8 }
0x13eb   :  { %15313 = vrsqrt.f32 %v2819_v6  ;;  %vm2829_vm14 = vcmp.eq.f32.partialorder %v2819_v6, inf  ;;  %v2832_v16 = vand.u32 2147483648, %v2819_v6  ;;  %vm2831_vm15 = vcmp.eq.f32.partialorder %v2819_v6, 0.0 }
0x13ec   :  { %15315 = vrsqrt.f32 %v2818_v9  ;;  %vm2822_vm1 = vcmp.eq.f32.partialorder %v2818_v9, inf  ;;  %v2825_v20 = vand.u32 2147483648, %v2818_v9  ;;  %vm2824_vm2 = vcmp.eq.f32.partialorder %v2818_v9, 0.0  ;;  %v15222_v27 = vpop.permute.xlu0 %15221 }
0x13ed   :  { %v15217_v10 = vpop.permute.xlu1 %15216  ;;  %v15224_v31 = vunpack.i.h.bf16 %v15222_v27  ;;  %v15223_v32 = vunpack.i.l.bf16 %v15222_v27 }
0x13ee   :  { %v15219_v11 = vunpack.i.h.bf16 %v15217_v10  ;;  %v15218_v12 = vunpack.i.l.bf16 %v15217_v10 }
0x13ef   :  { %v14920_v41 = vpack.c.bf16 %v15224_v31, %v15223_v32 }
0x13f0   :  { %v14916_v4 = vpack.c.bf16 %v15219_v11, %v15218_v12 }
0x13f1   :  { %v2972_v0 = vpop.permute.xlu1 %2971 }
0x13f2   :  { %14917 = vmatprep.subr.bf16.mxu1 %v14916_v4 }
0x13f5   :  { %v15314_v13 = vpop.eup %15313 }
0x13f6   :  { %v15316_v14 = vpop.eup %15315  ;;  %v2828_v15 = vmul.f32 %v15314_v13, %v2819_v6 }
0x13f7   :  { %v2821_v17 = vmul.f32 %v15316_v14, %v2818_v9 }
0x13f8   :  { %v2830_v18 = vsel %vm2829_vm14, %v2819_v6, %v2828_v15 }
0x13f9   :  { %v2833_v21 = vsel %vm2831_vm15, %v2832_v16, %v2830_v18  ;;  %v2823_v22 = vsel %vm2822_vm1, %v2818_v9, %v2821_v17 }
0x13fa   :  { %v2835_v23 = vadd.f32 1e-06, %v2833_v21  ;;  %v2826_v24 = vsel %vm2824_vm2, %v2825_v20, %v2823_v22 }
0x13fb   :  { %v2834_v25 = vadd.f32 1e-06, %v2826_v24 }
0x13fc   :  { %15317 = vrcp.f32 %v2835_v23 }
0x13fd   :  { %15319 = vrcp.f32 %v2834_v25 }
0x1406   :  { %v15318_v26 = vpop.eup %15317 }
0x1407   :  { %v15320_v29 = vpop.eup %15319  ;;  %v2839_v2 = vmul.f32 %v15318_v26, %v2809_v50 }
0x1408   :  { %v2838_v30 = vmul.f32 %v15320_v29, %v2808_v35 }
0x1409   :  { %v2847_v36 = vmul.f32 %v13388_v28, %v2839_v2 }
0x140a   :  { %v2846_v37 = vmul.f32 %v13388_v28, %v2838_v30 }
0x140b   :  { %v2855_v40 = vadd.f32 %v13389_v33, %v2847_v36 }
0x140c   :  { %v2854_v39 = vadd.f32 %v13389_v33, %v2846_v37 }
0x140e   :  { %14176 = vmatprep.mubr.msk.f32.mxu1 %vm633_vm0, %v2854_v39 }
0x140f   :  { %14177 = vmatmul.mubr.msk.f32.vlgmr.msra.gmra.mrb[24].mxu1 %vm633_vm0, %v2855_v40 }
0x1410   :  { %14919 = vmatpush3.bf16.msra.mxu1 %v14916_v4  ;;  %14187 = vmatprep.mubr.msk.f32.mxu1 %vm633_vm0, %v2854_v39 }
0x1411   :  { %14921 = vmatprep.subr.bf16.mxu1 %v14920_v41 }
0x1414   :  { %14923 = vmatpush3.bf16.msra.mxu1 %v14920_v41 }
0x1415   :  { %14195 = vmatprep.subr.mxu1 %v16343_v57 }
0x1417   :  { %14188 = vmatmul.mubr.msk.f32.vlgmr.msra.gmra.mrb[26].mxu1 %vm633_vm0, %v2855_v40 }
0x1418   :  { %14197 = vmatprep.mubr.msk.f32.mxu1 %vm16344_vm5, %v16343_v57 }
0x14e2   :  { %v14178_v1 = vpop.f32.mrb[24].mxu1 }
0x14e3   :  { %v2944_v42 = vpop.f32.mrb[25].mxu1  ;;  %v2950_v43 = vadd.f32 %v14178_v1, %v13390_v3 }
0x14e4   :  { %v2945_v47 = vadd.f32 %v13390_v3, %v2944_v42 }
0x14e5   :  { %v17094_v34 = vmul.f32 0.35355338, %v2950_v43 }
0x14e6   :  { %v17099_v50 = vmul.f32 0.35355338, %v2945_v47 }
0x14ea   :  { %v14189_v46 = vpop.f32.mrb[26].mxu1 }
0x14eb   :  { %v17088_v48 = vadd.f32 %v14189_v46, %v2972_v0  ;;  %v3040_v49 = vpop.f32.mrb[27].mxu1 }
0x14ec   :  { %v17090_v38 = vadd.f32 %v3040_v49, %v2972_v0 }
0x14ed   :  { %14196 = vmatpush3.xpose.msk.msra.mxu1 %vm884_vm6, %v17088_v48 }
0x14ee   :  { %14191 = vmatpush3.xpose.msk.msra.mxu0 %vm884_vm6, %v17090_v38  ;;  %14205 = vmatprep.subr.mxu1 %v16343_v57 }
0x14ef   :  { %14200 = vmatprep.subr.mxu0 %v16343_v57 }
0x14f0   :  { %14198 = vmatmul.mubr.msk.f32.vlgmr.msra.gmra.mrb[28].mxu1 %vm884_vm6, %v17094_v34 }
0x14f1   :  { %14193 = vmatmul.mubr.msk.f32.vlgmr.msra.gmra.mrb[18].mxu0 %vm884_vm6, %v17099_v50  ;;  %14207 = vmatprep.mubr.msk.f32.mxu1 %vm16344_vm5, %v16343_v57 }
0x14f2   :  { %14202 = vmatprep.mubr.msk.f32.mxu0 %vm16344_vm5, %v16343_v57 }
0x15c3   :  { %v3197_v35 = vpop.f32.mrb[28].mxu1 }
0x15c4   :  { %v3202_v51 = vsel %vm626_vm7, %v3197_v35, -1e+09  ;;  %v3121_v52 = vpop.f32.mrb[18].mxu0  ;;  %v14199_v53 = vpop.f32.mrb[29].mxu1 }
0x15c5   :  { %v14194_v54 = vpop.f32.mrb[19].mxu0  ;;  %v3206_v55 = vsel %vm884_vm6, %v3202_v51, -inf  ;;  %v3201_v56 = vsel %vm625_vm8, %v3121_v52, -1e+09 }
0x15c6   :  { %3207 = vmax.xlane.f32.xlu1 %v3206_v55  ;;  %v3203_v58 = vsel %vm884_vm6, %v3201_v56, -inf }
0x15d7   :  { %3457 = vrot.lane.b32.xlu1 %v17088_v48, %s16345_s21 }
0x15db   :  { %3455 = vrot.lane.b32.xlu1 %v17094_v34, %s16345_s21 }
0x15ff   :  { %3204 = vmax.xlane.f32.xlu1 %v3203_v58 }
0x1610   :  { %3379 = vrot.lane.b32.xlu1 %v17090_v38, %s16345_s21 }
0x1614   :  { %3377 = vrot.lane.b32.xlu1 %v17099_v50, %s16345_s21 }
0x1618   :  { %3873 = vrot.lane.b32.xlu1 %v17090_v38, %s16346_s5 }
0x1653   :  { %v3208_v59 = vpop.xlane.xlu1 %3207 }
0x1654   :  { %v3210_v60 = vsub.f32 %v3202_v51, %v3208_v59 }
0x1656   :  { %v3213_v61 = vmul.f32 1.442695, %v3210_v60 }
0x1657   :  { %v3458_v3 = vpop.permute.xlu1 %3457 }
0x1658   :  { %15321 = vpow2.f32 %v3213_v61 }
0x165b   :  { %v3456_v5 = vpop.permute.xlu1 %3455 }
0x1662   :  { %v15322_v62 = vpop.eup %15321 }
0x1663   :  { %v3218_v63 = vsel %vm884_vm6, %v15322_v62, 0.0 }
0x1664   :  { %3219 = vadd.xlane.f32.xlu0 %v3218_v63 }
0x167a   :  { %3301 = vrot.lane.b32.xlu0 %v17088_v48, %s16342_s25 }
0x168c   :  { %v3205_v6 = vpop.xlane.xlu1 %3204 }
0x168d   :  { %v3209_v8 = vsub.f32 %v3201_v56, %v3205_v6 }
0x168f   :  { %v3211_v9 = vmul.f32 1.442695, %v3209_v8 }
0x1690   :  { %v3380_v18 = vpop.permute.xlu1 %3379 }
0x1691   :  { %15323 = vpow2.f32 %v3211_v9 }
0x1694   :  { %v3378_v21 = vpop.permute.xlu1 %3377 }
0x1698   :  { %v3874_v1 = vpop.permute.xlu1 %3873 }
0x169b   :  { %v15324_v10 = vpop.eup %15323 }
0x169c   :  { %v3215_v11 = vsel %vm884_vm6, %v15324_v10, 0.0 }
0x169d   :  { %3216 = vadd.xlane.f32.xlu0 %v3215_v11  ;;  %v2862_v11 = vld [vmem:[%s18385_s4 + $0x8] sm:$0xff] }
0x16b3   :  { %3225 = vrot.lane.b32.xlu0 %v17090_v38, %s16342_s25 }
0x16f1   :  { %v3220_v12 = vpop.xlane.xlu0 %3219 }
0x16f2   :  { %15325 = vrcp.f32 %v3220_v12  ;;  %v2861_v12 = vld [vmem:[%s18385_s4] sm:$0xff] }
0x16f5   :  { %v3302_v4 = vpop.permute.xlu0 %3301 }
0x16f6   :  { %14206 = vmatpush3.msra.mxu1 %v3302_v4 }
0x16f7   :  { %14215 = vmatprep.subr.mxu1 %v16343_v57 }
0x16fc   :  { %v15326_v13 = vpop.eup %15325 }
0x16fd   :  { %v3224_v14 = vmul.f32 %v15326_v13, %v15322_v62 }
0x16ff   :  { %14208 = vmatmul.mubr.msk.f32.vlgmr.msra.gmra.mrb[30].mxu1 %vm884_vm6, %v3224_v14 }
0x1700   :  { %14216 = vmatpush3.xpose.msk.msra.mxu1 %vm884_vm6, %v3458_v3  ;;  %14217 = vmatprep.mubr.msk.f32.mxu1 %vm16344_vm5, %v16343_v57 }
0x1701   :  { %14225 = vmatprep.subr.mxu1 %v16343_v57 }
0x1703   :  { %14218 = vmatmul.mubr.msk.f32.vlgmr.msra.gmra.mrb[32].mxu1 %vm884_vm6, %v3456_v5 }
0x1704   :  { %14227 = vmatprep.mubr.msk.f32.mxu1 %vm16344_vm5, %v16343_v57 }
0x172a   :  { %v3217_v15 = vpop.xlane.xlu0 %3216 }
0x172b   :  { %15327 = vrcp.f32 %v3217_v15 }
0x172e   :  { %v3226_v16 = vpop.permute.xlu0 %3225 }
0x172f   :  { %14201 = vmatpush3.msra.mxu0 %v3226_v16 }
0x1730   :  { %14210 = vmatprep.subr.mxu0 %v16343_v57 }
0x1735   :  { %v15328_v17 = vpop.eup %15327 }
0x1736   :  { %v3223_v20 = vmul.f32 %v15328_v17, %v15324_v10 }
0x1738   :  { %14203 = vmatmul.mubr.msk.f32.vlgmr.msra.gmra.mrb[20].mxu0 %vm884_vm6, %v3223_v20 }
0x1739   :  { %14211 = vmatpush3.xpose.msk.msra.mxu0 %vm884_vm6, %v3380_v18  ;;  %14212 = vmatprep.mubr.msk.f32.mxu0 %vm16344_vm5, %v16343_v57 }
0x173a   :  { %14220 = vmatprep.subr.mxu0 %v16343_v57 }
0x173c   :  { %14213 = vmatmul.mubr.msk.f32.vlgmr.msra.gmra.mrb[22].mxu0 %vm884_vm6, %v3378_v21 }
0x173d   :  { %14222 = vmatprep.mubr.msk.f32.mxu0 %vm16344_vm5, %v16343_v57 }
0x17d2   :  { %v17150_v22 = vpop.f32.mrb[30].mxu1 }
0x17d3   :  { %v14209_v23 = vpop.f32.mrb[31].mxu1 }
0x17d6   :  { %v3529_v24 = vpop.f32.mrb[32].mxu1 }
0x17d7   :  { %v3534_v25 = vsel %vm626_vm7, %v3529_v24, -1e+09  ;;  %v14219_v26 = vpop.f32.mrb[33].mxu1 }
0x17d8   :  { %v3538_v27 = vsel %vm884_vm6, %v3534_v25, -inf }
0x17d9   :  { %3539 = vmax.xlane.f32.xlu0 %v3538_v27  ;;  %v2863_v27 = vld [vmem:[%s18385_s4 + $0x10] sm:$0xff] }
0x17ef   :  { %3633 = vrot.lane.b32.xlu0 %v17088_v48, %s16347_s26 }
0x17f3   :  { %3871 = vrot.lane.b32.xlu0 %v17099_v50, %s16346_s5 }
0x17f7   :  { %3949 = vrot.lane.b32.xlu0 %v17094_v34, %s16346_s5 }
0x180b   :  { %v17161_v28 = vpop.f32.mrb[20].mxu0 }
0x180c   :  { %v14204_v29 = vpop.f32.mrb[21].mxu0 }
0x180f   :  { %v3451_v2 = vpop.f32.mrb[22].mxu0 }
0x1810   :  { %v14214_v30 = vpop.f32.mrb[23].mxu0  ;;  %v3533_v40 = vsel %vm625_vm8, %v3451_v2, -1e+09 }
0x1811   :  { %v3535_v41 = vsel %vm884_vm6, %v3533_v40, -inf }
0x1866   :  { %v3540_v31 = vpop.xlane.xlu0 %3539 }
0x1867   :  { %v3542_v32 = vsub.f32 %v3534_v25, %v3540_v31 }
0x1869   :  { %v3545_v33 = vmul.f32 1.442695, %v3542_v32 }
0x186a   :  { %v3634_v36 = vpop.permute.xlu0 %3633 }
0x186b   :  { %15329 = vpow2.f32 %v3545_v33  ;;  %14226 = vmatpush3.msra.mxu1 %v3634_v36 }
0x186c   :  { %14240 = vmatprep.subr.mxu1 %v16343_v57 }
0x186e   :  { %v3872_v46 = vpop.permute.xlu0 %3871 }
0x1872   :  { %v3950_v49 = vpop.permute.xlu0 %3949 }
0x1875   :  { %v15330_v37 = vpop.eup %15329 }
0x1876   :  { %v3550_v39 = vsel %vm884_vm6, %v15330_v37, 0.0 }
0x1877   :  { %3551 = vadd.xlane.f32.xlu1 %v3550_v39 }
0x1888   :  { %3951 = vrot.lane.b32.xlu1 %v17088_v48, %s16346_s5 }
0x18ac   :  { %3536 = vmax.xlane.f32.xlu1 %v3535_v41 }
0x1904   :  { %v3552_v42 = vpop.xlane.xlu1 %3551 }
0x1905   :  { %15331 = vrcp.f32 %v3552_v42 }
0x1908   :  { %v3952_v47 = vpop.permute.xlu1 %3951 }
0x190f   :  { %v15332_v0 = vpop.eup %15331 }
0x1910   :  { %v3556_v43 = vmul.f32 %v15332_v0, %v15330_v37 }
0x1912   :  { %14228 = vmatmul.mubr.msk.f32.vlgmr.msra.gmra.mrb[34].mxu1 %vm884_vm6, %v3556_v43 }
0x1913   :  { %14241 = vmatpush3.xpose.msk.msra.mxu1 %vm884_vm6, %v3874_v1  ;;  %14242 = vmatprep.mubr.msk.f32.mxu1 %vm16344_vm5, %v16343_v57 }
0x1914   :  { %14245 = vmatprep.subr.mxu1 %v16343_v57 }
0x1916   :  { %14243 = vmatmul.mubr.msk.f32.vlgmr.msra.gmra.mrb[36].mxu1 %vm884_vm6, %v3872_v46 }
0x1917   :  { %14246 = vmatpush3.xpose.msk.msra.mxu1 %vm884_vm6, %v3952_v47  ;;  %14247 = vmatprep.mubr.msk.f32.mxu1 %vm16344_vm5, %v16343_v57 }
0x1918   :  { %14255 = vmatprep.subr.mxu1 %v16343_v57 }
0x191a   :  { %14248 = vmatmul.mubr.msk.f32.vlgmr.msra.gmra.mrb[38].mxu1 %vm884_vm6, %v3950_v49 }
0x191b   :  { %14257 = vmatprep.mubr.msk.f32.mxu1 %vm16344_vm5, %v16343_v57 }
0x1939   :  { %v3537_v35 = vpop.xlane.xlu1 %3536 }
0x193a   :  { %v3541_v51 = vsub.f32 %v3533_v40, %v3537_v35 }
0x193c   :  { %v3543_v52 = vmul.f32 1.442695, %v3541_v51 }
0x193e   :  { %15333 = vpow2.f32 %v3543_v52 }
0x1948   :  { %v15334_v53 = vpop.eup %15333 }
0x1949   :  { %v3547_v54 = vsel %vm884_vm6, %v15334_v53, 0.0 }
0x194a   :  { %3548 = vadd.xlane.f32.xlu0 %v3547_v54 }
0x1960   :  { %3557 = vrot.lane.b32.xlu0 %v17090_v38, %s16347_s26 }
0x1964   :  { %4127 = vrot.lane.b32.xlu0 %v17088_v48, %s16348_s14 }
0x1968   :  { %4288 = vrot.lane.b32.xlu0 %v17090_v38, %s16349_s0 }
0x196c   :  { %4366 = vrot.lane.b32.xlu0 %v17088_v48, %s16349_s0 }
0x1970   :  { %4286 = vrot.lane.b32.xlu0 %v17099_v50, %s16349_s0 }
0x19d7   :  { %v3549_v55 = vpop.xlane.xlu0 %3548 }
0x19d8   :  { %15335 = vrcp.f32 %v3549_v55 }
0x19db   :  { %v3558_v56 = vpop.permute.xlu0 %3557 }
0x19dc   :  { %14221 = vmatpush3.msra.mxu0 %v3558_v56 }
0x19dd   :  { %14230 = vmatprep.subr.mxu0 %v2862_v11 }
0x19df   :  { %v4128_v58 = vpop.permute.xlu0 %4127 }
0x19e0   :  { %14256 = vmatpush3.msra.mxu1 %v4128_v58 }
0x19e1   :  { %14265 = vmatprep.subr.mxu1 %v16343_v57 }
0x19e2   :  { %v15336_v59 = vpop.eup %15335 }
0x19e3   :  { %v3555_v60 = vmul.f32 %v15336_v59, %v15334_v53  ;;  %v4289_v2 = vpop.permute.xlu0 %4288 }
0x19e5   :  { %14223 = vmatmul.mubr.msk.f32.vlgmr.msra.gmra.mrb[24].mxu0 %vm884_vm6, %v3555_v60  ;;  %v3705_v61 = vpop.f32.mrb[34].mxu1 }
0x19e6   :  { %v14229_v62 = vpop.f32.mrb[35].mxu1  ;;  %14231 = vmatpush3.msra.mxu0 %v2862_v11 }
0x19e7   :  { %14235 = vmatprep.subr.mxu0 %v2861_v12  ;;  %v4367_v32 = vpop.permute.xlu0 %4366 }
0x19e9   :  { %v3945_v63 = vpop.f32.mrb[36].mxu1 }
0x19ea   :  { %v4027_v50 = vsel %vm625_vm8, %v3945_v63, -1e+09  ;;  %v14244_v3 = vpop.f32.mrb[37].mxu1 }
0x19eb   :  { %v4029_v5 = vsel %vm884_vm6, %v4027_v50, -inf  ;;  %v4287_v33 = vpop.permute.xlu0 %4286 }
0x19ec   :  { %4030 = vmax.xlane.f32.xlu1 %v4029_v5 }
0x19ed   :  { %v4023_v6 = vpop.f32.mrb[38].mxu1 }
0x19ee   :  { %v4028_v8 = vsel %vm626_vm7, %v4023_v6, -1e+09  ;;  %v14249_v9 = vpop.f32.mrb[39].mxu1 }
0x19ef   :  { %v4032_v10 = vsel %vm884_vm6, %v4028_v8, -inf  ;;  %v2864_v9 = vld [vmem:[%s18385_s4 + $0x18] sm:$0xff]  ;;  %s18408_s4 = sld [smem:[#allocation95_spill]] }
0x19f0   :  { %4033 = vmax.xlane.f32.xlu1 %v4032_v10 }
0x1a79   :  { %v4031_v4 = vpop.xlane.xlu1 %4030 }
0x1a7a   :  { %v4035_v13 = vsub.f32 %v4027_v50, %v4031_v4  ;;  %v13427_v4 = vld [vmem:[#allocation41] ss:$0 sm:$0xff] }
0x1a7c   :  { %v4037_v14 = vmul.f32 1.442695, %v4035_v13 }
0x1a7d   :  { %v4034_v15 = vpop.xlane.xlu1 %4033 }
0x1a7e   :  { %15337 = vpow2.f32 %v4037_v14  ;;  %v4036_v16 = vsub.f32 %v4028_v8, %v4034_v15 }
0x1a80   :  { %v4039_v17 = vmul.f32 1.442695, %v4036_v16 }
0x1a82   :  { %15339 = vpow2.f32 %v4039_v17 }
0x1a88   :  { %v15338_v18 = vpop.eup %15337 }
0x1a89   :  { %v4041_v20 = vsel %vm884_vm6, %v15338_v18, 0.0 }
0x1a8a   :  { %4042 = vadd.xlane.f32.xlu1 %v4041_v20  ;;  %v17263_v20 = vld [vmem:[%s18386_s3] sm:$0xff] }
0x1a8c   :  { %v15340_v21 = vpop.eup %15339 }
0x1a8d   :  { %v4044_v23 = vsel %vm884_vm6, %v15340_v21, 0.0 }
0x1a8e   :  { %4045 = vadd.xlane.f32.xlu1 %v4044_v23  ;;  %v17268_v23 = vld [vmem:[%s18386_s3 + $0x8] sm:$0xff]  ;;  %s18409_s3 = sld [smem:[#allocation90_spill]] }
0x1a9f   :  { %4051 = vrot.lane.b32.xlu1 %v17090_v38, %s16348_s14 }
0x1aa3   :  { %4364 = vrot.lane.b32.xlu1 %v17094_v34, %s16349_s0 }
0x1ab8   :  { %v3629_v24 = vpop.f32.mrb[24].mxu0 }
0x1ab9   :  { %v14224_v25 = vpop.f32.mrb[25].mxu0  ;;  %14232 = vmatprep.mubr.msk.f32.mxu0 %vm884_vm6, %v3629_v24 }
0x1aba   :  { %14233 = vmatmul.mubr.msk.f32.vlgmr.msra.gmra.mrb[26].mxu0 %vm884_vm6, %v3705_v61  ;;  %v5023_v25 = vsel %vm633_vm0, %v17263_v20, 0.0 }
0x1abb   :  { %14237 = vmatprep.mubr.msk.f32.mxu0 %vm884_vm6, %v17161_v28  ;;  %14236 = vmatpush3.msra.mxu0 %v2861_v12 }
0x1abc   :  { %14250 = vmatprep.subr.mxu0 %v16343_v57 }
0x1ac2   :  { %14238 = vmatmul.mubr.msk.f32.vlgmr.msra.gmra.mrb[26].mxu0 %vm884_vm6, %v17150_v22 }
0x1ac3   :  { %14252 = vmatprep.mubr.msk.f32.mxu0 %vm16344_vm5, %v16343_v57 }
0x1b17   :  { %v4043_v26 = vpop.xlane.xlu1 %4042 }
0x1b18   :  { %15341 = vrcp.f32 %v4043_v26 }
0x1b1b   :  { %v4046_v34 = vpop.xlane.xlu1 %4045 }
0x1b1c   :  { %15343 = vrcp.f32 %v4046_v34 }
0x1b1f   :  { %v4052_v29 = vpop.permute.xlu1 %4051 }
0x1b20   :  { %14251 = vmatpush3.msra.mxu0 %v4052_v29 }
0x1b21   :  { %14260 = vmatprep.subr.mxu0 %v2863_v27 }
0x1b22   :  { %v15342_v30 = vpop.eup %15341 }
0x1b23   :  { %v4049_v28 = vmul.f32 %v15342_v30, %v15338_v18  ;;  %v4365_v41 = vpop.permute.xlu1 %4364 }
0x1b25   :  { %14253 = vmatmul.mubr.msk.f32.vlgmr.msra.gmra.mrb[28].mxu0 %vm884_vm6, %v4049_v28 }
0x1b26   :  { %v15344_v31 = vpop.eup %15343  ;;  %14261 = vmatpush3.msra.mxu0 %v2863_v27 }
0x1b27   :  { %v4050_v22 = vmul.f32 %v15344_v31, %v15340_v21  ;;  %14270 = vmatprep.subr.mxu0 %v16343_v57 }
0x1b29   :  { %14258 = vmatmul.mubr.msk.f32.vlgmr.msra.gmra.mrb[40].mxu1 %vm884_vm6, %v4050_v22 }
0x1b2a   :  { %14266 = vmatpush3.xpose.msk.msra.mxu1 %vm884_vm6, %v4289_v2  ;;  %14267 = vmatprep.mubr.msk.f32.mxu1 %vm16344_vm5, %v16343_v57 }
0x1b2b   :  { %14275 = vmatprep.subr.mxu1 %v16343_v57 }
0x1b2d   :  { %14268 = vmatmul.mubr.msk.f32.vlgmr.msra.gmra.mrb[42].mxu1 %vm884_vm6, %v4287_v33 }
0x1b2e   :  { %14277 = vmatprep.mubr.msk.f32.mxu1 %vm16344_vm5, %v16343_v57 }
0x1bf8   :  { %v4123_v36 = vpop.f32.mrb[28].mxu0 }
0x1bf9   :  { %v14254_v37 = vpop.f32.mrb[29].mxu0  ;;  %14262 = vmatprep.mubr.msk.f32.mxu0 %vm884_vm6, %v4123_v36 }
0x1bfc   :  { %v4199_v39 = vpop.f32.mrb[40].mxu1 }
0x1bfd   :  { %v14259_v40 = vpop.f32.mrb[41].mxu1  ;;  %14263 = vmatmul.mubr.msk.f32.vlgmr.msra.gmra.mrb[26].mxu0 %vm884_vm6, %v4199_v39 }
0x1bfe   :  { %14271 = vmatpush3.xpose.msk.msra.mxu0 %vm884_vm6, %v4367_v32  ;;  %14272 = vmatprep.mubr.msk.f32.mxu0 %vm16344_vm5, %v16343_v57 }
0x1bff   :  { %14280 = vmatprep.subr.mxu0 %v16343_v57 }
0x1c00   :  { %v4360_v1 = vpop.f32.mrb[42].mxu1 }
0x1c01   :  { %v4442_v42 = vsel %vm625_vm8, %v4360_v1, -1e+09  ;;  %v14269_v0 = vpop.f32.mrb[43].mxu1  ;;  %14273 = vmatmul.mubr.msk.f32.vlgmr.msra.gmra.mrb[30].mxu0 %vm884_vm6, %v4365_v41 }
0x1c02   :  { %v4444_v43 = vsel %vm884_vm6, %v4442_v42, -inf  ;;  %14282 = vmatprep.mubr.msk.f32.mxu0 %vm16344_vm5, %v16343_v57 }
0x1c03   :  { %4445 = vmax.xlane.f32.xlu0 %v4444_v43  ;;  %v17301_v43 = vld [vmem:[%s18387_s2 + $0x10] sm:$0xff] }
0x1c90   :  { %v4446_v46 = vpop.xlane.xlu0 %4445 }
0x1c91   :  { %v4450_v47 = vsub.f32 %v4442_v42, %v4446_v46  ;;  %v17304_v46 = vld [vmem:[%s18387_s2 + $0x18] sm:$0xff] }
0x1c93   :  { %v4452_v49 = vmul.f32 1.442695, %v4450_v47  ;;  %v15230_v47 = vpack.i.bf16 %v17304_v46, %v17301_v43 }
0x1c95   :  { %15345 = vpow2.f32 %v4452_v49  ;;  %v5079_v49 = vld [vmem:[%s18387_s2] sm:$0xff] }
0x1c9f   :  { %v15346_v35 = vpop.eup %15345 }
0x1ca0   :  { %v4456_v51 = vsel %vm884_vm6, %v15346_v35, 0.0 }
0x1ca1   :  { %4457 = vadd.xlane.f32.xlu0 %v4456_v51 }
0x1cd4   :  { %v4438_v52 = vpop.f32.mrb[30].mxu0 }
0x1cd5   :  { %v4443_v53 = vsel %vm626_vm7, %v4438_v52, -1e+09  ;;  %v14274_v54 = vpop.f32.mrb[31].mxu0  ;;  %v4769_v52 = vld [vmem:[%s18388_s8] sm:$0xff] }
0x1cd6   :  { %v4447_v55 = vsel %vm884_vm6, %v4443_v53, -inf  ;;  %v4771_v54 = vld [vmem:[%s18388_s8 + $0x10] sm:$0xff] }
0x1cd7   :  { %4448 = vmax.xlane.f32.xlu1 %v4447_v55 }
0x1ce8   :  { %4542 = vrot.lane.b32.xlu1 %v17088_v48, %s16350_s29 }
0x1d2e   :  { %v4458_v63 = vpop.xlane.xlu0 %4457 }
0x1d64   :  { %v4449_v56 = vpop.xlane.xlu1 %4448 }
0x1d65   :  { %v4451_v58 = vsub.f32 %v4443_v53, %v4449_v56  ;;  %v4770_v53 = vld [vmem:[%s18388_s8 + $0x8] sm:$0xff]  ;;  %v4772_v56 = vld [vmem:[%s18388_s8 + $0x18] sm:$0xff]  ;;  %s18411_s8 = sld [smem:[#allocation98_spill]] }
0x1d66   :  { %v14924_v55 = vpack.c.bf16 %v4770_v53, %v4769_v52 }
0x1d67   :  { %v4454_v59 = vmul.f32 1.442695, %v4451_v58  ;;  %v14928_v58 = vpack.c.bf16 %v4772_v56, %v4771_v54 }
0x1d68   :  { %v4543_v60 = vpop.permute.xlu1 %4542 }
0x1d69   :  { %15347 = vpow2.f32 %v4454_v59  ;;  %14281 = vmatpush3.msra.mxu0 %v4543_v60  ;;  %v17320_v60 = vld [vmem:[%s18389_s17] ss:$0 sm:$0xff] }
0x1d6a   :  { %15349 = vrcp.f32 %v4458_v63  ;;  %14285 = vmatprep.subr.mxu0 %v2864_v9 }
0x1d73   :  { %v15348_v61 = vpop.eup %15347 }
0x1d74   :  { %v4459_v62 = vsel %vm884_vm6, %v15348_v61, 0.0  ;;  %v15350_v3 = vpop.eup %15349 }
0x1d75   :  { %4460 = vadd.xlane.f32.xlu0 %v4459_v62  ;;  %v4464_v5 = vmul.f32 %v15350_v3, %v15346_v35  ;;  %v5080_v35 = vld [vmem:[%s18387_s2 + $0x8] sm:$0xff]  ;;  %v4866_v3 = vld [vmem:[%s18390_s7 + $0x18] sm:$0xff]  ;;  %s18410_s2 = sld [smem:[#allocation93_spill]] }
0x1d76   :  { %v15225_v51 = vpack.i.bf16 %v5080_v35, %v5079_v49  ;;  %v17316_v59 = vpack.c.bf16 %v5080_v35, %v5079_v49  ;;  %v4864_v62 = vld [vmem:[%s18390_s7 + $0x8] sm:$0xff] }
0x1d8b   :  { %4466 = vrot.lane.b32.xlu0 %v17090_v38, %s16350_s29 }
0x1e02   :  { %v4461_v50 = vpop.xlane.xlu0 %4460 }
0x1e03   :  { %15351 = vrcp.f32 %v4461_v50  ;;  %v4865_v50 = vld [vmem:[%s18390_s7 + $0x10] sm:$0xff] }
0x1e06   :  { %v4467_v48 = vpop.permute.xlu0 %4466 }
0x1e07   :  { %14276 = vmatpush3.msra.mxu1 %v4467_v48  ;;  %v14936_v48 = vpack.c.bf16 %v4866_v3, %v4865_v50 }
0x1e08   :  { %14278 = vmatmul.mubr.msk.f32.vlgmr.msra.gmra.mrb[44].mxu1 %vm884_vm6, %v4464_v5  ;;  %14925 = vmatprep.subr.bf16.mxu1 %v14924_v55  ;;  %v4867_v5 = vld [vmem:[%s18390_s7 + $0x20] sm:$0xff] }
0x1e09   :  { %14927 = vmatpush3.bf16.msra.mxu1 %v14924_v55  ;;  %v13429_v55 = vld [vmem:[#allocation40] ss:$0 sm:$0xff] }
0x1e0a   :  { %14929 = vmatprep.subr.bf16.mxu1 %v14928_v58 }
0x1e0d   :  { %v15352_v6 = vpop.eup %15351  ;;  %14931 = vmatpush3.bf16.msra.mxu1 %v14928_v58 }
0x1e0e   :  { %v4465_v8 = vmul.f32 %v15352_v6, %v15348_v61  ;;  %14949 = vmatprep.subr.bf16.mxu1 %v17316_v59  ;;  %v4863_v61 = vld [vmem:[%s18390_s7] sm:$0xff]  ;;  %v4868_v6 = vld [vmem:[%s18390_s7 + $0x28] sm:$0xff] }
0x1e0f   :  { %v14932_v63 = vpack.c.bf16 %v4864_v62, %v4863_v61 }
0x1e10   :  { %14283 = vmatmul.mubr.msk.f32.vlgmr.msra.gmra.mrb[32].mxu0 %vm884_vm6, %v4465_v8  ;;  %v14940_v8 = vpack.c.bf16 %v4868_v6, %v4867_v5 }
0x1e11   :  { %14286 = vmatpush3.msra.mxu0 %v2864_v9 }
0x1e12   :  { %14933 = vmatprep.subr.bf16.mxu0 %v14932_v63 }
0x1edb   :  { %v4538_v38 = vpop.f32.mrb[44].mxu1 }
0x1edc   :  { %v14279_v10 = vpop.f32.mrb[45].mxu1  ;;  %14287 = vmatprep.mubr.msk.f32.mxu0 %vm884_vm6, %v4538_v38 }
0x1ee3   :  { %v4614_v11 = vpop.f32.mrb[32].mxu0 }
0x1ee4   :  { %v14284_v12 = vpop.f32.mrb[33].mxu0  ;;  %14288 = vmatmul.mubr.msk.f32.vlgmr.msra.gmra.mrb[26].mxu0 %vm884_vm6, %v4614_v11 }
0x1ee5   :  { %14935 = vmatpush3.bf16.msra.mxu0 %v14932_v63  ;;  %v13438_v63 = vld [vmem:[%s18391_s10] ss:$0 sm:$0xff] }
0x1ee6   :  { %14937 = vmatprep.subr.bf16.mxu0 %v14936_v48 }
0x1ee9   :  { %14939 = vmatpush3.bf16.msra.mxu0 %v14936_v48  ;;  %v14952_v48 = vpack.c.bf16 %v17304_v46, %v17301_v43 }
0x1eea   :  { %14941 = vmatprep.subr.bf16.mxu0 %v14940_v8 }
0x1eed   :  { %14943 = vmatpush3.bf16.msra.mxu0 %v14940_v8 }
0x1fb7   :  { %v14289_v13 = vpop.f32.mrb[26].mxu0 }
0x1fb8   :  { %v4708_v14 = vadd.f32 %v14289_v13, %v13427_v4  ;;  %v4690_v15 = vpop.f32.mrb[27].mxu0 }
0x1fb9   :  { %v4707_v16 = vadd.f32 %v13427_v4, %v4690_v15 }
0x1fba   :  { %v17257_v17 = vadd.f32 %v4708_v14, %v17061_v44  ;;  %v5026_v44 = vsel %vm633_vm0, %v17268_v23, 0.0 }
0x1fbb   :  { %v17260_v18 = vadd.f32 %v4707_v16, %v17064_v45 }
0x1fbc   :  { %v4716_v21 = vsel %vm633_vm0, %v17257_v17, 0.0 }
0x1fbd   :  { %4717 = vadd.xlane.f32.xlu0 %v4716_v21  ;;  %v4713_v24 = vsel %vm633_vm0, %v17260_v18, 0.0 }
0x1fbe   :  { %4714 = vadd.xlane.f32.xlu1 %v4713_v24 }
0x1fc1   :  { %5024 = vadd.xlane.f32.xlu0 %v5023_v25 }
0x1fc2   :  { %5027 = vadd.xlane.f32.xlu1 %v5026_v44 }
0x204a   :  { %v4718_v45 = vpop.xlane.xlu0 %4717 }
0x204b   :  { %v4720_v26 = vmul.f32 0.03125, %v4718_v45  ;;  %v4715_v34 = vpop.xlane.xlu1 %4714 }
0x204c   :  { %v4719_v27 = vmul.f32 0.03125, %v4715_v34 }
0x204d   :  { %v17277_v29 = vsub.f32 %v17257_v17, %v4720_v26 }
0x204e   :  { %v17280_v2 = vsub.f32 %v17260_v18, %v4719_v27  ;;  %v5025_v30 = vpop.xlane.xlu0 %5024 }
0x204f   :  { %v5029_v28 = vmul.f32 0.03125, %v5025_v30  ;;  %v5028_v31 = vpop.xlane.xlu1 %5027  ;;  %v4724_v32 = vmul.f32 %v17277_v29, %v17277_v29 }
0x2050   :  { %v5030_v22 = vmul.f32 0.03125, %v5028_v31  ;;  %v4723_v33 = vmul.f32 %v17280_v2, %v17280_v2 }
0x2051   :  { %v17287_v36 = vsub.f32 %v17263_v20, %v5029_v28  ;;  %v4728_v37 = vsel %vm633_vm0, %v4724_v32, 0.0 }
0x2052   :  { %v17291_v39 = vsub.f32 %v17268_v23, %v5030_v22  ;;  %4729 = vadd.xlane.f32.xlu1 %v4728_v37  ;;  %v4725_v40 = vsel %vm633_vm0, %v4723_v33, 0.0 }
0x2053   :  { %4726 = vadd.xlane.f32.xlu0 %v4725_v40  ;;  %v5033_v41 = vmul.f32 %v17287_v36, %v17287_v36 }
0x2054   :  { %v5034_v1 = vmul.f32 %v17291_v39, %v17291_v39 }
0x2055   :  { %v5035_v42 = vsel %vm633_vm0, %v5033_v41, 0.0 }
0x2056   :  { %v5038_v0 = vsel %vm633_vm0, %v5034_v1, 0.0 }
0x2057   :  { %5036 = vadd.xlane.f32.xlu0 %v5035_v42  ;;  %5039 = vadd.xlane.f32.xlu1 %v5038_v0 }
0x2068   :  { %15231 = vrot.lane.b32.xlu1 %v15230_v47, %s16342_s25 }
0x206c   :  { %5194 = vrot.lane.b32.xlu1 %v17320_v60, %s16342_s25 }
0x206d   :  { %15226 = vrot.lane.b32.xlu0 %v15225_v51, %s16342_s25  ;;  %v13428_v51 = vld [vmem:[#allocation38] ss:$0 sm:$0xff] }
0x20df   :  { %v4730_v9 = vpop.xlane.xlu1 %4729 }
0x20e0   :  { %v4732_v38 = vmul.f32 0.032258064, %v4730_v9  ;;  %v4727_v10 = vpop.xlane.xlu0 %4726 }
0x20e1   :  { %v4731_v11 = vmul.f32 0.032258064, %v4727_v10 }
0x20e2   :  { %15353 = vrsqrt.f32 %v4732_v38  ;;  %vm4742_vm3 = vcmp.eq.f32.partialorder %v4732_v38, inf  ;;  %v4745_v24 = vand.u32 2147483648, %v4732_v38  ;;  %vm4744_vm4 = vcmp.eq.f32.partialorder %v4732_v38, 0.0 }
0x20e3   :  { %15355 = vrsqrt.f32 %v4731_v11  ;;  %vm4735_vm9 = vcmp.eq.f32.partialorder %v4731_v11, inf  ;;  %v4738_v45 = vand.u32 2147483648, %v4731_v11  ;;  %vm4737_vm10 = vcmp.eq.f32.partialorder %v4731_v11, 0.0 }
0x20e4   :  { %v5037_v12 = vpop.xlane.xlu0 %5036  ;;  %v5040_v4 = vpop.xlane.xlu1 %5039 }
0x20e5   :  { %v5041_v13 = vmul.f32 0.032258064, %v5037_v12  ;;  %v5042_v14 = vmul.f32 0.032258064, %v5040_v4 }
0x20e7   :  { %15357 = vrsqrt.f32 %v5041_v13  ;;  %vm5045_vm11 = vcmp.eq.f32.partialorder %v5041_v13, inf  ;;  %vm5047_vm12 = vcmp.eq.f32.partialorder %v5041_v13, 0.0  ;;  %v5048_v33 = vand.u32 2147483648, %v5041_v13 }
0x20e8   :  { %15359 = vrsqrt.f32 %v5042_v14  ;;  %vm5052_vm14 = vcmp.eq.f32.partialorder %v5042_v14, inf  ;;  %v5055_v41 = vand.u32 2147483648, %v5042_v14  ;;  %vm5054_vm15 = vcmp.eq.f32.partialorder %v5042_v14, 0.0  ;;  %v15227_v61 = vpop.permute.xlu0 %15226  ;;  %v15232_v10 = vpop.permute.xlu1 %15231 }
0x20e9   :  { %v15229_v8 = vunpack.i.h.bf16 %v15227_v61  ;;  %v15228_v9 = vunpack.i.l.bf16 %v15227_v61  ;;  %v15234_v43 = vunpack.i.h.bf16 %v15232_v10 }
0x20eb   :  { %v14956_v46 = vpack.c.bf16 %v15229_v8, %v15228_v9 }
0x20ec   :  { %v15354_v15 = vpop.eup %15353 }
0x20ed   :  { %v15356_v16 = vpop.eup %15355  ;;  %v4741_v21 = vmul.f32 %v15354_v15, %v4732_v38  ;;  %v13430_v15 = vld [vmem:[#allocation32] ss:$0 sm:$0xff] }
0x20ee   :  { %v4734_v25 = vmul.f32 %v15356_v16, %v4731_v11 }
0x20ef   :  { %v4743_v44 = vsel %vm4742_vm3, %v4732_v38, %v4741_v21  ;;  %v13439_v38 = vld [vmem:[%s18392_s19] ss:$0 sm:$0xff] }
0x20f0   :  { %v4746_v26 = vsel %vm4744_vm4, %v4745_v24, %v4743_v44  ;;  %v4736_v34 = vsel %vm4735_vm9, %v4731_v11, %v4734_v25 }
0x20f1   :  { %v15358_v27 = vpop.eup %15357  ;;  %v4748_v30 = vadd.f32 1e-06, %v4746_v26  ;;  %v4739_v28 = vsel %vm4737_vm10, %v4738_v45, %v4736_v34 }
0x20f2   :  { %v15360_v31 = vpop.eup %15359  ;;  %v4747_v32 = vadd.f32 1e-06, %v4739_v28  ;;  %v5044_v22 = vmul.f32 %v15358_v27, %v5041_v13  ;;  %v5195_v27 = vpop.permute.xlu1 %5194 }
0x20f3   :  { %15361 = vrcp.f32 %v4748_v30  ;;  %v5051_v37 = vmul.f32 %v15360_v31, %v5042_v14 }
0x20f4   :  { %v5046_v40 = vsel %vm5045_vm11, %v5041_v13, %v5044_v22  ;;  %15363 = vrcp.f32 %v4747_v32  ;;  %v4870_v13 = vld [vmem:[%s18390_s7 + $0x38] sm:$0xff] }
0x20f5   :  { %v5049_v1 = vsel %vm5047_vm12, %v5048_v33, %v5046_v40  ;;  %v5053_v42 = vsel %vm5052_vm14, %v5042_v14, %v5051_v37 }
0x20f6   :  { %v5057_v0 = vadd.f32 1e-06, %v5049_v1  ;;  %v5056_v47 = vsel %vm5054_vm15, %v5055_v41, %v5053_v42 }
0x20f7   :  { %v5058_v49 = vadd.f32 1e-06, %v5056_v47 }
0x20f8   :  { %15365 = vrcp.f32 %v5057_v0  ;;  %v17387_v0 = vld [vmem:[%s18393_s9 + $0x8] sm:$0xff] }
0x20f9   :  { %15367 = vrcp.f32 %v5058_v49  ;;  %vm628_vm1 = vcmp.gt.s32.totalorder %v17387_v0, 0 }
0x20fd   :  { %v15362_v35 = vpop.eup %15361 }
0x20fe   :  { %v15364_v52 = vpop.eup %15363  ;;  %v4752_v53 = vmul.f32 %v15362_v35, %v17277_v29 }
0x20ff   :  { %v4751_v54 = vmul.f32 %v15364_v52, %v17280_v2 }
0x2100   :  { %v4760_v56 = vmul.f32 %v13428_v51, %v4752_v53 }
0x2101   :  { %v4759_v58 = vmul.f32 %v13428_v51, %v4751_v54 }
0x2102   :  { %v15366_v62 = vpop.eup %15365  ;;  %v4768_v6 = vadd.f32 %v13429_v55, %v4760_v56 }
0x2103   :  { %v15368_v50 = vpop.eup %15367  ;;  %v4767_v3 = vadd.f32 %v13429_v55, %v4759_v58  ;;  %v5061_v5 = vmul.f32 %v15366_v62, %v17287_v36  ;;  %v15233_v36 = vunpack.i.l.bf16 %v15232_v10  ;;  %v17401_v62 = vld [vmem:[%s18393_s9] sm:$0xff] }
0x2104   :  { %v5062_v29 = vmul.f32 %v15368_v50, %v17291_v39  ;;  %vm627_vm2 = vcmp.gt.s32.totalorder %v17401_v62, 0 }
0x2105   :  { %14298 = vmatprep.mubr.msk.f32.mxu1 %vm633_vm0, %v4767_v3  ;;  %v5069_v2 = vmul.f32 %v13438_v63, %v5061_v5  ;;  %v14960_v4 = vpack.c.bf16 %v15234_v43, %v15233_v36 }
0x2106   :  { %14299 = vmatmul.mubr.msk.f32.vlgmr.msra.gmra.mrb[46].mxu1 %vm633_vm0, %v4768_v6  ;;  %v5070_v12 = vmul.f32 %v13438_v63, %v5062_v29 }
0x2107   :  { %14951 = vmatpush3.bf16.msra.mxu1 %v17316_v59  ;;  %v5077_v11 = vadd.f32 %v13439_v38, %v5069_v2  ;;  %v4869_v59 = vld [vmem:[%s18390_s7 + $0x30] sm:$0xff] }
0x2108   :  { %14953 = vmatprep.subr.bf16.mxu1 %v14952_v48  ;;  %v5078_v39 = vadd.f32 %v13439_v38, %v5070_v12  ;;  %v14944_v14 = vpack.c.bf16 %v4870_v13, %v4869_v59 }
0x2109   :  { %14328 = vmatprep.mubr.msk.f32.mxu1 %vm633_vm0, %v5077_v11 }
0x210a   :  { %14945 = vmatprep.subr.bf16.mxu0 %v14944_v14 }
0x210b   :  { %14955 = vmatpush3.bf16.msra.mxu1 %v14952_v48  ;;  %14947 = vmatpush3.bf16.msra.mxu0 %v14944_v14 }
0x210c   :  { %14957 = vmatprep.subr.bf16.mxu1 %v14956_v46  ;;  %14342 = vmatprep.subr.mxu0 %v16343_v57 }
0x210e   :  { %14329 = vmatmul.mubr.msk.f32.vlgmr.msra.gmra.mrb[48].mxu1 %vm633_vm0, %v5078_v39 }
0x210f   :  { %14959 = vmatpush3.bf16.msra.mxu1 %v14956_v46  ;;  %14339 = vmatprep.mubr.msk.f32.mxu1 %vm633_vm0, %v5077_v11 }
0x2110   :  { %14961 = vmatprep.subr.bf16.mxu1 %v14960_v4 }
0x2113   :  { %14963 = vmatpush3.bf16.msra.mxu1 %v14960_v4 }
0x2114   :  { %14347 = vmatprep.subr.mxu1 %v16343_v57 }
0x2116   :  { %14340 = vmatmul.mubr.msk.f32.vlgmr.msra.gmra.mrb[50].mxu1 %vm633_vm0, %v5078_v39 }
0x2117   :  { %14349 = vmatprep.mubr.msk.f32.mxu1 %vm16344_vm5, %v16343_v57 }
0x21d9   :  { %v14300_v16 = vpop.f32.mrb[46].mxu1 }
0x21da   :  { %v4858_v21 = vadd.f32 %v14300_v16, %v13430_v15  ;;  %v4852_v24 = vpop.f32.mrb[47].mxu1 }
0x21db   :  { %v4853_v25 = vadd.f32 %v13430_v15, %v4852_v24 }
0x21dc   :  { %v4862_v45 = vmax.f32 %v4858_v21, 0.0 }
0x21dd   :  { %v4861_v44 = vmax.f32 %v4853_v25, 0.0 }
0x21df   :  { %14317 = vmatprep.mubr.msk.f32.mxu0 %vm2714_vm13, %v4861_v44 }
0x21e0   :  { %14318 = vmatmul.mubr.msk.f32.vlgmr.msra.gmra.mrb[34].mxu0 %vm2714_vm13, %v4862_v45 }
0x21e1   :  { %v14330_v26 = vpop.f32.mrb[48].mxu1  ;;  %14344 = vmatprep.mubr.msk.f32.mxu0 %vm16344_vm5, %v16343_v57 }
0x21e2   :  { %v5167_v34 = vpop.f32.mrb[49].mxu1  ;;  %v5173_v30 = vadd.f32 %v14330_v26, %v17320_v60 }
0x21e3   :  { %v5168_v31 = vadd.f32 %v17320_v60, %v5167_v34  ;;  %v17379_v60 = vld [vmem:[#allocation34] ss:$0 sm:$0xff] }
0x21e4   :  { %v17363_v37 = vmul.f32 0.35355338, %v5173_v30 }
0x21e5   :  { %v17368_v40 = vmul.f32 0.35355338, %v5168_v31 }
0x21e9   :  { %v14341_v28 = vpop.f32.mrb[50].mxu1 }
0x21ea   :  { %v17357_v32 = vadd.f32 %v14341_v28, %v5195_v27  ;;  %v5263_v22 = vpop.f32.mrb[51].mxu1 }
0x21eb   :  { %v17359_v33 = vadd.f32 %v5263_v22, %v5195_v27 }
0x21ec   :  { %14348 = vmatpush3.xpose.msk.msra.mxu1 %vm884_vm6, %v17357_v32 }
0x21ed   :  { %14343 = vmatpush3.xpose.msk.msra.mxu0 %vm884_vm6, %v17359_v33  ;;  %14357 = vmatprep.subr.mxu1 %v16343_v57 }
0x21ee   :  { %14352 = vmatprep.subr.mxu0 %v16343_v57 }
0x21ef   :  { %14350 = vmatmul.mubr.msk.f32.vlgmr.msra.gmra.mrb[52].mxu1 %vm884_vm6, %v17363_v37 }
0x21f0   :  { %14345 = vmatmul.mubr.msk.f32.vlgmr.msra.gmra.mrb[36].mxu0 %vm884_vm6, %v17368_v40  ;;  %14359 = vmatprep.mubr.msk.f32.mxu1 %vm16344_vm5, %v16343_v57 }
0x21f1   :  { %14354 = vmatprep.mubr.msk.f32.mxu0 %vm16344_vm5, %v16343_v57 }
0x22b3   :  { %v14319_v41 = vpop.f32.mrb[34].mxu0 }
0x22b4   :  { %v17382_v1 = vadd.f32 %v14319_v41, %v17379_v60  ;;  %v17384_v42 = vpop.f32.mrb[35].mxu0 }
0x22c2   :  { %v5420_v47 = vpop.f32.mrb[52].mxu1 }
0x22c3   :  { %v5425_v49 = vsel %vm628_vm1, %v5420_v47, -1e+09  ;;  %v5344_v35 = vpop.f32.mrb[36].mxu0  ;;  %v14351_v51 = vpop.f32.mrb[53].mxu1 }
0x22c4   :  { %v5429_v52 = vsel %vm884_vm6, %v5425_v49, -inf  ;;  %v14346_v53 = vpop.f32.mrb[37].mxu0  ;;  %v5424_v63 = vsel %vm627_vm2, %v5344_v35, -1e+09 }
0x22c5   :  { %5430 = vmax.xlane.f32.xlu1 %v5429_v52  ;;  %v5426_v50 = vsel %vm884_vm6, %v5424_v63, -inf }
0x22d6   :  { %5680 = vrot.lane.b32.xlu1 %v17357_v32, %s16345_s21 }
0x22da   :  { %5678 = vrot.lane.b32.xlu1 %v17363_v37, %s16345_s21 }
0x2352   :  { %v5431_v54 = vpop.xlane.xlu1 %5430 }
0x2353   :  { %v5433_v55 = vsub.f32 %v5425_v49, %v5431_v54 }
0x2355   :  { %v5436_v56 = vmul.f32 1.442695, %v5433_v55 }
0x2356   :  { %v5681_v6 = vpop.permute.xlu1 %5680 }
0x2357   :  { %15369 = vpow2.f32 %v5436_v56 }
0x235a   :  { %v5679_v9 = vpop.permute.xlu1 %5678 }
0x2361   :  { %v15370_v58 = vpop.eup %15369 }
0x2362   :  { %v5441_v61 = vsel %vm884_vm6, %v15370_v58, 0.0 }
0x2363   :  { %5442 = vadd.xlane.f32.xlu0 %v5441_v61 }
0x2379   :  { %5524 = vrot.lane.b32.xlu0 %v17357_v32, %s16342_s25 }
0x2398   :  { %5427 = vmax.xlane.f32.xlu0 %v5426_v50 }
0x23ae   :  { %5448 = vrot.lane.b32.xlu0 %v17359_v33, %s16342_s25 }
0x23b2   :  { %5600 = vrot.lane.b32.xlu0 %v17368_v40, %s16345_s21 }
0x23f0   :  { %v5443_v3 = vpop.xlane.xlu0 %5442 }
0x23f1   :  { %15371 = vrcp.f32 %v5443_v3 }
0x23f4   :  { %v5525_v48 = vpop.permute.xlu0 %5524 }
0x23f5   :  { %14358 = vmatpush3.msra.mxu1 %v5525_v48 }
0x23f6   :  { %14367 = vmatprep.subr.mxu1 %v16343_v57 }
0x23fb   :  { %v15372_v5 = vpop.eup %15371 }
0x23fc   :  { %v5447_v8 = vmul.f32 %v15372_v5, %v15370_v58 }
0x23fe   :  { %14360 = vmatmul.mubr.msk.f32.vlgmr.msra.gmra.mrb[54].mxu1 %vm884_vm6, %v5447_v8 }
0x23ff   :  { %14368 = vmatpush3.xpose.msk.msra.mxu1 %vm884_vm6, %v5681_v6  ;;  %14369 = vmatprep.mubr.msk.f32.mxu1 %vm16344_vm5, %v16343_v57 }
0x2400   :  { %14377 = vmatprep.subr.mxu1 %v16343_v57 }
0x2402   :  { %14370 = vmatmul.mubr.msk.f32.vlgmr.msra.gmra.mrb[56].mxu1 %vm884_vm6, %v5679_v9 }
0x2403   :  { %14379 = vmatprep.mubr.msk.f32.mxu1 %vm16344_vm5, %v16343_v57 }
0x2425   :  { %v5428_v38 = vpop.xlane.xlu0 %5427 }
0x2426   :  { %v5432_v29 = vsub.f32 %v5424_v63, %v5428_v38 }
0x2428   :  { %v5434_v2 = vmul.f32 1.442695, %v5432_v29 }
0x2429   :  { %v5449_v10 = vpop.permute.xlu0 %5448 }
0x242a   :  { %15373 = vpow2.f32 %v5434_v2  ;;  %14353 = vmatpush3.msra.mxu0 %v5449_v10 }
0x242b   :  { %14362 = vmatprep.subr.mxu0 %v16343_v57 }
0x242d   :  { %v5601_v13 = vpop.permute.xlu0 %5600 }
0x2434   :  { %v15374_v11 = vpop.eup %15373 }
0x2435   :  { %v5438_v12 = vsel %vm884_vm6, %v15374_v11, 0.0 }
0x2436   :  { %5439 = vadd.xlane.f32.xlu1 %v5438_v12  ;;  %v5085_v12 = vld [vmem:[%s18394_s11 + $0x8] sm:$0xff] }
0x2447   :  { %5602 = vrot.lane.b32.xlu1 %v17359_v33, %s16345_s21 }
0x24c3   :  { %v5440_v43 = vpop.xlane.xlu1 %5439 }
0x24c4   :  { %15375 = vrcp.f32 %v5440_v43  ;;  %v5084_v43 = vld [vmem:[%s18394_s11] sm:$0xff] }
0x24c7   :  { %v5603_v39 = vpop.permute.xlu1 %5602 }
0x24ce   :  { %v15376_v36 = vpop.eup %15375 }
0x24cf   :  { %v5446_v46 = vmul.f32 %v15376_v36, %v15374_v11 }
0x24d1   :  { %14355 = vmatmul.mubr.msk.f32.vlgmr.msra.gmra.mrb[38].mxu0 %vm884_vm6, %v5446_v46  ;;  %v17425_v4 = vpop.f32.mrb[54].mxu1 }
0x24d2   :  { %14363 = vmatpush3.xpose.msk.msra.mxu0 %vm884_vm6, %v5603_v39  ;;  %v14361_v59 = vpop.f32.mrb[55].mxu1  ;;  %14364 = vmatprep.mubr.msk.f32.mxu0 %vm16344_vm5, %v16343_v57 }
0x24d3   :  { %14372 = vmatprep.subr.mxu0 %v16343_v57 }
0x24d5   :  { %14365 = vmatmul.mubr.msk.f32.vlgmr.msra.gmra.mrb[40].mxu0 %vm884_vm6, %v5601_v13  ;;  %v5752_v14 = vpop.f32.mrb[56].mxu1 }
0x24d6   :  { %v5757_v15 = vsel %vm628_vm1, %v5752_v14, -1e+09  ;;  %v14371_v16 = vpop.f32.mrb[57].mxu1  ;;  %14374 = vmatprep.mubr.msk.f32.mxu0 %vm16344_vm5, %v16343_v57 }
0x24d7   :  { %v5761_v21 = vsel %vm884_vm6, %v5757_v15, -inf }
0x24d8   :  { %5762 = vmax.xlane.f32.xlu1 %v5761_v21 }
0x24e9   :  { %6096 = vrot.lane.b32.xlu1 %v17359_v33, %s16346_s5 }
0x24ed   :  { %6094 = vrot.lane.b32.xlu1 %v17368_v40, %s16346_s5 }
0x24f1   :  { %6172 = vrot.lane.b32.xlu1 %v17363_v37, %s16346_s5 }
0x2565   :  { %v5763_v24 = vpop.xlane.xlu1 %5762 }
0x2566   :  { %v5765_v25 = vsub.f32 %v5757_v15, %v5763_v24 }
0x2568   :  { %v5768_v44 = vmul.f32 1.442695, %v5765_v25 }
0x2569   :  { %v6097_v49 = vpop.permute.xlu1 %6096 }
0x256a   :  { %15377 = vpow2.f32 %v5768_v44 }
0x256d   :  { %v6095_v52 = vpop.permute.xlu1 %6094 }
0x2574   :  { %v15378_v45 = vpop.eup %15377 }
0x2575   :  { %v5773_v26 = vsel %vm884_vm6, %v15378_v45, 0.0 }
0x2576   :  { %5774 = vadd.xlane.f32.xlu0 %v5773_v26 }
0x258c   :  { %5856 = vrot.lane.b32.xlu0 %v17357_v32, %s16347_s26 }
0x2590   :  { %6174 = vrot.lane.b32.xlu0 %v17357_v32, %s16346_s5 }
0x25a4   :  { %v17448_v34 = vpop.f32.mrb[38].mxu0 }
0x25a5   :  { %v14356_v27 = vpop.f32.mrb[39].mxu0 }
0x25a8   :  { %v5674_v30 = vpop.f32.mrb[40].mxu0 }
0x25a9   :  { %v14366_v28 = vpop.f32.mrb[41].mxu0  ;;  %v5756_v31 = vsel %vm627_vm2, %v5674_v30, -1e+09 }
0x25aa   :  { %v5758_v22 = vsel %vm884_vm6, %v5756_v31, -inf }
0x25af   :  { %5759 = vmax.xlane.f32.xlu0 %v5758_v22 }
0x25c5   :  { %5780 = vrot.lane.b32.xlu0 %v17359_v33, %s16347_s26 }
0x25c9   :  { %6274 = vrot.lane.b32.xlu0 %v17359_v33, %s16348_s14 }
0x25cd   :  { %6511 = vrot.lane.b32.xlu0 %v17359_v33, %s16349_s0 }
0x25d1   :  { %6589 = vrot.lane.b32.xlu0 %v17357_v32, %s16349_s0 }
0x25d5   :  { %6509 = vrot.lane.b32.xlu0 %v17368_v40, %s16349_s0  ;;  %v6173_v40 = vpop.permute.xlu1 %6172 }
0x25d9   :  { %6587 = vrot.lane.b32.xlu0 %v17363_v37, %s16349_s0 }
0x2603   :  { %v5775_v41 = vpop.xlane.xlu0 %5774 }
0x2604   :  { %15379 = vrcp.f32 %v5775_v41 }
0x2607   :  { %v5857_v47 = vpop.permute.xlu0 %5856 }
0x2608   :  { %14378 = vmatpush3.msra.mxu1 %v5857_v47 }
0x2609   :  { %14392 = vmatprep.subr.mxu1 %v16343_v57 }
0x260b   :  { %v6175_v37 = vpop.permute.xlu0 %6174 }
0x260e   :  { %v15380_v35 = vpop.eup %15379 }
0x260f   :  { %v5779_v51 = vmul.f32 %v15380_v35, %v15378_v45  ;;  %v5086_v45 = vld [vmem:[%s18394_s11 + $0x10] sm:$0xff] }
0x2611   :  { %14380 = vmatmul.mubr.msk.f32.vlgmr.msra.gmra.mrb[58].mxu1 %vm884_vm6, %v5779_v51 }
0x2612   :  { %14393 = vmatpush3.xpose.msk.msra.mxu1 %vm884_vm6, %v6097_v49  ;;  %14394 = vmatprep.mubr.msk.f32.mxu1 %vm16344_vm5, %v16343_v57 }
0x2613   :  { %14397 = vmatprep.subr.mxu1 %v16343_v57 }
0x2615   :  { %14395 = vmatmul.mubr.msk.f32.vlgmr.msra.gmra.mrb[60].mxu1 %vm884_vm6, %v6095_v52 }
0x2616   :  { %14398 = vmatpush3.xpose.msk.msra.mxu1 %vm884_vm6, %v6175_v37  ;;  %14399 = vmatprep.mubr.msk.f32.mxu1 %vm16344_vm5, %v16343_v57 }
0x2617   :  { %14407 = vmatprep.subr.mxu1 %v16343_v57 }
0x2619   :  { %14400 = vmatmul.mubr.msk.f32.vlgmr.msra.gmra.mrb[62].mxu1 %vm884_vm6, %v6173_v40 }
0x261a   :  { %14409 = vmatprep.mubr.msk.f32.mxu1 %vm16344_vm5, %v16343_v57 }
0x263c   :  { %v5760_v53 = vpop.xlane.xlu0 %5759 }
0x263d   :  { %v5764_v54 = vsub.f32 %v5756_v31, %v5760_v53 }
0x263f   :  { %v5766_v55 = vmul.f32 1.442695, %v5764_v54 }
0x2640   :  { %v5781_v56 = vpop.permute.xlu0 %5780 }
0x2641   :  { %15381 = vpow2.f32 %v5766_v55  ;;  %14373 = vmatpush3.msra.mxu0 %v5781_v56 }
0x2642   :  { %14382 = vmatprep.subr.mxu0 %v5085_v12 }
0x2644   :  { %v6275_v26 = vpop.permute.xlu0 %6274 }
0x2648   :  { %v6512_v31 = vpop.permute.xlu0 %6511 }
0x264b   :  { %v15382_v58 = vpop.eup %15381 }
0x264c   :  { %v5770_v61 = vsel %vm884_vm6, %v15382_v58, 0.0 }
0x264d   :  { %5771 = vadd.xlane.f32.xlu1 %v5770_v61 }
0x26da   :  { %v5772_v63 = vpop.xlane.xlu1 %5771 }
0x26db   :  { %15383 = vrcp.f32 %v5772_v63 }
0x26e4   :  { %v5928_v50 = vpop.f32.mrb[58].mxu1 }
0x26e5   :  { %v15384_v3 = vpop.eup %15383  ;;  %v14381_v48 = vpop.f32.mrb[59].mxu1 }
0x26e6   :  { %v5778_v5 = vmul.f32 %v15384_v3, %v15382_v58  ;;  %v4951_v58 = vadd.f32 %v17379_v60, %v17384_v42 }
0x26e8   :  { %14375 = vmatmul.mubr.msk.f32.vlgmr.msra.gmra.mrb[42].mxu0 %vm884_vm6, %v5778_v5  ;;  %v6168_v6 = vpop.f32.mrb[60].mxu1  ;;  %v4959_v61 = vadd.f32 %v4951_v58, %v17260_v18 }
0x26e9   :  { %v6250_v8 = vsel %vm627_vm2, %v6168_v6, -1e+09  ;;  %v14396_v9 = vpop.f32.mrb[61].mxu1  ;;  %14383 = vmatpush3.msra.mxu0 %v5085_v12 }
0x26ea   :  { %v6252_v38 = vsel %vm884_vm6, %v6250_v8, -inf  ;;  %14387 = vmatprep.subr.mxu0 %v5084_v43  ;;  %v4963_v63 = vsel %vm633_vm0, %v4959_v61, 0.0 }
0x26eb   :  { %6253 = vmax.xlane.f32.xlu1 %v6252_v38 }
0x26ec   :  { %v6246_v29 = vpop.f32.mrb[62].mxu1 }
0x26ed   :  { %v6251_v2 = vsel %vm628_vm1, %v6246_v29, -1e+09  ;;  %v14401_v10 = vpop.f32.mrb[63].mxu1 }
0x26ee   :  { %v6255_v11 = vsel %vm884_vm6, %v6251_v2, -inf }
0x26ef   :  { %6256 = vmax.xlane.f32.xlu1 %v6255_v11 }
0x2778   :  { %v6254_v36 = vpop.xlane.xlu1 %6253 }
0x2779   :  { %v6258_v46 = vsub.f32 %v6250_v8, %v6254_v36  ;;  %v4960_v36 = vadd.f32 %v17382_v1, %v17257_v17 }
0x277b   :  { %v6260_v39 = vmul.f32 1.442695, %v6258_v46  ;;  %v4966_v46 = vsel %vm633_vm0, %v4960_v36, 0.0 }
0x277c   :  { %v6257_v59 = vpop.xlane.xlu1 %6256 }
0x277d   :  { %15385 = vpow2.f32 %v6260_v39  ;;  %v6259_v13 = vsub.f32 %v6251_v2, %v6257_v59  ;;  %v5087_v59 = vld [vmem:[%s18394_s11 + $0x18] sm:$0xff] }
0x277f   :  { %v6262_v14 = vmul.f32 1.442695, %v6259_v13 }
0x2781   :  { %15387 = vpow2.f32 %v6262_v14 }
0x2787   :  { %v15386_v15 = vpop.eup %15385 }
0x2788   :  { %v6264_v16 = vsel %vm884_vm6, %v15386_v15, 0.0 }
0x2789   :  { %6265 = vadd.xlane.f32.xlu1 %v6264_v16 }
0x278b   :  { %v15388_v21 = vpop.eup %15387 }
0x278c   :  { %v6267_v24 = vsel %vm884_vm6, %v15388_v21, 0.0 }
0x278d   :  { %6268 = vadd.xlane.f32.xlu1 %v6267_v24 }
0x279e   :  { %6350 = vrot.lane.b32.xlu1 %v17357_v32, %s16348_s14 }
0x27bb   :  { %v5852_v25 = vpop.f32.mrb[42].mxu0 }
0x27bc   :  { %v14376_v44 = vpop.f32.mrb[43].mxu0  ;;  %14384 = vmatprep.mubr.msk.f32.mxu0 %vm884_vm6, %v5852_v25 }
0x27bd   :  { %14385 = vmatmul.mubr.msk.f32.vlgmr.msra.gmra.mrb[44].mxu0 %vm884_vm6, %v5928_v50 }
0x27be   :  { %14389 = vmatprep.mubr.msk.f32.mxu0 %vm884_vm6, %v17448_v34  ;;  %14388 = vmatpush3.msra.mxu0 %v5084_v43 }
0x27bf   :  { %14402 = vmatprep.subr.mxu0 %v16343_v57 }
0x27c5   :  { %14390 = vmatmul.mubr.msk.f32.vlgmr.msra.gmra.mrb[44].mxu0 %vm884_vm6, %v17425_v4  ;;  %v6590_v4 = vpop.permute.xlu0 %6589 }
0x27c6   :  { %14403 = vmatpush3.msra.mxu0 %v6275_v26  ;;  %14404 = vmatprep.mubr.msk.f32.mxu0 %vm16344_vm5, %v16343_v57 }
0x27c7   :  { %14412 = vmatprep.subr.mxu0 %v5086_v45 }
0x27c9   :  { %v6510_v49 = vpop.permute.xlu0 %6509 }
0x27cd   :  { %v6588_v40 = vpop.permute.xlu0 %6587 }
0x2816   :  { %v6266_v27 = vpop.xlane.xlu1 %6265 }
0x2817   :  { %15389 = vrcp.f32 %v6266_v27 }
0x281a   :  { %v6269_v30 = vpop.xlane.xlu1 %6268 }
0x281b   :  { %15391 = vrcp.f32 %v6269_v30 }
0x281e   :  { %v6351_v28 = vpop.permute.xlu1 %6350 }
0x281f   :  { %14408 = vmatpush3.msra.mxu1 %v6351_v28 }
0x2820   :  { %14417 = vmatprep.subr.mxu1 %v16343_v57 }
0x2821   :  { %v15390_v34 = vpop.eup %15389 }
0x2822   :  { %v6272_v22 = vmul.f32 %v15390_v34, %v15386_v15 }
0x2824   :  { %14405 = vmatmul.mubr.msk.f32.vlgmr.msra.gmra.mrb[46].mxu0 %vm884_vm6, %v6272_v22 }
0x2825   :  { %v15392_v41 = vpop.eup %15391  ;;  %14413 = vmatpush3.msra.mxu0 %v5086_v45  ;;  %v13477_v45 = vld [vmem:[%s18395_s12] ss:$0 sm:$0xff] }
0x2826   :  { %v6273_v47 = vmul.f32 %v15392_v41, %v15388_v21  ;;  %14422 = vmatprep.subr.mxu0 %v16343_v57 }
0x2828   :  { %14410 = vmatmul.mubr.msk.f32.vlgmr.msra.gmra.mrb[64].mxu1 %vm884_vm6, %v6273_v47 }
0x2829   :  { %14418 = vmatpush3.xpose.msk.msra.mxu1 %vm884_vm6, %v6512_v31  ;;  %14419 = vmatprep.mubr.msk.f32.mxu1 %vm16344_vm5, %v16343_v57 }
0x282a   :  { %14427 = vmatprep.subr.mxu1 %v16343_v57 }
0x282c   :  { %14420 = vmatmul.mubr.msk.f32.vlgmr.msra.gmra.mrb[66].mxu1 %vm884_vm6, %v6510_v49 }
0x282d   :  { %14429 = vmatprep.mubr.msk.f32.mxu1 %vm16344_vm5, %v16343_v57 }
0x28f7   :  { %v6346_v35 = vpop.f32.mrb[46].mxu0 }
0x28f8   :  { %v14406_v51 = vpop.f32.mrb[47].mxu0  ;;  %14414 = vmatprep.mubr.msk.f32.mxu0 %vm884_vm6, %v6346_v35 }
0x28fb   :  { %v6422_v52 = vpop.f32.mrb[64].mxu1 }
0x28fc   :  { %v14411_v37 = vpop.f32.mrb[65].mxu1  ;;  %14415 = vmatmul.mubr.msk.f32.vlgmr.msra.gmra.mrb[44].mxu0 %vm884_vm6, %v6422_v52 }
0x28fd   :  { %14423 = vmatpush3.xpose.msk.msra.mxu0 %vm884_vm6, %v6590_v4  ;;  %14424 = vmatprep.mubr.msk.f32.mxu0 %vm16344_vm5, %v16343_v57 }
0x28fe   :  { %14432 = vmatprep.subr.mxu0 %v16343_v57 }
0x28ff   :  { %v6583_v53 = vpop.f32.mrb[66].mxu1 }
0x2900   :  { %v6665_v54 = vsel %vm627_vm2, %v6583_v53, -1e+09  ;;  %v14421_v55 = vpop.f32.mrb[67].mxu1  ;;  %14425 = vmatmul.mubr.msk.f32.vlgmr.msra.gmra.mrb[48].mxu0 %vm884_vm6, %v6588_v40 }
0x2901   :  { %v6667_v56 = vsel %vm884_vm6, %v6665_v54, -inf  ;;  %14434 = vmatprep.mubr.msk.f32.mxu0 %vm16344_vm5, %v16343_v57 }
0x2902   :  { %6668 = vmax.xlane.f32.xlu1 %v6667_v56 }
0x2913   :  { %6689 = vrot.lane.b32.xlu1 %v17359_v33, %s16350_s29 }
0x2937   :  { %4964 = vadd.xlane.f32.xlu1 %v4963_v63 }
0x298f   :  { %v6669_v50 = vpop.xlane.xlu1 %6668 }
0x2990   :  { %v6673_v48 = vsub.f32 %v6665_v54, %v6669_v50 }
0x2992   :  { %v6675_v5 = vmul.f32 1.442695, %v6673_v48 }
0x2993   :  { %v6690_v3 = vpop.permute.xlu1 %6689 }
0x2994   :  { %14428 = vmatpush3.msra.mxu1 %v6690_v3  ;;  %15393 = vpow2.f32 %v6675_v5 }
0x299e   :  { %v15394_v38 = vpop.eup %15393 }
0x299f   :  { %v6679_v18 = vsel %vm884_vm6, %v15394_v38, 0.0 }
0x29c4   :  { %v4965_v24 = vpop.xlane.xlu1 %4964 }
0x29c5   :  { %v4969_v44 = vmul.f32 0.03125, %v4965_v24 }
0x29c7   :  { %v17550_v31 = vsub.f32 %v4959_v61, %v4969_v44 }
0x29c9   :  { %v4973_v35 = vmul.f32 %v17550_v31, %v17550_v31 }
0x29d3   :  { %v6661_v6 = vpop.f32.mrb[48].mxu0 }
0x29d4   :  { %v6666_v8 = vsel %vm628_vm1, %v6661_v6, -1e+09  ;;  %v14426_v9 = vpop.f32.mrb[49].mxu0 }
0x29d5   :  { %v6670_v33 = vsel %vm884_vm6, %v6666_v8, -inf }
0x29d6   :  { %6671 = vmax.xlane.f32.xlu0 %v6670_v33 }
0x29da   :  { %6680 = vadd.xlane.f32.xlu0 %v6679_v18 }
0x2a63   :  { %v6672_v60 = vpop.xlane.xlu0 %6671 }
0x2a64   :  { %v6674_v42 = vsub.f32 %v6666_v8, %v6672_v60  ;;  %v6992_v60 = vld [vmem:[%s18396_s15] sm:$0xff] }
0x2a66   :  { %v6677_v29 = vmul.f32 1.442695, %v6674_v42  ;;  %v6993_v42 = vld [vmem:[%s18396_s15 + $0x8] sm:$0xff] }
0x2a67   :  { %v6681_v2 = vpop.xlane.xlu0 %6680 }
0x2a68   :  { %15395 = vpow2.f32 %v6677_v29 }
0x2a69   :  { %15397 = vrcp.f32 %v6681_v2 }
0x2a72   :  { %v15396_v10 = vpop.eup %15395 }
0x2a73   :  { %v15398_v11 = vpop.eup %15397  ;;  %v6682_v12 = vsel %vm884_vm6, %v15396_v10, 0.0 }
0x2a74   :  { %6683 = vadd.xlane.f32.xlu0 %v6682_v12  ;;  %v6687_v43 = vmul.f32 %v15398_v11, %v15394_v38 }
0x2a76   :  { %14430 = vmatmul.mubr.msk.f32.vlgmr.msra.gmra.mrb[68].mxu1 %vm884_vm6, %v6687_v43  ;;  %v15235_v43 = vpack.i.bf16 %v6993_v42, %v6992_v60 }
0x2a8a   :  { %6765 = vrot.lane.b32.xlu0 %v17357_v32, %s16350_s29 }
0x2aa9   :  { %4967 = vadd.xlane.f32.xlu0 %v4966_v46  ;;  %v6995_v46 = vld [vmem:[%s18396_s15 + $0x18] sm:$0xff] }
0x2b01   :  { %v6684_v39 = vpop.xlane.xlu0 %6683 }
0x2b02   :  { %15399 = vrcp.f32 %v6684_v39 }
0x2b05   :  { %v6766_v13 = vpop.permute.xlu0 %6765 }
0x2b06   :  { %14433 = vmatpush3.msra.mxu0 %v6766_v13  ;;  %v13436_v13 = vld [vmem:[#allocation44] ss:$0 sm:$0xff] }
0x2b07   :  { %14437 = vmatprep.subr.mxu0 %v5087_v59 }
0x2b0c   :  { %v15400_v14 = vpop.eup %15399 }
0x2b0d   :  { %v6688_v15 = vmul.f32 %v15400_v14, %v15396_v10 }
0x2b0f   :  { %14435 = vmatmul.mubr.msk.f32.vlgmr.msra.gmra.mrb[50].mxu0 %vm884_vm6, %v6688_v15 }
0x2b10   :  { %14438 = vmatpush3.msra.mxu0 %v5087_v59 }
0x2b36   :  { %v4968_v21 = vpop.xlane.xlu0 %4967 }
0x2b37   :  { %v4970_v25 = vmul.f32 0.03125, %v4968_v21 }
0x2b39   :  { %v17548_v27 = vsub.f32 %v4960_v36, %v4970_v25  ;;  %v6994_v36 = vld [vmem:[%s18396_s15 + $0x10] sm:$0xff]  ;;  %v14964_v25 = vpack.c.bf16 %v6993_v42, %v6992_v60 }
0x2b3a   :  { %v15240_v39 = vpack.i.bf16 %v6995_v46, %v6994_v36  ;;  %v14968_v44 = vpack.c.bf16 %v6995_v46, %v6994_v36 }
0x2b3b   :  { %v4974_v47 = vmul.f32 %v17548_v27, %v17548_v27  ;;  %14965 = vmatprep.subr.bf16.mxu1 %v14964_v25 }
0x2b3c   :  { %14967 = vmatpush3.bf16.msra.mxu1 %v14964_v25 }
0x2b3d   :  { %14969 = vmatprep.subr.bf16.mxu1 %v14968_v44 }
0x2b40   :  { %14971 = vmatpush3.bf16.msra.mxu1 %v14968_v44 }
0x2b41   :  { %14464 = vmatprep.subr.mxu1 %v16343_v57 }
0x2b49   :  { %v6761_v16 = vpop.f32.mrb[68].mxu1 }
0x2b4a   :  { %v14431_v32 = vpop.f32.mrb[69].mxu1  ;;  %14439 = vmatprep.mubr.msk.f32.mxu0 %vm884_vm6, %v6761_v16  ;;  %v13437_v16 = vld [vmem:[#allocation46] ss:$0 sm:$0xff] }
0x2be2   :  { %v6837_v17 = vpop.f32.mrb[50].mxu0 }
0x2be3   :  { %v14436_v1 = vpop.f32.mrb[51].mxu0  ;;  %14440 = vmatmul.mubr.msk.f32.vlgmr.msra.gmra.mrb[44].mxu0 %vm884_vm6, %v6837_v17 }
0x2cb6   :  { %v14441_v26 = vpop.f32.mrb[44].mxu0 }
0x2cb7   :  { %v6931_v30 = vadd.f32 %v14441_v26, %v13477_v45  ;;  %v6913_v28 = vpop.f32.mrb[45].mxu0 }
0x2cb8   :  { %v6930_v34 = vadd.f32 %v13477_v45, %v6913_v28  ;;  %v17596_v45 = vld [vmem:[%s18397_s16] ss:$0 sm:$0xff] }
0x2cb9   :  { %v17553_v22 = vadd.f32 %v6931_v30, %v17268_v23  ;;  %v4978_v23 = vsel %vm633_vm0, %v4974_v47, 0.0 }
0x2cba   :  { %v17556_v41 = vadd.f32 %v6930_v34, %v17263_v20  ;;  %v4975_v20 = vsel %vm633_vm0, %v4973_v35, 0.0 }
0x2cbb   :  { %v6939_v4 = vsel %vm633_vm0, %v17553_v22, 0.0 }
0x2cbc   :  { %6940 = vadd.xlane.f32.xlu0 %v6939_v4  ;;  %v6936_v49 = vsel %vm633_vm0, %v17556_v41, 0.0 }
0x2cbd   :  { %6937 = vadd.xlane.f32.xlu1 %v6936_v49 }
0x2cc0   :  { %4979 = vadd.xlane.f32.xlu0 %v4978_v23 }
0x2cc1   :  { %4976 = vadd.xlane.f32.xlu1 %v4975_v20 }
0x2d49   :  { %v6941_v51 = vpop.xlane.xlu0 %6940 }
0x2d4a   :  { %v6943_v52 = vmul.f32 0.03125, %v6941_v51  ;;  %v6938_v37 = vpop.xlane.xlu1 %6937 }
0x2d4b   :  { %v6942_v40 = vmul.f32 0.03125, %v6938_v37 }
0x2d4c   :  { %v17569_v53 = vsub.f32 %v17553_v22, %v6943_v52 }
0x2d4d   :  { %v17572_v54 = vsub.f32 %v17556_v41, %v6942_v40  ;;  %v4980_v55 = vpop.xlane.xlu0 %4979 }
0x2d4e   :  { %v4982_v56 = vmul.f32 0.032258064, %v4980_v55  ;;  %v4977_v58 = vpop.xlane.xlu1 %4976  ;;  %v6947_v61 = vmul.f32 %v17569_v53, %v17569_v53 }
0x2d4f   :  { %v4981_v63 = vmul.f32 0.032258064, %v4977_v58  ;;  %v6946_v50 = vmul.f32 %v17572_v54, %v17572_v54 }
0x2d50   :  { %15401 = vrsqrt.f32 %v4982_v56  ;;  %v6951_v3 = vsel %vm633_vm0, %v6947_v61, 0.0  ;;  %vm4992_vm3 = vcmp.eq.f32.partialorder %v4982_v56, inf  ;;  %v4995_v9 = vand.u32 2147483648, %v4982_v56 }
0x2d51   :  { %15403 = vrsqrt.f32 %v4981_v63  ;;  %v6948_v48 = vsel %vm633_vm0, %v6946_v50, 0.0  ;;  %6952 = vadd.xlane.f32.xlu0 %v6951_v3  ;;  %vm4994_vm4 = vcmp.eq.f32.partialorder %v4982_v56, 0.0  ;;  %vm4985_vm9 = vcmp.eq.f32.partialorder %v4981_v63, inf }
0x2d52   :  { %6949 = vadd.xlane.f32.xlu1 %v6948_v48  ;;  %v4988_v18 = vand.u32 2147483648, %v4981_v63  ;;  %vm4987_vm10 = vcmp.eq.f32.partialorder %v4981_v63, 0.0 }
0x2d5a   :  { %v15402_v5 = vpop.eup %15401 }
0x2d5b   :  { %v15404_v6 = vpop.eup %15403  ;;  %v4991_v8 = vmul.f32 %v15402_v5, %v4982_v56 }
0x2d5c   :  { %v4984_v33 = vmul.f32 %v15404_v6, %v4981_v63  ;;  %v13478_v6 = vld [vmem:[%s18398_s18] ss:$0 sm:$0xff] }
0x2d5d   :  { %v4993_v38 = vsel %vm4992_vm3, %v4982_v56, %v4991_v8 }
0x2d5e   :  { %v4996_v29 = vsel %vm4994_vm4, %v4995_v9, %v4993_v38  ;;  %v4986_v2 = vsel %vm4985_vm9, %v4981_v63, %v4984_v33  ;;  %v13479_v38 = vld [vmem:[%s18399_s30] ss:$0 sm:$0xff] }
0x2d5f   :  { %v4998_v10 = vadd.f32 1e-06, %v4996_v29  ;;  %v4989_v11 = vsel %vm4987_vm10, %v4988_v18, %v4986_v2 }
0x2d60   :  { %v4997_v12 = vadd.f32 1e-06, %v4989_v11 }
0x2d61   :  { %15405 = vrcp.f32 %v4998_v10 }
0x2d62   :  { %15407 = vrcp.f32 %v4997_v12 }
0x2d63   :  { %15236 = vrot.lane.b32.xlu1 %v15235_v43, %s16342_s25 }
0x2d67   :  { %15241 = vrot.lane.b32.xlu0 %v15240_v39, %s16342_s25  ;;  %7107 = vrot.lane.b32.xlu1 %v17596_v45, %s16342_s25 }
0x2d6b   :  { %v15406_v59 = vpop.eup %15405 }
0x2d6c   :  { %v15408_v14 = vpop.eup %15407  ;;  %v5002_v15 = vmul.f32 %v15406_v59, %v17548_v27 }
0x2d6d   :  { %v5001_v32 = vmul.f32 %v15408_v14, %v17550_v31 }
0x2d6e   :  { %v5010_v17 = vmul.f32 %v13436_v13, %v5002_v15 }
0x2d6f   :  { %v5009_v1 = vmul.f32 %v13436_v13, %v5001_v32 }
0x2d70   :  { %v17588_v21 = vadd.f32 %v13437_v16, %v5010_v17 }
0x2d71   :  { %v17590_v24 = vadd.f32 %v13437_v16, %v5009_v1 }
0x2d73   :  { %14461 = vmatprep.mubr.msk.f32.mxu0 %vm633_vm0, %v17590_v24 }
0x2dde   :  { %v6953_v26 = vpop.xlane.xlu0 %6952 }
0x2ddf   :  { %v6950_v27 = vpop.xlane.xlu1 %6949  ;;  %v6955_v30 = vmul.f32 0.032258064, %v6953_v26 }
0x2de0   :  { %v6954_v28 = vmul.f32 0.032258064, %v6950_v27 }
0x2de1   :  { %15409 = vrsqrt.f32 %v6955_v30  ;;  %vm6965_vm11 = vcmp.eq.f32.partialorder %v6955_v30, inf  ;;  %v6968_v40 = vand.u32 2147483648, %v6955_v30  ;;  %vm6967_vm12 = vcmp.eq.f32.partialorder %v6955_v30, 0.0 }
0x2de2   :  { %15411 = vrsqrt.f32 %v6954_v28  ;;  %v15242_v34 = vpop.permute.xlu0 %15241  ;;  %vm6958_vm14 = vcmp.eq.f32.partialorder %v6954_v28, inf  ;;  %v6961_v58 = vand.u32 2147483648, %v6954_v28  ;;  %vm6960_vm15 = vcmp.eq.f32.partialorder %v6954_v28, 0.0 }
0x2de3   :  { %v15237_v31 = vpop.permute.xlu1 %15236  ;;  %v15244_v49 = vunpack.i.h.bf16 %v15242_v34  ;;  %v15243_v35 = vunpack.i.l.bf16 %v15242_v34 }
0x2de4   :  { %v15239_v4 = vunpack.i.h.bf16 %v15237_v31  ;;  %v15238_v47 = vunpack.i.l.bf16 %v15237_v31 }
0x2de5   :  { %v14976_v20 = vpack.c.bf16 %v15244_v49, %v15243_v35 }
0x2de6   :  { %v14972_v23 = vpack.c.bf16 %v15239_v4, %v15238_v47 }
0x2de7   :  { %v7108_v2 = vpop.permute.xlu1 %7107 }
0x2de8   :  { %14973 = vmatprep.subr.bf16.mxu0 %v14972_v23 }
0x2de9   :  { %14975 = vmatpush3.bf16.msra.mxu0 %v14972_v23 }
0x2dea   :  { %14977 = vmatprep.subr.bf16.mxu0 %v14976_v20 }
0x2deb   :  { %v15410_v51 = vpop.eup %15409 }
0x2dec   :  { %v15412_v52 = vpop.eup %15411  ;;  %v6964_v37 = vmul.f32 %v15410_v51, %v6955_v30 }
0x2ded   :  { %14979 = vmatpush3.bf16.msra.mxu0 %v14976_v20  ;;  %v6957_v55 = vmul.f32 %v15412_v52, %v6954_v28 }
0x2dee   :  { %14474 = vmatprep.subr.mxu0 %v16343_v57  ;;  %v6966_v56 = vsel %vm6965_vm11, %v6955_v30, %v6964_v37 }
0x2def   :  { %v6969_v61 = vsel %vm6967_vm12, %v6968_v40, %v6966_v56  ;;  %v6959_v63 = vsel %vm6958_vm14, %v6954_v28, %v6957_v55 }
0x2df0   :  { %14462 = vmatmul.mubr.msk.f32.vlgmr.msra.gmra.mrb[52].mxu0 %vm633_vm0, %v17588_v21  ;;  %v6971_v50 = vadd.f32 1e-06, %v6969_v61  ;;  %v6962_v3 = vsel %vm6960_vm15, %v6961_v58, %v6959_v63 }
0x2df1   :  { %14476 = vmatprep.mubr.msk.f32.mxu0 %vm16344_vm5, %v16343_v57  ;;  %v6970_v48 = vadd.f32 1e-06, %v6962_v3 }
0x2df2   :  { %15413 = vrcp.f32 %v6971_v50 }
0x2df3   :  { %15415 = vrcp.f32 %v6970_v48 }
0x2dfc   :  { %v15414_v5 = vpop.eup %15413 }
0x2dfd   :  { %v15416_v8 = vpop.eup %15415  ;;  %v6975_v9 = vmul.f32 %v15414_v5, %v17569_v53 }
0x2dfe   :  { %v6974_v33 = vmul.f32 %v15416_v8, %v17572_v54 }
0x2dff   :  { %v6983_v18 = vmul.f32 %v13478_v6, %v6975_v9 }
0x2e00   :  { %v6982_v60 = vmul.f32 %v13478_v6, %v6974_v33 }
0x2e01   :  { %v6991_v29 = vadd.f32 %v13479_v38, %v6983_v18 }
0x2e02   :  { %v6990_v42 = vadd.f32 %v13479_v38, %v6982_v60 }
0x2e04   :  { %14450 = vmatprep.mubr.msk.f32.mxu1 %vm633_vm0, %v6990_v42 }
0x2e05   :  { %14451 = vmatmul.mubr.msk.f32.vlgmr.msra.gmra.mrb[70].mxu1 %vm633_vm0, %v6991_v29 }
0x2e06   :  { %14466 = vmatprep.mubr.msk.f32.mxu1 %vm16344_vm5, %v16343_v57 }
0x2ec3   :  { %v14463_v10 = vpop.f32.mrb[52].mxu0 }
0x2ec4   :  { %v7182_v11 = vpop.f32.mrb[53].mxu0  ;;  %v17622_v39 = vadd.f32 %v14463_v10, %v7108_v2 }
0x2ec5   :  { %v17613_v12 = vadd.f32 %v7182_v11, %v7108_v2 }
0x2ec7   :  { %14465 = vmatpush3.xpose.msk.msra.mxu1 %vm884_vm6, %v17613_v12 }
0x2ec8   :  { %14469 = vmatprep.subr.mxu1 %v16343_v57 }
0x2ed8   :  { %v14452_v53 = vpop.f32.mrb[70].mxu1 }
0x2ed9   :  { %v7080_v54 = vpop.f32.mrb[71].mxu1  ;;  %v7086_v36 = vadd.f32 %v14452_v53, %v17596_v45 }
0x2eda   :  { %v7081_v43 = vadd.f32 %v17596_v45, %v7080_v54 }
0x2edb   :  { %v17630_v59 = vmul.f32 0.35355338, %v7086_v36 }
0x2edc   :  { %v17620_v46 = vmul.f32 0.35355338, %v7081_v43 }
0x2ede   :  { %14467 = vmatmul.mubr.msk.f32.vlgmr.msra.gmra.mrb[72].mxu1 %vm884_vm6, %v17620_v46 }
0x2edf   :  { %14470 = vmatpush3.xpose.msk.msra.mxu1 %vm884_vm6, %v17622_v39  ;;  %14471 = vmatprep.mubr.msk.f32.mxu1 %vm16344_vm5, %v16343_v57 }
0x2ee0   :  { %14479 = vmatprep.subr.mxu1 %v16343_v57 }
0x2ee2   :  { %14472 = vmatmul.mubr.msk.f32.vlgmr.msra.gmra.mrb[74].mxu1 %vm884_vm6, %v17630_v59 }
0x2ee3   :  { %14481 = vmatprep.mubr.msk.f32.mxu1 %vm16344_vm5, %v16343_v57 }
0x2fb1   :  { %v7263_v13 = vpop.f32.mrb[72].mxu1 }
0x2fb2   :  { %v14468_v14 = vpop.f32.mrb[73].mxu1  ;;  %v7343_v1 = vsel %vm625_vm8, %v7263_v13, -1e+09 }
0x2fb3   :  { %v7345_v25 = vsel %vm884_vm6, %v7343_v1, -inf }
0x2fb5   :  { %v7339_v15 = vpop.f32.mrb[74].mxu1 }
0x2fb6   :  { %v7344_v16 = vsel %vm626_vm7, %v7339_v15, -1e+09  ;;  %v14473_v32 = vpop.f32.mrb[75].mxu1 }
0x2fb7   :  { %v7348_v17 = vsel %vm884_vm6, %v7344_v16, -inf }
0x2fb8   :  { %7349 = vmax.xlane.f32.xlu1 %v7348_v17 }
0x2fc9   :  { %7599 = vrot.lane.b32.xlu1 %v17622_v39, %s16345_s21 }
0x2fcd   :  { %7597 = vrot.lane.b32.xlu1 %v17630_v59, %s16345_s21 }
0x2ff1   :  { %7346 = vmax.xlane.f32.xlu1 %v7345_v25 }
0x3002   :  { %7521 = vrot.lane.b32.xlu1 %v17613_v12, %s16345_s21 }
0x3006   :  { %7519 = vrot.lane.b32.xlu1 %v17620_v46, %s16345_s21 }
0x300a   :  { %8015 = vrot.lane.b32.xlu1 %v17613_v12, %s16346_s5 }
0x3045   :  { %v7350_v44 = vpop.xlane.xlu1 %7349 }
0x3046   :  { %v7352_v45 = vsub.f32 %v7344_v16, %v7350_v44 }
0x3048   :  { %v7355_v26 = vmul.f32 1.442695, %v7352_v45 }
0x3049   :  { %v7600_v28 = vpop.permute.xlu1 %7599 }
0x304a   :  { %15417 = vpow2.f32 %v7355_v26 }
0x304d   :  { %v7598_v31 = vpop.permute.xlu1 %7597 }
0x3054   :  { %v15418_v27 = vpop.eup %15417 }
0x3055   :  { %v7360_v30 = vsel %vm884_vm6, %v15418_v27, 0.0 }
0x3056   :  { %7361 = vadd.xlane.f32.xlu0 %v7360_v30 }
0x306c   :  { %7443 = vrot.lane.b32.xlu0 %v17622_v39, %s16342_s25 }
0x307e   :  { %v7347_v34 = vpop.xlane.xlu1 %7346 }
0x307f   :  { %v7351_v4 = vsub.f32 %v7343_v1, %v7347_v34 }
0x3081   :  { %v7353_v47 = vmul.f32 1.442695, %v7351_v4 }
0x3082   :  { %v7522_v56 = vpop.permute.xlu1 %7521 }
0x3083   :  { %15419 = vpow2.f32 %v7353_v47 }
0x3086   :  { %v7520_v61 = vpop.permute.xlu1 %7519 }
0x308a   :  { %v8016_v54 = vpop.permute.xlu1 %8015 }
0x308d   :  { %v15420_v49 = vpop.eup %15419 }
0x308e   :  { %v7357_v35 = vsel %vm884_vm6, %v15420_v49, 0.0 }
0x308f   :  { %7358 = vadd.xlane.f32.xlu0 %v7357_v35 }
0x30a5   :  { %7367 = vrot.lane.b32.xlu0 %v17613_v12, %s16342_s25 }
0x30e3   :  { %v7362_v23 = vpop.xlane.xlu0 %7361 }
0x30e4   :  { %15421 = vrcp.f32 %v7362_v23 }
0x30e7   :  { %v7444_v20 = vpop.permute.xlu0 %7443 }
0x30e8   :  { %14480 = vmatpush3.msra.mxu1 %v7444_v20 }
0x30e9   :  { %14489 = vmatprep.subr.mxu1 %v16343_v57 }
0x30ee   :  { %v15422_v51 = vpop.eup %15421 }
0x30ef   :  { %v7366_v52 = vmul.f32 %v15422_v51, %v15418_v27 }
0x30f1   :  { %14482 = vmatmul.mubr.msk.f32.vlgmr.msra.gmra.mrb[76].mxu1 %vm884_vm6, %v7366_v52  ;;  %v6998_v52 = vld [vmem:[%s18400_s22 + $0x8] sm:$0xff] }
0x30f2   :  { %14490 = vmatpush3.xpose.msk.msra.mxu1 %vm884_vm6, %v7600_v28  ;;  %14491 = vmatprep.mubr.msk.f32.mxu1 %vm16344_vm5, %v16343_v57 }
0x30f3   :  { %14499 = vmatprep.subr.mxu1 %v16343_v57 }
0x30f5   :  { %14492 = vmatmul.mubr.msk.f32.vlgmr.msra.gmra.mrb[78].mxu1 %vm884_vm6, %v7598_v31 }
0x30f6   :  { %14501 = vmatprep.mubr.msk.f32.mxu1 %vm16344_vm5, %v16343_v57 }
0x311c   :  { %v7359_v37 = vpop.xlane.xlu0 %7358 }
0x311d   :  { %15423 = vrcp.f32 %v7359_v37  ;;  %v6997_v37 = vld [vmem:[%s18400_s22] sm:$0xff] }
0x3120   :  { %v7368_v40 = vpop.permute.xlu0 %7367 }
0x3121   :  { %14475 = vmatpush3.msra.mxu0 %v7368_v40 }
0x3122   :  { %14484 = vmatprep.subr.mxu0 %v16343_v57 }
0x3127   :  { %v15424_v55 = vpop.eup %15423 }
0x3128   :  { %v7365_v58 = vmul.f32 %v15424_v55, %v15420_v49 }
0x312a   :  { %14477 = vmatmul.mubr.msk.f32.vlgmr.msra.gmra.mrb[54].mxu0 %vm884_vm6, %v7365_v58 }
0x312b   :  { %14485 = vmatpush3.xpose.msk.msra.mxu0 %vm884_vm6, %v7522_v56  ;;  %14486 = vmatprep.mubr.msk.f32.mxu0 %vm16344_vm5, %v16343_v57 }
0x312c   :  { %14494 = vmatprep.subr.mxu0 %v16343_v57 }
0x312e   :  { %14487 = vmatmul.mubr.msk.f32.vlgmr.msra.gmra.mrb[56].mxu0 %vm884_vm6, %v7520_v61 }
0x312f   :  { %14496 = vmatprep.mubr.msk.f32.mxu0 %vm16344_vm5, %v16343_v57 }
0x31c4   :  { %v17677_v63 = vpop.f32.mrb[76].mxu1 }
0x31c5   :  { %v14483_v50 = vpop.f32.mrb[77].mxu1 }
0x31c8   :  { %v7671_v3 = vpop.f32.mrb[78].mxu1 }
0x31c9   :  { %v7676_v48 = vsel %vm626_vm7, %v7671_v3, -1e+09  ;;  %v14493_v5 = vpop.f32.mrb[79].mxu1 }
0x31ca   :  { %v7680_v6 = vsel %vm884_vm6, %v7676_v48, -inf }
0x31cb   :  { %7681 = vmax.xlane.f32.xlu0 %v7680_v6 }
0x31e1   :  { %7775 = vrot.lane.b32.xlu0 %v17622_v39, %s16347_s26 }
0x31e5   :  { %8013 = vrot.lane.b32.xlu0 %v17620_v46, %s16346_s5 }
0x31e9   :  { %8091 = vrot.lane.b32.xlu0 %v17630_v59, %s16346_s5 }
0x31fd   :  { %v17688_v8 = vpop.f32.mrb[54].mxu0 }
0x31fe   :  { %v14478_v9 = vpop.f32.mrb[55].mxu0 }
0x3201   :  { %v7593_v33 = vpop.f32.mrb[56].mxu0 }
0x3202   :  { %v14488_v38 = vpop.f32.mrb[57].mxu0  ;;  %v7675_v11 = vsel %vm625_vm8, %v7593_v33, -1e+09 }
0x3203   :  { %v7677_v53 = vsel %vm884_vm6, %v7675_v11, -inf }
0x3258   :  { %v7682_v18 = vpop.xlane.xlu0 %7681 }
0x3259   :  { %v7684_v60 = vsub.f32 %v7676_v48, %v7682_v18  ;;  %v6999_v18 = vld [vmem:[%s18400_s22 + $0x10] sm:$0xff] }
0x325b   :  { %v7687_v42 = vmul.f32 1.442695, %v7684_v60 }
0x325c   :  { %v7776_v29 = vpop.permute.xlu0 %7775 }
0x325d   :  { %15425 = vpow2.f32 %v7687_v42  ;;  %14500 = vmatpush3.msra.mxu1 %v7776_v29 }
0x325e   :  { %14514 = vmatprep.subr.mxu1 %v16343_v57 }
0x3260   :  { %v8014_v14 = vpop.permute.xlu0 %8013 }
0x3264   :  { %v8092_v16 = vpop.permute.xlu0 %8091 }
0x3267   :  { %v15426_v2 = vpop.eup %15425 }
0x3268   :  { %v7692_v10 = vsel %vm884_vm6, %v15426_v2, 0.0 }
0x3269   :  { %7693 = vadd.xlane.f32.xlu1 %v7692_v10 }
0x327a   :  { %8093 = vrot.lane.b32.xlu1 %v17622_v39, %s16346_s5 }
0x329e   :  { %7678 = vmax.xlane.f32.xlu1 %v7677_v53 }
0x32f6   :  { %v7694_v43 = vpop.xlane.xlu1 %7693 }
0x32f7   :  { %15427 = vrcp.f32 %v7694_v43 }
0x32fa   :  { %v8094_v15 = vpop.permute.xlu1 %8093 }
0x3301   :  { %v15428_v36 = vpop.eup %15427 }
0x3302   :  { %v7698_v13 = vmul.f32 %v15428_v36, %v15426_v2 }
0x3304   :  { %14502 = vmatmul.mubr.msk.f32.vlgmr.msra.gmra.mrb[80].mxu1 %vm884_vm6, %v7698_v13 }
0x3305   :  { %14515 = vmatpush3.xpose.msk.msra.mxu1 %vm884_vm6, %v8016_v54  ;;  %14516 = vmatprep.mubr.msk.f32.mxu1 %vm16344_vm5, %v16343_v57 }
0x3306   :  { %14519 = vmatprep.subr.mxu1 %v16343_v57 }
0x3308   :  { %14517 = vmatmul.mubr.msk.f32.vlgmr.msra.gmra.mrb[82].mxu1 %vm884_vm6, %v8014_v14 }
0x3309   :  { %14520 = vmatpush3.xpose.msk.msra.mxu1 %vm884_vm6, %v8094_v15  ;;  %14521 = vmatprep.mubr.msk.f32.mxu1 %vm16344_vm5, %v16343_v57 }
0x330a   :  { %14529 = vmatprep.subr.mxu1 %v16343_v57 }
0x330c   :  { %14522 = vmatmul.mubr.msk.f32.vlgmr.msra.gmra.mrb[84].mxu1 %vm884_vm6, %v8092_v16 }
0x330d   :  { %14531 = vmatprep.mubr.msk.f32.mxu1 %vm16344_vm5, %v16343_v57 }
0x332b   :  { %v7679_v32 = vpop.xlane.xlu1 %7678 }
0x332c   :  { %v7683_v17 = vsub.f32 %v7675_v11, %v7679_v32 }
0x332e   :  { %v7685_v1 = vmul.f32 1.442695, %v7683_v17 }
0x3330   :  { %15429 = vpow2.f32 %v7685_v1 }
0x333a   :  { %v15430_v25 = vpop.eup %15429 }
0x333b   :  { %v7689_v44 = vsel %vm884_vm6, %v15430_v25, 0.0 }
0x333c   :  { %7690 = vadd.xlane.f32.xlu0 %v7689_v44 }
0x3352   :  { %7699 = vrot.lane.b32.xlu0 %v17613_v12, %s16347_s26 }
0x3356   :  { %8269 = vrot.lane.b32.xlu0 %v17622_v39, %s16348_s14 }
0x335a   :  { %8430 = vrot.lane.b32.xlu0 %v17613_v12, %s16349_s0 }
0x335e   :  { %8508 = vrot.lane.b32.xlu0 %v17622_v39, %s16349_s0 }
0x3362   :  { %8428 = vrot.lane.b32.xlu0 %v17620_v46, %s16349_s0 }
0x33c9   :  { %v7691_v45 = vpop.xlane.xlu0 %7690 }
0x33ca   :  { %15431 = vrcp.f32 %v7691_v45 }
0x33cd   :  { %v7700_v26 = vpop.permute.xlu0 %7699 }
0x33ce   :  { %14495 = vmatpush3.msra.mxu0 %v7700_v26 }
0x33cf   :  { %14504 = vmatprep.subr.mxu0 %v6998_v52 }
0x33d1   :  { %v8270_v27 = vpop.permute.xlu0 %8269 }
0x33d2   :  { %14530 = vmatpush3.msra.mxu1 %v8270_v27 }
0x33d3   :  { %14539 = vmatprep.subr.mxu1 %v16343_v57 }
0x33d4   :  { %v15432_v30 = vpop.eup %15431 }
0x33d5   :  { %v7697_v28 = vmul.f32 %v15432_v30, %v15430_v25  ;;  %v8431_v42 = vpop.permute.xlu0 %8430 }
0x33d7   :  { %14497 = vmatmul.mubr.msk.f32.vlgmr.msra.gmra.mrb[58].mxu0 %vm884_vm6, %v7697_v28  ;;  %v7847_v31 = vpop.f32.mrb[80].mxu1 }
0x33d8   :  { %v14503_v34 = vpop.f32.mrb[81].mxu1  ;;  %14505 = vmatpush3.msra.mxu0 %v6998_v52 }
0x33d9   :  { %14509 = vmatprep.subr.mxu0 %v6997_v37  ;;  %v8509_v10 = vpop.permute.xlu0 %8508 }
0x33db   :  { %v8087_v4 = vpop.f32.mrb[82].mxu1 }
0x33dc   :  { %v8169_v46 = vsel %vm625_vm8, %v8087_v4, -1e+09  ;;  %v14518_v47 = vpop.f32.mrb[83].mxu1 }
0x33dd   :  { %v8171_v49 = vsel %vm884_vm6, %v8169_v46, -inf  ;;  %v8429_v11 = vpop.permute.xlu0 %8428 }
0x33de   :  { %8172 = vmax.xlane.f32.xlu1 %v8171_v49 }
0x33df   :  { %v8165_v35 = vpop.f32.mrb[84].mxu1 }
0x33e0   :  { %v8170_v23 = vsel %vm626_vm7, %v8165_v35, -1e+09  ;;  %v14523_v20 = vpop.f32.mrb[85].mxu1 }
0x33e1   :  { %v8174_v51 = vsel %vm884_vm6, %v8170_v23, -inf }
0x33e2   :  { %8175 = vmax.xlane.f32.xlu1 %v8174_v51 }
0x346b   :  { %v8173_v40 = vpop.xlane.xlu1 %8172 }
0x346c   :  { %v8177_v55 = vsub.f32 %v8169_v46, %v8173_v40  ;;  %v7000_v40 = vld [vmem:[%s18400_s22 + $0x18] sm:$0xff] }
0x346e   :  { %v8179_v56 = vmul.f32 1.442695, %v8177_v55 }
0x346f   :  { %v8176_v58 = vpop.xlane.xlu1 %8175 }
0x3470   :  { %15433 = vpow2.f32 %v8179_v56  ;;  %v8178_v61 = vsub.f32 %v8170_v23, %v8176_v58 }
0x3472   :  { %v8181_v50 = vmul.f32 1.442695, %v8178_v61  ;;  %v13517_v61 = vld [vmem:[%s18401_s27] ss:$0 sm:$0xff] }
0x3474   :  { %15435 = vpow2.f32 %v8181_v50 }
0x347a   :  { %v15434_v3 = vpop.eup %15433 }
0x347b   :  { %v8183_v48 = vsel %vm884_vm6, %v15434_v3, 0.0 }
0x347c   :  { %8184 = vadd.xlane.f32.xlu1 %v8183_v48 }
0x347e   :  { %v15436_v5 = vpop.eup %15435 }
0x347f   :  { %v8186_v6 = vsel %vm884_vm6, %v15436_v5, 0.0 }
0x3480   :  { %8187 = vadd.xlane.f32.xlu1 %v8186_v6 }
0x3491   :  { %8193 = vrot.lane.b32.xlu1 %v17613_v12, %s16348_s14 }
0x3495   :  { %8506 = vrot.lane.b32.xlu1 %v17630_v59, %s16349_s0 }
0x34aa   :  { %v7771_v9 = vpop.f32.mrb[58].mxu0 }
0x34ab   :  { %v14498_v33 = vpop.f32.mrb[59].mxu0  ;;  %14506 = vmatprep.mubr.msk.f32.mxu0 %vm884_vm6, %v7771_v9 }
0x34ac   :  { %14507 = vmatmul.mubr.msk.f32.vlgmr.msra.gmra.mrb[60].mxu0 %vm884_vm6, %v7847_v31 }
0x34ad   :  { %14511 = vmatprep.mubr.msk.f32.mxu0 %vm884_vm6, %v17688_v8  ;;  %14510 = vmatpush3.msra.mxu0 %v6997_v37 }
0x34ae   :  { %14524 = vmatprep.subr.mxu0 %v16343_v57 }
0x34b4   :  { %14512 = vmatmul.mubr.msk.f32.vlgmr.msra.gmra.mrb[60].mxu0 %vm884_vm6, %v17677_v63 }
0x34b5   :  { %14526 = vmatprep.mubr.msk.f32.mxu0 %vm16344_vm5, %v16343_v57 }
0x3509   :  { %v8185_v38 = vpop.xlane.xlu1 %8184 }
0x350a   :  { %15437 = vrcp.f32 %v8185_v38 }
0x350d   :  { %v8188_v59 = vpop.xlane.xlu1 %8187 }
0x350e   :  { %15439 = vrcp.f32 %v8188_v59 }
0x3511   :  { %v8194_v60 = vpop.permute.xlu1 %8193 }
0x3512   :  { %14525 = vmatpush3.msra.mxu0 %v8194_v60 }
0x3513   :  { %14534 = vmatprep.subr.mxu0 %v6999_v18 }
0x3514   :  { %v15438_v29 = vpop.eup %15437 }
0x3515   :  { %v8191_v8 = vmul.f32 %v15438_v29, %v15434_v3  ;;  %v8507_v13 = vpop.permute.xlu1 %8506 }
0x3517   :  { %14527 = vmatmul.mubr.msk.f32.vlgmr.msra.gmra.mrb[62].mxu0 %vm884_vm6, %v8191_v8 }
0x3518   :  { %v15440_v2 = vpop.eup %15439  ;;  %14535 = vmatpush3.msra.mxu0 %v6999_v18 }
0x3519   :  { %v8192_v63 = vmul.f32 %v15440_v2, %v15436_v5  ;;  %14544 = vmatprep.subr.mxu0 %v16343_v57 }
0x351b   :  { %14532 = vmatmul.mubr.msk.f32.vlgmr.msra.gmra.mrb[86].mxu1 %vm884_vm6, %v8192_v63  ;;  %v8911_v63 = vld [vmem:[%s18402_s13] sm:$0xff] }
0x351c   :  { %14540 = vmatpush3.xpose.msk.msra.mxu1 %vm884_vm6, %v8431_v42  ;;  %14541 = vmatprep.mubr.msk.f32.mxu1 %vm16344_vm5, %v16343_v57 }
0x351d   :  { %14549 = vmatprep.subr.mxu1 %v16343_v57 }
0x351f   :  { %14542 = vmatmul.mubr.msk.f32.vlgmr.msra.gmra.mrb[88].mxu1 %vm884_vm6, %v8429_v11  ;;  %v8912_v11 = vld [vmem:[%s18402_s13 + $0x8] sm:$0xff] }
0x3520   :  { %14551 = vmatprep.mubr.msk.f32.mxu1 %vm16344_vm5, %v16343_v57 }
0x35ea   :  { %v8265_v53 = vpop.f32.mrb[62].mxu0 }
0x35eb   :  { %v14528_v54 = vpop.f32.mrb[63].mxu0  ;;  %14536 = vmatprep.mubr.msk.f32.mxu0 %vm884_vm6, %v8265_v53  ;;  %v8913_v53 = vld [vmem:[%s18402_s13 + $0x10] sm:$0xff] }
0x35ec   :  { %v14980_v54 = vpack.c.bf16 %v8912_v11, %v8911_v63 }
0x35ee   :  { %v8341_v43 = vpop.f32.mrb[86].mxu1 }
0x35ef   :  { %v14533_v36 = vpop.f32.mrb[87].mxu1  ;;  %14537 = vmatmul.mubr.msk.f32.vlgmr.msra.gmra.mrb[60].mxu0 %vm884_vm6, %v8341_v43  ;;  %v8914_v43 = vld [vmem:[%s18402_s13 + $0x18] sm:$0xff] }
0x35f0   :  { %14545 = vmatpush3.xpose.msk.msra.mxu0 %vm884_vm6, %v8509_v10  ;;  %14546 = vmatprep.mubr.msk.f32.mxu0 %vm16344_vm5, %v16343_v57  ;;  %v14984_v36 = vpack.c.bf16 %v8914_v43, %v8913_v53 }
0x35f1   :  { %14554 = vmatprep.subr.mxu0 %v16343_v57 }
0x35f2   :  { %v8502_v14 = vpop.f32.mrb[88].mxu1 }
0x35f3   :  { %v8584_v15 = vsel %vm625_vm8, %v8502_v14, -1e+09  ;;  %v14543_v16 = vpop.f32.mrb[89].mxu1  ;;  %14547 = vmatmul.mubr.msk.f32.vlgmr.msra.gmra.mrb[64].mxu0 %vm884_vm6, %v8507_v13  ;;  %v9005_v13 = vld [vmem:[%s18403_s20] sm:$0xff]  ;;  %v9006_v14 = vld [vmem:[%s18403_s20 + $0x8] sm:$0xff] }
0x35f4   :  { %v8586_v32 = vsel %vm884_vm6, %v8584_v15, -inf  ;;  %14556 = vmatprep.mubr.msk.f32.mxu0 %vm16344_vm5, %v16343_v57  ;;  %v14988_v16 = vpack.c.bf16 %v9006_v14, %v9005_v13 }
0x35f5   :  { %8587 = vmax.xlane.f32.xlu0 %v8586_v32  ;;  %v9008_v32 = vld [vmem:[%s18403_s20 + $0x18] sm:$0xff] }
0x3682   :  { %v8588_v17 = vpop.xlane.xlu0 %8587 }
0x3683   :  { %v8592_v1 = vsub.f32 %v8584_v15, %v8588_v17  ;;  %v9007_v15 = vld [vmem:[%s18403_s20 + $0x10] sm:$0xff] }
0x3684   :  { %v14992_v17 = vpack.c.bf16 %v9008_v32, %v9007_v15 }
0x3685   :  { %v8594_v25 = vmul.f32 1.442695, %v8592_v1  ;;  %v9009_v1 = vld [vmem:[%s18403_s20 + $0x20] sm:$0xff] }
0x3687   :  { %15441 = vpow2.f32 %v8594_v25  ;;  %v9010_v25 = vld [vmem:[%s18403_s20 + $0x28] sm:$0xff] }
0x3691   :  { %v15442_v44 = vpop.eup %15441 }
0x3692   :  { %v8598_v45 = vsel %vm884_vm6, %v15442_v44, 0.0 }
0x3693   :  { %8599 = vadd.xlane.f32.xlu0 %v8598_v45 }
0x36c6   :  { %v8580_v26 = vpop.f32.mrb[64].mxu0 }
0x36c7   :  { %v8585_v27 = vsel %vm626_vm7, %v8580_v26, -1e+09  ;;  %v14548_v30 = vpop.f32.mrb[65].mxu0 }
0x36c8   :  { %v8589_v28 = vsel %vm884_vm6, %v8585_v27, -inf }
0x36c9   :  { %8590 = vmax.xlane.f32.xlu1 %v8589_v28 }
0x36da   :  { %8684 = vrot.lane.b32.xlu1 %v17622_v39, %s16350_s29 }
0x3720   :  { %v8600_v35 = vpop.xlane.xlu0 %8599 }
0x3756   :  { %v8591_v31 = vpop.xlane.xlu1 %8590 }
0x3757   :  { %v8593_v34 = vsub.f32 %v8585_v27, %v8591_v31 }
0x3759   :  { %v8596_v4 = vmul.f32 1.442695, %v8593_v34 }
0x375a   :  { %v8685_v46 = vpop.permute.xlu1 %8684 }
0x375b   :  { %15443 = vpow2.f32 %v8596_v4  ;;  %14555 = vmatpush3.msra.mxu0 %v8685_v46 }
0x375c   :  { %15445 = vrcp.f32 %v8600_v35  ;;  %14559 = vmatprep.subr.mxu0 %v7000_v40 }
0x3765   :  { %v15444_v47 = vpop.eup %15443 }
0x3766   :  { %v8601_v49 = vsel %vm884_vm6, %v15444_v47, 0.0  ;;  %v15446_v20 = vpop.eup %15445 }
0x3767   :  { %8602 = vadd.xlane.f32.xlu0 %v8601_v49  ;;  %v8606_v51 = vmul.f32 %v15446_v20, %v15442_v44  ;;  %v14996_v44 = vpack.c.bf16 %v9010_v25, %v9009_v1  ;;  %v9163_v25 = vld [vmem:[%s18408_s4 + $0x10] sm:$0xff] }
0x377d   :  { %8608 = vrot.lane.b32.xlu0 %v17613_v12, %s16350_s29 }
0x37f4   :  { %v8603_v23 = vpop.xlane.xlu0 %8602 }
0x37f5   :  { %15447 = vrcp.f32 %v8603_v23 }
0x37f8   :  { %v8609_v39 = vpop.permute.xlu0 %8608 }
0x37f9   :  { %14550 = vmatpush3.msra.mxu1 %v8609_v39 }
0x37fa   :  { %14552 = vmatmul.mubr.msk.f32.vlgmr.msra.gmra.mrb[90].mxu1 %vm884_vm6, %v8606_v51  ;;  %14981 = vmatprep.subr.bf16.mxu1 %v14980_v54 }
0x37fb   :  { %14983 = vmatpush3.bf16.msra.mxu1 %v14980_v54 }
0x37fc   :  { %14985 = vmatprep.subr.bf16.mxu1 %v14984_v36 }
0x37ff   :  { %v15448_v52 = vpop.eup %15447  ;;  %14987 = vmatpush3.bf16.msra.mxu1 %v14984_v36 }
0x3800   :  { %v8607_v37 = vmul.f32 %v15448_v52, %v15444_v47 }
0x3802   :  { %14557 = vmatmul.mubr.msk.f32.vlgmr.msra.gmra.mrb[66].mxu0 %vm884_vm6, %v8607_v37  ;;  %v13518_v37 = vld [vmem:[%s18404_s23] ss:$0 sm:$0xff] }
0x3803   :  { %14560 = vmatpush3.msra.mxu0 %v7000_v40 }
0x3804   :  { %14989 = vmatprep.subr.bf16.mxu0 %v14988_v16 }
0x38cd   :  { %v8680_v55 = vpop.f32.mrb[90].mxu1 }
0x38ce   :  { %v14553_v12 = vpop.f32.mrb[91].mxu1  ;;  %14561 = vmatprep.mubr.msk.f32.mxu0 %vm884_vm6, %v8680_v55 }
0x38d5   :  { %v8756_v56 = vpop.f32.mrb[66].mxu0 }
0x38d6   :  { %v14558_v58 = vpop.f32.mrb[67].mxu0  ;;  %14562 = vmatmul.mubr.msk.f32.vlgmr.msra.gmra.mrb[60].mxu0 %vm884_vm6, %v8756_v56  ;;  %v13519_v56 = vld [vmem:[%s18405_s28] ss:$0 sm:$0xff] }
0x38d7   :  { %14991 = vmatpush3.bf16.msra.mxu0 %v14988_v16 }
0x38d8   :  { %14993 = vmatprep.subr.bf16.mxu0 %v14992_v17 }
0x38db   :  { %14995 = vmatpush3.bf16.msra.mxu0 %v14992_v17 }
0x38dc   :  { %14997 = vmatprep.subr.bf16.mxu0 %v14996_v44 }
0x38df   :  { %14999 = vmatpush3.bf16.msra.mxu0 %v14996_v44  ;;  %v9164_v44 = vld [vmem:[%s18408_s4 + $0x18] sm:$0xff] }
0x39a9   :  { %v14563_v50 = vpop.f32.mrb[60].mxu0 }
0x39aa   :  { %v8850_v3 = vadd.f32 %v14563_v50, %v13517_v61  ;;  %v8832_v48 = vpop.f32.mrb[61].mxu0 }
0x39ab   :  { %v8849_v5 = vadd.f32 %v13517_v61, %v8832_v48  ;;  %v9011_v48 = vld [vmem:[%s18403_s20 + $0x30] sm:$0xff] }
0x39ac   :  { %v17785_v6 = vadd.f32 %v8850_v3, %v17553_v22 }
0x39ad   :  { %v17788_v9 = vadd.f32 %v8849_v5, %v17556_v41  ;;  %v9012_v5 = vld [vmem:[%s18403_s20 + $0x38] sm:$0xff] }
0x39ae   :  { %v8858_v33 = vsel %vm633_vm0, %v17785_v6, 0.0 }
0x39af   :  { %8859 = vadd.xlane.f32.xlu0 %v8858_v33  ;;  %v8855_v38 = vsel %vm633_vm0, %v17788_v9, 0.0  ;;  %v15000_v33 = vpack.c.bf16 %v9012_v5, %v9011_v48 }
0x39b0   :  { %8856 = vadd.xlane.f32.xlu1 %v8855_v38  ;;  %v13520_v38 = vld [vmem:[%s18406_s1] ss:$0 sm:$0xff] }
0x39b1   :  { %15001 = vmatprep.subr.bf16.mxu0 %v15000_v33 }
0x39b2   :  { %15003 = vmatpush3.bf16.msra.mxu0 %v15000_v33 }
0x39b3   :  { %14616 = vmatprep.subr.mxu0 %v16343_v57 }
0x3a3c   :  { %v8860_v59 = vpop.xlane.xlu0 %8859 }
0x3a3d   :  { %v8862_v18 = vmul.f32 0.03125, %v8860_v59  ;;  %v8857_v60 = vpop.xlane.xlu1 %8856 }
0x3a3e   :  { %v8861_v22 = vmul.f32 0.03125, %v8857_v60 }
0x3a3f   :  { %v8864_v42 = vsub.f32 %v17785_v6, %v8862_v18 }
0x3a40   :  { %v8863_v41 = vsub.f32 %v17788_v9, %v8861_v22 }
0x3a41   :  { %v8866_v29 = vmul.f32 %v8864_v42, %v8864_v42 }
0x3a42   :  { %v8865_v8 = vmul.f32 %v8863_v41, %v8863_v41 }
0x3a43   :  { %v8870_v2 = vsel %vm633_vm0, %v8866_v29, 0.0  ;;  %v13523_v29 = vld [vmem:[%s18407_s6] ss:$0 sm:$0xff] }
0x3a44   :  { %8871 = vadd.xlane.f32.xlu1 %v8870_v2  ;;  %v8867_v10 = vsel %vm633_vm0, %v8865_v8, 0.0 }
0x3a45   :  { %8868 = vadd.xlane.f32.xlu0 %v8867_v10 }
0x3ad1   :  { %v8872_v45 = vpop.xlane.xlu1 %8871 }
0x3ad2   :  { %v8874_v26 = vmul.f32 0.032258064, %v8872_v45  ;;  %v8869_v27 = vpop.xlane.xlu0 %8868  ;;  %v15250_v45 = vpack.i.bf16 %v9164_v44, %v9163_v25 }
0x3ad3   :  { %v8873_v30 = vmul.f32 0.032258064, %v8869_v27  ;;  %v9162_v27 = vld [vmem:[%s18408_s4 + $0x8] sm:$0xff] }
0x3ad4   :  { %15449 = vrsqrt.f32 %v8874_v26  ;;  %vm8884_vm3 = vcmp.eq.f32.partialorder %v8874_v26, inf  ;;  %v8887_v4 = vand.u32 2147483648, %v8874_v26  ;;  %vm8886_vm4 = vcmp.eq.f32.partialorder %v8874_v26, 0.0 }
0x3ad5   :  { %15451 = vrsqrt.f32 %v8873_v30  ;;  %vm8877_vm9 = vcmp.eq.f32.partialorder %v8873_v30, inf  ;;  %v8880_v49 = vand.u32 2147483648, %v8873_v30  ;;  %vm8879_vm10 = vcmp.eq.f32.partialorder %v8873_v30, 0.0 }
0x3ade   :  { %v15450_v28 = vpop.eup %15449 }
0x3adf   :  { %v15452_v31 = vpop.eup %15451  ;;  %v8883_v34 = vmul.f32 %v15450_v28, %v8874_v26 }
0x3ae0   :  { %v8876_v46 = vmul.f32 %v15452_v31, %v8873_v30  ;;  %v15008_v31 = vpack.c.bf16 %v9164_v44, %v9163_v25 }
0x3ae1   :  { %v8885_v47 = vsel %vm8884_vm3, %v8874_v26, %v8883_v34  ;;  %v9161_v26 = vld [vmem:[%s18408_s4] sm:$0xff]  ;;  %v13528_v34 = vld [vmem:[#allocation13] ss:$0 sm:$0xff] }
0x3ae2   :  { %v8888_v35 = vsel %vm8886_vm4, %v8887_v4, %v8885_v47  ;;  %v8878_v23 = vsel %vm8877_vm9, %v8873_v30, %v8876_v46  ;;  %v15245_v30 = vpack.i.bf16 %v9162_v27, %v9161_v26  ;;  %v15004_v28 = vpack.c.bf16 %v9162_v27, %v9161_v26 }
0x3ae3   :  { %v8890_v20 = vadd.f32 1e-06, %v8888_v35  ;;  %v8881_v39 = vsel %vm8879_vm10, %v8880_v49, %v8878_v23 }
0x3ae4   :  { %v8889_v51 = vadd.f32 1e-06, %v8881_v39  ;;  %15005 = vmatprep.subr.bf16.mxu1 %v15004_v28 }
0x3ae5   :  { %15453 = vrcp.f32 %v8890_v20 }
0x3ae6   :  { %15455 = vrcp.f32 %v8889_v51 }
0x3aef   :  { %v15454_v52 = vpop.eup %15453 }
0x3af0   :  { %v15456_v40 = vpop.eup %15455  ;;  %v8894_v55 = vmul.f32 %v15454_v52, %v8864_v42 }
0x3af1   :  { %v8893_v12 = vmul.f32 %v15456_v40, %v8863_v41 }
0x3af2   :  { %v8902_v58 = vmul.f32 %v13518_v37, %v8894_v55 }
0x3af3   :  { %v8901_v61 = vmul.f32 %v13518_v37, %v8893_v12 }
0x3af4   :  { %v8910_v3 = vadd.f32 %v13519_v56, %v8902_v58 }
0x3af5   :  { %v8909_v50 = vadd.f32 %v13519_v56, %v8901_v61 }
0x3af7   :  { %14572 = vmatprep.mubr.msk.f32.mxu1 %vm633_vm0, %v8909_v50 }
0x3af8   :  { %14573 = vmatmul.mubr.msk.f32.vlgmr.msra.gmra.mrb[92].mxu1 %vm633_vm0, %v8910_v3 }
0x3af9   :  { %15007 = vmatpush3.bf16.msra.mxu1 %v15004_v28 }
0x3afa   :  { %15009 = vmatprep.subr.bf16.mxu1 %v15008_v31 }
0x3afd   :  { %15011 = vmatpush3.bf16.msra.mxu1 %v15008_v31 }
0x3bcb   :  { %v14574_v59 = vpop.f32.mrb[92].mxu1 }
0x3bcc   :  { %v9000_v18 = vadd.f32 %v14574_v59, %v13520_v38  ;;  %v8994_v60 = vpop.f32.mrb[93].mxu1 }
0x3bcd   :  { %v8995_v22 = vadd.f32 %v13520_v38, %v8994_v60  ;;  %v13526_v38 = vld [vmem:[%s18409_s3] ss:$0 sm:$0xff] }
0x3bce   :  { %v9004_v41 = vmax.f32 %v9000_v18, 0.0 }
0x3bcf   :  { %v9003_v42 = vmax.f32 %v8995_v22, 0.0 }
0x3bd1   :  { %14591 = vmatprep.mubr.msk.f32.mxu0 %vm2714_vm13, %v9003_v42 }
0x3bd2   :  { %14592 = vmatmul.mubr.msk.f32.vlgmr.msra.gmra.mrb[68].mxu0 %vm2714_vm13, %v9004_v41  ;;  %v13527_v41 = vld [vmem:[#allocation2] ss:$0 sm:$0xff] }
0x3bd3   :  { %14618 = vmatprep.mubr.msk.f32.mxu0 %vm16344_vm5, %v16343_v57 }
0x3ca5   :  { %v14593_v8 = vpop.f32.mrb[68].mxu0 }
0x3ca6   :  { %v9098_v2 = vadd.f32 %v14593_v8, %v13523_v29  ;;  %v9092_v10 = vpop.f32.mrb[69].mxu0 }
0x3ca7   :  { %v9093_v63 = vadd.f32 %v13523_v29, %v9092_v10 }
0x3ca8   :  { %v17822_v11 = vadd.f32 %v9098_v2, %v17785_v6 }
0x3ca9   :  { %v17825_v53 = vadd.f32 %v9093_v63, %v17788_v9 }
0x3caa   :  { %v9108_v54 = vsel %vm633_vm0, %v17822_v11, 0.0 }
0x3cab   :  { %9109 = vadd.xlane.f32.xlu1 %v9108_v54  ;;  %v9105_v43 = vsel %vm633_vm0, %v17825_v53, 0.0 }
0x3cac   :  { %9106 = vadd.xlane.f32.xlu0 %v9105_v43 }
0x3d38   :  { %v9110_v36 = vpop.xlane.xlu1 %9109 }
0x3d39   :  { %v9112_v13 = vmul.f32 0.03125, %v9110_v36  ;;  %v9107_v14 = vpop.xlane.xlu0 %9106 }
0x3d3a   :  { %v9111_v6 = vmul.f32 0.03125, %v9107_v14 }
0x3d3b   :  { %v9114_v15 = vsub.f32 %v17822_v11, %v9112_v13 }
0x3d3c   :  { %v9113_v9 = vsub.f32 %v17825_v53, %v9111_v6 }
0x3d3d   :  { %v9116_v16 = vmul.f32 %v9114_v15, %v9114_v15 }
0x3d3e   :  { %v9115_v32 = vmul.f32 %v9113_v9, %v9113_v9 }
0x3d3f   :  { %v9120_v17 = vsel %vm633_vm0, %v9116_v16, 0.0 }
0x3d40   :  { %9121 = vadd.xlane.f32.xlu1 %v9120_v17  ;;  %v9117_v1 = vsel %vm633_vm0, %v9115_v32, 0.0 }
0x3d41   :  { %9118 = vadd.xlane.f32.xlu0 %v9117_v1 }
0x3d51   :  { %15251 = vrot.lane.b32.xlu1 %v15250_v45, %s16342_s25 }
0x3d55   :  { %9276 = vrot.lane.b32.xlu1 %v13528_v34, %s16342_s25 }
0x3d57   :  { %15246 = vrot.lane.b32.xlu0 %v15245_v30, %s16342_s25 }
0x3dcd   :  { %v9122_v4 = vpop.xlane.xlu1 %9121 }
0x3dce   :  { %v9124_v46 = vmul.f32 0.032258064, %v9122_v4  ;;  %v9119_v47 = vpop.xlane.xlu0 %9118 }
0x3dcf   :  { %v9123_v49 = vmul.f32 0.032258064, %v9119_v47 }
0x3dd0   :  { %15457 = vrsqrt.f32 %v9124_v46  ;;  %vm9134_vm11 = vcmp.eq.f32.partialorder %v9124_v46, inf  ;;  %v9137_v40 = vand.u32 2147483648, %v9124_v46  ;;  %vm9136_vm12 = vcmp.eq.f32.partialorder %v9124_v46, 0.0 }
0x3dd1   :  { %15459 = vrsqrt.f32 %v9123_v49  ;;  %vm9127_vm14 = vcmp.eq.f32.partialorder %v9123_v49, inf  ;;  %v9130_v56 = vand.u32 2147483648, %v9123_v49  ;;  %vm9129_vm15 = vcmp.eq.f32.partialorder %v9123_v49, 0.0  ;;  %v15252_v33 = vpop.permute.xlu1 %15251 }
0x3dd2   :  { %v15247_v35 = vpop.permute.xlu0 %15246  ;;  %v15254_v22 = vunpack.i.h.bf16 %v15252_v33  ;;  %v15253_v42 = vunpack.i.l.bf16 %v15252_v33 }
0x3dd3   :  { %v15249_v23 = vunpack.i.h.bf16 %v15247_v35  ;;  %v15248_v20 = vunpack.i.l.bf16 %v15247_v35 }
0x3dd4   :  { %v15016_v10 = vpack.c.bf16 %v15254_v22, %v15253_v42 }
0x3dd5   :  { %v15012_v39 = vpack.c.bf16 %v15249_v23, %v15248_v20  ;;  %v9277_v36 = vpop.permute.xlu1 %9276 }
0x3dd7   :  { %15013 = vmatprep.subr.bf16.mxu1 %v15012_v39 }
0x3dda   :  { %v15458_v51 = vpop.eup %15457 }
0x3ddb   :  { %v15460_v52 = vpop.eup %15459  ;;  %v9133_v37 = vmul.f32 %v15458_v51, %v9124_v46 }
0x3ddc   :  { %v9126_v55 = vmul.f32 %v15460_v52, %v9123_v49 }
0x3ddd   :  { %v9135_v12 = vsel %vm9134_vm11, %v9124_v46, %v9133_v37 }
0x3dde   :  { %v9138_v58 = vsel %vm9136_vm12, %v9137_v40, %v9135_v12  ;;  %v9128_v61 = vsel %vm9127_vm14, %v9123_v49, %v9126_v55 }
0x3ddf   :  { %v9140_v50 = vadd.f32 1e-06, %v9138_v58  ;;  %v9131_v3 = vsel %vm9129_vm15, %v9130_v56, %v9128_v61 }
0x3de0   :  { %v9139_v48 = vadd.f32 1e-06, %v9131_v3 }
0x3de1   :  { %15461 = vrcp.f32 %v9140_v50 }
0x3de2   :  { %15463 = vrcp.f32 %v9139_v48 }
0x3deb   :  { %v15462_v5 = vpop.eup %15461 }
0x3dec   :  { %v15464_v59 = vpop.eup %15463  ;;  %v9144_v18 = vmul.f32 %v15462_v5, %v9114_v15 }
0x3ded   :  { %v9143_v60 = vmul.f32 %v15464_v59, %v9113_v9 }
0x3dee   :  { %v9152_v29 = vmul.f32 %v13526_v38, %v9144_v18 }
0x3def   :  { %v9151_v8 = vmul.f32 %v13526_v38, %v9143_v60 }
0x3df0   :  { %v9160_v63 = vadd.f32 %v13527_v41, %v9152_v29 }
0x3df1   :  { %v9159_v2 = vadd.f32 %v13527_v41, %v9151_v8 }
0x3df3   :  { %14602 = vmatprep.mubr.msk.f32.mxu1 %vm633_vm0, %v9159_v2 }
0x3df4   :  { %14603 = vmatmul.mubr.msk.f32.vlgmr.msra.gmra.mrb[94].mxu1 %vm633_vm0, %v9160_v63 }
0x3df5   :  { %15015 = vmatpush3.bf16.msra.mxu1 %v15012_v39  ;;  %14613 = vmatprep.mubr.msk.f32.mxu1 %vm633_vm0, %v9159_v2 }
0x3df6   :  { %15017 = vmatprep.subr.bf16.mxu1 %v15016_v10 }
0x3df9   :  { %15019 = vmatpush3.bf16.msra.mxu1 %v15016_v10 }
0x3dfa   :  { %14621 = vmatprep.subr.mxu1 %v16343_v57 }
0x3dfc   :  { %14614 = vmatmul.mubr.msk.f32.vlgmr.msra.gmra.mrb[96].mxu1 %vm633_vm0, %v9160_v63 }
0x3dfd   :  { %14623 = vmatprep.mubr.msk.f32.mxu1 %vm16344_vm5, %v16343_v57 }
0x3ec7   :  { %v14604_v54 = vpop.f32.mrb[94].mxu1 }
0x3ec8   :  { %v9249_v43 = vpop.f32.mrb[95].mxu1  ;;  %v9255_v13 = vadd.f32 %v14604_v54, %v13528_v34 }
0x3ec9   :  { %v9250_v6 = vadd.f32 %v13528_v34, %v9249_v43 }
0x3eca   :  { %v17856_v32 = vmul.f32 0.35355338, %v9255_v13 }
0x3ecb   :  { %v17861_v17 = vmul.f32 0.35355338, %v9250_v6 }
0x3ecf   :  { %v14615_v14 = vpop.f32.mrb[96].mxu1 }
0x3ed0   :  { %v17850_v15 = vadd.f32 %v14615_v14, %v9277_v36  ;;  %v9345_v9 = vpop.f32.mrb[97].mxu1 }
0x3ed1   :  { %v17852_v16 = vadd.f32 %v9345_v9, %v9277_v36 }
0x3ed2   :  { %14622 = vmatpush3.xpose.msk.msra.mxu1 %vm884_vm6, %v17850_v15 }
0x3ed3   :  { %14617 = vmatpush3.xpose.msk.msra.mxu0 %vm884_vm6, %v17852_v16  ;;  %14631 = vmatprep.subr.mxu1 %v16343_v57 }
0x3ed4   :  { %14626 = vmatprep.subr.mxu0 %v16343_v57 }
0x3ed5   :  { %14624 = vmatmul.mubr.msk.f32.vlgmr.msra.gmra.mrb[98].mxu1 %vm884_vm6, %v17856_v32 }
0x3ed6   :  { %14619 = vmatmul.mubr.msk.f32.vlgmr.msra.gmra.mrb[70].mxu0 %vm884_vm6, %v17861_v17  ;;  %14633 = vmatprep.mubr.msk.f32.mxu1 %vm16344_vm5, %v16343_v57 }
0x3ed7   :  { %14628 = vmatprep.mubr.msk.f32.mxu0 %vm16344_vm5, %v16343_v57 }
0x3fa8   :  { %v9502_v1 = vpop.f32.mrb[98].mxu1 }
0x3fa9   :  { %v9507_v25 = vsel %vm628_vm1, %v9502_v1, -1e+09  ;;  %v9426_v44 = vpop.f32.mrb[70].mxu0  ;;  %v14625_v45 = vpop.f32.mrb[99].mxu1 }
0x3faa   :  { %v9511_v26 = vsel %vm884_vm6, %v9507_v25, -inf  ;;  %v14620_v27 = vpop.f32.mrb[71].mxu0  ;;  %v9506_v46 = vsel %vm627_vm2, %v9426_v44, -1e+09 }
0x3fab   :  { %9512 = vmax.xlane.f32.xlu1 %v9511_v26  ;;  %v9508_v47 = vsel %vm884_vm6, %v9506_v46, -inf }
0x3fbc   :  { %9762 = vrot.lane.b32.xlu1 %v17850_v15, %s16345_s21 }
0x3fc0   :  { %9760 = vrot.lane.b32.xlu1 %v17856_v32, %s16345_s21 }
0x4038   :  { %v9513_v30 = vpop.xlane.xlu1 %9512 }
0x4039   :  { %v9515_v28 = vsub.f32 %v9507_v25, %v9513_v30 }
0x403b   :  { %v9518_v31 = vmul.f32 1.442695, %v9515_v28 }
0x403c   :  { %v9763_v20 = vpop.permute.xlu1 %9762 }
0x403d   :  { %15465 = vpow2.f32 %v9518_v31 }
0x4040   :  { %v9761_v51 = vpop.permute.xlu1 %9760 }
0x4047   :  { %v15466_v34 = vpop.eup %15465 }
0x4048   :  { %v9523_v4 = vsel %vm884_vm6, %v15466_v34, 0.0 }
0x4049   :  { %9524 = vadd.xlane.f32.xlu0 %v9523_v4 }
0x405f   :  { %9606 = vrot.lane.b32.xlu0 %v17850_v15, %s16342_s25 }
0x407e   :  { %9509 = vmax.xlane.f32.xlu0 %v9508_v47 }
0x4094   :  { %9530 = vrot.lane.b32.xlu0 %v17852_v16, %s16342_s25 }
0x4098   :  { %9682 = vrot.lane.b32.xlu0 %v17861_v17, %s16345_s21 }
0x40d6   :  { %v9525_v49 = vpop.xlane.xlu0 %9524 }
0x40d7   :  { %15467 = vrcp.f32 %v9525_v49 }
0x40da   :  { %v9607_v35 = vpop.permute.xlu0 %9606 }
0x40db   :  { %14632 = vmatpush3.msra.mxu1 %v9607_v35 }
0x40dc   :  { %14641 = vmatprep.subr.mxu1 %v16343_v57 }
0x40e1   :  { %v15468_v23 = vpop.eup %15467 }
0x40e2   :  { %v9529_v39 = vmul.f32 %v15468_v23, %v15466_v34 }
0x40e4   :  { %14634 = vmatmul.mubr.msk.f32.vlgmr.msra.gmra.mrb[100].mxu1 %vm884_vm6, %v9529_v39 }
0x40e5   :  { %14642 = vmatpush3.xpose.msk.msra.mxu1 %vm884_vm6, %v9763_v20  ;;  %14643 = vmatprep.mubr.msk.f32.mxu1 %vm16344_vm5, %v16343_v57 }
0x40e6   :  { %14651 = vmatprep.subr.mxu1 %v16343_v57 }
0x40e8   :  { %14644 = vmatmul.mubr.msk.f32.vlgmr.msra.gmra.mrb[102].mxu1 %vm884_vm6, %v9761_v51 }
0x40e9   :  { %14653 = vmatprep.mubr.msk.f32.mxu1 %vm16344_vm5, %v16343_v57 }
0x410b   :  { %v9510_v52 = vpop.xlane.xlu0 %9509 }
0x410c   :  { %v9514_v37 = vsub.f32 %v9506_v46, %v9510_v52 }
0x410e   :  { %v9516_v40 = vmul.f32 1.442695, %v9514_v37 }
0x410f   :  { %v9531_v55 = vpop.permute.xlu0 %9530 }
0x4110   :  { %15469 = vpow2.f32 %v9516_v40  ;;  %14627 = vmatpush3.msra.mxu0 %v9531_v55  ;;  %v9167_v40 = vld [vmem:[%s18410_s2 + $0x8] sm:$0xff]  ;;  %v9166_v55 = vld [vmem:[%s18410_s2] sm:$0xff] }
0x4111   :  { %14636 = vmatprep.subr.mxu0 %v16343_v57 }
0x4113   :  { %v9683_v33 = vpop.permute.xlu0 %9682 }
0x411a   :  { %v15470_v12 = vpop.eup %15469 }
0x411b   :  { %v9520_v56 = vsel %vm884_vm6, %v15470_v12, 0.0 }
0x411c   :  { %9521 = vadd.xlane.f32.xlu1 %v9520_v56 }
0x412d   :  { %9684 = vrot.lane.b32.xlu1 %v17852_v16, %s16345_s21 }
0x41a9   :  { %v9522_v58 = vpop.xlane.xlu1 %9521 }
0x41aa   :  { %15471 = vrcp.f32 %v9522_v58 }
0x41ad   :  { %v9685_v3 = vpop.permute.xlu1 %9684 }
0x41b4   :  { %v15472_v61 = vpop.eup %15471 }
0x41b5   :  { %v9528_v50 = vmul.f32 %v15472_v61, %v15470_v12 }
0x41b7   :  { %14629 = vmatmul.mubr.msk.f32.vlgmr.msra.gmra.mrb[72].mxu0 %vm884_vm6, %v9528_v50  ;;  %v17903_v48 = vpop.f32.mrb[100].mxu1 }
0x41b8   :  { %14637 = vmatpush3.xpose.msk.msra.mxu0 %vm884_vm6, %v9685_v3  ;;  %v14635_v5 = vpop.f32.mrb[101].mxu1  ;;  %14638 = vmatprep.mubr.msk.f32.mxu0 %vm16344_vm5, %v16343_v57 }
0x41b9   :  { %14646 = vmatprep.subr.mxu0 %v16343_v57 }
0x41bb   :  { %14639 = vmatmul.mubr.msk.f32.vlgmr.msra.gmra.mrb[74].mxu0 %vm884_vm6, %v9683_v33  ;;  %v9834_v38 = vpop.f32.mrb[102].mxu1 }
0x41bc   :  { %v9839_v59 = vsel %vm628_vm1, %v9834_v38, -1e+09  ;;  %v14645_v18 = vpop.f32.mrb[103].mxu1  ;;  %14648 = vmatprep.mubr.msk.f32.mxu0 %vm16344_vm5, %v16343_v57 }
0x41bd   :  { %v9843_v60 = vsel %vm884_vm6, %v9839_v59, -inf }
0x41be   :  { %9844 = vmax.xlane.f32.xlu1 %v9843_v60 }
0x41cf   :  { %10178 = vrot.lane.b32.xlu1 %v17852_v16, %s16346_s5 }
0x41d3   :  { %10176 = vrot.lane.b32.xlu1 %v17861_v17, %s16346_s5 }
0x41d7   :  { %10254 = vrot.lane.b32.xlu1 %v17856_v32, %s16346_s5 }
0x424b   :  { %v9845_v22 = vpop.xlane.xlu1 %9844 }
0x424c   :  { %v9847_v42 = vsub.f32 %v9839_v59, %v9845_v22  ;;  %v9168_v22 = vld [vmem:[%s18410_s2 + $0x10] sm:$0xff] }
0x424e   :  { %v9850_v41 = vmul.f32 1.442695, %v9847_v42 }
0x424f   :  { %v10179_v6 = vpop.permute.xlu1 %10178 }
0x4250   :  { %15473 = vpow2.f32 %v9850_v41 }
0x4253   :  { %v10177_v25 = vpop.permute.xlu1 %10176 }
0x425a   :  { %v15474_v29 = vpop.eup %15473 }
0x425b   :  { %v9855_v8 = vsel %vm884_vm6, %v15474_v29, 0.0 }
0x425c   :  { %9856 = vadd.xlane.f32.xlu0 %v9855_v8 }
0x4272   :  { %9938 = vrot.lane.b32.xlu0 %v17850_v15, %s16347_s26 }
0x4276   :  { %10256 = vrot.lane.b32.xlu0 %v17850_v15, %s16346_s5 }
0x428a   :  { %v17926_v2 = vpop.f32.mrb[72].mxu0 }
0x428b   :  { %v14630_v10 = vpop.f32.mrb[73].mxu0 }
0x428e   :  { %v9756_v63 = vpop.f32.mrb[74].mxu0 }
0x428f   :  { %v14640_v54 = vpop.f32.mrb[75].mxu0  ;;  %v9838_v43 = vsel %vm627_vm2, %v9756_v63, -1e+09 }
0x4290   :  { %v9840_v36 = vsel %vm884_vm6, %v9838_v43, -inf }
0x4295   :  { %9841 = vmax.xlane.f32.xlu0 %v9840_v36 }
0x42ab   :  { %9862 = vrot.lane.b32.xlu0 %v17852_v16, %s16347_s26 }
0x42af   :  { %10356 = vrot.lane.b32.xlu0 %v17852_v16, %s16348_s14 }
0x42b3   :  { %10593 = vrot.lane.b32.xlu0 %v17852_v16, %s16349_s0 }
0x42b7   :  { %10671 = vrot.lane.b32.xlu0 %v17850_v15, %s16349_s0 }
0x42bb   :  { %10591 = vrot.lane.b32.xlu0 %v17861_v17, %s16349_s0  ;;  %v10255_v17 = vpop.permute.xlu1 %10254 }
0x42bf   :  { %10669 = vrot.lane.b32.xlu0 %v17856_v32, %s16349_s0 }
0x42e9   :  { %v9857_v13 = vpop.xlane.xlu0 %9856 }
0x42ea   :  { %15475 = vrcp.f32 %v9857_v13 }
0x42ed   :  { %v9939_v14 = vpop.permute.xlu0 %9938 }
0x42ee   :  { %14652 = vmatpush3.msra.mxu1 %v9939_v14 }
0x42ef   :  { %14666 = vmatprep.subr.mxu1 %v16343_v57 }
0x42f1   :  { %v10257_v32 = vpop.permute.xlu0 %10256 }
0x42f4   :  { %v15476_v9 = vpop.eup %15475 }
0x42f5   :  { %v9861_v1 = vmul.f32 %v15476_v9, %v15474_v29 }
0x42f7   :  { %14654 = vmatmul.mubr.msk.f32.vlgmr.msra.gmra.mrb[104].mxu1 %vm884_vm6, %v9861_v1 }
0x42f8   :  { %14667 = vmatpush3.xpose.msk.msra.mxu1 %vm884_vm6, %v10179_v6  ;;  %14668 = vmatprep.mubr.msk.f32.mxu1 %vm16344_vm5, %v16343_v57 }
0x42f9   :  { %14671 = vmatprep.subr.mxu1 %v16343_v57 }
0x42fb   :  { %14669 = vmatmul.mubr.msk.f32.vlgmr.msra.gmra.mrb[106].mxu1 %vm884_vm6, %v10177_v25 }
0x42fc   :  { %14672 = vmatpush3.xpose.msk.msra.mxu1 %vm884_vm6, %v10257_v32  ;;  %14673 = vmatprep.mubr.msk.f32.mxu1 %vm16344_vm5, %v16343_v57 }
0x42fd   :  { %14681 = vmatprep.subr.mxu1 %v16343_v57 }
0x42ff   :  { %14674 = vmatmul.mubr.msk.f32.vlgmr.msra.gmra.mrb[108].mxu1 %vm884_vm6, %v10255_v17 }
0x4300   :  { %14683 = vmatprep.mubr.msk.f32.mxu1 %vm16344_vm5, %v16343_v57 }
0x4322   :  { %v9842_v44 = vpop.xlane.xlu0 %9841 }
0x4323   :  { %v9846_v45 = vsub.f32 %v9838_v43, %v9842_v44 }
0x4325   :  { %v9848_v26 = vmul.f32 1.442695, %v9846_v45 }
0x4326   :  { %v9863_v27 = vpop.permute.xlu0 %9862 }
0x4327   :  { %15477 = vpow2.f32 %v9848_v26  ;;  %14647 = vmatpush3.msra.mxu0 %v9863_v27 }
0x4328   :  { %14656 = vmatprep.subr.mxu0 %v9167_v40 }
0x432a   :  { %v10357_v42 = vpop.permute.xlu0 %10356 }
0x432e   :  { %v10594_v10 = vpop.permute.xlu0 %10593 }
0x4331   :  { %v15478_v30 = vpop.eup %15477 }
0x4332   :  { %v9852_v28 = vsel %vm884_vm6, %v15478_v30, 0.0 }
0x4333   :  { %9853 = vadd.xlane.f32.xlu1 %v9852_v28 }
0x43c0   :  { %v9854_v31 = vpop.xlane.xlu1 %9853 }
0x43c1   :  { %15479 = vrcp.f32 %v9854_v31 }
0x43ca   :  { %v10010_v34 = vpop.f32.mrb[104].mxu1 }
0x43cb   :  { %v15480_v4 = vpop.eup %15479  ;;  %v14655_v46 = vpop.f32.mrb[105].mxu1 }
0x43cc   :  { %v9860_v47 = vmul.f32 %v15480_v4, %v15478_v30 }
0x43ce   :  { %14649 = vmatmul.mubr.msk.f32.vlgmr.msra.gmra.mrb[76].mxu0 %vm884_vm6, %v9860_v47  ;;  %v10250_v49 = vpop.f32.mrb[106].mxu1 }
0x43cf   :  { %v10332_v35 = vsel %vm627_vm2, %v10250_v49, -1e+09  ;;  %v14670_v23 = vpop.f32.mrb[107].mxu1  ;;  %14657 = vmatpush3.msra.mxu0 %v9167_v40 }
0x43d0   :  { %v10334_v20 = vsel %vm884_vm6, %v10332_v35, -inf  ;;  %14661 = vmatprep.subr.mxu0 %v9166_v55 }
0x43d1   :  { %10335 = vmax.xlane.f32.xlu1 %v10334_v20 }
0x43d2   :  { %v10328_v39 = vpop.f32.mrb[108].mxu1 }
0x43d3   :  { %v10333_v51 = vsel %vm628_vm1, %v10328_v39, -1e+09  ;;  %v14675_v52 = vpop.f32.mrb[109].mxu1 }
0x43d4   :  { %v10337_v37 = vsel %vm884_vm6, %v10333_v51, -inf  ;;  %v9169_v52 = vld [vmem:[%s18410_s2 + $0x18] sm:$0xff] }
0x43d5   :  { %10338 = vmax.xlane.f32.xlu1 %v10337_v37 }
0x445e   :  { %v10336_v12 = vpop.xlane.xlu1 %10335 }
0x445f   :  { %v10340_v56 = vsub.f32 %v10332_v35, %v10336_v12 }
0x4461   :  { %v10342_v58 = vmul.f32 1.442695, %v10340_v56 }
0x4462   :  { %v10339_v61 = vpop.xlane.xlu1 %10338 }
0x4463   :  { %15481 = vpow2.f32 %v10342_v58  ;;  %v10341_v50 = vsub.f32 %v10333_v51, %v10339_v61 }
0x4465   :  { %v10344_v3 = vmul.f32 1.442695, %v10341_v50 }
0x4467   :  { %15483 = vpow2.f32 %v10344_v3 }
0x446d   :  { %v15482_v5 = vpop.eup %15481 }
0x446e   :  { %v10346_v33 = vsel %vm884_vm6, %v15482_v5, 0.0 }
0x446f   :  { %10347 = vadd.xlane.f32.xlu1 %v10346_v33 }
0x4471   :  { %v15484_v38 = vpop.eup %15483 }
0x4472   :  { %v10349_v59 = vsel %vm884_vm6, %v15484_v38, 0.0 }
0x4473   :  { %10350 = vadd.xlane.f32.xlu1 %v10349_v59 }
0x4484   :  { %10432 = vrot.lane.b32.xlu1 %v17850_v15, %s16348_s14 }
0x44a1   :  { %v9934_v18 = vpop.f32.mrb[76].mxu0 }
0x44a2   :  { %v14650_v60 = vpop.f32.mrb[77].mxu0  ;;  %14658 = vmatprep.mubr.msk.f32.mxu0 %vm884_vm6, %v9934_v18 }
0x44a3   :  { %14659 = vmatmul.mubr.msk.f32.vlgmr.msra.gmra.mrb[78].mxu0 %vm884_vm6, %v10010_v34 }
0x44a4   :  { %14663 = vmatprep.mubr.msk.f32.mxu0 %vm884_vm6, %v17926_v2  ;;  %14662 = vmatpush3.msra.mxu0 %v9166_v55 }
0x44a5   :  { %14676 = vmatprep.subr.mxu0 %v16343_v57 }
0x44ab   :  { %14664 = vmatmul.mubr.msk.f32.vlgmr.msra.gmra.mrb[78].mxu0 %vm884_vm6, %v17903_v48  ;;  %v10672_v48 = vpop.permute.xlu0 %10671 }
0x44ac   :  { %14677 = vmatpush3.msra.mxu0 %v10357_v42  ;;  %14678 = vmatprep.mubr.msk.f32.mxu0 %vm16344_vm5, %v16343_v57 }
0x44ad   :  { %14686 = vmatprep.subr.mxu0 %v9168_v22 }
0x44af   :  { %v10592_v36 = vpop.permute.xlu0 %10591 }
0x44b3   :  { %v10670_v1 = vpop.permute.xlu0 %10669 }
0x44fc   :  { %v10348_v41 = vpop.xlane.xlu1 %10347 }
0x44fd   :  { %15485 = vrcp.f32 %v10348_v41 }
0x4500   :  { %v10351_v29 = vpop.xlane.xlu1 %10350 }
0x4501   :  { %15487 = vrcp.f32 %v10351_v29 }
0x4504   :  { %v10433_v8 = vpop.permute.xlu1 %10432 }
0x4505   :  { %14682 = vmatpush3.msra.mxu1 %v10433_v8 }
0x4506   :  { %14691 = vmatprep.subr.mxu1 %v16343_v57 }
0x4507   :  { %v15486_v2 = vpop.eup %15485 }
0x4508   :  { %v10354_v63 = vmul.f32 %v15486_v2, %v15482_v5 }
0x450a   :  { %14679 = vmatmul.mubr.msk.f32.vlgmr.msra.gmra.mrb[80].mxu0 %vm884_vm6, %v10354_v63  ;;  %v11074_v63 = vld [vmem:[%s18411_s8] sm:$0xff] }
0x450b   :  { %v15488_v54 = vpop.eup %15487  ;;  %14687 = vmatpush3.msra.mxu0 %v9168_v22 }
0x450c   :  { %v10355_v43 = vmul.f32 %v15488_v54, %v15484_v38  ;;  %14696 = vmatprep.subr.mxu0 %v16343_v57  ;;  %v11075_v54 = vld [vmem:[%s18411_s8 + $0x8] sm:$0xff] }
0x450e   :  { %14684 = vmatmul.mubr.msk.f32.vlgmr.msra.gmra.mrb[110].mxu1 %vm884_vm6, %v10355_v43  ;;  %v11076_v43 = vld [vmem:[%s18411_s8 + $0x10] sm:$0xff] }
0x450f   :  { %14692 = vmatpush3.xpose.msk.msra.mxu1 %vm884_vm6, %v10594_v10  ;;  %14693 = vmatprep.mubr.msk.f32.mxu1 %vm16344_vm5, %v16343_v57 }
0x4510   :  { %14701 = vmatprep.subr.mxu1 %v16343_v57 }
0x4512   :  { %14694 = vmatmul.mubr.msk.f32.vlgmr.msra.gmra.mrb[112].mxu1 %vm884_vm6, %v10592_v36  ;;  %v11077_v36 = vld [vmem:[%s18411_s8 + $0x18] sm:$0xff] }
0x4513   :  { %14703 = vmatprep.mubr.msk.f32.mxu1 %vm16344_vm5, %v16343_v57 }
0x45dd   :  { %v10428_v13 = vpop.f32.mrb[80].mxu0 }
0x45de   :  { %v14680_v14 = vpop.f32.mrb[81].mxu0  ;;  %14688 = vmatprep.mubr.msk.f32.mxu0 %vm884_vm6, %v10428_v13  ;;  %v15260_v13 = vpack.i.bf16 %v11077_v36, %v11076_v43 }
0x45df   :  { %v15020_v14 = vpack.c.bf16 %v11075_v54, %v11074_v63 }
0x45e1   :  { %v10504_v6 = vpop.f32.mrb[110].mxu1 }
0x45e2   :  { %v14685_v9 = vpop.f32.mrb[111].mxu1  ;;  %14689 = vmatmul.mubr.msk.f32.vlgmr.msra.gmra.mrb[78].mxu0 %vm884_vm6, %v10504_v6  ;;  %v15024_v6 = vpack.c.bf16 %v11077_v36, %v11076_v43 }
0x45e3   :  { %14697 = vmatpush3.xpose.msk.msra.mxu0 %vm884_vm6, %v10672_v48  ;;  %14698 = vmatprep.mubr.msk.f32.mxu0 %vm16344_vm5, %v16343_v57  ;;  %v15255_v48 = vpack.i.bf16 %v11075_v54, %v11074_v63  ;;  %v18049_v9 = vld [vmem:[#allocation16] ss:$0 sm:$0xff] }
0x45e4   :  { %14706 = vmatprep.subr.mxu0 %v16343_v57 }
0x45e5   :  { %v10665_v25 = vpop.f32.mrb[112].mxu1 }
0x45e6   :  { %v10747_v32 = vsel %vm627_vm2, %v10665_v25, -1e+09  ;;  %v14695_v17 = vpop.f32.mrb[113].mxu1  ;;  %14699 = vmatmul.mubr.msk.f32.vlgmr.msra.gmra.mrb[82].mxu0 %vm884_vm6, %v10670_v1 }
0x45e7   :  { %v10749_v44 = vsel %vm884_vm6, %v10747_v32, -inf  ;;  %14708 = vmatprep.mubr.msk.f32.mxu0 %vm16344_vm5, %v16343_v57 }
0x45e8   :  { %10750 = vmax.xlane.f32.xlu1 %v10749_v44 }
0x45f9   :  { %10771 = vrot.lane.b32.xlu1 %v17852_v16, %s16350_s29 }
0x4675   :  { %v10751_v45 = vpop.xlane.xlu1 %10750 }
0x4676   :  { %v10755_v27 = vsub.f32 %v10747_v32, %v10751_v45 }
0x4678   :  { %v10757_v30 = vmul.f32 1.442695, %v10755_v27 }
0x4679   :  { %v10772_v26 = vpop.permute.xlu1 %10771 }
0x467a   :  { %14702 = vmatpush3.msra.mxu1 %v10772_v26  ;;  %15489 = vpow2.f32 %v10757_v30 }
0x467b   :  { %15021 = vmatprep.subr.bf16.mxu1 %v15020_v14 }
0x4684   :  { %v15490_v4 = vpop.eup %15489 }
0x4685   :  { %v10761_v46 = vsel %vm884_vm6, %v15490_v4, 0.0 }
0x46b9   :  { %v10743_v62 = vpop.f32.mrb[82].mxu0 }
0x46ba   :  { %v10748_v28 = vsel %vm628_vm1, %v10743_v62, -1e+09  ;;  %v14700_v31 = vpop.f32.mrb[83].mxu0 }
0x46bb   :  { %v10752_v34 = vsel %vm884_vm6, %v10748_v28, -inf }
0x46bc   :  { %10753 = vmax.xlane.f32.xlu0 %v10752_v34 }
0x46c0   :  { %10762 = vadd.xlane.f32.xlu0 %v10761_v46 }
0x4749   :  { %v10754_v16 = vpop.xlane.xlu0 %10753 }
0x474a   :  { %v10756_v47 = vsub.f32 %v10748_v28, %v10754_v16 }
0x474c   :  { %v10759_v49 = vmul.f32 1.442695, %v10756_v47 }
0x474d   :  { %v10763_v35 = vpop.xlane.xlu0 %10762 }
0x474e   :  { %15491 = vpow2.f32 %v10759_v49 }
0x474f   :  { %15493 = vrcp.f32 %v10763_v35 }
0x4758   :  { %v15492_v23 = vpop.eup %15491 }
0x4759   :  { %v15494_v20 = vpop.eup %15493  ;;  %v10764_v0 = vsel %vm884_vm6, %v15492_v23, 0.0 }
0x475a   :  { %v10769_v39 = vmul.f32 %v15494_v20, %v15490_v4  ;;  %10765 = vadd.xlane.f32.xlu0 %v10764_v0 }
0x475c   :  { %14704 = vmatmul.mubr.msk.f32.vlgmr.msra.gmra.mrb[114].mxu1 %vm884_vm6, %v10769_v39 }
0x475d   :  { %15023 = vmatpush3.bf16.msra.mxu1 %v15020_v14 }
0x475e   :  { %15025 = vmatprep.subr.bf16.mxu1 %v15024_v6 }
0x4761   :  { %15027 = vmatpush3.bf16.msra.mxu1 %v15024_v6 }
0x4762   :  { %14738 = vmatprep.subr.mxu1 %v16343_v57 }
0x4770   :  { %10847 = vrot.lane.b32.xlu0 %v17850_v15, %s16350_s29  ;;  %v13565_v15 = vld [vmem:[#allocation11] ss:$0 sm:$0xff] }
0x47e7   :  { %v10766_v51 = vpop.xlane.xlu0 %10765 }
0x47e8   :  { %15495 = vrcp.f32 %v10766_v51 }
0x47eb   :  { %v10848_v37 = vpop.permute.xlu0 %10847 }
0x47ec   :  { %14707 = vmatpush3.msra.mxu0 %v10848_v37  ;;  %v13566_v37 = vld [vmem:[#allocation5] ss:$0 sm:$0xff] }
0x47ed   :  { %14711 = vmatprep.subr.mxu0 %v9169_v52 }
0x47f2   :  { %v15496_v40 = vpop.eup %15495 }
0x47f3   :  { %v10770_v55 = vmul.f32 %v15496_v40, %v15492_v23 }
0x47f5   :  { %14709 = vmatmul.mubr.msk.f32.vlgmr.msra.gmra.mrb[84].mxu0 %vm884_vm6, %v10770_v55 }
0x47f6   :  { %14712 = vmatpush3.msra.mxu0 %v9169_v52 }
0x482f   :  { %v10843_v12 = vpop.f32.mrb[114].mxu1 }
0x4830   :  { %v14705_v56 = vpop.f32.mrb[115].mxu1  ;;  %14713 = vmatprep.mubr.msk.f32.mxu0 %vm884_vm6, %v10843_v12 }
0x4831   :  { %v13567_v56 = vld [vmem:[#allocation7] ss:$0 sm:$0xff] }
0x48c8   :  { %v10919_v58 = vpop.f32.mrb[84].mxu0 }
0x48c9   :  { %v14710_v61 = vpop.f32.mrb[85].mxu0  ;;  %14714 = vmatmul.mubr.msk.f32.vlgmr.msra.gmra.mrb[78].mxu0 %vm884_vm6, %v10919_v58 }
0x48ca   :  { %14735 = vmatprep.mubr.msk.f32.mxu0 %vm633_vm0, %v17590_v24 }
0x499c   :  { %v14715_v50 = vpop.f32.mrb[78].mxu0 }
0x499d   :  { %v11013_v3 = vadd.f32 %v14715_v50, %v13565_v15  ;;  %v10995_v5 = vpop.f32.mrb[79].mxu0 }
0x499e   :  { %v11012_v33 = vadd.f32 %v13565_v15, %v10995_v5 }
0x499f   :  { %v18021_v38 = vadd.f32 %v11013_v3, %v17822_v11 }
0x49a0   :  { %v18024_v59 = vadd.f32 %v11012_v33, %v17825_v53 }
0x49a1   :  { %v11021_v18 = vsel %vm633_vm0, %v18021_v38, 0.0 }
0x49a2   :  { %11022 = vadd.xlane.f32.xlu0 %v11021_v18  ;;  %v11018_v24 = vsel %vm633_vm0, %v18024_v59, 0.0 }
0x49a3   :  { %11019 = vadd.xlane.f32.xlu1 %v11018_v24 }
0x4a2f   :  { %v11023_v60 = vpop.xlane.xlu0 %11022 }
0x4a30   :  { %v11025_v22 = vmul.f32 0.03125, %v11023_v60  ;;  %v11020_v42 = vpop.xlane.xlu1 %11019 }
0x4a31   :  { %v11024_v11 = vmul.f32 0.03125, %v11020_v42 }
0x4a32   :  { %v18031_v41 = vsub.f32 %v18021_v38, %v11025_v22 }
0x4a33   :  { %v18034_v53 = vsub.f32 %v18024_v59, %v11024_v11 }
0x4a34   :  { %v11029_v29 = vmul.f32 %v18031_v41, %v18031_v41 }
0x4a35   :  { %v11028_v8 = vmul.f32 %v18034_v53, %v18034_v53 }
0x4a36   :  { %v11033_v10 = vsel %vm633_vm0, %v11029_v29, 0.0 }
0x4a37   :  { %11034 = vadd.xlane.f32.xlu0 %v11033_v10  ;;  %v11030_v2 = vsel %vm633_vm0, %v11028_v8, 0.0 }
0x4a38   :  { %11031 = vadd.xlane.f32.xlu1 %v11030_v2 }
0x4a49   :  { %15256 = vrot.lane.b32.xlu1 %v15255_v48, %s16342_s25 }
0x4a4d   :  { %15261 = vrot.lane.b32.xlu0 %v15260_v13, %s16342_s25  ;;  %11189 = vrot.lane.b32.xlu1 %v18049_v9, %s16342_s25 }
0x4ac4   :  { %v11035_v1 = vpop.xlane.xlu0 %11034 }
0x4ac5   :  { %v11037_v25 = vmul.f32 0.032258064, %v11035_v1  ;;  %v11032_v32 = vpop.xlane.xlu1 %11031 }
0x4ac6   :  { %v11036_v17 = vmul.f32 0.032258064, %v11032_v32 }
0x4ac7   :  { %15497 = vrsqrt.f32 %v11037_v25  ;;  %vm11047_vm1 = vcmp.eq.f32.partialorder %v11037_v25, inf  ;;  %v11050_v16 = vand.u32 2147483648, %v11037_v25  ;;  %vm11049_vm2 = vcmp.eq.f32.partialorder %v11037_v25, 0.0 }
0x4ac8   :  { %15499 = vrsqrt.f32 %v11036_v17  ;;  %v15262_v44 = vpop.permute.xlu0 %15261  ;;  %vm11040_vm3 = vcmp.eq.f32.partialorder %v11036_v17, inf  ;;  %v11043_v35 = vand.u32 2147483648, %v11036_v17  ;;  %vm11042_vm4 = vcmp.eq.f32.partialorder %v11036_v17, 0.0 }
0x4ac9   :  { %v15257_v45 = vpop.permute.xlu1 %15256  ;;  %v15264_v26 = vunpack.i.h.bf16 %v15262_v44  ;;  %v15263_v27 = vunpack.i.l.bf16 %v15262_v44 }
0x4aca   :  { %v15259_v30 = vunpack.i.h.bf16 %v15257_v45  ;;  %v15258_v62 = vunpack.i.l.bf16 %v15257_v45 }
0x4acb   :  { %v15032_v31 = vpack.c.bf16 %v15264_v26, %v15263_v27 }
0x4acc   :  { %v15028_v28 = vpack.c.bf16 %v15259_v30, %v15258_v62 }
0x4ace   :  { %15029 = vmatprep.subr.bf16.mxu0 %v15028_v28 }
0x4acf   :  { %15031 = vmatpush3.bf16.msra.mxu0 %v15028_v28 }
0x4ad0   :  { %15033 = vmatprep.subr.bf16.mxu0 %v15032_v31 }
0x4ad1   :  { %v15498_v34 = vpop.eup %15497 }
0x4ad2   :  { %v15500_v4 = vpop.eup %15499  ;;  %v11046_v46 = vmul.f32 %v15498_v34, %v11037_v25 }
0x4ad3   :  { %v11039_v47 = vmul.f32 %v15500_v4, %v11036_v17  ;;  %15035 = vmatpush3.bf16.msra.mxu0 %v15032_v31 }
0x4ad4   :  { %v11048_v49 = vsel %vm11047_vm1, %v11037_v25, %v11046_v46  ;;  %14748 = vmatprep.subr.mxu0 %v16343_v57 }
0x4ad5   :  { %v11051_v23 = vsel %vm11049_vm2, %v11050_v16, %v11048_v49  ;;  %v11041_v20 = vsel %vm11040_vm3, %v11036_v17, %v11039_v47 }
0x4ad6   :  { %v11053_v0 = vadd.f32 1e-06, %v11051_v23  ;;  %v11044_v39 = vsel %vm11042_vm4, %v11043_v35, %v11041_v20  ;;  %14736 = vmatmul.mubr.msk.f32.vlgmr.msra.gmra.mrb[86].mxu0 %vm633_vm0, %v17588_v21  ;;  %v11190_v21 = vpop.permute.xlu1 %11189 }
0x4ad7   :  { %v11052_v51 = vadd.f32 1e-06, %v11044_v39  ;;  %14750 = vmatprep.mubr.msk.f32.mxu0 %vm16344_vm5, %v16343_v57 }
0x4ad8   :  { %15501 = vrcp.f32 %v11053_v0 }
0x4ad9   :  { %15503 = vrcp.f32 %v11052_v51 }
0x4ae2   :  { %v15502_v52 = vpop.eup %15501 }
0x4ae3   :  { %v15504_v40 = vpop.eup %15503  ;;  %v11057_v55 = vmul.f32 %v15502_v52, %v18031_v41 }
0x4ae4   :  { %v11056_v12 = vmul.f32 %v15504_v40, %v18034_v53 }
0x4ae5   :  { %v11065_v58 = vmul.f32 %v13566_v37, %v11057_v55 }
0x4ae6   :  { %v11064_v61 = vmul.f32 %v13566_v37, %v11056_v12 }
0x4ae7   :  { %v11073_v50 = vadd.f32 %v13567_v56, %v11065_v58 }
0x4ae8   :  { %v11072_v15 = vadd.f32 %v13567_v56, %v11064_v61 }
0x4aea   :  { %14724 = vmatprep.mubr.msk.f32.mxu1 %vm633_vm0, %v11072_v15 }
0x4aeb   :  { %14725 = vmatmul.mubr.msk.f32.vlgmr.msra.gmra.mrb[116].mxu1 %vm633_vm0, %v11073_v50 }
0x4aec   :  { %14740 = vmatprep.mubr.msk.f32.mxu1 %vm16344_vm5, %v16343_v57 }
0x4ba9   :  { %v14737_v3 = vpop.f32.mrb[86].mxu0 }
0x4baa   :  { %v11258_v5 = vpop.f32.mrb[87].mxu0  ;;  %v18073_v11 = vadd.f32 %v14737_v3, %v11190_v21 }
0x4bab   :  { %v18064_v33 = vadd.f32 %v11258_v5, %v11190_v21 }
0x4bad   :  { %14739 = vmatpush3.xpose.msk.msra.mxu1 %vm884_vm6, %v18064_v33 }
0x4bae   :  { %14743 = vmatprep.subr.mxu1 %v16343_v57 }
0x4bbe   :  { %v14726_v18 = vpop.f32.mrb[116].mxu1 }
0x4bbf   :  { %v11162_v24 = vpop.f32.mrb[117].mxu1  ;;  %v11168_v22 = vadd.f32 %v14726_v18, %v18049_v9 }
0x4bc0   :  { %v11163_v60 = vadd.f32 %v18049_v9, %v11162_v24 }
0x4bc1   :  { %v18081_v41 = vmul.f32 0.35355338, %v11168_v22 }
0x4bc2   :  { %v18071_v42 = vmul.f32 0.35355338, %v11163_v60 }
0x4bc4   :  { %14741 = vmatmul.mubr.msk.f32.vlgmr.msra.gmra.mrb[118].mxu1 %vm884_vm6, %v18071_v42 }
0x4bc5   :  { %14744 = vmatpush3.xpose.msk.msra.mxu1 %vm884_vm6, %v18073_v11  ;;  %14745 = vmatprep.mubr.msk.f32.mxu1 %vm16344_vm5, %v16343_v57 }
0x4bc6   :  { %14753 = vmatprep.subr.mxu1 %v16343_v57 }
0x4bc8   :  { %14746 = vmatmul.mubr.msk.f32.vlgmr.msra.gmra.mrb[120].mxu1 %vm884_vm6, %v18081_v41 }
0x4bc9   :  { %14755 = vmatprep.mubr.msk.f32.mxu1 %vm16344_vm5, %v16343_v57 }
0x4c97   :  { %v11339_v53 = vpop.f32.mrb[118].mxu1 }
0x4c98   :  { %v14742_v29 = vpop.f32.mrb[119].mxu1  ;;  %v11419_v54 = vsel %vm625_vm8, %v11339_v53, -1e+09 }
0x4c99   :  { %v11421_v48 = vsel %vm884_vm6, %v11419_v54, -inf }
0x4c9b   :  { %v11415_v8 = vpop.f32.mrb[120].mxu1 }
0x4c9c   :  { %v11420_v10 = vsel %vm626_vm7, %v11415_v8, -1e+09  ;;  %v14747_v2 = vpop.f32.mrb[121].mxu1 }
0x4c9d   :  { %v11424_v63 = vsel %vm884_vm6, %v11420_v10, -inf }
0x4c9e   :  { %11425 = vmax.xlane.f32.xlu1 %v11424_v63 }
0x4caf   :  { %11675 = vrot.lane.b32.xlu1 %v18073_v11, %s16345_s21 }
0x4cb3   :  { %11673 = vrot.lane.b32.xlu1 %v18081_v41, %s16345_s21 }
0x4cd7   :  { %11422 = vmax.xlane.f32.xlu1 %v11421_v48 }
0x4ce8   :  { %11597 = vrot.lane.b32.xlu1 %v18064_v33, %s16345_s21 }
0x4cec   :  { %11595 = vrot.lane.b32.xlu1 %v18071_v42, %s16345_s21  ;;  %s18413_s21 = sld [smem:[#allocation88_spill]] }
0x4cf0   :  { %12091 = vrot.lane.b32.xlu1 %v18064_v33, %s16346_s5 }
0x4d2b   :  { %v11426_v43 = vpop.xlane.xlu1 %11425 }
0x4d2c   :  { %v11428_v36 = vsub.f32 %v11420_v10, %v11426_v43 }
0x4d2e   :  { %v11431_v13 = vmul.f32 1.442695, %v11428_v36 }
0x4d2f   :  { %v11676_v9 = vpop.permute.xlu1 %11675 }
0x4d30   :  { %15505 = vpow2.f32 %v11431_v13 }
0x4d33   :  { %v11674_v1 = vpop.permute.xlu1 %11673 }
0x4d3a   :  { %v15506_v14 = vpop.eup %15505 }
0x4d3b   :  { %v11436_v6 = vsel %vm884_vm6, %v15506_v14, 0.0 }
0x4d3c   :  { %11437 = vadd.xlane.f32.xlu0 %v11436_v6 }
0x4d52   :  { %11519 = vrot.lane.b32.xlu0 %v18073_v11, %s16342_s25 }
0x4d64   :  { %v11423_v25 = vpop.xlane.xlu1 %11422 }
0x4d65   :  { %v11427_v32 = vsub.f32 %v11419_v54, %v11423_v25 }
0x4d67   :  { %v11429_v17 = vmul.f32 1.442695, %v11427_v32 }
0x4d68   :  { %v11598_v4 = vpop.permute.xlu1 %11597 }
0x4d69   :  { %15507 = vpow2.f32 %v11429_v17 }
0x4d6c   :  { %v11596_v16 = vpop.permute.xlu1 %11595 }
0x4d70   :  { %v12092_v21 = vpop.permute.xlu1 %12091 }
0x4d73   :  { %v15508_v44 = vpop.eup %15507 }
0x4d74   :  { %v11433_v45 = vsel %vm884_vm6, %v15508_v44, 0.0 }
0x4d75   :  { %11434 = vadd.xlane.f32.xlu0 %v11433_v45 }
0x4d8b   :  { %11443 = vrot.lane.b32.xlu0 %v18064_v33, %s16342_s25  ;;  %s18412_s25 = sld [smem:[#allocation96_spill]] }
0x4d91   :  { %v11080_v45 = vld [vmem:[%s18412_s25 + $0x8] sm:$0xff] }
0x4dc9   :  { %v11438_v26 = vpop.xlane.xlu0 %11437 }
0x4dca   :  { %15509 = vrcp.f32 %v11438_v26  ;;  %v11079_v26 = vld [vmem:[%s18412_s25] sm:$0xff] }
0x4dcd   :  { %v11520_v27 = vpop.permute.xlu0 %11519 }
0x4dce   :  { %14754 = vmatpush3.msra.mxu1 %v11520_v27 }
0x4dcf   :  { %14763 = vmatprep.subr.mxu1 %v16343_v57 }
0x4dd4   :  { %v15510_v30 = vpop.eup %15509 }
0x4dd5   :  { %v11442_v62 = vmul.f32 %v15510_v30, %v15506_v14 }
0x4dd7   :  { %14756 = vmatmul.mubr.msk.f32.vlgmr.msra.gmra.mrb[122].mxu1 %vm884_vm6, %v11442_v62 }
0x4dd8   :  { %14764 = vmatpush3.xpose.msk.msra.mxu1 %vm884_vm6, %v11676_v9  ;;  %14765 = vmatprep.mubr.msk.f32.mxu1 %vm16344_vm5, %v16343_v57 }
0x4dd9   :  { %14773 = vmatprep.subr.mxu1 %v16343_v57 }
0x4ddb   :  { %14766 = vmatmul.mubr.msk.f32.vlgmr.msra.gmra.mrb[124].mxu1 %vm884_vm6, %v11674_v1 }
0x4ddc   :  { %14775 = vmatprep.mubr.msk.f32.mxu1 %vm16344_vm5, %v16343_v57 }
0x4e02   :  { %v11435_v28 = vpop.xlane.xlu0 %11434 }
0x4e03   :  { %15511 = vrcp.f32 %v11435_v28 }
0x4e06   :  { %v11444_v31 = vpop.permute.xlu0 %11443 }
0x4e07   :  { %14749 = vmatpush3.msra.mxu0 %v11444_v31 }
0x4e08   :  { %14758 = vmatprep.subr.mxu0 %v16343_v57 }
0x4e0d   :  { %v15512_v34 = vpop.eup %15511 }
0x4e0e   :  { %v11441_v46 = vmul.f32 %v15512_v34, %v15508_v44 }
0x4e10   :  { %14751 = vmatmul.mubr.msk.f32.vlgmr.msra.gmra.mrb[88].mxu0 %vm884_vm6, %v11441_v46 }
0x4e11   :  { %14759 = vmatpush3.xpose.msk.msra.mxu0 %vm884_vm6, %v11598_v4  ;;  %14760 = vmatprep.mubr.msk.f32.mxu0 %vm16344_vm5, %v16343_v57 }
0x4e12   :  { %14768 = vmatprep.subr.mxu0 %v16343_v57 }
0x4e14   :  { %14761 = vmatmul.mubr.msk.f32.vlgmr.msra.gmra.mrb[90].mxu0 %vm884_vm6, %v11596_v16 }
0x4e15   :  { %14770 = vmatprep.mubr.msk.f32.mxu0 %vm16344_vm5, %v16343_v57 }
0x4eaa   :  { %v18128_v47 = vpop.f32.mrb[122].mxu1 }
0x4eab   :  { %v14757_v49 = vpop.f32.mrb[123].mxu1 }
0x4eae   :  { %v11747_v35 = vpop.f32.mrb[124].mxu1 }
0x4eaf   :  { %v11752_v23 = vsel %vm626_vm7, %v11747_v35, -1e+09  ;;  %v14767_v20 = vpop.f32.mrb[125].mxu1 }
0x4eb0   :  { %v11756_v0 = vsel %vm884_vm6, %v11752_v23, -inf }
0x4eb1   :  { %11757 = vmax.xlane.f32.xlu0 %v11756_v0  ;;  %v11081_v0 = vld [vmem:[%s18412_s25 + $0x10] sm:$0xff] }
0x4ec7   :  { %11851 = vrot.lane.b32.xlu0 %v18073_v11, %s16347_s26 }
0x4ecb   :  { %12089 = vrot.lane.b32.xlu0 %v18071_v42, %s16346_s5 }
0x4ecf   :  { %12167 = vrot.lane.b32.xlu0 %v18081_v41, %s16346_s5 }
0x4ee3   :  { %v18139_v39 = vpop.f32.mrb[88].mxu0 }
0x4ee4   :  { %v14752_v51 = vpop.f32.mrb[89].mxu0 }
0x4ee7   :  { %v11669_v52 = vpop.f32.mrb[90].mxu0 }
0x4ee8   :  { %v14762_v37 = vpop.f32.mrb[91].mxu0  ;;  %v11751_v15 = vsel %vm625_vm8, %v11669_v52, -1e+09 }
0x4ee9   :  { %v11753_v50 = vsel %vm884_vm6, %v11751_v15, -inf }
0x4f3e   :  { %v11758_v40 = vpop.xlane.xlu0 %11757 }
0x4f3f   :  { %v11760_v55 = vsub.f32 %v11752_v23, %v11758_v40 }
0x4f41   :  { %v11763_v12 = vmul.f32 1.442695, %v11760_v55 }
0x4f42   :  { %v11852_v56 = vpop.permute.xlu0 %11851 }
0x4f43   :  { %15513 = vpow2.f32 %v11763_v12  ;;  %14774 = vmatpush3.msra.mxu1 %v11852_v56 }
0x4f44   :  { %14788 = vmatprep.subr.mxu1 %v16343_v57 }
0x4f46   :  { %v12090_v24 = vpop.permute.xlu0 %12089 }
0x4f4a   :  { %v12168_v22 = vpop.permute.xlu0 %12167 }
0x4f4d   :  { %v15514_v58 = vpop.eup %15513 }
0x4f4e   :  { %v11768_v61 = vsel %vm884_vm6, %v15514_v58, 0.0 }
0x4f4f   :  { %11769 = vadd.xlane.f32.xlu1 %v11768_v61 }
0x4f60   :  { %12169 = vrot.lane.b32.xlu1 %v18073_v11, %s16346_s5  ;;  %s18414_s5 = sld [smem:[#allocation89_spill]] }
0x4f84   :  { %11754 = vmax.xlane.f32.xlu1 %v11753_v50 }
0x4fdc   :  { %v11770_v3 = vpop.xlane.xlu1 %11769 }
0x4fdd   :  { %15515 = vrcp.f32 %v11770_v3 }
0x4fe0   :  { %v12170_v60 = vpop.permute.xlu1 %12169 }
0x4fe7   :  { %v15516_v5 = vpop.eup %15515 }
0x4fe8   :  { %v11774_v18 = vmul.f32 %v15516_v5, %v15514_v58 }
0x4fea   :  { %14776 = vmatmul.mubr.msk.f32.vlgmr.msra.gmra.mrb[126].mxu1 %vm884_vm6, %v11774_v18 }
0x4feb   :  { %14789 = vmatpush3.xpose.msk.msra.mxu1 %vm884_vm6, %v12092_v21  ;;  %14790 = vmatprep.mubr.msk.f32.mxu1 %vm16344_vm5, %v16343_v57 }
0x4fec   :  { %14793 = vmatprep.subr.mxu1 %v16343_v57 }
0x4fee   :  { %14791 = vmatmul.mubr.msk.f32.vlgmr.msra.gmra.mrb[128].mxu1 %vm884_vm6, %v12090_v24 }
0x4fef   :  { %14794 = vmatpush3.xpose.msk.msra.mxu1 %vm884_vm6, %v12170_v60  ;;  %14795 = vmatprep.mubr.msk.f32.mxu1 %vm16344_vm5, %v16343_v57 }
0x4ff0   :  { %14803 = vmatprep.subr.mxu1 %v16343_v57 }
0x4ff2   :  { %14796 = vmatmul.mubr.msk.f32.vlgmr.msra.gmra.mrb[130].mxu1 %vm884_vm6, %v12168_v22 }
0x4ff3   :  { %14805 = vmatprep.mubr.msk.f32.mxu1 %vm16344_vm5, %v16343_v57 }
0x5011   :  { %v11755_v53 = vpop.xlane.xlu1 %11754 }
0x5012   :  { %v11759_v29 = vsub.f32 %v11751_v15, %v11755_v53 }
0x5014   :  { %v11761_v8 = vmul.f32 1.442695, %v11759_v29 }
0x5016   :  { %15517 = vpow2.f32 %v11761_v8 }
0x5020   :  { %v15518_v10 = vpop.eup %15517 }
0x5021   :  { %v11765_v2 = vsel %vm884_vm6, %v15518_v10, 0.0 }
0x5022   :  { %11766 = vadd.xlane.f32.xlu0 %v11765_v2 }
0x5038   :  { %11775 = vrot.lane.b32.xlu0 %v18064_v33, %s16347_s26  ;;  %s18415_s26 = sld [smem:[#allocation86_spill]] }
0x503c   :  { %12345 = vrot.lane.b32.xlu0 %v18073_v11, %s16348_s14 }
0x5040   :  { %12506 = vrot.lane.b32.xlu0 %v18064_v33, %s16349_s0 }
0x5044   :  { %12584 = vrot.lane.b32.xlu0 %v18073_v11, %s16349_s0 }
0x5048   :  { %12504 = vrot.lane.b32.xlu0 %v18071_v42, %s16349_s0 }
0x50af   :  { %v11767_v63 = vpop.xlane.xlu0 %11766 }
0x50b0   :  { %15519 = vrcp.f32 %v11767_v63 }
0x50b3   :  { %v11776_v54 = vpop.permute.xlu0 %11775 }
0x50b4   :  { %14769 = vmatpush3.msra.mxu0 %v11776_v54 }
0x50b5   :  { %14778 = vmatprep.subr.mxu0 %v11080_v45 }
0x50b7   :  { %v12346_v48 = vpop.permute.xlu0 %12345 }
0x50b8   :  { %14804 = vmatpush3.msra.mxu1 %v12346_v48 }
0x50b9   :  { %14813 = vmatprep.subr.mxu1 %v16343_v57 }
0x50ba   :  { %v15520_v43 = vpop.eup %15519 }
0x50bb   :  { %v11773_v36 = vmul.f32 %v15520_v43, %v15518_v10  ;;  %v12507_v52 = vpop.permute.xlu0 %12506 }
0x50bd   :  { %14771 = vmatmul.mubr.msk.f32.vlgmr.msra.gmra.mrb[92].mxu0 %vm884_vm6, %v11773_v36  ;;  %v11923_v13 = vpop.f32.mrb[126].mxu1 }
0x50be   :  { %v14777_v14 = vpop.f32.mrb[127].mxu1  ;;  %14779 = vmatpush3.msra.mxu0 %v11080_v45 }
0x50bf   :  { %14783 = vmatprep.subr.mxu0 %v11079_v26  ;;  %v12585_v55 = vpop.permute.xlu0 %12584 }
0x50c1   :  { %v12163_v6 = vpop.f32.mrb[128].mxu1 }
0x50c2   :  { %v12245_v42 = vsel %vm625_vm8, %v12163_v6, -1e+09  ;;  %v14792_v9 = vpop.f32.mrb[129].mxu1 }
0x50c3   :  { %v12247_v1 = vsel %vm884_vm6, %v12245_v42, -inf  ;;  %v12505_v12 = vpop.permute.xlu0 %12504 }
0x50c4   :  { %12248 = vmax.xlane.f32.xlu1 %v12247_v1  ;;  %v11082_v1 = vld [vmem:[%s18412_s25 + $0x18] sm:$0xff] }
0x50c5   :  { %v12241_v25 = vpop.f32.mrb[130].mxu1 }
0x50c6   :  { %v12246_v32 = vsel %vm626_vm7, %v12241_v25, -1e+09  ;;  %v14797_v17 = vpop.f32.mrb[131].mxu1 }
0x50c7   :  { %v12250_v44 = vsel %vm884_vm6, %v12246_v32, -inf }
0x50c8   :  { %12251 = vmax.xlane.f32.xlu1 %v12250_v44  ;;  %v13605_v44 = vld [vmem:[#allocation14] ss:$0 sm:$0xff] }
0x5151   :  { %v12249_v27 = vpop.xlane.xlu1 %12248 }
0x5152   :  { %v12253_v30 = vsub.f32 %v12245_v42, %v12249_v27 }
0x5154   :  { %v12255_v62 = vmul.f32 1.442695, %v12253_v30 }
0x5155   :  { %v12252_v28 = vpop.xlane.xlu1 %12251 }
0x5156   :  { %15521 = vpow2.f32 %v12255_v62  ;;  %v12254_v31 = vsub.f32 %v12246_v32, %v12252_v28 }
0x5158   :  { %v12257_v34 = vmul.f32 1.442695, %v12254_v31 }
0x515a   :  { %15523 = vpow2.f32 %v12257_v34 }
0x5160   :  { %v15522_v4 = vpop.eup %15521 }
0x5161   :  { %v12259_v46 = vsel %vm884_vm6, %v15522_v4, 0.0 }
0x5162   :  { %12260 = vadd.xlane.f32.xlu1 %v12259_v46 }
0x5164   :  { %v15524_v16 = vpop.eup %15523 }
0x5165   :  { %v12262_v49 = vsel %vm884_vm6, %v15524_v16, 0.0 }
0x5166   :  { %12263 = vadd.xlane.f32.xlu1 %v12262_v49 }
0x5177   :  { %12269 = vrot.lane.b32.xlu1 %v18064_v33, %s16348_s14  ;;  %s18416_s14 = sld [smem:[#allocation87_spill]] }
0x517b   :  { %12582 = vrot.lane.b32.xlu1 %v18081_v41, %s16349_s0  ;;  %s16351_s0 = smov [#allocation47]  }
0x5190   :  { %v11847_v35 = vpop.f32.mrb[92].mxu0 }
0x5191   :  { %v14772_v23 = vpop.f32.mrb[93].mxu0  ;;  %14780 = vmatprep.mubr.msk.f32.mxu0 %vm884_vm6, %v11847_v35 }
0x5192   :  { %14781 = vmatmul.mubr.msk.f32.vlgmr.msra.gmra.mrb[94].mxu0 %vm884_vm6, %v11923_v13 }
0x5193   :  { %14785 = vmatprep.mubr.msk.f32.mxu0 %vm884_vm6, %v18139_v39  ;;  %14784 = vmatpush3.msra.mxu0 %v11079_v26 }
0x5194   :  { %14798 = vmatprep.subr.mxu0 %v16343_v57 }
0x519a   :  { %14786 = vmatmul.mubr.msk.f32.vlgmr.msra.gmra.mrb[94].mxu0 %vm884_vm6, %v18128_v47 }
0x519b   :  { %14800 = vmatprep.mubr.msk.f32.mxu0 %vm16344_vm5, %v16343_v57 }
0x51ef   :  { %v12261_v20 = vpop.xlane.xlu1 %12260 }
0x51f0   :  { %15525 = vrcp.f32 %v12261_v20 }
0x51f3   :  { %v12264_v41 = vpop.xlane.xlu1 %12263 }
0x51f4   :  { %15527 = vrcp.f32 %v12264_v41 }
0x51f7   :  { %v12270_v51 = vpop.permute.xlu1 %12269 }
0x51f8   :  { %14799 = vmatpush3.msra.mxu0 %v12270_v51  ;;  %v12988_v51 = vld [vmem:[%s18413_s21 + $0x8] sm:$0xff] }
0x51f9   :  { %14808 = vmatprep.subr.mxu0 %v11081_v0 }
0x51fa   :  { %v15526_v37 = vpop.eup %15525 }
0x51fb   :  { %v12267_v39 = vmul.f32 %v15526_v37, %v15522_v4  ;;  %v12583_v50 = vpop.permute.xlu1 %12582 }
0x51fd   :  { %14801 = vmatmul.mubr.msk.f32.vlgmr.msra.gmra.mrb[96].mxu0 %vm884_vm6, %v12267_v39  ;;  %v12990_v39 = vld [vmem:[%s18413_s21 + $0x18] sm:$0xff] }
0x51fe   :  { %v15528_v40 = vpop.eup %15527  ;;  %14809 = vmatpush3.msra.mxu0 %v11081_v0  ;;  %v12987_v0 = vld [vmem:[%s18413_s21] sm:$0xff] }
0x51ff   :  { %v12268_v47 = vmul.f32 %v15528_v40, %v15524_v16  ;;  %14818 = vmatprep.subr.mxu0 %v16343_v57  ;;  %v15036_v37 = vpack.c.bf16 %v12988_v51, %v12987_v0 }
0x5201   :  { %14806 = vmatmul.mubr.msk.f32.vlgmr.msra.gmra.mrb[132].mxu1 %vm884_vm6, %v12268_v47  ;;  %v13082_v47 = vld [vmem:[%s18414_s5 + $0x8] sm:$0xff] }
0x5202   :  { %14814 = vmatpush3.xpose.msk.msra.mxu1 %vm884_vm6, %v12507_v52  ;;  %14815 = vmatprep.mubr.msk.f32.mxu1 %vm16344_vm5, %v16343_v57  ;;  %v12989_v52 = vld [vmem:[%s18413_s21 + $0x10] sm:$0xff] }
0x5203   :  { %14823 = vmatprep.subr.mxu1 %v16343_v57  ;;  %v15040_v40 = vpack.c.bf16 %v12990_v39, %v12989_v52 }
0x5205   :  { %14816 = vmatmul.mubr.msk.f32.vlgmr.msra.gmra.mrb[134].mxu1 %vm884_vm6, %v12505_v12  ;;  %v13083_v12 = vld [vmem:[%s18414_s5 + $0x10] sm:$0xff] }
0x5206   :  { %14825 = vmatprep.mubr.msk.f32.mxu1 %vm16344_vm5, %v16343_v57 }
0x52d0   :  { %v12341_v56 = vpop.f32.mrb[96].mxu0 }
0x52d1   :  { %v14802_v58 = vpop.f32.mrb[97].mxu0  ;;  %14810 = vmatprep.mubr.msk.f32.mxu0 %vm884_vm6, %v12341_v56 }
0x52d2   :  { %v13084_v58 = vld [vmem:[%s18414_s5 + $0x18] sm:$0xff] }
0x52d4   :  { %v12417_v61 = vpop.f32.mrb[132].mxu1 }
0x52d5   :  { %v14807_v15 = vpop.f32.mrb[133].mxu1  ;;  %14811 = vmatmul.mubr.msk.f32.vlgmr.msra.gmra.mrb[94].mxu0 %vm884_vm6, %v12417_v61  ;;  %v15048_v61 = vpack.c.bf16 %v13084_v58, %v13083_v12 }
0x52d6   :  { %14819 = vmatpush3.xpose.msk.msra.mxu0 %vm884_vm6, %v12585_v55  ;;  %14820 = vmatprep.mubr.msk.f32.mxu0 %vm16344_vm5, %v16343_v57  ;;  %v13081_v55 = vld [vmem:[%s18414_s5] sm:$0xff] }
0x52d7   :  { %14828 = vmatprep.subr.mxu0 %v16343_v57  ;;  %v15044_v56 = vpack.c.bf16 %v13082_v47, %v13081_v55  ;;  %v13085_v15 = vld [vmem:[%s18414_s5 + $0x20] sm:$0xff] }
0x52d8   :  { %v12578_v21 = vpop.f32.mrb[134].mxu1 }
0x52d9   :  { %v12660_v3 = vsel %vm625_vm8, %v12578_v21, -1e+09  ;;  %v14817_v5 = vpop.f32.mrb[135].mxu1  ;;  %14821 = vmatmul.mubr.msk.f32.vlgmr.msra.gmra.mrb[98].mxu0 %vm884_vm6, %v12583_v50  ;;  %v13086_v50 = vld [vmem:[%s18414_s5 + $0x28] sm:$0xff] }
0x52da   :  { %v12662_v18 = vsel %vm884_vm6, %v12660_v3, -inf  ;;  %14830 = vmatprep.mubr.msk.f32.mxu0 %vm16344_vm5, %v16343_v57  ;;  %v15052_v21 = vpack.c.bf16 %v13086_v50, %v13085_v15 }
0x52db   :  { %12663 = vmax.xlane.f32.xlu0 %v12662_v18 }
0x5368   :  { %v12664_v24 = vpop.xlane.xlu0 %12663 }
0x5369   :  { %v12668_v60 = vsub.f32 %v12660_v3, %v12664_v24 }
0x536b   :  { %v12670_v22 = vmul.f32 1.442695, %v12668_v60 }
0x536d   :  { %15529 = vpow2.f32 %v12670_v22 }
0x5377   :  { %v15530_v53 = vpop.eup %15529 }
0x5378   :  { %v12674_v29 = vsel %vm884_vm6, %v15530_v53, 0.0 }
0x5379   :  { %12675 = vadd.xlane.f32.xlu0 %v12674_v29 }
0x53ac   :  { %v12656_v8 = vpop.f32.mrb[98].mxu0 }
0x53ad   :  { %v12661_v19 = vsel %vm626_vm7, %v12656_v8, -1e+09  ;;  %v14822_v10 = vpop.f32.mrb[99].mxu0 }
0x53ae   :  { %v12665_v2 = vsel %vm884_vm6, %v12661_v19, -inf }
0x53af   :  { %12666 = vmax.xlane.f32.xlu1 %v12665_v2 }
0x53c0   :  { %12760 = vrot.lane.b32.xlu1 %v18073_v11, %s16350_s29 }
0x5406   :  { %v12676_v7 = vpop.xlane.xlu0 %12675 }
0x543c   :  { %v12667_v57 = vpop.xlane.xlu1 %12666 }
0x543d   :  { %v12669_v63 = vsub.f32 %v12661_v19, %v12667_v57 }
0x543f   :  { %v12672_v54 = vmul.f32 1.442695, %v12669_v63 }
0x5440   :  { %v12761_v48 = vpop.permute.xlu1 %12760 }
0x5441   :  { %15531 = vpow2.f32 %v12672_v54  ;;  %14829 = vmatpush3.msra.mxu0 %v12761_v48 }
0x5442   :  { %15533 = vrcp.f32 %v12676_v7  ;;  %14833 = vmatprep.subr.mxu0 %v11082_v1 }
0x544b   :  { %v15532_v43 = vpop.eup %15531 }
0x544c   :  { %v12677_v36 = vsel %vm884_vm6, %v15532_v43, 0.0  ;;  %v15534_v14 = vpop.eup %15533 }
0x544d   :  { %12678 = vadd.xlane.f32.xlu0 %v12677_v36  ;;  %v12682_v11 = vmul.f32 %v15534_v14, %v15530_v53  ;;  %v13606_v36 = vld [vmem:[#allocation8] ss:$0 sm:$0xff] }
0x5463   :  { %12684 = vrot.lane.b32.xlu0 %v18064_v33, %s16350_s29  ;;  %s13244_s29 = sshll.u32 %s16351_s0, 4  ;;  %s13245_s29 = int_to_ptr.vmem [resolvable:$true] %s13244_s29 }
0x5464   :  { %s16191_s17 = scalar_lea.vmem %s13245_s29, 256  ;;  %p16196_p9 = scmp.lt.s32.totalorder %s13245_s29, %s13245_s29 }
0x5465   :  { %p16192_p8 = scmp.ne.s32.totalorder %s13245_s29, %s16191_s17  ;;  %p16197_p10 = scmp.lt.s32.totalorder %s16191_s17, %s16191_s17 }
0x5467   :  { %p16198_p11 = por %p16197_p10, %p16196_p9 }
0x5469   :  { %p16199_p12 = pnand %p16198_p11, %p16192_p8 }
0x54da   :  { %v12679_v13 = vpop.xlane.xlu0 %12678 }
0x54db   :  { %15535 = vrcp.f32 %v12679_v13 }
0x54de   :  { %v12685_v6 = vpop.permute.xlu0 %12684 }
0x54df   :  { %14824 = vmatpush3.msra.mxu1 %v12685_v6 }
0x54e0   :  { %14826 = vmatmul.mubr.msk.f32.vlgmr.msra.gmra.mrb[136].mxu1 %vm884_vm6, %v12682_v11  ;;  %15037 = vmatprep.subr.bf16.mxu1 %v15036_v37  ;;  %v13607_v11 = vld [vmem:[#allocation10] ss:$0 sm:$0xff] }
0x54e1   :  { %15039 = vmatpush3.bf16.msra.mxu1 %v15036_v37 }
0x54e2   :  { %15041 = vmatprep.subr.bf16.mxu1 %v15040_v40 }
0x54e5   :  { %v15536_v42 = vpop.eup %15535  ;;  %15043 = vmatpush3.bf16.msra.mxu1 %v15040_v40 }
0x54e6   :  { %v12683_v9 = vmul.f32 %v15536_v42, %v15532_v43 }
0x54e8   :  { %14831 = vmatmul.mubr.msk.f32.vlgmr.msra.gmra.mrb[100].mxu0 %vm884_vm6, %v12683_v9 }
0x54e9   :  { %14834 = vmatpush3.msra.mxu0 %v11082_v1 }
0x54ea   :  { %15045 = vmatprep.subr.bf16.mxu0 %v15044_v56 }
0x55b3   :  { %v12756_v25 = vpop.f32.mrb[136].mxu1 }
0x55b4   :  { %v14827_v32 = vpop.f32.mrb[137].mxu1  ;;  %14835 = vmatprep.mubr.msk.f32.mxu0 %vm884_vm6, %v12756_v25  ;;  %v13087_v25 = vld [vmem:[%s18414_s5 + $0x30] sm:$0xff] }
0x55b5   :  { %v13088_v32 = vld [vmem:[%s18414_s5 + $0x38] sm:$0xff] }
0x55bb   :  { %v12832_v33 = vpop.f32.mrb[100].mxu0 }
0x55bc   :  { %v14832_v17 = vpop.f32.mrb[101].mxu0  ;;  %14836 = vmatmul.mubr.msk.f32.vlgmr.msra.gmra.mrb[94].mxu0 %vm884_vm6, %v12832_v33  ;;  %v15056_v33 = vpack.c.bf16 %v13088_v32, %v13087_v25 }
0x55bd   :  { %15047 = vmatpush3.bf16.msra.mxu0 %v15044_v56  ;;  %v13608_v17 = vld [vmem:[%s18415_s26] ss:$0 sm:$0xff] }
0x55be   :  { %15049 = vmatprep.subr.bf16.mxu0 %v15048_v61 }
0x55c1   :  { %15051 = vmatpush3.bf16.msra.mxu0 %v15048_v61 }
0x55c2   :  { %15053 = vmatprep.subr.bf16.mxu0 %v15052_v21 }
0x55c5   :  { %15055 = vmatpush3.bf16.msra.mxu0 %v15052_v21 }
0x55c6   :  { %15057 = vmatprep.subr.bf16.mxu0 %v15056_v33 }
0x55c9   :  { %15059 = vmatpush3.bf16.msra.mxu0 %v15056_v33 }
0x568f   :  { %v14837_v45 = vpop.f32.mrb[94].mxu0 }
0x5690   :  { %v12926_v26 = vadd.f32 %v14837_v45, %v13605_v44  ;;  %v12908_v27 = vpop.f32.mrb[95].mxu0 }
0x5691   :  { %v12925_v30 = vadd.f32 %v13605_v44, %v12908_v27 }
0x5692   :  { %v18235_v62 = vadd.f32 %v12926_v26, %v18021_v38 }
0x5693   :  { %v18238_v28 = vadd.f32 %v12925_v30, %v18024_v59 }
0x5694   :  { %v12934_v31 = vsel %vm633_vm0, %v18235_v62, 0.0 }
0x5695   :  { %12935 = vadd.xlane.f32.xlu0 %v12934_v31  ;;  %v12931_v34 = vsel %vm633_vm0, %v18238_v28, 0.0 }
0x5696   :  { %12932 = vadd.xlane.f32.xlu1 %v12931_v34  ;;  %v13611_v34 = vld [vmem:[%s18416_s14] ss:$0 sm:$0xff] }
0x5722   :  { %v12936_v4 = vpop.xlane.xlu0 %12935 }
0x5723   :  { %v12938_v46 = vmul.f32 0.03125, %v12936_v4  ;;  %v12933_v16 = vpop.xlane.xlu1 %12932 }
0x5724   :  { %v12937_v38 = vmul.f32 0.03125, %v12933_v16 }
0x5725   :  { %v12940_v49 = vsub.f32 %v18235_v62, %v12938_v46 }
0x5726   :  { %v12939_v59 = vsub.f32 %v18238_v28, %v12937_v38 }
0x5727   :  { %v12942_v35 = vmul.f32 %v12940_v49, %v12940_v49 }
0x5728   :  { %v12941_v23 = vmul.f32 %v12939_v59, %v12939_v59 }
0x5729   :  { %v12946_v20 = vsel %vm633_vm0, %v12942_v35, 0.0 }
0x572a   :  { %12947 = vadd.xlane.f32.xlu1 %v12946_v20  ;;  %v12943_v41 = vsel %vm633_vm0, %v12941_v23, 0.0 }
0x572b   :  { %12944 = vadd.xlane.f32.xlu0 %v12943_v41 }
0x57b7   :  { %v12948_v3 = vpop.xlane.xlu1 %12947 }
0x57b8   :  { %v12950_v5 = vmul.f32 0.032258064, %v12948_v3  ;;  %v12945_v18 = vpop.xlane.xlu0 %12944 }
0x57b9   :  { %v12949_v24 = vmul.f32 0.032258064, %v12945_v18 }
0x57ba   :  { %15537 = vrsqrt.f32 %v12950_v5  ;;  %vm12960_vm5 = vcmp.eq.f32.partialorder %v12950_v5, inf  ;;  %v12963_v29 = vand.u32 2147483648, %v12950_v5  ;;  %vm12962_vm6 = vcmp.eq.f32.partialorder %v12950_v5, 0.0 }
0x57bb   :  { %15539 = vrsqrt.f32 %v12949_v24  ;;  %vm12953_vm7 = vcmp.eq.f32.partialorder %v12949_v24, inf  ;;  %v12956_v10 = vand.u32 2147483648, %v12949_v24  ;;  %vm12955_vm8 = vcmp.eq.f32.partialorder %v12949_v24, 0.0 }
0x57c4   :  { %v15538_v60 = vpop.eup %15537 }
0x57c5   :  { %v15540_v22 = vpop.eup %15539  ;;  %v12959_v53 = vmul.f32 %v15538_v60, %v12950_v5 }
0x57c6   :  { %v12952_v8 = vmul.f32 %v15540_v22, %v12949_v24 }
0x57c7   :  { %v12961_v19 = vsel %vm12960_vm5, %v12950_v5, %v12959_v53 }
0x57c8   :  { %v12964_v2 = vsel %vm12962_vm6, %v12963_v29, %v12961_v19  ;;  %v12954_v57 = vsel %vm12953_vm7, %v12949_v24, %v12952_v8  ;;  %v13614_v8 = vld [vmem:[#allocation17] ss:$0 sm:$0xff] }
0x57c9   :  { %v12966_v63 = vadd.f32 1e-06, %v12964_v2  ;;  %v12957_v54 = vsel %vm12955_vm8, %v12956_v10, %v12954_v57  ;;  %v13615_v2 = vld [vmem:[#allocation19] ss:$0 sm:$0xff] }
0x57ca   :  { %v12965_v48 = vadd.f32 1e-06, %v12957_v54 }
0x57cb   :  { %15541 = vrcp.f32 %v12966_v63 }
0x57cc   :  { %15543 = vrcp.f32 %v12965_v48 }
0x57d5   :  { %v15542_v43 = vpop.eup %15541 }
0x57d6   :  { %v15544_v7 = vpop.eup %15543  ;;  %v12970_v13 = vmul.f32 %v15542_v43, %v12940_v49 }
0x57d7   :  { %v12969_v14 = vmul.f32 %v15544_v7, %v12939_v59 }
0x57d8   :  { %v12978_v6 = vmul.f32 %v13606_v36, %v12970_v13 }
0x57d9   :  { %v12977_v42 = vmul.f32 %v13606_v36, %v12969_v14 }
0x57da   :  { %v12986_v1 = vadd.f32 %v13607_v11, %v12978_v6 }
0x57db   :  { %v12985_v9 = vadd.f32 %v13607_v11, %v12977_v42 }
0x57dd   :  { %14846 = vmatprep.mubr.msk.f32.mxu1 %vm633_vm0, %v12985_v9 }
0x57de   :  { %14847 = vmatmul.mubr.msk.f32.vlgmr.msra.gmra.mrb[138].mxu1 %vm633_vm0, %v12986_v1 }
0x58b1   :  { %v14848_v44 = vpop.f32.mrb[138].mxu1 }
0x58b2   :  { %v13076_v45 = vadd.f32 %v14848_v44, %v13608_v17  ;;  %v13070_v26 = vpop.f32.mrb[139].mxu1 }
0x58b3   :  { %v13071_v27 = vadd.f32 %v13608_v17, %v13070_v26 }
0x58b4   :  { %v13080_v31 = vmax.f32 %v13076_v45, 0.0 }
0x58b5   :  { %v13079_v30 = vmax.f32 %v13071_v27, 0.0 }
0x58b7   :  { %14865 = vmatprep.mubr.msk.f32.mxu0 %vm2714_vm13, %v13079_v30 }
0x58b8   :  { %14866 = vmatmul.mubr.msk.f32.vlgmr.msra.gmra.mrb[102].mxu0 %vm2714_vm13, %v13080_v31 }
0x598b   :  { %v14867_v4 = vpop.f32.mrb[102].mxu0 }
0x598c   :  { %v13174_v46 = vadd.f32 %v14867_v4, %v13611_v34  ;;  %v13168_v16 = vpop.f32.mrb[103].mxu0 }
0x598d   :  { %v13169_v38 = vadd.f32 %v13611_v34, %v13168_v16 }
0x598e   :  { %v13178_v49 = vadd.f32 %v13174_v46, %v18235_v62 }
0x598f   :  { %v13177_v59 = vadd.f32 %v13169_v38, %v18238_v28 }
0x5990   :  { %v13184_v35 = vsel %vm633_vm0, %v13178_v49, 0.0 }
0x5991   :  { %13185 = vadd.xlane.f32.xlu1 %v13184_v35  ;;  %v13181_v23 = vsel %vm633_vm0, %v13177_v59, 0.0 }
0x5992   :  { %13182 = vadd.xlane.f32.xlu0 %v13181_v23 }
0x5a1e   :  { %v13186_v20 = vpop.xlane.xlu1 %13185 }
0x5a1f   :  { %v13188_v41 = vmul.f32 0.03125, %v13186_v20  ;;  %v13183_v0 = vpop.xlane.xlu0 %13182 }
0x5a20   :  { %v13187_v51 = vmul.f32 0.03125, %v13183_v0 }
0x5a21   :  { %v13190_v52 = vsub.f32 %v13178_v49, %v13188_v41 }
0x5a22   :  { %v13189_v37 = vsub.f32 %v13177_v59, %v13187_v51 }
0x5a23   :  { %v13192_v39 = vmul.f32 %v13190_v52, %v13190_v52 }
0x5a24   :  { %v13191_v40 = vmul.f32 %v13189_v37, %v13189_v37 }
0x5a25   :  { %v13196_v55 = vsel %vm633_vm0, %v13192_v39, 0.0 }
0x5a26   :  { %13197 = vadd.xlane.f32.xlu1 %v13196_v55  ;;  %v13193_v62 = vsel %vm633_vm0, %v13191_v40, 0.0 }
0x5a27   :  { %13194 = vadd.xlane.f32.xlu0 %v13193_v62 }
0x5ab3   :  { %v13198_v28 = vpop.xlane.xlu1 %13197 }
0x5ab4   :  { %v13200_v47 = vmul.f32 0.032258064, %v13198_v28  ;;  %v13195_v12 = vpop.xlane.xlu0 %13194 }
0x5ab5   :  { %v13199_v56 = vmul.f32 0.032258064, %v13195_v12 }
0x5ab6   :  { %15545 = vrsqrt.f32 %v13200_v47  ;;  %vm13210_vm13 = vcmp.eq.f32.partialorder %v13200_v47, inf  ;;  %v13213_v50 = vand.u32 2147483648, %v13200_v47  ;;  %vm13212_vm9 = vcmp.eq.f32.partialorder %v13200_v47, 0.0 }
0x5ab7   :  { %15547 = vrsqrt.f32 %v13199_v56  ;;  %vm13203_vm10 = vcmp.eq.f32.partialorder %v13199_v56, inf  ;;  %v13206_v5 = vand.u32 2147483648, %v13199_v56  ;;  %vm13205_vm11 = vcmp.eq.f32.partialorder %v13199_v56, 0.0 }
0x5ac0   :  { %v15546_v58 = vpop.eup %15545 }
0x5ac1   :  { %v15548_v61 = vpop.eup %15547  ;;  %v13209_v15 = vmul.f32 %v15546_v58, %v13200_v47 }
0x5ac2   :  { %v13202_v21 = vmul.f32 %v15548_v61, %v13199_v56 }
0x5ac3   :  { %v13211_v3 = vsel %vm13210_vm13, %v13200_v47, %v13209_v15 }
0x5ac4   :  { %v13214_v18 = vsel %vm13212_vm9, %v13213_v50, %v13211_v3  ;;  %v13204_v24 = vsel %vm13203_vm10, %v13199_v56, %v13202_v21 }
0x5ac5   :  { %v13216_v60 = vadd.f32 1e-06, %v13214_v18  ;;  %v13207_v22 = vsel %vm13205_vm11, %v13206_v5, %v13204_v24 }
0x5ac6   :  { %v13215_v53 = vadd.f32 1e-06, %v13207_v22 }
0x5ac7   :  { %15549 = vrcp.f32 %v13216_v60 }
0x5ac8   :  { %15551 = vrcp.f32 %v13215_v53 }
0x5ad1   :  { %v15550_v29 = vpop.eup %15549 }
0x5ad2   :  { %v15552_v19 = vpop.eup %15551  ;;  %v13220_v10 = vmul.f32 %v15550_v29, %v13190_v52 }
0x5ad3   :  { %v13219_v57 = vmul.f32 %v15552_v19, %v13189_v37 }
0x5ad4   :  { %v13228_v63 = vmul.f32 %v13614_v8, %v13220_v10 }
0x5ad5   :  { %v13227_v54 = vmul.f32 %v13614_v8, %v13219_v57 }
0x5ad6   :  { %v13236_v48 = vadd.f32 %v13615_v2, %v13228_v63 }
0x5ad7   :  { %v13235_v43 = vadd.f32 %v13615_v2, %v13227_v54 }
0x5ad8   :  { %13238 = vst.msk [vmem:[#allocation47 + $0x8] sm:$0xff] %vm633_vm0, %v13236_v48 }
0x5ad9   :  { %13237 = vst.msk [vmem:[#allocation47] sm:$0xff] %vm633_vm0, %v13235_v43 }
0x5ada   :  { %16202 = shalt.err (!%p16199_p12)
}
0x5adb   :  { %s16203_s7 = scalar_lea.hbm %s16702_s24, 256 }
0x5adc   :  { %p16204_p13 = scmp.ne.s32.totalorder %s16702_s24, %s16203_s7  ;;  %p16207_p0 = scmp.lt.u32.totalorder %s16203_s7, %s16702_s24 }
0x5ade   :  { %p16209_p1 = pnand %p16207_p0, %p16204_p13 }
0x5ae0   :  { %16212 = shalt.err (!%p16209_p1)
}
0x5ae1   :  { %s16352_s10 = smov 128   ;;  %s16353_s19 = smov 8  }
0x5ae2   :  { %13250 = dma.vmem_to_hbm [thread:$0]  %s13245_s29, 256, %s16702_s24, [#allocation4], %s16352_s10, %s16352_s10, %s16353_s19  }
0x5ae3   :  { %16243 = dma.done.wait [#allocation4], 256  }
0x5ae4   :  { %16244 = vsyncadd [#allocation4], 4294967040 }
0x5ae5   :  { %13254 = vsyncpa [#allocation3], 1 }
0x5ae6   :  { %13255 = vsyncpa [#allocation6], 1 }
0x5ae7   :  { %13256 = vsyncpa [#allocation9], 1 }
0x5ae8   :  { %13257 = vsyncpa [#allocation12], 1 }
0x5ae9   :  { %13258 = vsyncpa [#allocation15], 1 }
0x5aea   :  { %13259 = vsyncpa [#allocation18], 1 }
0x5aeb   :  { %13260 = vsyncpa [#allocation21], 1 }
0x5aec   :  { %13261 = vsyncpa [#allocation24], 1 }
0x5aed   :  { %13262 = vsyncpa [#allocation27], 1 }
0x5aee   :  { %13263 = vsyncpa [#allocation30], 1 }
0x5aef   :  { %13264 = vsyncpa [#allocation33], 1 }
0x5af0   :  { %13265 = vsyncpa [#allocation36], 1 }
0x5af1   :  { %13266 = vsyncpa [#allocation39], 1 }
0x5af2   :  { %13267 = vsyncpa [#allocation42], 1 }
0x5af3   :  { %13268 = vsyncpa [#allocation45], 1 }
0x5af4   :  { %13269 = vsyncpa [#allocation4], 1 }

</bundles_post_ra>
